<compile_context>
chip_gen: v5e
topology: v5e:2x2
jax: 0.10.0
libtpu: 0.0.40
codegen_flags: <defaults>
</compile_context>

<pallas_src>
import jax
import jax.numpy as jnp
import numpy as np
from jax.experimental import pallas as pl
from jax.experimental.pallas import tpu as pltpu


# ----------------------------------------------------------------------------
# Helpers
# ----------------------------------------------------------------------------
def _round_up(x: int, m: int) -> int:
    return ((x + m - 1) // m) * m


def _pick_batch_tile(n_rows: int, cap: int = 1024) -> int:
    """Batch tile: multiple of 16 (bf16 sublane packing), <= cap, and small
    enough to give at least 2 grid steps when the batch allows (v7x megacore).
    Rows are padded up to a multiple of the tile, so no giant-tile fallback."""
    padded = _round_up(max(n_rows, 1), 16)
    tb = min(cap, padded)
    if padded >= 32:                       # room for at least two tiles
        tb = min(tb, _round_up((padded + 1) // 2, 16))
    return max(tb, 16)


def _pad_rows(x, n_rows_padded, fill):
    pad = n_rows_padded - x.shape[0]
    if pad == 0:
        return x
    return jnp.pad(x, ((0, pad),) + ((0, 0),) * (x.ndim - 1),
                   constant_values=fill)


# ----------------------------------------------------------------------------
# Pallas kernel
# ----------------------------------------------------------------------------
def _make_tgnn_kernel(n_classes: int, k: int):
    """Kernel closure over static class count and neighbor count."""

    def kernel(sf_ref, sn_ref, ss_ref, df_ref, dn_ref, ds_ref,
               freqs_ref, w_self_ref, w_neigh_ref, w_time_ref,
               b1_ref, w_cls_ref, b_cls_ref, s_out_ref, d_out_ref):
        dtm = freqs_ref.shape[1]

        def one_stream(feat_ref, nbr_ref, side_ref, out_ref):
            tb = feat_ref.shape[0]
            cp = out_ref.shape[1]
            side = side_ref[...]                               # [TB, K+1] f32

            # temporal encoding: mean_k cos(delta_k * freqs) — exact f32 on
            # VPU/EUP (cos lives on the otherwise-idle EUP slot).
            agg_t = jnp.zeros((tb, dtm), jnp.float32)
            for kk in range(k):                                # unrolled K
                agg_t = agg_t + jnp.cos(side[:, kk:kk + 1] * freqs_ref[...])
            agg_t = agg_t * (1.0 / k)                          # [TB, Dt]

            lbl = side[:, k:k + 1].astype(jnp.int32)           # [TB, 1]

            # projection: self + neighbor-mean (mean folded into the K-tiled
            # w_neigh contraction) + time.  bf16 operands, f32 accumulation.
            h = (jnp.dot(feat_ref[...], w_self_ref[...],
                         preferred_element_type=jnp.float32)
                 + jnp.dot(nbr_ref[...], w_neigh_ref[...],
                           preferred_element_type=jnp.float32)
                 + jnp.dot(agg_t, w_time_ref[...],
                           preferred_element_type=jnp.float32)
                 + b1_ref[...])
            h = jnp.maximum(h, 0.0)                            # ReLU

            # classifier (weights zero-padded to CP lanes)
            logits = (jnp.dot(h, w_cls_ref[...],
                              preferred_element_type=jnp.float32)
                      + b_cls_ref[...])                        # [TB, CP]

            # cross-entropy with int labels (no one-hot input).  Padded rows
            # carry label=-1 -> no column matches -> zero loss contribution.
            col = jax.lax.broadcasted_iota(jnp.int32, (tb, cp), 1)
            valid = col < n_classes
            masked = jnp.where(valid, logits, jnp.float32(-1e30))
            m = jnp.max(masked, axis=-1, keepdims=True)
            z = masked - m
            e = jnp.where(valid, jnp.exp(z), 0.0)
            lse = jnp.log(jnp.sum(e, axis=-1, keepdims=True))
            logp = z - lse
            pick = col == lbl
            per_loss = -jnp.sum(jnp.where(pick, logp, 0.0),
                                axis=-1, keepdims=True)        # [TB, 1]

            # packed slab: [logits(C) | per-example xent | zero pad]
            out_ref[...] = jnp.where(col == n_classes, per_loss, logits)

        one_stream(sf_ref, sn_ref, ss_ref, s_out_ref)
        one_stream(df_ref, dn_ref, ds_ref, d_out_ref)

    return kernel


# ----------------------------------------------------------------------------
# Wrapper
# ----------------------------------------------------------------------------
def tgnn_forward_pallas(src_feat, dst_feat, src_nbr, dst_nbr,
                        src_delta, dst_delta, labels_src, labels_dst,
                        params, freqs, *, batch_tile_cap=1024):
    """Forward pass of the temporal-GNN node classifier.

    src/dst_feat:  [B, D]     gathered node features
    src/dst_nbr:   [B, K, D]  gathered temporal-neighbor features
    src/dst_delta: [B, K]     edge_time - neighbor_time (raw deltas)
    labels_*:      [B]        int class labels
    Returns (src_logits [B,C], dst_logits [B,C], scalar loss).
    """
    B, D = src_feat.shape
    _, K, _ = src_nbr.shape
    Dt = int(freqs.shape[0])
    H = params["w_self"].shape[1]
    C = params["w_cls"].shape[1]
    CP = _round_up(C + 1, 8)              # logits + loss column, 8-lane slab
    assert C + 1 <= CP

    TB = _pick_batch_tile(B, batch_tile_cap)
    PB = _round_up(B, TB)
    grid = (PB // TB,)

    # --- bf16 row streams; padded rows are zero, label=-1 => zero loss ------
    def prep_feat(x):
        return _pad_rows(x.astype(jnp.bfloat16), PB, 0)

    def prep_nbr(x):
        return _pad_rows(x.reshape(B, K * D).astype(jnp.bfloat16), PB, 0)

    def prep_side(delta, lbl):
        side = jnp.concatenate(
            [delta.astype(jnp.float32), lbl.astype(jnp.float32)[:, None]],
            axis=1)                                            # [B, K+1]
        return _pad_rows(side, PB, -1.0)

    s_feat = prep_feat(src_feat)
    d_feat = prep_feat(dst_feat)
    s_nbr = prep_nbr(src_nbr)
    d_nbr = prep_nbr(dst_nbr)
    s_side = prep_side(src_delta, labels_src)
    d_side = prep_side(dst_delta, labels_dst)

    # --- weights: 1/K neighbor mean folded into a K-tiled w_neigh; bf16 -----
    # TODO(synk): alternative is jnp.mean(nbr,1) in the wrapper (kernel reads
    # [B,D] not [B,K*D]); only a win if XLA fuses gather+mean — kept folded.
    w_self = params["w_self"].astype(jnp.bfloat16)                   # [D, H]
    w_neigh = (jnp.tile(params["w_neigh"], (K, 1)) / K
               ).astype(jnp.bfloat16)                                # [K*D, H]
    w_time = params["w_time"].astype(jnp.float32)                    # [Dt, H]
    b1 = params["b1"].astype(jnp.float32).reshape(1, H)
    w_cls = jnp.zeros((H, CP), jnp.float32).at[:, :C].set(params["w_cls"])
    b_cls = jnp.zeros((1, CP), jnp.float32).at[:, :C].set(
        params["b_cls"].reshape(-1))
    freqs2d = freqs.reshape(1, Dt).astype(jnp.float32)

    def row_spec(w):
        return pl.BlockSpec((TB, w), lambda i: (i, 0))

    def rep_spec(shape):
        return pl.BlockSpec(shape, lambda i: (0,) * len(shape))

    rows = 2 * PB
    cost = pl.CostEstimate(
        flops=2 * rows * (D * H + K * D * H + Dt * H + H * CP),
        transcendentals=rows * K * Dt,
        bytes_accessed=(rows * (2 * D + 2 * K * D + 4 * (K + 1) + 4 * CP)
                        + 2 * (D * H + K * D * H)
                        + 4 * (Dt * H + H + H * CP + CP + Dt)))

    s_slab, d_slab = pl.pallas_call(
        _make_tgnn_kernel(C, K),
        grid=grid,
        in_specs=[row_spec(D), row_spec(K * D), row_spec(K + 1),      # src
                  row_spec(D), row_spec(K * D), row_spec(K + 1),      # dst
                  rep_spec((1, Dt)),                                  # freqs
                  rep_spec((D, H)), rep_spec((K * D, H)),             # w_self, w_neigh
                  rep_spec((Dt, H)), rep_spec((1, H)),                # w_time, b1
                  rep_spec((H, CP)), rep_spec((1, CP))],              # classifier
        out_specs=[row_spec(CP), row_spec(CP)],
        out_shape=[jax.ShapeDtypeStruct((PB, CP), jnp.float32),
                   jax.ShapeDtypeStruct((PB, CP), jnp.float32)],
        compiler_params=pltpu.CompilerParams(
            dimension_semantics=("parallel",),       # megacore on v7x
            vmem_limit_bytes=32 * 1024 * 1024),      # safe on v5e/v6e/v7x
        cost_estimate=cost,
    )(s_feat, s_nbr, s_side, d_feat, d_nbr, d_side,
      freqs2d, w_self, w_neigh, w_time, b1, w_cls, b_cls)

    src_logits = s_slab[:B, :C]
    dst_logits = d_slab[:B, :C]
    # column C holds per-example xent; padded rows contribute exactly 0,
    # so this equals mean_B(0.5*(xent_src + xent_dst)) of the original module.
    loss = (jnp.sum(s_slab[:, C]) + jnp.sum(d_slab[:, C])) / (2.0 * B)
    return src_logits, dst_logits, loss


# ----------------------------------------------------------------------------
# Plain-JAX reference (matches the original module semantics, f32)
# ----------------------------------------------------------------------------
def reference_forward(src_feat, dst_feat, src_nbr, dst_nbr,
                      src_delta, dst_delta, labels_src, labels_dst,
                      params, freqs):
    def tenc(delta):                                   # [B,K] -> [B,K,Dt]
        return jnp.cos(delta[..., None] * freqs[None, None, :])

    def emb(x, nbr, d):
        h = (x @ params["w_self"]
             + jnp.mean(nbr, 1) @ params["w_neigh"]
             + jnp.mean(tenc(d), 1) @ params["w_time"]
             + params["b1"])
        h = jnp.maximum(h, 0.0)
        return h @ params["w_cls"] + params["b_cls"]

    ls = emb(src_feat, src_nbr, src_delta)
    ld = emb(dst_feat, dst_nbr, dst_delta)

    def xent(lg, lbl):
        lg = lg - jnp.max(lg, -1, keepdims=True)
        logp = lg - jnp.log(jnp.sum(jnp.exp(lg), -1, keepdims=True))
        return -jnp.take_along_axis(logp, lbl[:, None], axis=-1)[:, 0]

    loss = jnp.mean(0.5 * (xent(ls, labels_src) + xent(ld, labels_dst)))
    return ls, ld, loss


# ----------------------------------------------------------------------------
# Demo / correctness check
# ----------------------------------------------------------------------------
if __name__ == "__main__":
    # Small shapes implied by the module's forward: a batch of src/dst node
    # ids, their edge timestamps, K sampled temporal neighbors.
    B, K = 8, 8                      # interactions, neighbors per node
    N_NODES = 40
    D, Dt, H, C = 32, 32, 32, 4      # node feat dim, time dim, hidden, classes

    key = jax.random.PRNGKey(0)
    ks = jax.random.split(key, 12)

    node_features = jax.random.normal(ks[0], (N_NODES, D), jnp.float32)

    src_nodes = jax.random.randint(ks[1], (B,), 0, N_NODES)
    dst_nodes = jax.random.randint(ks[2], (B,), 0, N_NODES)
    edge_times = jax.random.uniform(ks[3], (B,), jnp.float32, 0.0, 100.0)
    labels_src = jax.random.randint(ks[4], (B,), 0, C)
    labels_dst = jax.random.randint(ks[5], (B,), 0, C)

    # synthetic temporal-neighbor finder: K neighbor ids + interaction times
    src_nbr_idx = jax.random.randint(ks[6], (B, K), 0, N_NODES)
    dst_nbr_idx = jax.random.randint(ks[7], (B, K), 0, N_NODES)
    src_nbr_dt = jax.random.uniform(ks[8], (B, K), jnp.float32, 0.0, 50.0)
    dst_nbr_dt = jax.random.uniform(ks[9], (B, K), jnp.float32, 0.0, 50.0)

    pk = jax.random.split(ks[10], 6)
    params = {
        "w_self":  jax.random.normal(pk[0], (D, H), jnp.float32) * 0.1,
        "w_neigh": jax.random.normal(pk[1], (D, H), jnp.float32) * 0.1,
        "w_time":  jax.random.normal(pk[2], (Dt, H), jnp.float32) * 0.1,
        "b1":      jnp.zeros((1, H), jnp.float32),
        "w_cls":   jax.random.normal(pk[3], (H, C), jnp.float32) * 0.1,
        "b_cls":   jnp.zeros((1, C), jnp.float32),
    }

    # TGAT-style deterministic cosine frequencies
    freqs = 1.0 / (10.0 ** jnp.linspace(0.0, 4.0, Dt))

    # ---- JAX glue: neighbor gathers only (time encoding is in-kernel) ------
    # TODO(synk): in-kernel neighbor gather via pl.ANY + manual DMA is not
    # worthwhile here (D=32 -> 128-byte rows, far below efficient DMA size);
    # the row gather stays in XLA.
    src_feat = node_features[src_nodes]            # [B, D]
    dst_feat = node_features[dst_nodes]            # [B, D]
    src_nbr = node_features[src_nbr_idx]           # [B, K, D]
    dst_nbr = node_features[dst_nbr_idx]           # [B, K, D]
    src_delta = edge_times[:, None] - src_nbr_dt   # [B, K] raw deltas
    dst_delta = edge_times[:, None] - dst_nbr_dt   # [B, K]

    # ---- Pallas kernel (hot path) ----
    src_logits, dst_logits, loss = jax.block_until_ready(
        tgnn_forward_pallas(src_feat, dst_feat, src_nbr, dst_nbr,
                            src_delta, dst_delta, labels_src, labels_dst,
                            params, freqs))

    # ---- sanity check vs plain-JAX f32 reference (bf16 operands => looser) -
    rls, rld, rloss = reference_forward(src_feat, dst_feat, src_nbr, dst_nbr,
                                        src_delta, dst_delta,
                                        labels_src, labels_dst, params, freqs)
    np.testing.assert_allclose(np.asarray(src_logits), np.asarray(rls),
                               rtol=3e-2, atol=3e-2)
    np.testing.assert_allclose(np.asarray(dst_logits), np.asarray(rld),
                               rtol=3e-2, atol=3e-2)
    np.testing.assert_allclose(float(loss), float(rloss), rtol=3e-2, atol=3e-2)

    # TODO(synk): optimizer.step()/StepLR scheduler/memory-replay bookkeeping
    # from SubGraph.forward_nodecls is host-side training logic, not kernel
    # work; only the model forward + loss is implemented here.
    print("KERNEL_OK")
</pallas_src>

<mosaic_0001>
module attributes {stable_mosaic.version = 11 : i64} {
  func.func @kernel(%arg0: i32, %arg1: memref<16x32xbf16, #tpu.memory_space<vmem>>, %arg2: memref<16x256xbf16, #tpu.memory_space<vmem>>, %arg3: memref<16x9xf32, #tpu.memory_space<vmem>>, %arg4: memref<16x32xbf16, #tpu.memory_space<vmem>>, %arg5: memref<16x256xbf16, #tpu.memory_space<vmem>>, %arg6: memref<16x9xf32, #tpu.memory_space<vmem>>, %arg7: memref<1x32xf32, #tpu.memory_space<vmem>>, %arg8: memref<32x32xbf16, #tpu.memory_space<vmem>>, %arg9: memref<256x32xbf16, #tpu.memory_space<vmem>>, %arg10: memref<32x32xf32, #tpu.memory_space<vmem>>, %arg11: memref<1x32xf32, #tpu.memory_space<vmem>>, %arg12: memref<32x8xf32, #tpu.memory_space<vmem>>, %arg13: memref<1x8xf32, #tpu.memory_space<vmem>>, %arg14: memref<16x8xf32, #tpu.memory_space<vmem>>, %arg15: memref<16x8xf32, #tpu.memory_space<vmem>>) attributes {dimension_semantics = [#tpu.dimension_semantics<parallel>], iteration_bounds = array<i64: 1>, scalar_prefetch = 0 : i64, scratch_operands = 0 : i64, tpu.core_type = #tpu.core_type<tc>, window_params = [{transform_indices = @transform_0, window_bounds = array<i64: 16, 32>}, {transform_indices = @transform_1, window_bounds = array<i64: 16, 256>}, {transform_indices = @transform_2, window_bounds = array<i64: 16, 9>}, {transform_indices = @transform_3, window_bounds = array<i64: 16, 32>}, {transform_indices = @transform_4, window_bounds = array<i64: 16, 256>}, {transform_indices = @transform_5, window_bounds = array<i64: 16, 9>}, {pipeline_mode = #tpu.pipeline_mode<synchronous>, transform_indices = @transform_6, window_bounds = array<i64: 1, 32>}, {pipeline_mode = #tpu.pipeline_mode<synchronous>, transform_indices = @transform_7, window_bounds = array<i64: 32, 32>}, {pipeline_mode = #tpu.pipeline_mode<synchronous>, transform_indices = @transform_8, window_bounds = array<i64: 256, 32>}, {pipeline_mode = #tpu.pipeline_mode<synchronous>, transform_indices = @transform_9, window_bounds = array<i64: 32, 32>}, {pipeline_mode = #tpu.pipeline_mode<synchronous>, transform_indices = @transform_10, window_bounds = array<i64: 1, 32>}, {pipeline_mode = #tpu.pipeline_mode<synchronous>, transform_indices = @transform_11, window_bounds = array<i64: 32, 8>}, {pipeline_mode = #tpu.pipeline_mode<synchronous>, transform_indices = @transform_12, window_bounds = array<i64: 1, 8>}, {transform_indices = @transform_13, window_bounds = array<i64: 16, 8>}, {transform_indices = @transform_14, window_bounds = array<i64: 16, 8>}]} {
    %c0 = arith.constant 0 : index
    %c0_0 = arith.constant 0 : index
    %0 = vector.load %arg3[%c0, %c0_0] : memref<16x9xf32, #tpu.memory_space<vmem>>, vector<16x9xf32>
    %cst = arith.constant 0.000000e+00 : f32
    %1 = vector.broadcast %cst : f32 to vector<16x32xf32>
    %2 = vector.extract_strided_slice %0 {offsets = [0, 0], sizes = [16, 1], strides = [1, 1]} : vector<16x9xf32> to vector<16x1xf32>
    %c0_1 = arith.constant 0 : index
    %c0_2 = arith.constant 0 : index
    %3 = vector.load %arg7[%c0_1, %c0_2] : memref<1x32xf32, #tpu.memory_space<vmem>>, vector<1x32xf32>
    %4 = vector.broadcast %2 : vector<16x1xf32> to vector<16x32xf32>
    %5 = vector.broadcast %3 : vector<1x32xf32> to vector<16x32xf32>
    %6 = arith.mulf %4, %5 : vector<16x32xf32>
    %7 = math.cos %6 : vector<16x32xf32>
    %8 = arith.addf %1, %7 : vector<16x32xf32>
    %9 = vector.extract_strided_slice %0 {offsets = [0, 1], sizes = [16, 1], strides = [1, 1]} : vector<16x9xf32> to vector<16x1xf32>
    %c0_3 = arith.constant 0 : index
    %c0_4 = arith.constant 0 : index
    %10 = vector.load %arg7[%c0_3, %c0_4] : memref<1x32xf32, #tpu.memory_space<vmem>>, vector<1x32xf32>
    %11 = vector.broadcast %9 : vector<16x1xf32> to vector<16x32xf32>
    %12 = vector.broadcast %10 : vector<1x32xf32> to vector<16x32xf32>
    %13 = arith.mulf %11, %12 : vector<16x32xf32>
    %14 = math.cos %13 : vector<16x32xf32>
    %15 = arith.addf %8, %14 : vector<16x32xf32>
    %16 = vector.extract_strided_slice %0 {offsets = [0, 2], sizes = [16, 1], strides = [1, 1]} : vector<16x9xf32> to vector<16x1xf32>
    %c0_5 = arith.constant 0 : index
    %c0_6 = arith.constant 0 : index
    %17 = vector.load %arg7[%c0_5, %c0_6] : memref<1x32xf32, #tpu.memory_space<vmem>>, vector<1x32xf32>
    %18 = vector.broadcast %16 : vector<16x1xf32> to vector<16x32xf32>
    %19 = vector.broadcast %17 : vector<1x32xf32> to vector<16x32xf32>
    %20 = arith.mulf %18, %19 : vector<16x32xf32>
    %21 = math.cos %20 : vector<16x32xf32>
    %22 = arith.addf %15, %21 : vector<16x32xf32>
    %23 = vector.extract_strided_slice %0 {offsets = [0, 3], sizes = [16, 1], strides = [1, 1]} : vector<16x9xf32> to vector<16x1xf32>
    %c0_7 = arith.constant 0 : index
    %c0_8 = arith.constant 0 : index
    %24 = vector.load %arg7[%c0_7, %c0_8] : memref<1x32xf32, #tpu.memory_space<vmem>>, vector<1x32xf32>
    %25 = vector.broadcast %23 : vector<16x1xf32> to vector<16x32xf32>
    %26 = vector.broadcast %24 : vector<1x32xf32> to vector<16x32xf32>
    %27 = arith.mulf %25, %26 : vector<16x32xf32>
    %28 = math.cos %27 : vector<16x32xf32>
    %29 = arith.addf %22, %28 : vector<16x32xf32>
    %30 = vector.extract_strided_slice %0 {offsets = [0, 4], sizes = [16, 1], strides = [1, 1]} : vector<16x9xf32> to vector<16x1xf32>
    %c0_9 = arith.constant 0 : index
    %c0_10 = arith.constant 0 : index
    %31 = vector.load %arg7[%c0_9, %c0_10] : memref<1x32xf32, #tpu.memory_space<vmem>>, vector<1x32xf32>
    %32 = vector.broadcast %30 : vector<16x1xf32> to vector<16x32xf32>
    %33 = vector.broadcast %31 : vector<1x32xf32> to vector<16x32xf32>
    %34 = arith.mulf %32, %33 : vector<16x32xf32>
    %35 = math.cos %34 : vector<16x32xf32>
    %36 = arith.addf %29, %35 : vector<16x32xf32>
    %37 = vector.extract_strided_slice %0 {offsets = [0, 5], sizes = [16, 1], strides = [1, 1]} : vector<16x9xf32> to vector<16x1xf32>
    %c0_11 = arith.constant 0 : index
    %c0_12 = arith.constant 0 : index
    %38 = vector.load %arg7[%c0_11, %c0_12] : memref<1x32xf32, #tpu.memory_space<vmem>>, vector<1x32xf32>
    %39 = vector.broadcast %37 : vector<16x1xf32> to vector<16x32xf32>
    %40 = vector.broadcast %38 : vector<1x32xf32> to vector<16x32xf32>
    %41 = arith.mulf %39, %40 : vector<16x32xf32>
    %42 = math.cos %41 : vector<16x32xf32>
    %43 = arith.addf %36, %42 : vector<16x32xf32>
    %44 = vector.extract_strided_slice %0 {offsets = [0, 6], sizes = [16, 1], strides = [1, 1]} : vector<16x9xf32> to vector<16x1xf32>
    %c0_13 = arith.constant 0 : index
    %c0_14 = arith.constant 0 : index
    %45 = vector.load %arg7[%c0_13, %c0_14] : memref<1x32xf32, #tpu.memory_space<vmem>>, vector<1x32xf32>
    %46 = vector.broadcast %44 : vector<16x1xf32> to vector<16x32xf32>
    %47 = vector.broadcast %45 : vector<1x32xf32> to vector<16x32xf32>
    %48 = arith.mulf %46, %47 : vector<16x32xf32>
    %49 = math.cos %48 : vector<16x32xf32>
    %50 = arith.addf %43, %49 : vector<16x32xf32>
    %51 = vector.extract_strided_slice %0 {offsets = [0, 7], sizes = [16, 1], strides = [1, 1]} : vector<16x9xf32> to vector<16x1xf32>
    %c0_15 = arith.constant 0 : index
    %c0_16 = arith.constant 0 : index
    %52 = vector.load %arg7[%c0_15, %c0_16] : memref<1x32xf32, #tpu.memory_space<vmem>>, vector<1x32xf32>
    %53 = vector.broadcast %51 : vector<16x1xf32> to vector<16x32xf32>
    %54 = vector.broadcast %52 : vector<1x32xf32> to vector<16x32xf32>
    %55 = arith.mulf %53, %54 : vector<16x32xf32>
    %56 = math.cos %55 : vector<16x32xf32>
    %57 = arith.addf %50, %56 : vector<16x32xf32>
    %cst_17 = arith.constant 1.250000e-01 : f32
    %58 = vector.broadcast %cst_17 : f32 to vector<16x32xf32>
    %59 = arith.mulf %57, %58 : vector<16x32xf32>
    %60 = vector.extract_strided_slice %0 {offsets = [0, 8], sizes = [16, 1], strides = [1, 1]} : vector<16x9xf32> to vector<16x1xf32>
    %61 = arith.fptosi %60 : vector<16x1xf32> to vector<16x1xi32>
    %c0_18 = arith.constant 0 : index
    %c0_19 = arith.constant 0 : index
    %62 = vector.load %arg1[%c0_18, %c0_19] : memref<16x32xbf16, #tpu.memory_space<vmem>>, vector<16x32xbf16>
    %c0_20 = arith.constant 0 : index
    %c0_21 = arith.constant 0 : index
    %63 = vector.load %arg8[%c0_20, %c0_21] : memref<32x32xbf16, #tpu.memory_space<vmem>>, vector<32x32xbf16>
    %cst_22 = arith.constant dense<0.000000e+00> : vector<16x32xf32>
    %64 = tpu.matmul %62, %63, %cst_22 {dimension_numbers = #tpu.dot_dimension_numbers<[1], [0], [0], [1], [0, 0, 1, 1], [], []>} : vector<16x32xbf16>, vector<32x32xbf16>, vector<16x32xf32> -> vector<16x32xf32>
    %c0_23 = arith.constant 0 : index
    %c0_24 = arith.constant 0 : index
    %65 = vector.load %arg2[%c0_23, %c0_24] : memref<16x256xbf16, #tpu.memory_space<vmem>>, vector<16x256xbf16>
    %c0_25 = arith.constant 0 : index
    %c0_26 = arith.constant 0 : index
    %66 = vector.load %arg9[%c0_25, %c0_26] : memref<256x32xbf16, #tpu.memory_space<vmem>>, vector<256x32xbf16>
    %cst_27 = arith.constant dense<0.000000e+00> : vector<16x32xf32>
    %67 = tpu.matmul %65, %66, %cst_27 {dimension_numbers = #tpu.dot_dimension_numbers<[1], [0], [0], [1], [0, 0, 1, 1], [], []>} : vector<16x256xbf16>, vector<256x32xbf16>, vector<16x32xf32> -> vector<16x32xf32>
    %68 = arith.addf %64, %67 : vector<16x32xf32>
    %c0_28 = arith.constant 0 : index
    %c0_29 = arith.constant 0 : index
    %69 = vector.load %arg10[%c0_28, %c0_29] : memref<32x32xf32, #tpu.memory_space<vmem>>, vector<32x32xf32>
    %cst_30 = arith.constant dense<0.000000e+00> : vector<16x32xf32>
    %70 = tpu.matmul %59, %69, %cst_30 {dimension_numbers = #tpu.dot_dimension_numbers<[1], [0], [0], [1], [0, 0, 1, 1], [], []>} : vector<16x32xf32>, vector<32x32xf32>, vector<16x32xf32> -> vector<16x32xf32>
    %71 = arith.addf %68, %70 : vector<16x32xf32>
    %c0_31 = arith.constant 0 : index
    %c0_32 = arith.constant 0 : index
    %72 = vector.load %arg11[%c0_31, %c0_32] : memref<1x32xf32, #tpu.memory_space<vmem>>, vector<1x32xf32>
    %73 = vector.broadcast %72 : vector<1x32xf32> to vector<16x32xf32>
    %74 = arith.addf %71, %73 : vector<16x32xf32>
    %cst_33 = arith.constant 0.000000e+00 : f32
    %75 = vector.broadcast %cst_33 : f32 to vector<16x32xf32>
    %76 = arith.maximumf %74, %75 : vector<16x32xf32>
    %c0_34 = arith.constant 0 : index
    %c0_35 = arith.constant 0 : index
    %77 = vector.load %arg12[%c0_34, %c0_35] : memref<32x8xf32, #tpu.memory_space<vmem>>, vector<32x8xf32>
    %cst_36 = arith.constant dense<0.000000e+00> : vector<16x8xf32>
    %78 = tpu.matmul %76, %77, %cst_36 {dimension_numbers = #tpu.dot_dimension_numbers<[1], [0], [0], [1], [0, 0, 1, 1], [], []>} : vector<16x32xf32>, vector<32x8xf32>, vector<16x8xf32> -> vector<16x8xf32>
    %c0_37 = arith.constant 0 : index
    %c0_38 = arith.constant 0 : index
    %79 = vector.load %arg13[%c0_37, %c0_38] : memref<1x8xf32, #tpu.memory_space<vmem>>, vector<1x8xf32>
    %80 = vector.broadcast %79 : vector<1x8xf32> to vector<16x8xf32>
    %81 = arith.addf %78, %80 : vector<16x8xf32>
    %82 = tpu.iota {dimensions = array<i32: 1>} : vector<16x8xi32>
    %c4_i32 = arith.constant 4 : i32
    %83 = vector.broadcast %c4_i32 : i32 to vector<16x8xi32>
    %84 = arith.cmpi slt, %82, %83 : vector<16x8xi32>
    %cst_39 = arith.constant -1.000000e+30 : f32
    %85 = vector.broadcast %cst_39 : f32 to vector<16x8xf32>
    %86 = arith.select %84, %81, %85 : vector<16x8xi1>, vector<16x8xf32>
    %cst_40 = arith.constant dense<0xFF800000> : vector<16xf32>
    %87 = vector.multi_reduction <maximumf>, %86, %cst_40 [1] : vector<16x8xf32> to vector<16xf32>
    %88 = vector.shape_cast %87 : vector<16xf32> to vector<16x1xf32>
    %89 = vector.broadcast %88 : vector<16x1xf32> to vector<16x8xf32>
    %90 = arith.subf %86, %89 : vector<16x8xf32>
    %91 = math.exp %90 : vector<16x8xf32>
    %cst_41 = arith.constant 0.000000e+00 : f32
    %92 = vector.broadcast %cst_41 : f32 to vector<16x8xf32>
    %93 = arith.select %84, %91, %92 : vector<16x8xi1>, vector<16x8xf32>
    %cst_42 = arith.constant dense<0.000000e+00> : vector<16xf32>
    %94 = vector.multi_reduction <add>, %93, %cst_42 [1] : vector<16x8xf32> to vector<16xf32>
    %95 = vector.shape_cast %94 : vector<16xf32> to vector<16x1xf32>
    %96 = math.log %95 : vector<16x1xf32>
    %97 = vector.broadcast %96 : vector<16x1xf32> to vector<16x8xf32>
    %98 = arith.subf %90, %97 : vector<16x8xf32>
    %99 = vector.broadcast %61 : vector<16x1xi32> to vector<16x8xi32>
    %100 = arith.cmpi eq, %82, %99 : vector<16x8xi32>
    %cst_43 = arith.constant 0.000000e+00 : f32
    %101 = vector.broadcast %cst_43 : f32 to vector<16x8xf32>
    %102 = arith.select %100, %98, %101 : vector<16x8xi1>, vector<16x8xf32>
    %cst_44 = arith.constant dense<0.000000e+00> : vector<16xf32>
    %103 = vector.multi_reduction <add>, %102, %cst_44 [1] : vector<16x8xf32> to vector<16xf32>
    %104 = vector.shape_cast %103 : vector<16xf32> to vector<16x1xf32>
    %cst_45 = arith.constant 0.000000e+00 : f32
    %105 = vector.broadcast %cst_45 : f32 to vector<16x1xf32>
    %106 = arith.subf %105, %104 : vector<16x1xf32>
    %c4_i32_46 = arith.constant 4 : i32
    %107 = vector.broadcast %c4_i32_46 : i32 to vector<16x8xi32>
    %108 = arith.cmpi eq, %82, %107 : vector<16x8xi32>
    %109 = vector.shape_cast %106 : vector<16x1xf32> to vector<16x1xf32>
    %110 = vector.broadcast %109 : vector<16x1xf32> to vector<16x8xf32>
    %111 = arith.select %108, %110, %81 : vector<16x8xi1>, vector<16x8xf32>
    %c0_47 = arith.constant 0 : index
    %c0_48 = arith.constant 0 : index
    %112 = vector.load %arg14[%c0_47, %c0_48] : memref<16x8xf32, #tpu.memory_space<vmem>>, vector<16x8xf32>
    tpu.vector_store %arg14[%c0_47, %c0_48], %111 {strides = array<i32>} : memref<16x8xf32, #tpu.memory_space<vmem>>, vector<16x8xf32>,
    %c0_49 = arith.constant 0 : index
    %c0_50 = arith.constant 0 : index
    %113 = vector.load %arg6[%c0_49, %c0_50] : memref<16x9xf32, #tpu.memory_space<vmem>>, vector<16x9xf32>
    %cst_51 = arith.constant 0.000000e+00 : f32
    %114 = vector.broadcast %cst_51 : f32 to vector<16x32xf32>
    %115 = vector.extract_strided_slice %113 {offsets = [0, 0], sizes = [16, 1], strides = [1, 1]} : vector<16x9xf32> to vector<16x1xf32>
    %c0_52 = arith.constant 0 : index
    %c0_53 = arith.constant 0 : index
    %116 = vector.load %arg7[%c0_52, %c0_53] : memref<1x32xf32, #tpu.memory_space<vmem>>, vector<1x32xf32>
    %117 = vector.broadcast %115 : vector<16x1xf32> to vector<16x32xf32>
    %118 = vector.broadcast %116 : vector<1x32xf32> to vector<16x32xf32>
    %119 = arith.mulf %117, %118 : vector<16x32xf32>
    %120 = math.cos %119 : vector<16x32xf32>
    %121 = arith.addf %114, %120 : vector<16x32xf32>
    %122 = vector.extract_strided_slice %113 {offsets = [0, 1], sizes = [16, 1], strides = [1, 1]} : vector<16x9xf32> to vector<16x1xf32>
    %c0_54 = arith.constant 0 : index
    %c0_55 = arith.constant 0 : index
    %123 = vector.load %arg7[%c0_54, %c0_55] : memref<1x32xf32, #tpu.memory_space<vmem>>, vector<1x32xf32>
    %124 = vector.broadcast %122 : vector<16x1xf32> to vector<16x32xf32>
    %125 = vector.broadcast %123 : vector<1x32xf32> to vector<16x32xf32>
    %126 = arith.mulf %124, %125 : vector<16x32xf32>
    %127 = math.cos %126 : vector<16x32xf32>
    %128 = arith.addf %121, %127 : vector<16x32xf32>
    %129 = vector.extract_strided_slice %113 {offsets = [0, 2], sizes = [16, 1], strides = [1, 1]} : vector<16x9xf32> to vector<16x1xf32>
    %c0_56 = arith.constant 0 : index
    %c0_57 = arith.constant 0 : index
    %130 = vector.load %arg7[%c0_56, %c0_57] : memref<1x32xf32, #tpu.memory_space<vmem>>, vector<1x32xf32>
    %131 = vector.broadcast %129 : vector<16x1xf32> to vector<16x32xf32>
    %132 = vector.broadcast %130 : vector<1x32xf32> to vector<16x32xf32>
    %133 = arith.mulf %131, %132 : vector<16x32xf32>
    %134 = math.cos %133 : vector<16x32xf32>
    %135 = arith.addf %128, %134 : vector<16x32xf32>
    %136 = vector.extract_strided_slice %113 {offsets = [0, 3], sizes = [16, 1], strides = [1, 1]} : vector<16x9xf32> to vector<16x1xf32>
    %c0_58 = arith.constant 0 : index
    %c0_59 = arith.constant 0 : index
    %137 = vector.load %arg7[%c0_58, %c0_59] : memref<1x32xf32, #tpu.memory_space<vmem>>, vector<1x32xf32>
    %138 = vector.broadcast %136 : vector<16x1xf32> to vector<16x32xf32>
    %139 = vector.broadcast %137 : vector<1x32xf32> to vector<16x32xf32>
    %140 = arith.mulf %138, %139 : vector<16x32xf32>
    %141 = math.cos %140 : vector<16x32xf32>
    %142 = arith.addf %135, %141 : vector<16x32xf32>
    %143 = vector.extract_strided_slice %113 {offsets = [0, 4], sizes = [16, 1], strides = [1, 1]} : vector<16x9xf32> to vector<16x1xf32>
    %c0_60 = arith.constant 0 : index
    %c0_61 = arith.constant 0 : index
    %144 = vector.load %arg7[%c0_60, %c0_61] : memref<1x32xf32, #tpu.memory_space<vmem>>, vector<1x32xf32>
    %145 = vector.broadcast %143 : vector<16x1xf32> to vector<16x32xf32>
    %146 = vector.broadcast %144 : vector<1x32xf32> to vector<16x32xf32>
    %147 = arith.mulf %145, %146 : vector<16x32xf32>
    %148 = math.cos %147 : vector<16x32xf32>
    %149 = arith.addf %142, %148 : vector<16x32xf32>
    %150 = vector.extract_strided_slice %113 {offsets = [0, 5], sizes = [16, 1], strides = [1, 1]} : vector<16x9xf32> to vector<16x1xf32>
    %c0_62 = arith.constant 0 : index
    %c0_63 = arith.constant 0 : index
    %151 = vector.load %arg7[%c0_62, %c0_63] : memref<1x32xf32, #tpu.memory_space<vmem>>, vector<1x32xf32>
    %152 = vector.broadcast %150 : vector<16x1xf32> to vector<16x32xf32>
    %153 = vector.broadcast %151 : vector<1x32xf32> to vector<16x32xf32>
    %154 = arith.mulf %152, %153 : vector<16x32xf32>
    %155 = math.cos %154 : vector<16x32xf32>
    %156 = arith.addf %149, %155 : vector<16x32xf32>
    %157 = vector.extract_strided_slice %113 {offsets = [0, 6], sizes = [16, 1], strides = [1, 1]} : vector<16x9xf32> to vector<16x1xf32>
    %c0_64 = arith.constant 0 : index
    %c0_65 = arith.constant 0 : index
    %158 = vector.load %arg7[%c0_64, %c0_65] : memref<1x32xf32, #tpu.memory_space<vmem>>, vector<1x32xf32>
    %159 = vector.broadcast %157 : vector<16x1xf32> to vector<16x32xf32>
    %160 = vector.broadcast %158 : vector<1x32xf32> to vector<16x32xf32>
    %161 = arith.mulf %159, %160 : vector<16x32xf32>
    %162 = math.cos %161 : vector<16x32xf32>
    %163 = arith.addf %156, %162 : vector<16x32xf32>
    %164 = vector.extract_strided_slice %113 {offsets = [0, 7], sizes = [16, 1], strides = [1, 1]} : vector<16x9xf32> to vector<16x1xf32>
    %c0_66 = arith.constant 0 : index
    %c0_67 = arith.constant 0 : index
    %165 = vector.load %arg7[%c0_66, %c0_67] : memref<1x32xf32, #tpu.memory_space<vmem>>, vector<1x32xf32>
    %166 = vector.broadcast %164 : vector<16x1xf32> to vector<16x32xf32>
    %167 = vector.broadcast %165 : vector<1x32xf32> to vector<16x32xf32>
    %168 = arith.mulf %166, %167 : vector<16x32xf32>
    %169 = math.cos %168 : vector<16x32xf32>
    %170 = arith.addf %163, %169 : vector<16x32xf32>
    %cst_68 = arith.constant 1.250000e-01 : f32
    %171 = vector.broadcast %cst_68 : f32 to vector<16x32xf32>
    %172 = arith.mulf %170, %171 : vector<16x32xf32>
    %173 = vector.extract_strided_slice %113 {offsets = [0, 8], sizes = [16, 1], strides = [1, 1]} : vector<16x9xf32> to vector<16x1xf32>
    %174 = arith.fptosi %173 : vector<16x1xf32> to vector<16x1xi32>
    %c0_69 = arith.constant 0 : index
    %c0_70 = arith.constant 0 : index
    %175 = vector.load %arg4[%c0_69, %c0_70] : memref<16x32xbf16, #tpu.memory_space<vmem>>, vector<16x32xbf16>
    %c0_71 = arith.constant 0 : index
    %c0_72 = arith.constant 0 : index
    %176 = vector.load %arg8[%c0_71, %c0_72] : memref<32x32xbf16, #tpu.memory_space<vmem>>, vector<32x32xbf16>
    %cst_73 = arith.constant dense<0.000000e+00> : vector<16x32xf32>
    %177 = tpu.matmul %175, %176, %cst_73 {dimension_numbers = #tpu.dot_dimension_numbers<[1], [0], [0], [1], [0, 0, 1, 1], [], []>} : vector<16x32xbf16>, vector<32x32xbf16>, vector<16x32xf32> -> vector<16x32xf32>
    %c0_74 = arith.constant 0 : index
    %c0_75 = arith.constant 0 : index
    %178 = vector.load %arg5[%c0_74, %c0_75] : memref<16x256xbf16, #tpu.memory_space<vmem>>, vector<16x256xbf16>
    %c0_76 = arith.constant 0 : index
    %c0_77 = arith.constant 0 : index
    %179 = vector.load %arg9[%c0_76, %c0_77] : memref<256x32xbf16, #tpu.memory_space<vmem>>, vector<256x32xbf16>
    %cst_78 = arith.constant dense<0.000000e+00> : vector<16x32xf32>
    %180 = tpu.matmul %178, %179, %cst_78 {dimension_numbers = #tpu.dot_dimension_numbers<[1], [0], [0], [1], [0, 0, 1, 1], [], []>} : vector<16x256xbf16>, vector<256x32xbf16>, vector<16x32xf32> -> vector<16x32xf32>
    %181 = arith.addf %177, %180 : vector<16x32xf32>
    %c0_79 = arith.constant 0 : index
    %c0_80 = arith.constant 0 : index
    %182 = vector.load %arg10[%c0_79, %c0_80] : memref<32x32xf32, #tpu.memory_space<vmem>>, vector<32x32xf32>
    %cst_81 = arith.constant dense<0.000000e+00> : vector<16x32xf32>
    %183 = tpu.matmul %172, %182, %cst_81 {dimension_numbers = #tpu.dot_dimension_numbers<[1], [0], [0], [1], [0, 0, 1, 1], [], []>} : vector<16x32xf32>, vector<32x32xf32>, vector<16x32xf32> -> vector<16x32xf32>
    %184 = arith.addf %181, %183 : vector<16x32xf32>
    %c0_82 = arith.constant 0 : index
    %c0_83 = arith.constant 0 : index
    %185 = vector.load %arg11[%c0_82, %c0_83] : memref<1x32xf32, #tpu.memory_space<vmem>>, vector<1x32xf32>
    %186 = vector.broadcast %185 : vector<1x32xf32> to vector<16x32xf32>
    %187 = arith.addf %184, %186 : vector<16x32xf32>
    %cst_84 = arith.constant 0.000000e+00 : f32
    %188 = vector.broadcast %cst_84 : f32 to vector<16x32xf32>
    %189 = arith.maximumf %187, %188 : vector<16x32xf32>
    %c0_85 = arith.constant 0 : index
    %c0_86 = arith.constant 0 : index
    %190 = vector.load %arg12[%c0_85, %c0_86] : memref<32x8xf32, #tpu.memory_space<vmem>>, vector<32x8xf32>
    %cst_87 = arith.constant dense<0.000000e+00> : vector<16x8xf32>
    %191 = tpu.matmul %189, %190, %cst_87 {dimension_numbers = #tpu.dot_dimension_numbers<[1], [0], [0], [1], [0, 0, 1, 1], [], []>} : vector<16x32xf32>, vector<32x8xf32>, vector<16x8xf32> -> vector<16x8xf32>
    %c0_88 = arith.constant 0 : index
    %c0_89 = arith.constant 0 : index
    %192 = vector.load %arg13[%c0_88, %c0_89] : memref<1x8xf32, #tpu.memory_space<vmem>>, vector<1x8xf32>
    %193 = vector.broadcast %192 : vector<1x8xf32> to vector<16x8xf32>
    %194 = arith.addf %191, %193 : vector<16x8xf32>
    %195 = tpu.iota {dimensions = array<i32: 1>} : vector<16x8xi32>
    %c4_i32_90 = arith.constant 4 : i32
    %196 = vector.broadcast %c4_i32_90 : i32 to vector<16x8xi32>
    %197 = arith.cmpi slt, %195, %196 : vector<16x8xi32>
    %cst_91 = arith.constant -1.000000e+30 : f32
    %198 = vector.broadcast %cst_91 : f32 to vector<16x8xf32>
    %199 = arith.select %197, %194, %198 : vector<16x8xi1>, vector<16x8xf32>
    %cst_92 = arith.constant dense<0xFF800000> : vector<16xf32>
    %200 = vector.multi_reduction <maximumf>, %199, %cst_92 [1] : vector<16x8xf32> to vector<16xf32>
    %201 = vector.shape_cast %200 : vector<16xf32> to vector<16x1xf32>
    %202 = vector.broadcast %201 : vector<16x1xf32> to vector<16x8xf32>
    %203 = arith.subf %199, %202 : vector<16x8xf32>
    %204 = math.exp %203 : vector<16x8xf32>
    %cst_93 = arith.constant 0.000000e+00 : f32
    %205 = vector.broadcast %cst_93 : f32 to vector<16x8xf32>
    %206 = arith.select %197, %204, %205 : vector<16x8xi1>, vector<16x8xf32>
    %cst_94 = arith.constant dense<0.000000e+00> : vector<16xf32>
    %207 = vector.multi_reduction <add>, %206, %cst_94 [1] : vector<16x8xf32> to vector<16xf32>
    %208 = vector.shape_cast %207 : vector<16xf32> to vector<16x1xf32>
    %209 = math.log %208 : vector<16x1xf32>
    %210 = vector.broadcast %209 : vector<16x1xf32> to vector<16x8xf32>
    %211 = arith.subf %203, %210 : vector<16x8xf32>
    %212 = vector.broadcast %174 : vector<16x1xi32> to vector<16x8xi32>
    %213 = arith.cmpi eq, %195, %212 : vector<16x8xi32>
    %cst_95 = arith.constant 0.000000e+00 : f32
    %214 = vector.broadcast %cst_95 : f32 to vector<16x8xf32>
    %215 = arith.select %213, %211, %214 : vector<16x8xi1>, vector<16x8xf32>
    %cst_96 = arith.constant dense<0.000000e+00> : vector<16xf32>
    %216 = vector.multi_reduction <add>, %215, %cst_96 [1] : vector<16x8xf32> to vector<16xf32>
    %217 = vector.shape_cast %216 : vector<16xf32> to vector<16x1xf32>
    %cst_97 = arith.constant 0.000000e+00 : f32
    %218 = vector.broadcast %cst_97 : f32 to vector<16x1xf32>
    %219 = arith.subf %218, %217 : vector<16x1xf32>
    %c4_i32_98 = arith.constant 4 : i32
    %220 = vector.broadcast %c4_i32_98 : i32 to vector<16x8xi32>
    %221 = arith.cmpi eq, %195, %220 : vector<16x8xi32>
    %222 = vector.shape_cast %219 : vector<16x1xf32> to vector<16x1xf32>
    %223 = vector.broadcast %222 : vector<16x1xf32> to vector<16x8xf32>
    %224 = arith.select %221, %223, %194 : vector<16x8xi1>, vector<16x8xf32>
    %c0_99 = arith.constant 0 : index
    %c0_100 = arith.constant 0 : index
    %225 = vector.load %arg15[%c0_99, %c0_100] : memref<16x8xf32, #tpu.memory_space<vmem>>, vector<16x8xf32>
    tpu.vector_store %arg15[%c0_99, %c0_100], %224 {strides = array<i32>} : memref<16x8xf32, #tpu.memory_space<vmem>>, vector<16x8xf32>,
    return
  }
  func.func @transform_0(%arg0: i32) -> (i32, i32) {
    %c0_i32 = arith.constant 0 : i32
    %c0_i32_0 = arith.constant 0 : i32
    return %arg0, %c0_i32 : i32, i32
  }
  func.func @transform_1(%arg0: i32) -> (i32, i32) {
    %c0_i32 = arith.constant 0 : i32
    %c0_i32_0 = arith.constant 0 : i32
    return %arg0, %c0_i32 : i32, i32
  }
  func.func @transform_2(%arg0: i32) -> (i32, i32) {
    %c0_i32 = arith.constant 0 : i32
    %c0_i32_0 = arith.constant 0 : i32
    return %arg0, %c0_i32 : i32, i32
  }
  func.func @transform_3(%arg0: i32) -> (i32, i32) {
    %c0_i32 = arith.constant 0 : i32
    %c0_i32_0 = arith.constant 0 : i32
    return %arg0, %c0_i32 : i32, i32
  }
  func.func @transform_4(%arg0: i32) -> (i32, i32) {
    %c0_i32 = arith.constant 0 : i32
    %c0_i32_0 = arith.constant 0 : i32
    return %arg0, %c0_i32 : i32, i32
  }
  func.func @transform_5(%arg0: i32) -> (i32, i32) {
    %c0_i32 = arith.constant 0 : i32
    %c0_i32_0 = arith.constant 0 : i32
    return %arg0, %c0_i32 : i32, i32
  }
  func.func @transform_6(%arg0: i32) -> (i32, i32) {
    %c0_i32 = arith.constant 0 : i32
    %c0_i32_0 = arith.constant 0 : i32
    %c0_i32_1 = arith.constant 0 : i32
    return %c0_i32, %c0_i32_0 : i32, i32
  }
  func.func @transform_7(%arg0: i32) -> (i32, i32) {
    %c0_i32 = arith.constant 0 : i32
    %c0_i32_0 = arith.constant 0 : i32
    %c0_i32_1 = arith.constant 0 : i32
    return %c0_i32, %c0_i32_0 : i32, i32
  }
  func.func @transform_8(%arg0: i32) -> (i32, i32) {
    %c0_i32 = arith.constant 0 : i32
    %c0_i32_0 = arith.constant 0 : i32
    %c0_i32_1 = arith.constant 0 : i32
    return %c0_i32, %c0_i32_0 : i32, i32
  }
  func.func @transform_9(%arg0: i32) -> (i32, i32) {
    %c0_i32 = arith.constant 0 : i32
    %c0_i32_0 = arith.constant 0 : i32
    %c0_i32_1 = arith.constant 0 : i32
    return %c0_i32, %c0_i32_0 : i32, i32
  }
  func.func @transform_10(%arg0: i32) -> (i32, i32) {
    %c0_i32 = arith.constant 0 : i32
    %c0_i32_0 = arith.constant 0 : i32
    %c0_i32_1 = arith.constant 0 : i32
    return %c0_i32, %c0_i32_0 : i32, i32
  }
  func.func @transform_11(%arg0: i32) -> (i32, i32) {
    %c0_i32 = arith.constant 0 : i32
    %c0_i32_0 = arith.constant 0 : i32
    %c0_i32_1 = arith.constant 0 : i32
    return %c0_i32, %c0_i32_0 : i32, i32
  }
  func.func @transform_12(%arg0: i32) -> (i32, i32) {
    %c0_i32 = arith.constant 0 : i32
    %c0_i32_0 = arith.constant 0 : i32
    %c0_i32_1 = arith.constant 0 : i32
    return %c0_i32, %c0_i32_0 : i32, i32
  }
  func.func @transform_13(%arg0: i32) -> (i32, i32) {
    %c0_i32 = arith.constant 0 : i32
    %c0_i32_0 = arith.constant 0 : i32
    return %arg0, %c0_i32 : i32, i32
  }
  func.func @transform_14(%arg0: i32) -> (i32, i32) {
    %c0_i32 = arith.constant 0 : i32
    %c0_i32_0 = arith.constant 0 : i32
    return %arg0, %c0_i32 : i32, i32
  }
}

</mosaic_0001>

<bundles_post_ra>
// kernel: tpu_custom_call.1
= control target key start
LH: loop header
LB: loop body
LE: loop exit
PB: predicated region body
PF: predicated region fallthrough
CT: control target
= control target key end

     0   :  { %v6300_v0 = vmov 4   ;;  %v6301_v1 = vmov 2   ;;  %v12022_v3 = vmov 0   ;;  %v6303_v5 = vmov 3   ;;  %s12004_s2 = inlined_call_operand.vmem [shape: f32[16,9], index: 2, kind: input, shape index: {}]   ;;  %s12005_s6 = inlined_call_operand.vmem [shape: f32[1,32], index: 6, kind: input, shape index: {}]   ;;  %s12006_s5 = inlined_call_operand.vmem [shape: f32[16,9], index: 5, kind: input, shape index: {}]   ;;  %s12007_s8 = inlined_call_operand.vmem [shape: bf16[256,32], index: 8, kind: input, shape index: {}]   ;;  %s12008_s7 = inlined_call_operand.vmem [shape: bf16[32,32], index: 7, kind: input, shape index: {}]   ;;  %s12009_s9 = inlined_call_operand.vmem [shape: f32[32,32], index: 9, kind: input, shape index: {}]   ;;  %s12010_s0 = inlined_call_operand.vmem [shape: bf16[16,32], index: 0, kind: input, shape index: {}]   ;;  %s12011_s1 = inlined_call_operand.vmem [shape: bf16[16,256], index: 1, kind: input, shape index: {}]   ;;  %s12012_s10 = inlined_call_operand.vmem [shape: f32[1,32], index: 10, kind: input, shape index: {}]   ;;  %s12013_s11 = inlined_call_operand.vmem [shape: f32[32,8], index: 11, kind: input, shape index: {}]   ;;  %s12014_s12 = inlined_call_operand.vmem [shape: f32[1,8], index: 12, kind: input, shape index: {}]   ;;  %s12015_s4 = inlined_call_operand.vmem [shape: bf16[16,256], index: 4, kind: input, shape index: {}]   ;;  %s12016_s3 = inlined_call_operand.vmem [shape: bf16[16,32], index: 3, kind: input, shape index: {}]   ;;  %s12017_s13 = inlined_call_operand.vmem [shape: f32[16,8], index: 13, kind: output, shape index: {0}]   ;;  %s12018_s14 = inlined_call_operand.vmem [shape: f32[16,8], index: 14, kind: output, shape index: {1}]  }
   0x1   :  { %6236 = vset.pattern.permute.xlu2 %v6300_v0  ;;  %6234 = vset.pattern.permute.xlu1 %v6301_v1  ;;  %v47_v2 = vld [vmem:[%s12004_s2] sm:$0xff]  ;;  %v48_v4 = vld [vmem:[%s12004_s2 + $0x8] sm:$0xff]  ;;  %v6304_v6 = vmov 1   ;;  %v6305_v7 = vmov 5   ;;  %v6306_v8 = vmov 6   ;;  %v6307_v9 = vmov 7  }
   0x2   :  { %6232 = vset.pattern.permute.xlu0 %v12022_v3  ;;  %1336 = vperm.xlu2 %6236, %v47_v2   ;;  %v2963_v10 = vld [vmem:[%s12006_s5] sm:$0xff]  ;;  %v2964_v11 = vld [vmem:[%s12006_s5 + $0x8] sm:$0xff]  ;;  %v12038_v30 = vmov 2102212464   ;;  %v12030_v32 = vmov 920167782  }
   0x3   :  { %696 = vperm.xlu1 %6234, %v47_v2   ;;  %52 = vperm.xlu0 %6232, %v47_v2   ;;  %v6409_v12 = vld [vmem:[%s12005_s6] ss:$0 sm:$0xff]  ;;  %v12040_v35 = vmov 1326507024   ;;  %v12024_v38 = vmov 683565275  }
   0x4   :  { %v12026_v40 = vmov 2475754826   ;;  %v12051_v42 = vmov 2131351028  }
   0xa   :  { %6237 = vset.pattern.permute.xlu2 %v12022_v3 }
   0xb   :  { %6235 = vset.pattern.permute.xlu1 %v6303_v5  ;;  %6233 = vset.pattern.permute.xlu0 %v6304_v6 }
   0xc   :  { %57 = vperm.xlu2 %6237, %v48_v4   ;;  %1016 = vperm.xlu1 %6235, %v47_v2  }
   0xd   :  { %376 = vperm.xlu0 %6233, %v47_v2  }
  0x14   :  { %6239 = vset.pattern.permute.xlu2 %v6305_v7  ;;  %6238 = vset.pattern.permute.xlu1 %v6304_v6 }
  0x15   :  { %6240 = vset.pattern.permute.xlu0 %v6301_v1  ;;  %1656 = vperm.xlu2 %6239, %v47_v2  }
  0x16   :  { %380 = vperm.xlu1 %6238, %v48_v4   ;;  %700 = vperm.xlu0 %6240, %v48_v4  }
  0x1d   :  { %6242 = vset.pattern.permute.xlu2 %v6303_v5 }
  0x1e   :  { %6241 = vset.pattern.permute.xlu1 %v6306_v8  ;;  %6245 = vset.pattern.permute.xlu0 %v6305_v7 }
  0x1f   :  { %1020 = vperm.xlu2 %6242, %v48_v4   ;;  %1976 = vperm.xlu1 %6241, %v47_v2  }
  0x20   :  { %1660 = vperm.xlu0 %6245, %v48_v4  }
  0x27   :  { %6244 = vset.pattern.permute.xlu2 %v6300_v0  ;;  %6243 = vset.pattern.permute.xlu1 %v6307_v9 }
  0x28   :  { %1340 = vperm.xlu2 %6244, %v48_v4   ;;  %2296 = vperm.xlu1 %6243, %v47_v2  }
  0x29   :  { %6250 = vset.pattern.permute.xlu0 %v6301_v1 }
  0x2a   :  { %3612 = vperm.xlu0 %6250, %v2963_v10  }
  0x30   :  { %6247 = vset.pattern.permute.xlu2 %v6307_v9  ;;  %6246 = vset.pattern.permute.xlu1 %v6306_v8 }
  0x31   :  { %2300 = vperm.xlu2 %6247, %v48_v4   ;;  %1980 = vperm.xlu1 %6246, %v48_v4  }
  0x32   :  { %6255 = vset.pattern.permute.xlu0 %v6305_v7 }
  0x33   :  { %4572 = vperm.xlu0 %6255, %v2963_v10  }
  0x39   :  { %6248 = vset.pattern.permute.xlu1 %v12022_v3  ;;  %6249 = vset.pattern.permute.xlu2 %v6304_v6 }
  0x3a   :  { %2968 = vperm.xlu1 %6248, %v2963_v10   ;;  %3292 = vperm.xlu2 %6249, %v2963_v10  }
  0x3b   :  { %6260 = vset.pattern.permute.xlu0 %v6300_v0 }
  0x3c   :  { %4256 = vperm.xlu0 %6260, %v2964_v11  }
  0x42   :  { %6251 = vset.pattern.permute.xlu1 %v6303_v5  ;;  %6252 = vset.pattern.permute.xlu2 %v6300_v0 }
  0x43   :  { %3932 = vperm.xlu1 %6251, %v2963_v10   ;;  %4252 = vperm.xlu2 %6252, %v2963_v10  }
  0x4b   :  { %6253 = vset.pattern.permute.xlu1 %v12022_v3  ;;  %6254 = vset.pattern.permute.xlu2 %v6304_v6 }
  0x4c   :  { %2973 = vperm.xlu1 %6253, %v2964_v11   ;;  %3296 = vperm.xlu2 %6254, %v2964_v11  }
  0x54   :  { %6256 = vset.pattern.permute.xlu1 %v6301_v1  ;;  %6257 = vset.pattern.permute.xlu2 %v6306_v8 }
  0x55   :  { %3616 = vperm.xlu1 %6256, %v2964_v11   ;;  %4892 = vperm.xlu2 %6257, %v2963_v10  }
  0x5c   :  { %v1337_v13 = vpop.permute.xlu2 %1336 }
  0x5d   :  { %6258 = vset.pattern.permute.xlu1 %v6303_v5  ;;  %v6412_v14 = vmul.f32 %v6409_v12, %v1337_v13  ;;  %6259 = vset.pattern.permute.xlu2 %v6307_v9 }
  0x5e   :  { %3936 = vperm.xlu1 %6258, %v2964_v11   ;;  %5212 = vperm.xlu2 %6259, %v2963_v10  }
  0x5f   :  { %12171 = vst [vmem:[#allocation2_spill] sm:$0xff] %v6412_v14  ;;  %v1348_v15 = vand.u32 2139095040, %v6412_v14  ;;  %v1345_v25 = vand.u32 2147483647, %v6412_v14 }
  0x61   :  { %v1349_v16 = vshrl.u32 %v1348_v15, 23  ;;  %v1352_v29 = vand.u32 8388607, %v1345_v25 }
  0x63   :  { %v5905_v17 = vadd.s32 4294967169, %v1349_v16  ;;  %v1353_v49 = vor.u32 8388608, %v1352_v29 }
  0x65   :  { %v1355_v18 = vadd.s32 1, %v5905_v17  ;;  %v6454_v57 = vshll.u32 %v1353_v49, 8 }
  0x66   :  { %6261 = vset.pattern.permute.xlu1 %v6305_v7  ;;  %v58_v19 = vpop.permute.xlu2 %57  ;;  %6262 = vset.pattern.permute.xlu2 %v6306_v8 }
  0x67   :  { %4576 = vperm.xlu1 %6261, %v2964_v11   ;;  %4896 = vperm.xlu2 %6262, %v2964_v11   ;;  %vm1356_vm0 = vcmp.gt.s32.totalorder %v1355_v18, 0  ;;  %v6416_v20 = vmul.f32 %v6409_v12, %v58_v19  ;;  %v1394_v19 = vand.u32 65535, %v6454_v57 }
  0x68   :  { %v1357_v21 = vsel %vm1356_vm0, %v1355_v18, 0 }
  0x69   :  { %v222_v22 = vand.u32 2139095040, %v6416_v20  ;;  %v1359_v23 = vand.u32 31, %v1357_v21  ;;  %v6430_v37 = vshrl.u32 %v1357_v21, 5  ;;  %v219_v58 = vand.u32 2147483647, %v6416_v20 }
  0x6b   :  { %v223_v24 = vshrl.u32 %v222_v22, 23  ;;  %v6420_v26 = vsub.s32 32, %v1359_v23  ;;  %v1371_v31 = vshll.u32 %v12038_v30, %v1359_v23  ;;  %v1374_v34 = vshll.u32 %v12030_v32, %v1359_v23 }
  0x6c   :  { %v1362_v39 = vshll.u32 %v12024_v38, %v1359_v23  ;;  %v1365_v41 = vshll.u32 %v12026_v40, %v1359_v23  ;;  %v1368_v43 = vshll.u32 %v12051_v42, %v1359_v23  ;;  %vm1380_vm2 = vcmp.lt.s32.totalorder %v6430_v37, 4 }
  0x6d   :  { %v5884_v27 = vadd.s32 4294967169, %v223_v24  ;;  %v1372_v33 = vshrl.u32 %v12030_v32, %v6420_v26  ;;  %v1375_v36 = vshrl.u32 %v12040_v35, %v6420_v26  ;;  %v1363_v44 = vshrl.u32 %v12026_v40, %v6420_v26 }
  0x6e   :  { %v1366_v45 = vshrl.u32 %v12051_v42, %v6420_v26  ;;  %v1369_v46 = vshrl.u32 %v12038_v30, %v6420_v26  ;;  %vm1377_vm3 = vcmp.lt.s32.totalorder %v6430_v37, 1  ;;  %vm1379_vm4 = vcmp.lt.s32.totalorder %v6430_v37, 3 }
  0x6f   :  { %6263 = vset.pattern.permute.xlu1 %v6307_v9  ;;  %v229_v28 = vadd.s32 1, %v5884_v27  ;;  %v1373_v47 = vor.u32 %v1372_v33, %v1371_v31  ;;  %v1376_v48 = vor.u32 %v1375_v36, %v1374_v34  ;;  %v6442_v51 = vor.u32 %v1363_v44, %v1362_v39 }
  0x70   :  { %5216 = vperm.xlu1 %6263, %v2964_v11   ;;  %v6444_v52 = vor.u32 %v1366_v45, %v1365_v41  ;;  %v6446_v53 = vor.u32 %v1369_v46, %v1368_v43  ;;  %vm1378_vm5 = vcmp.lt.s32.totalorder %v6430_v37, 2  ;;  %v226_v16 = vand.u32 8388607, %v219_v58 }
  0x71   :  { %vm230_vm1 = vcmp.gt.s32.totalorder %v229_v28, 0  ;;  %v1386_v55 = vsel %vm1380_vm2, %v1373_v47, 920167782  ;;  %v1390_v56 = vsel %vm1380_vm2, %v1376_v48, 1326507024  ;;  %v1395_v31 = vshrl.u32 %v6454_v57, 16 }
  0x72   :  { %v231_v50 = vsel %vm230_vm1, %v229_v28, 0  ;;  %v1385_v60 = vsel %vm1377_vm3, %v6442_v51, %v6444_v52  ;;  %v1389_v61 = vsel %vm1377_vm3, %v6444_v52, %v6446_v53  ;;  %v1387_v63 = vsel %vm1379_vm4, %v6446_v53, %v1386_v55 }
  0x73   :  { %v233_v54 = vand.u32 31, %v231_v50  ;;  %v1391_v0 = vsel %vm1379_vm4, %v1373_v47, %v1390_v56  ;;  %v6474_v1 = vshrl.u32 %v231_v50, 5  ;;  %v1388_v18 = vsel %vm1378_vm5, %v1385_v60, %v1387_v63  ;;  %v1657_v56 = vpop.permute.xlu2 %1656 }
  0x74   :  { %v1392_v13 = vsel %vm1378_vm5, %v1389_v61, %v1391_v0  ;;  %v227_v29 = vor.u32 8388608, %v226_v16  ;;  %v1419_v34 = vshrl.u32 %v1388_v18, 16  ;;  %v1418_v46 = vand.u32 65535, %v1388_v18 }
  0x75   :  { %v6457_v59 = vsub.s32 32, %v233_v54  ;;  %v245_v62 = vshll.u32 %v12038_v30, %v233_v54  ;;  %v236_v2 = vshll.u32 %v12024_v38, %v233_v54  ;;  %v239_v4 = vshll.u32 %v12026_v40, %v233_v54 }
  0x76   :  { %v242_v5 = vshll.u32 %v12051_v42, %v233_v54  ;;  %v248_v7 = vshll.u32 %v12030_v32, %v233_v54  ;;  %vm254_vm6 = vcmp.lt.s32.totalorder %v6474_v1, 4  ;;  %v1397_v21 = vshrl.u32 %v1392_v13, 16 }
  0x77   :  { %v246_v6 = vshrl.u32 %v12030_v32, %v6457_v59  ;;  %v237_v8 = vshrl.u32 %v12026_v40, %v6457_v59  ;;  %v240_v9 = vshrl.u32 %v12051_v42, %v6457_v59  ;;  %v243_v10 = vshrl.u32 %v12038_v30, %v6457_v59 }
  0x78   :  { %v249_v11 = vshrl.u32 %v12040_v35, %v6457_v59  ;;  %vm251_vm7 = vcmp.lt.s32.totalorder %v6474_v1, 1  ;;  %vm253_vm8 = vcmp.lt.s32.totalorder %v6474_v1, 3  ;;  %v1396_v33 = vand.u32 65535, %v1392_v13 }
  0x79   :  { %v247_v15 = vor.u32 %v246_v6, %v245_v62  ;;  %v6498_v22 = vor.u32 %v237_v8, %v236_v2  ;;  %v6500_v23 = vor.u32 %v240_v9, %v239_v4  ;;  %v6502_v24 = vor.u32 %v243_v10, %v242_v5 }
  0x7a   :  { %v250_v17 = vor.u32 %v249_v11, %v248_v7  ;;  %vm252_vm9 = vcmp.lt.s32.totalorder %v6474_v1, 2  ;;  %v6525_v44 = vmul.u32 %v1397_v21, %v1394_v19  ;;  %v6527_v45 = vshll.u32 %v227_v29, 8 }
  0x7b   :  { %v260_v27 = vsel %vm254_vm6, %v247_v15, 920167782  ;;  %v259_v36 = vsel %vm251_vm7, %v6498_v22, %v6500_v23  ;;  %v263_v41 = vsel %vm251_vm7, %v6500_v23, %v6502_v24  ;;  %v6533_v49 = vmul.u32 %v1396_v33, %v1395_v31 }
  0x7c   :  { %v264_v28 = vsel %vm254_vm6, %v250_v17, 1326507024  ;;  %v261_v39 = vsel %vm253_vm8, %v6502_v24, %v260_v27  ;;  %v6535_v50 = vmul.u32 %v1419_v34, %v1394_v19  ;;  %v1398_v54 = vmul.u32 %v1396_v33, %v1394_v19 }
  0x7d   :  { %v265_v43 = vsel %vm253_vm8, %v247_v15, %v264_v28  ;;  %v262_v47 = vsel %vm252_vm9, %v259_v36, %v261_v39  ;;  %v1402_v55 = vshll.u32 %v6525_v44, 16  ;;  %v268_v60 = vand.u32 65535, %v6527_v45 }
  0x7e   :  { %v266_v48 = vsel %vm252_vm9, %v263_v41, %v265_v43  ;;  %v293_v62 = vshrl.u32 %v262_v47, 16  ;;  %v6539_v63 = vmul.u32 %v1418_v46, %v1395_v31  ;;  %v1404_v0 = vshll.u32 %v6533_v49, 16 }
  0x7f   :  { %v271_v61 = vshrl.u32 %v266_v48, 16  ;;  %v1420_v2 = vmul.u32 %v1418_v46, %v1394_v19  ;;  %v1424_v4 = vshll.u32 %v6535_v50, 16  ;;  %v6544_v5 = vmul.f32 %v6409_v12, %v1657_v56 }
  0x80   :  { %vm1406_vm10 = vc.u32 %v1398_v54, %v1402_v55  ;;  %v1408_v6 = vadd.s32 %v1402_v55, %v1398_v54  ;;  %v269_v7 = vshrl.u32 %v6527_v45, 16  ;;  %v292_v8 = vand.u32 65535, %v262_v47 }
  0x81   :  { %12172 = vst [vmem:[#allocation3_spill] sm:$0xff] %v6544_v5  ;;  %v270_v9 = vand.u32 65535, %v266_v48  ;;  %v6547_v10 = vmul.u32 %v271_v61, %v268_v60  ;;  %v6549_v11 = vmul.u32 %v293_v62, %v268_v60  ;;  %v1401_v13 = vmul.u32 %v1397_v21, %v1395_v31 }
  0x82   :  { %v1426_v15 = vshll.u32 %v6539_v63, 16  ;;  %v1407_v16 = vsel %vm1406_vm10, 1, %v12022_v3  ;;  %vm1428_vm11 = vc.u32 %v1420_v2, %v1424_v4  ;;  %v6553_v17 = vadd.s32 %v1424_v4, %v1420_v2 }
  0x83   :  { %v1668_v18 = vand.u32 2139095040, %v6544_v5  ;;  %v1361_v19 = vshrl.u32 %v12024_v38, %v6420_v26  ;;  %vm1410_vm12 = vc.u32 %v1408_v6, %v1404_v0  ;;  %v294_v27 = vmul.u32 %v292_v8, %v268_v60 }
  0x84   :  { %v6558_v28 = vmul.u32 %v292_v8, %v269_v7  ;;  %v272_v29 = vmul.u32 %v270_v9, %v268_v60  ;;  %v276_v33 = vshll.u32 %v6547_v10, 16  ;;  %v298_v21 = vshll.u32 %v6549_v11, 16 }
  0x85   :  { %v1669_v36 = vshrl.u32 %v1668_v18, 23  ;;  %v1409_v39 = vadd.s32 %v1407_v16, %v1401_v13  ;;  %v1423_v41 = vmul.u32 %v1419_v34, %v1395_v31  ;;  %v1429_v43 = vsel %vm1428_vm11, 1, %v12022_v3 }
  0x86   :  { %v1411_v46 = vsel %vm1410_vm12, 1, %v12022_v3  ;;  %vm1432_vm13 = vc.u32 %v6553_v17, %v1426_v15  ;;  %v6567_v26 = vmul.u32 %v270_v9, %v269_v7  ;;  %v1381_v48 = vsel %vm1377_vm3, %v1361_v19, %v6442_v51 }
  0x87   :  { %v5911_v47 = vadd.s32 4294967169, %v1669_v36  ;;  %v1382_v54 = vsel %vm1380_vm2, %v6446_v53, 2102212464  ;;  %v1403_v31 = vshrl.u32 %v6525_v44, 16  ;;  %vm280_vm14 = vc.u32 %v272_v29, %v276_v33 }
  0x88   :  { %v300_v34 = vshll.u32 %v6558_v28, 16  ;;  %v6577_v55 = vadd.s32 %v298_v21, %v294_v27  ;;  %v1413_v60 = vadd.s32 %v1411_v46, %v1409_v39  ;;  %v1431_v0 = vadd.s32 %v1429_v43, %v1423_v41 }
  0x89   :  { %v1675_v56 = vadd.s32 1, %v5911_v47  ;;  %v1433_v2 = vsel %vm1432_vm13, 1, %v12022_v3  ;;  %vm302_vm15 = vc.u32 %v294_v27, %v298_v21  ;;  %v275_v4 = vmul.u32 %v271_v61, %v269_v7 }
  0x8a   :  { %v278_v51 = vshll.u32 %v6567_v26, 16  ;;  %v282_v6 = vadd.s32 %v276_v33, %v272_v29  ;;  %v281_v53 = vsel %vm280_vm14, 1, %v12022_v3  ;;  %v297_v8 = vmul.u32 %v293_v62, %v269_v7 }
  0x8b   :  { %vm1676_vm0 = vcmp.gt.s32.totalorder %v1675_v56, 0  ;;  %v1665_v44 = vand.u32 2147483647, %v6544_v5  ;;  %v1383_v13 = vsel %vm1379_vm4, %v6444_v52, %v1382_v54  ;;  %v303_v16 = vsel %vm302_vm15, 1, %v12022_v3 }
  0x8c   :  { %v1677_v9 = vsel %vm1676_vm0, %v1675_v56, 0  ;;  %vm306_vm1 = vc.u32 %v6577_v55, %v300_v34  ;;  %v1405_v18 = vshrl.u32 %v6533_v49, 16  ;;  %v1425_v19 = vshrl.u32 %v6535_v50, 16 }
  0x8d   :  { %v1679_v61 = vand.u32 31, %v1677_v9  ;;  %v1427_v62 = vshrl.u32 %v6539_v63, 16  ;;  %v1435_v7 = vadd.s32 %v1433_v2, %v1431_v0  ;;  %v1414_v27 = vadd.s32 %v1413_v60, %v1403_v31  ;;  %v697_v63 = vpop.permute.xlu1 %696 }
  0x8e   :  { %v283_v29 = vadd.s32 %v281_v53, %v275_v4  ;;  %vm284_vm2 = vc.u32 %v282_v6, %v278_v51  ;;  %v305_v52 = vadd.s32 %v303_v16, %v297_v8  ;;  %v307_v21 = vsel %vm306_vm1, 1, %v12022_v3 }
  0x8f   :  { %v6593_v33 = vsub.s32 32, %v1679_v61  ;;  %v1672_v36 = vand.u32 8388607, %v1665_v44  ;;  %v6598_v39 = vshrl.u32 %v1677_v9, 5  ;;  %v1682_v49 = vshll.u32 %v12024_v38, %v1679_v61 }
  0x90   :  { %v1685_v41 = vshll.u32 %v12026_v40, %v1679_v61  ;;  %v1688_v46 = vshll.u32 %v12051_v42, %v1679_v61  ;;  %v1691_v54 = vshll.u32 %v12038_v30, %v1679_v61  ;;  %v1436_v56 = vadd.s32 %v1435_v7, %v1425_v19 }
  0x91   :  { %v1683_v50 = vshrl.u32 %v12026_v40, %v6593_v33  ;;  %v1686_v43 = vshrl.u32 %v12051_v42, %v6593_v33  ;;  %v1689_v47 = vshrl.u32 %v12038_v30, %v6593_v33  ;;  %v1692_v31 = vshrl.u32 %v12030_v32, %v6593_v33 }
  0x92   :  { %v285_v60 = vsel %vm284_vm2, 1, %v12022_v3  ;;  %v1694_v0 = vshll.u32 %v12030_v32, %v1679_v61  ;;  %v1695_v2 = vshrl.u32 %v12040_v35, %v6593_v33  ;;  %v1384_v4 = vsel %vm1378_vm5, %v1381_v48, %v1383_v13 }
  0x93   :  { %v6621_v51 = vadd.s32 %v6553_v17, %v1426_v15  ;;  %v299_v6 = vshrl.u32 %v6549_v11, 16  ;;  %v1673_v53 = vor.u32 8388608, %v1672_v36  ;;  %v277_v8 = vshrl.u32 %v6547_v10, 16 }
  0x94   :  { %v309_v9 = vadd.s32 %v307_v21, %v305_v52  ;;  %v6625_v16 = vor.u32 %v1683_v50, %v1682_v49  ;;  %v6627_v61 = vor.u32 %v1686_v43, %v1685_v41  ;;  %v287_v19 = vadd.s32 %v285_v60, %v283_v29 }
  0x95   :  { %v6629_v7 = vor.u32 %v1689_v47, %v1688_v46  ;;  %v1693_v37 = vor.u32 %v1692_v31, %v1691_v54  ;;  %vm1697_vm3 = vcmp.lt.s32.totalorder %v6598_v39, 1  ;;  %v6632_v48 = vadd.s32 %v1414_v27, %v1405_v18 }
  0x96   :  { %v1437_v15 = vadd.s32 %v1436_v56, %v1427_v62  ;;  %v1696_v17 = vor.u32 %v1695_v2, %v1694_v0  ;;  %vm1700_vm4 = vcmp.lt.s32.totalorder %v6598_v39, 4  ;;  %v235_v10 = vshrl.u32 %v12024_v38, %v6457_v59 }
  0x97   :  { %v301_v11 = vshrl.u32 %v6558_v28, 16  ;;  %vm1699_vm5 = vcmp.lt.s32.totalorder %v6598_v39, 3  ;;  %v6639_v13 = vshll.u32 %v1673_v53, 8  ;;  %v310_v29 = vadd.s32 %v309_v9, %v299_v6 }
  0x98   :  { %vm1698_vm10 = vcmp.lt.s32.totalorder %v6598_v39, 2  ;;  %v1705_v18 = vsel %vm1697_vm3, %v6625_v16, %v6627_v61  ;;  %v6647_v62 = vmul.f32 %v6409_v12, %v697_v63  ;;  %v279_v27 = vshrl.u32 %v6567_v26, 16  ;;  %v53_v39 = vpop.permute.xlu0 %52 }
  0x99   :  { %v288_v59 = vadd.s32 %v287_v19, %v277_v8  ;;  %v1706_v52 = vsel %vm1700_vm4, %v1693_v37, 920167782  ;;  %v1709_v21 = vsel %vm1697_vm3, %v6627_v61, %v6629_v7  ;;  %vm1440_vm11 = vc.u32 %v6632_v48, %v6621_v51 }
  0x9a   :  { %12173 = vst [vmem:[#allocation4_spill] sm:$0xff] %v6647_v62  ;;  %v1441_v36 = vadd.s32 1, %v1437_v15  ;;  %v1707_v49 = vsel %vm1699_vm5, %v6629_v7, %v1706_v52  ;;  %v1710_v26 = vsel %vm1700_vm4, %v1696_v17, 1326507024  ;;  %v256_v50 = vsel %vm254_vm6, %v6502_v24, 2102212464 }
  0x9b   :  { %v1708_v41 = vsel %vm1698_vm10, %v1705_v18, %v1707_v49  ;;  %v1711_v43 = vsel %vm1699_vm5, %v1693_v37, %v1710_v26  ;;  %v1714_v46 = vand.u32 65535, %v6639_v13  ;;  %v311_v47 = vadd.s32 %v310_v29, %v301_v11 }
  0x9c   :  { %v1712_v54 = vsel %vm1698_vm10, %v1709_v21, %v1711_v43  ;;  %v1739_v31 = vshrl.u32 %v1708_v41, 16  ;;  %v708_v56 = vand.u32 2139095040, %v6647_v62  ;;  %v255_v60 = vsel %vm251_vm7, %v235_v10, %v6498_v22 }
  0x9d   :  { %v6677_v24 = vadd.s32 %v288_v59, %v279_v27  ;;  %v6682_v0 = vadd.s32 %v6577_v55, %v300_v34  ;;  %v1717_v2 = vshrl.u32 %v1712_v54, 16  ;;  %v257_v6 = vsel %vm253_vm8, %v6500_v23, %v256_v50 }
  0x9e   :  { %v1715_v53 = vshrl.u32 %v6639_v13, 16  ;;  %v1716_v8 = vand.u32 65535, %v1712_v54  ;;  %v1738_v9 = vand.u32 65535, %v1708_v41  ;;  %v1442_v22 = vsel %vm1440_vm11, %v1441_v36, %v1437_v15 }
  0x9f   :  { %v6688_v19 = vmul.u32 %v1717_v2, %v1714_v46  ;;  %v315_v37 = vadd.s32 1, %v311_v47  ;;  %v6693_v28 = vmul.u32 %v1739_v31, %v1714_v46  ;;  %v709_v34 = vshrl.u32 %v708_v56, 23 }
  0xa0   :  { %v1438_v55 = vmul.u32 %v6454_v57, %v1384_v4  ;;  %v258_v63 = vsel %vm252_vm9, %v255_v60, %v257_v6  ;;  %vm314_vm6 = vc.u32 %v6677_v24, %v6682_v0  ;;  %v1718_v23 = vmul.u32 %v1716_v8, %v1714_v46 }
  0xa1   :  { %v6700_v17 = vmul.u32 %v1716_v8, %v1715_v53  ;;  %v1722_v10 = vshll.u32 %v6688_v19, 16  ;;  %v6703_v11 = vmul.u32 %v1738_v9, %v1715_v53  ;;  %v1740_v29 = vmul.u32 %v1738_v9, %v1714_v46 }
  0xa2   :  { %v1443_v15 = vadd.s32 %v1442_v22, %v1438_v55  ;;  %v316_v18 = vsel %vm314_vm6, %v315_v37, %v311_v47  ;;  %v1744_v27 = vshll.u32 %v6693_v28, 16  ;;  %v5893_v59 = vadd.s32 4294967169, %v709_v34 }
  0xa3   :  { %v312_v57 = vmul.u32 %v6527_v45, %v258_v63  ;;  %v1724_v1 = vshll.u32 %v6700_v17, 16  ;;  %vm1726_vm7 = vc.u32 %v1718_v23, %v1722_v10  ;;  %v1728_v4 = vadd.s32 %v1722_v10, %v1718_v23 }
  0xa4   :  { %v1746_v52 = vshll.u32 %v6703_v11, 16  ;;  %v1444_v21 = vadd.s32 536870912, %v1443_v15  ;;  %vm1748_vm8 = vc.u32 %v1740_v29, %v1744_v27  ;;  %v1750_v49 = vadd.s32 %v1744_v27, %v1740_v29 }
  0xa5   :  { %v317_v36 = vadd.s32 %v316_v18, %v312_v57  ;;  %v1721_v26 = vmul.u32 %v1717_v2, %v1715_v53  ;;  %v1743_v50 = vmul.u32 %v1739_v31, %v1715_v53  ;;  %v715_v41 = vadd.s32 1, %v5893_v59 }
  0xa6   :  { %v1727_v43 = vsel %vm1726_vm7, 1, %v12022_v3  ;;  %v1749_v46 = vsel %vm1748_vm8, 1, %v12022_v3  ;;  %vm1730_vm9 = vc.u32 %v1728_v4, %v1724_v1  ;;  %vm1752_vm12 = vc.u32 %v1750_v49, %v1746_v52 }
  0xa7   :  { %vm716_vm13 = vcmp.gt.s32.totalorder %v715_v41, 0  ;;  %v6713_v45 = vshrl.u32 %v1444_v21, 30  ;;  %v318_v47 = vadd.s32 536870912, %v317_v36  ;;  %v12019_v54 = vand.u32 2147483647, %v6647_v62 }
  0xa8   :  { %v717_v56 = vsel %vm716_vm13, %v715_v41, 0  ;;  %v1729_v60 = vadd.s32 %v1727_v43, %v1721_v26  ;;  %v1751_v6 = vadd.s32 %v1749_v46, %v1743_v50  ;;  %v1731_v31 = vsel %vm1730_vm9, 1, %v12022_v3 }
  0xa9   :  { %v719_v2 = vand.u32 31, %v717_v56  ;;  %v1753_v53 = vsel %vm1752_vm12, 1, %v12022_v3  ;;  %v1446_v9 = vshll.u32 %v6713_v45, 30  ;;  %v6721_v22 = vshrl.u32 %v318_v47, 30 }
  0xaa   :  { %v1723_v37 = vshrl.u32 %v6688_v19, 16  ;;  %v712_v34 = vand.u32 8388607, %v12019_v54  ;;  %v1733_v55 = vadd.s32 %v1731_v31, %v1729_v60  ;;  %v1745_v63 = vshrl.u32 %v6693_v28, 16 }
  0xab   :  { %v6718_v8 = vsub.s32 32, %v719_v2  ;;  %v1755_v23 = vadd.s32 %v1753_v53, %v1751_v6  ;;  %v731_v27 = vshll.u32 %v12038_v30, %v719_v2  ;;  %v6736_v59 = vshrl.u32 %v717_v56, 5 }
  0xac   :  { %v722_v57 = vshll.u32 %v12024_v38, %v719_v2  ;;  %v725_v28 = vshll.u32 %v12026_v40, %v719_v2  ;;  %v320_v4 = vshll.u32 %v6721_v22, 30  ;;  %v728_v21 = vshll.u32 %v12051_v42, %v719_v2 }
  0xad   :  { %v723_v10 = vshrl.u32 %v12026_v40, %v6718_v8  ;;  %v726_v29 = vshrl.u32 %v12051_v42, %v6718_v8  ;;  %v729_v18 = vshrl.u32 %v12038_v30, %v6718_v8  ;;  %v732_v19 = vshrl.u32 %v12030_v32, %v6718_v8 }
  0xae   :  { %v735_v1 = vshrl.u32 %v12040_v35, %v6718_v8  ;;  %v734_v50 = vshll.u32 %v12030_v32, %v719_v2  ;;  %v1747_v41 = vshrl.u32 %v6703_v11, 16  ;;  %v1756_v43 = vadd.s32 %v1755_v23, %v1745_v63 }
  0xaf   :  { %v733_v26 = vor.u32 %v732_v19, %v731_v27  ;;  %v6746_v46 = vor.u32 %v723_v10, %v722_v57  ;;  %v6748_v47 = vor.u32 %v726_v29, %v725_v28  ;;  %v1725_v56 = vshrl.u32 %v6700_v17, 16 }
  0xb0   :  { %v1734_v60 = vadd.s32 %v1733_v55, %v1723_v37  ;;  %v6751_v6 = vor.u32 %v729_v18, %v728_v21  ;;  %v736_v31 = vor.u32 %v735_v1, %v734_v50  ;;  %v6753_v53 = vsub.s32 %v1443_v15, %v1446_v9 }
  0xb1   :  { %v713_v54 = vor.u32 8388608, %v712_v34  ;;  %vm740_vm14 = vcmp.lt.s32.totalorder %v6736_v59, 4  ;;  %v6756_v27 = vsub.s32 %v317_v36, %v320_v4  ;;  %v1681_v2 = vshrl.u32 %v12024_v38, %v6593_v33 }
  0xb2   :  { %vm737_vm15 = vcmp.lt.s32.totalorder %v6736_v59, 1  ;;  %v746_v63 = vsel %vm740_vm14, %v733_v26, 920167782  ;;  %v1702_v17 = vsel %vm1700_vm4, %v6629_v7, 2102212464  ;;  %v1757_v37 = vadd.s32 %v1756_v43, %v1747_v41 }
  0xb3   :  { %vm739_vm0 = vcmp.lt.s32.totalorder %v6736_v59, 3  ;;  %v745_v15 = vsel %vm737_vm15, %v6746_v46, %v6748_v47  ;;  %v6771_v36 = vadd.s32 %v1734_v60, %v1725_v56  ;;  %v6775_v33 = vadd.s32 %v1750_v49, %v1746_v52 }
  0xb4   :  { %v747_v9 = vsel %vm739_vm0, %v6751_v6, %v746_v63  ;;  %v750_v7 = vsel %vm740_vm14, %v736_v31, 1326507024  ;;  %vm738_vm1 = vcmp.lt.s32.totalorder %v6736_v59, 2  ;;  %v749_v34 = vsel %vm737_vm15, %v6748_v47, %v6751_v6 }
  0xb5   :  { %v6787_v55 = vshll.u32 %v713_v54, 8  ;;  %v1701_v11 = vsel %vm1697_vm3, %v1681_v2, %v6625_v16  ;;  %v1703_v52 = vsel %vm1699_vm5, %v6627_v61, %v1702_v17  ;;  %v748_v49 = vsel %vm738_vm1, %v745_v15, %v747_v9 }
  0xb6   :  { %v751_v23 = vsel %vm739_vm0, %v733_v26, %v750_v7  ;;  %vm1448_vm2 = vcmp.lt.s32.totalorder %v6753_v53, 0  ;;  %v1449_v10 = vsub.s32 0, %v6753_v53  ;;  %v1761_v54 = vadd.s32 1, %v1757_v37 }
  0xb7   :  { %v323_v29 = vsub.s32 0, %v6756_v27  ;;  %vm1760_vm3 = vc.u32 %v6771_v36, %v6775_v33  ;;  %v752_v16 = vsel %vm738_vm1, %v749_v34, %v751_v23  ;;  %v779_v61 = vshrl.u32 %v748_v49, 16 }
  0xb8   :  { %vm322_vm4 = vcmp.lt.s32.totalorder %v6756_v27, 0  ;;  %v1704_v18 = vsel %vm1698_vm10, %v1701_v11, %v1703_v52  ;;  %v754_v19 = vand.u32 65535, %v6787_v55  ;;  %v778_v57 = vand.u32 65535, %v748_v49 }
  0xb9   :  { %v756_v28 = vand.u32 65535, %v752_v16  ;;  %v757_v1 = vshrl.u32 %v752_v16, 16  ;;  %v1762_v4 = vsel %vm1760_vm3, %v1761_v54, %v1757_v37  ;;  %v755_v21 = vshrl.u32 %v6787_v55, 16 }
  0xba   :  { %v781_v26 = vmul.u32 %v779_v61, %v754_v19  ;;  %v1450_v50 = vsel %vm1448_vm2, %v1449_v10, %v6753_v53  ;;  %v324_v41 = vsel %vm322_vm4, %v323_v29, %v6756_v27  ;;  %v1758_v43 = vmul.u32 %v6639_v13, %v1704_v18 }
  0xbb   :  { %v759_v56 = vmul.u32 %v757_v1, %v754_v19  ;;  %v760_v60 = vmul.u32 %v756_v28, %v755_v21  ;;  %v782_v31 = vmul.u32 %v778_v57, %v755_v21  ;;  %v758_v63 = vmul.u32 %v756_v28, %v754_v19 }
  0xbc   :  { %v1763_v2 = vadd.s32 %v1762_v4, %v1758_v43  ;;  %v784_v15 = vshll.u32 %v781_v26, 16  ;;  %v1451_v37 = vclz %v1450_v50  ;;  %v325_v9 = vclz %v324_v41 }
  0xbd   :  { %v762_v17 = vshll.u32 %v759_v56, 16  ;;  %v780_v7 = vmul.u32 %v778_v57, %v754_v19  ;;  %v6817_v34 = vmul.f32 %v6409_v12, %v53_v39  ;;  %v761_v11 = vmul.u32 %v757_v1, %v755_v21 }
  0xbe   :  { %v764_v52 = vshll.u32 %v760_v60, 16  ;;  %v786_v23 = vshll.u32 %v782_v31, 16  ;;  %v1764_v54 = vadd.s32 536870912, %v1763_v2  ;;  %v783_v16 = vmul.u32 %v779_v61, %v755_v21 }
  0xbf   :  { %12174 = vst [vmem:[#allocation5_spill] sm:$0xff] %v6817_v34  ;;  %vm766_vm5 = vc.u32 %v758_v63, %v762_v17  ;;  %v768_v49 = vadd.s32 %v762_v17, %v758_v63  ;;  %vm788_vm10 = vc.u32 %v780_v7, %v784_v15  ;;  %v790_v10 = vadd.s32 %v784_v15, %v780_v7 }
  0xc0   :  { %v767_v13 = vsel %vm766_vm5, 1, %v12022_v3  ;;  %v5906_v18 = vadd.s32 4294967294, %v1451_v37  ;;  %v789_v28 = vsel %vm788_vm10, 1, %v12022_v3  ;;  %v5885_v19 = vadd.s32 4294967294, %v325_v9 }
  0xc1   :  { %v769_v29 = vadd.s32 %v767_v13, %v761_v11  ;;  %vm770_vm11 = vc.u32 %v768_v49, %v764_v52  ;;  %vm792_vm6 = vc.u32 %v790_v10, %v786_v23  ;;  %v721_v57 = vshrl.u32 %v12024_v38, %v6718_v8 }
  0xc2   :  { %v771_v1 = vsel %vm770_vm11, 1, %v12022_v3  ;;  %v791_v4 = vadd.s32 %v789_v28, %v783_v16  ;;  %v763_v50 = vshrl.u32 %v759_v56, 16  ;;  %v793_v43 = vsel %vm792_vm6, 1, %v12022_v3 }
  0xc3   :  { %v773_v41 = vadd.s32 %v771_v1, %v769_v29  ;;  %v68_v39 = vand.u32 2139095040, %v6817_v34  ;;  %v6826_v63 = vshrl.u32 %v1764_v54, 30  ;;  %v742_v61 = vsel %vm740_vm14, %v6751_v6, 2102212464 }
  0xc4   :  { %v785_v21 = vshrl.u32 %v781_v26, 16  ;;  %v795_v17 = vadd.s32 %v793_v43, %v791_v4  ;;  %vm5907_vm7 = vcmp.lt.s32.totalorder %v5906_v18, 0  ;;  %v765_v15 = vshrl.u32 %v760_v60, 16 }
  0xc5   :  { %v774_v8 = vadd.s32 %v773_v41, %v763_v50  ;;  %v69_v37 = vshrl.u32 %v68_v39, 23  ;;  %vm5886_vm8 = vcmp.lt.s32.totalorder %v5885_v19, 0  ;;  %v741_v56 = vsel %vm737_vm15, %v721_v57, %v6746_v46 }
  0xc6   :  { %v787_v9 = vshrl.u32 %v782_v31, 16  ;;  %v796_v7 = vadd.s32 %v795_v17, %v785_v21  ;;  %v743_v11 = vsel %vm739_vm0, %v6748_v47, %v742_v61  ;;  %v6839_v6 = vadd.s32 %v790_v10, %v786_v23 }
  0xc7   :  { %v6837_v52 = vadd.s32 %v774_v8, %v765_v15  ;;  %v5881_v26 = vadd.s32 4294967169, %v69_v37  ;;  %v1454_v49 = vsel %vm5907_vm7, 0, %v5906_v18  ;;  %v1766_v60 = vshll.u32 %v6826_v63, 30 }
  0xc8   :  { %v797_v13 = vadd.s32 %v796_v7, %v787_v9  ;;  %v328_v54 = vsel %vm5886_vm8, 0, %v5885_v19  ;;  %v744_v31 = vsel %vm738_vm1, %v741_v56, %v743_v11  ;;  %v12021_v47 = vand.u32 2147483647, %v6817_v34 }
  0xc9   :  { %vm800_vm9 = vc.u32 %v6837_v52, %v6839_v6  ;;  %v75_v46 = vadd.s32 1, %v5881_v26  ;;  %v1455_v16 = vsub.s32 32, %v1454_v49  ;;  %v1459_v28 = vsub.s32 4294967266, %v1454_v49 }
  0xca   :  { %v801_v29 = vadd.s32 1, %v797_v13  ;;  %v333_v23 = vsub.s32 4294967266, %v328_v54  ;;  %v6847_v10 = vsub.s32 %v1763_v2, %v1766_v60  ;;  %v1439_v19 = vadd.s32 %v6621_v51, %v6632_v48 }
  0xcb   :  { %vm76_vm12 = vcmp.gt.s32.totalorder %v75_v46, 0  ;;  %v798_v1 = vmul.u32 %v6787_v55, %v744_v31  ;;  %v1456_v59 = vshll.u32 %v6753_v53, %v1454_v49  ;;  %v313_v50 = vadd.s32 %v6682_v0, %v6677_v24 }
  0xcc   :  { %v802_v18 = vsel %vm800_vm9, %v801_v29, %v797_v13  ;;  %v77_v57 = vsel %vm76_vm12, %v75_v46, 0  ;;  %v72_v41 = vand.u32 8388607, %v12021_v47  ;;  %v1457_v43 = vshrl.u32 %v1439_v19, %v1455_v16 }
  0xcd   :  { %v79_v4 = vand.u32 31, %v77_v57  ;;  %v1460_v39 = vadd.s32 127, %v1459_v28  ;;  %v803_v2 = vadd.s32 %v802_v18, %v798_v1  ;;  %v329_v21 = vsub.s32 32, %v328_v54 }
  0xce   :  { %v334_v17 = vadd.s32 127, %v333_v23  ;;  %vm1768_vm13 = vcmp.lt.s32.totalorder %v6847_v10, 0  ;;  %v1769_v51 = vsub.s32 0, %v6847_v10  ;;  %v73_v55 = vor.u32 8388608, %v72_v41 }
  0xcf   :  { %v6857_v61 = vsub.s32 32, %v79_v4  ;;  %v82_v48 = vshll.u32 %v12024_v38, %v79_v4  ;;  %v85_v24 = vshll.u32 %v12026_v40, %v79_v4  ;;  %v6867_v15 = vshrl.u32 %v77_v57, 5 }
  0xd0   :  { %v91_v8 = vshll.u32 %v12038_v30, %v79_v4  ;;  %v804_v56 = vadd.s32 536870912, %v803_v2  ;;  %v88_v9 = vshll.u32 %v12051_v42, %v79_v4  ;;  %v94_v11 = vshll.u32 %v12030_v32, %v79_v4 }
  0xd1   :  { %v83_v53 = vshrl.u32 %v12026_v40, %v6857_v61  ;;  %v86_v0 = vshrl.u32 %v12051_v42, %v6857_v61  ;;  %v92_v37 = vshrl.u32 %v12030_v32, %v6857_v61  ;;  %v89_v7 = vshrl.u32 %v12038_v30, %v6857_v61 }
  0xd2   :  { %v1461_v26 = vshll.u32 %v1460_v39, 23  ;;  %v335_v49 = vshll.u32 %v334_v17, 23  ;;  %v95_v60 = vshrl.u32 %v12040_v35, %v6857_v61  ;;  %v1458_v13 = vor.u32 %v1457_v43, %v1456_v59 }
  0xd3   :  { %v331_v46 = vshrl.u32 %v313_v50, %v329_v21  ;;  %v6878_v31 = vor.u32 %v83_v53, %v82_v48  ;;  %v6880_v29 = vor.u32 %v86_v0, %v85_v24  ;;  %v1770_v16 = vsel %vm1768_vm13, %v1769_v51, %v6847_v10  ;;  %v1021_v53 = vpop.permute.xlu2 %1020 }
  0xd4   :  { %v93_v28 = vor.u32 %v92_v37, %v91_v8  ;;  %vm97_vm14 = vcmp.lt.s32.totalorder %v6867_v15, 1  ;;  %v6886_v23 = vshll.u32 %v73_v55, 8  ;;  %v6888_v18 = vshrl.u32 %v804_v56, 30 }
  0xd5   :  { %v6890_v57 = vor.u32 %v89_v7, %v88_v9  ;;  %v96_v19 = vor.u32 %v95_v60, %v94_v11  ;;  %vm100_vm15 = vcmp.lt.s32.totalorder %v6867_v15, 4  ;;  %v1462_v1 = vor.u32 4788187, %v1461_v26 }
  0xd6   :  { %v330_v4 = vshll.u32 %v6756_v27, %v328_v54  ;;  %v336_v59 = vor.u32 4788187, %v335_v49  ;;  %vm99_vm0 = vcmp.lt.s32.totalorder %v6867_v15, 3  ;;  %v1465_v50 = vcvt.s32.f32 %v1458_v13 }
  0xd7   :  { %vm98_vm1 = vcmp.lt.s32.totalorder %v6867_v15, 2  ;;  %v105_v41 = vsel %vm97_vm14, %v6878_v31, %v6880_v29  ;;  %v1771_v39 = vclz %v1770_v16  ;;  %v106_v21 = vsel %vm100_vm15, %v93_v28, 920167782 }
  0xd8   :  { %v332_v43 = vor.u32 %v331_v46, %v330_v4  ;;  %v114_v17 = vand.u32 65535, %v6886_v23  ;;  %v806_v27 = vshll.u32 %v6888_v18, 30  ;;  %v107_v54 = vsel %vm99_vm0, %v6890_v57, %v106_v21 }
  0xd9   :  { %v109_v51 = vsel %vm97_vm14, %v6880_v29, %v6890_v57  ;;  %v110_v48 = vsel %vm100_vm15, %v96_v19, 1326507024  ;;  %v1463_v24 = vand.u32 2147483647, %v1462_v1  ;;  %v337_v0 = vand.u32 2147483647, %v336_v59 }
  0xda   :  { %v108_v55 = vsel %vm98_vm1, %v105_v41, %v107_v54  ;;  %v111_v8 = vsel %vm99_vm0, %v93_v28, %v110_v48  ;;  %v115_v56 = vshrl.u32 %v6886_v23, 16  ;;  %v339_v11 = vcvt.s32.f32 %v332_v43 }
  0xdb   :  { %v112_v37 = vsel %vm98_vm1, %v109_v51, %v111_v8  ;;  %v138_v9 = vand.u32 65535, %v108_v55  ;;  %v139_v7 = vshrl.u32 %v108_v55, 16  ;;  %v6921_v60 = vmul.f32 %v6409_v12, %v1021_v53 }
  0xdc   :  { %v116_v26 = vand.u32 65535, %v112_v37  ;;  %v117_v49 = vshrl.u32 %v112_v37, 16  ;;  %v5912_v13 = vadd.s32 4294967294, %v1771_v39  ;;  %v6923_v46 = vsub.s32 %v803_v2, %v806_v27 }
  0xdd   :  { %12175 = vst [vmem:[#allocation6_spill] sm:$0xff] %v6921_v60  ;;  %v141_v16 = vmul.u32 %v139_v7, %v114_v17  ;;  %v1466_v19 = vmul.f32 %v1465_v50, %v1463_v24  ;;  %v340_v1 = vmul.f32 %v339_v11, %v337_v0  ;;  %v140_v28 = vmul.u32 %v138_v9, %v114_v17 }
  0xde   :  { %v118_v4 = vmul.u32 %v116_v26, %v114_v17  ;;  %v119_v59 = vmul.u32 %v117_v49, %v114_v17  ;;  %v6925_v41 = vmul.u32 %v116_v26, %v115_v56  ;;  %v6927_v21 = vmul.u32 %v138_v9, %v115_v56 }
  0xdf   :  { %v144_v54 = vshll.u32 %v141_v16, 16  ;;  %v1182_v43 = vand.u32 2139095040, %v6921_v60  ;;  %vm5913_vm2 = vcmp.lt.s32.totalorder %v5912_v13, 0  ;;  %v809_v12 = vsub.s32 0, %v6923_v46 }
  0xe0   :  { %v122_v51 = vshll.u32 %v119_v59, 16  ;;  %v1467_v39 = vxor.u32 2147483648, %v1466_v19  ;;  %v341_v2 = vxor.u32 2147483648, %v340_v1  ;;  %vm808_vm3 = vcmp.lt.s32.totalorder %v6923_v46, 0 }
  0xe1   :  { %v124_v50 = vshll.u32 %v6925_v41, 16  ;;  %v146_v17 = vshll.u32 %v6927_v21, 16  ;;  %vm148_vm5 = vc.u32 %v140_v28, %v144_v54  ;;  %v1774_v48 = vsel %vm5913_vm2, 0, %v5912_v13 }
  0xe2   :  { %vm126_vm4 = vc.u32 %v118_v4, %v122_v51  ;;  %v128_v27 = vadd.s32 %v122_v51, %v118_v4  ;;  %v143_v53 = vmul.u32 %v139_v7, %v115_v56  ;;  %v1183_v24 = vshrl.u32 %v1182_v43, 23 }
  0xe3   :  { %v810_v0 = vsel %vm808_vm3, %v809_v12, %v6923_v46  ;;  %v121_v55 = vmul.u32 %v117_v49, %v115_v56  ;;  %v149_v8 = vsel %vm148_vm5, 1, %v12022_v3  ;;  %v150_v37 = vadd.s32 %v144_v54, %v140_v28 }
  0xe4   :  { %vm1347_vm10 = vcmp.lt.s32.totalorder %v6412_v14, 0  ;;  %vm221_vm11 = vcmp.lt.s32.totalorder %v6416_v20, 0  ;;  %v127_v9 = vsel %vm126_vm4, 1, %v12022_v3  ;;  %vm130_vm6 = vc.u32 %v128_v27, %v124_v50 }
  0xe5   :  { %v1468_v11 = vsel %vm1347_vm10, %v1467_v39, %v1466_v19  ;;  %v342_v26 = vsel %vm221_vm11, %v341_v2, %v340_v1  ;;  %vm152_vm7 = vc.u32 %v150_v37, %v146_v17  ;;  %v1779_v56 = vsub.s32 4294967266, %v1774_v48 }
  0xe6   :  { %v811_v7 = vclz %v810_v0  ;;  %v151_v49 = vadd.s32 %v149_v8, %v143_v53  ;;  %v5902_v13 = vadd.s32 4294967169, %v1183_v24  ;;  %vm6947_vm8 = vcmp.le.f32.partialorder %v1345_v25, 0.7853982 }
  0xe7   :  { %v129_v4 = vadd.s32 %v127_v9, %v121_v55  ;;  %v153_v19 = vsel %vm152_vm7, 1, %v12022_v3  ;;  %v6955_v1 = vsel %vm6947_vm8, %v6412_v14, %v1468_v11  ;;  %vm6959_vm9 = vcmp.le.f32.partialorder %v219_v58, 0.7853982 }
  0xe8   :  { %v131_v43 = vsel %vm130_vm6, 1, %v12022_v3  ;;  %v6967_v25 = vsel %vm6959_vm9, %v6416_v20, %v342_v26  ;;  %v1780_v12 = vadd.s32 127, %v1779_v56  ;;  %v5894_v51 = vadd.s32 4294967294, %v811_v7 }
  0xe9   :  { %v155_v39 = vadd.s32 %v153_v19, %v151_v49  ;;  %v1189_v2 = vadd.s32 1, %v5902_v13  ;;  %v6971_v50 = vmul.f32 %v6955_v1, %v6955_v1  ;;  %v133_v27 = vadd.s32 %v131_v43, %v129_v4 }
  0xea   :  { %v6975_v58 = vmul.f32 %v6967_v25, %v6967_v25  ;;  %v1775_v53 = vsub.s32 32, %v1774_v48  ;;  %v145_v24 = vshrl.u32 %v141_v16, 16  ;;  %v1759_v0 = vadd.s32 %v6775_v33, %v6771_v36 }
  0xeb   :  { %12180 = vst [vmem:[#allocation7_spill] sm:$0xff] %v6971_v50  ;;  %v123_v55 = vshrl.u32 %v119_v59, 16  ;;  %v1781_v8 = vshll.u32 %v1780_v12, 23  ;;  %vm5895_vm12 = vcmp.lt.s32.totalorder %v5894_v51, 0  ;;  %vm1190_vm13 = vcmp.gt.s32.totalorder %v1189_v2, 0 }
  0xec   :  { %v156_v9 = vadd.s32 %v155_v39, %v145_v24  ;;  %v1481_v11 = vmul.f32 -0.00019511016, %v6971_v50  ;;  %v355_v56 = vmul.f32 -0.00019511016, %v6975_v58  ;;  %v1777_v7 = vshrl.u32 %v1759_v0, %v1775_v53 }
  0xed   :  { %v134_v26 = vadd.s32 %v133_v27, %v123_v55  ;;  %v147_v49 = vshrl.u32 %v6927_v21, 16  ;;  %v6982_v13 = vsel %vm5895_vm12, 0, %v5894_v51  ;;  %v81_v16 = vshrl.u32 %v12024_v38, %v6857_v61 }
  0xee   :  { %v125_v36 = vshrl.u32 %v6925_v41, 16  ;;  %v1191_v33 = vsel %vm1190_vm13, %v1189_v2, 0  ;;  %v1776_v59 = vshll.u32 %v6847_v10, %v1774_v48  ;;  %v1782_v4 = vor.u32 4788187, %v1781_v8 }
  0xef   :  { %v102_v19 = vsel %vm100_vm15, %v6890_v57, 2102212464  ;;  %v157_v43 = vadd.s32 %v156_v9, %v147_v49  ;;  %v1469_v12 = vsub.s32 4, %v6713_v45  ;;  %v1482_v39 = vadd.f32 0.008332121, %v1481_v11 }
  0xf0   :  { %v6992_v27 = vadd.s32 %v134_v26, %v125_v36  ;;  %v348_v51 = vmul.f32 -0.001358992, %v6975_v58  ;;  %v1778_v53 = vor.u32 %v1777_v7, %v1776_v59  ;;  %v819_v61 = vsub.s32 4294967266, %v6982_v13 }
  0xf1   :  { %v6996_v41 = vand.u32 31, %v1191_v33  ;;  %v356_v2 = vadd.f32 0.008332121, %v355_v56  ;;  %v101_v10 = vsel %vm97_vm14, %v81_v16, %v6878_v31  ;;  %v103_v57 = vsel %vm99_vm0, %v6880_v29, %v102_v19 }
  0xf2   :  { %v7006_v48 = vadd.s32 %v150_v37, %v146_v17  ;;  %v1783_v24 = vand.u32 2147483647, %v1782_v4  ;;  %v161_v0 = vadd.s32 1, %v157_v43  ;;  %v7011_v55 = vsel %vm1347_vm10, %v1469_v12, %v6713_v45 }
  0xf3   :  { %v1785_v8 = vcvt.s32.f32 %v1778_v53  ;;  %v820_v31 = vadd.s32 127, %v819_v61  ;;  %v104_v9 = vsel %vm98_vm1, %v101_v10, %v103_v57  ;;  %v7018_v29 = vsub.s32 32, %v6996_v41 }
  0xf4   :  { %vm160_vm15 = vc.u32 %v6992_v27, %v7006_v48  ;;  %v1483_v21 = vmul.f32 %v1482_v39, %v6971_v50  ;;  %v349_v17 = vadd.f32 0.041655596, %v348_v51  ;;  %v357_v37 = vmul.f32 %v356_v2, %v6975_v58 }
  0xf5   :  { %v1786_v11 = vmul.f32 %v1785_v8, %v1783_v24  ;;  %v815_v45 = vsub.s32 32, %v6982_v13  ;;  %v162_v26 = vsel %vm160_vm15, %v161_v0, %v157_v43  ;;  %v12020_v56 = vand.u32 2147483647, %v6921_v60 }
  0xf6   :  { %v1472_v7 = vsel %vm6947_vm8, 0, %v7011_v55  ;;  %v343_v15 = vsub.s32 4, %v6721_v22  ;;  %vm1667_vm14 = vcmp.lt.s32.totalorder %v6544_v5, 0  ;;  %v158_v49 = vmul.u32 %v6886_v23, %v104_v9 }
  0xf7   :  { %v799_v16 = vadd.s32 %v6839_v6, %v6837_v52  ;;  %v821_v36 = vshll.u32 %v820_v31, 23  ;;  %v1208_v59 = vshll.u32 %v12030_v32, %v6996_v41  ;;  %v1209_v4 = vshrl.u32 %v12040_v35, %v7018_v29 }
  0xf8   :  { %v1484_v19 = vadd.f32 -0.16666654, %v1483_v21  ;;  %v350_v28 = vmul.f32 %v349_v17, %v6975_v58  ;;  %v7037_v43 = vadd.s32 %v162_v26, %v158_v49  ;;  %v7039_v12 = vshrl.u32 %v1191_v33, 5 }
  0xf9   :  { %v358_v39 = vadd.f32 -0.16666654, %v357_v37  ;;  %v1787_v51 = vxor.u32 2147483648, %v1786_v11  ;;  %v817_v23 = vshrl.u32 %v799_v16, %v815_v45  ;;  %v1186_v52 = vand.u32 8388607, %v12020_v56  ;;  %v1017_v45 = vpop.permute.xlu1 %1016  ;;  %v377_v56 = vpop.permute.xlu0 %376 }
  0xfa   :  { %vm7045_vm0 = vcmp.le.f32.partialorder %v1665_v44, 0.7853982  ;;  %v1199_v53 = vshll.u32 %v12026_v40, %v6996_v41  ;;  %v1200_v61 = vshrl.u32 %v12051_v42, %v7018_v29  ;;  %v1202_v33 = vshll.u32 %v12051_v42, %v6996_v41 }
  0xfb   :  { %v1203_v2 = vshrl.u32 %v12038_v30, %v7018_v29  ;;  %v344_v10 = vsel %vm221_vm11, %v343_v15, %v6721_v22  ;;  %v816_v44 = vshll.u32 %v6923_v46, %v6982_v13  ;;  %v822_v57 = vor.u32 4788187, %v821_v36 }
  0xfc   :  { %v1210_v24 = vor.u32 %v1209_v4, %v1208_v59  ;;  %v164_v0 = vadd.s32 536870912, %v7037_v43  ;;  %v1205_v55 = vshll.u32 %v12038_v30, %v6996_v41  ;;  %v1206_v8 = vshrl.u32 %v12030_v32, %v7018_v29 }
  0xfd   :  { %vm1214_vm1 = vcmp.lt.s32.totalorder %v7039_v12, 4  ;;  %v1485_v31 = vmul.f32 %v1484_v19, %v6971_v50  ;;  %v351_v9 = vadd.f32 -0.4999988, %v350_v28  ;;  %v359_v22 = vmul.f32 %v358_v39, %v6975_v58  ;;  %v7091_v28 = vld [vmem:[%s12005_s6] ss:$0 sm:$0xff] }
  0xfe   :  { %v818_v21 = vor.u32 %v817_v23, %v816_v44  ;;  %v1788_v46 = vsel %vm1667_vm14, %v1787_v51, %v1786_v11  ;;  %v1187_v13 = vor.u32 8388608, %v1186_v52  ;;  %v7072_v17 = vor.u32 %v1200_v61, %v1199_v53 }
  0xff   :  { %v7074_v37 = vor.u32 %v1203_v2, %v1202_v33  ;;  %v823_v26 = vand.u32 2147483647, %v822_v57  ;;  %vm1211_vm2 = vcmp.lt.s32.totalorder %v7039_v12, 1  ;;  %vm1213_vm3 = vcmp.lt.s32.totalorder %v7039_v12, 3 }
 0x100   :  { %v1224_v15 = vsel %vm1214_vm1, %v1210_v24, 1326507024  ;;  %v7080_v49 = vshrl.u32 %v164_v0, 30  ;;  %v1196_v16 = vshll.u32 %v12024_v38, %v6996_v41  ;;  %v1197_v11 = vshrl.u32 %v12026_v40, %v7018_v29 }
 0x101   :  { %v1207_v36 = vor.u32 %v1206_v8, %v1205_v55  ;;  %v1486_v59 = vadd.f32 1.0, %v1485_v31  ;;  %v346_v4 = vsel %vm6959_vm9, 0, %v344_v10  ;;  %v825_v19 = vcvt.s32.f32 %v818_v21 }
 0x102   :  { %v7094_v39 = vmul.f32 %v7091_v28, %v1017_v45  ;;  %v360_v51 = vadd.f32 1.0, %v359_v22  ;;  %vm1212_vm4 = vcmp.lt.s32.totalorder %v7039_v12, 2  ;;  %v1223_v41 = vsel %vm1211_vm2, %v7072_v17, %v7074_v37 }
 0x103   :  { %v1225_v54 = vsel %vm1213_vm3, %v1207_v36, %v1224_v15  ;;  %v352_v23 = vmul.f32 %v351_v9, %v6975_v58  ;;  %v7107_v52 = vsel %vm7045_vm0, %v6544_v5, %v1788_v46  ;;  %v826_v53 = vmul.f32 %v825_v19, %v823_v26 }
 0x104   :  { %12183 = vst [vmem:[#allocation8_spill] sm:$0xff] %v7094_v39  ;;  %v7109_v61 = vshll.u32 %v1187_v13, 8  ;;  %v7111_v33 = vand.u32 3, %v1472_v7  ;;  %vm707_vm5 = vcmp.lt.s32.totalorder %v6647_v62, 0  ;;  %v166_v2 = vshll.u32 %v7080_v49, 30 }
 0x105   :  { %v7115_v10 = vor.u32 %v1197_v11, %v1196_v16  ;;  %v363_v44 = vand.u32 3, %v346_v4  ;;  %v1220_v58 = vsel %vm1214_vm1, %v1207_v36, 920167782  ;;  %v1226_v57 = vsel %vm1212_vm4, %v1223_v41, %v1225_v54 }
 0x106   :  { %12184 = vst [vmem:[#allocation9_spill] sm:$0xff] %v7111_v33  ;;  %v1028_v24 = vand.u32 2139095040, %v7094_v39  ;;  %v7123_v0 = vmul.f32 %v1486_v59, %v6955_v1  ;;  %v361_v7 = vmul.f32 %v360_v51, %v6967_v25  ;;  %v1789_v55 = vsub.s32 4, %v6826_v63 }
 0x107   :  { %v7129_v8 = vmul.f32 %v7107_v52, %v7107_v52  ;;  %v353_v31 = vadd.f32 1.0, %v352_v23  ;;  %v827_v9 = vxor.u32 2147483648, %v826_v53  ;;  %v1228_v22 = vand.u32 65535, %v7109_v61 }
 0x108   :  { %12185 = vst [vmem:[#allocation10_spill] sm:$0xff] %v7123_v0  ;;  %v1029_v21 = vshrl.u32 %v1028_v24, 23  ;;  %v7133_v46 = vsub.s32 %v7037_v43, %v166_v2  ;;  %v1219_v1 = vsel %vm1211_vm2, %v7115_v10, %v7072_v17  ;;  %v1221_v25 = vsel %vm1213_vm3, %v7074_v37, %v1220_v58 }
 0x109   :  { %12186 = vst [vmem:[#allocation11_spill] sm:$0xff] %v7129_v8  ;;  %v1231_v13 = vshrl.u32 %v1226_v57, 16  ;;  %vm364_vm10 = vcmp.lt.s32.totalorder %v363_v44, 2  ;;  %vm365_vm11 = vcmp.eq.s32.totalorder %v363_v44, 0  ;;  %v12187_v45 = vand.u32 2147483647, %v6647_v62 }
 0x10a   :  { %v5899_v43 = vadd.s32 4294967169, %v1029_v21  ;;  %v366_v15 = vxor.u32 2147483648, %v361_v7  ;;  %vm368_vm7 = vcmp.eq.s32.totalorder %v363_v44, 2  ;;  %v1790_v16 = vsel %vm1667_vm14, %v1789_v55, %v6826_v63 }
 0x10b   :  { %vm7144_vm6 = vcmp.le.f32.partialorder %v12187_v45, 0.7853982  ;;  %v1801_v11 = vmul.f32 -0.00019511016, %v7129_v8  ;;  %v369_v59 = vxor.u32 2147483648, %v353_v31  ;;  %v1222_v4 = vsel %vm1212_vm4, %v1219_v1, %v1221_v25 }
 0x10c   :  { %v1035_v19 = vadd.s32 1, %v5899_v43  ;;  %v828_v51 = vsel %vm707_vm5, %v827_v9, %v826_v53  ;;  %v169_v41 = vsub.s32 0, %v7133_v46  ;;  %v1230_v54 = vand.u32 65535, %v1226_v57 }
 0x10d   :  { %v7158_v23 = vmul.u32 %v1231_v13, %v1228_v22  ;;  %v1792_v63 = vsel %vm7045_vm0, 0, %v1790_v16  ;;  %v829_v2 = vsub.s32 4, %v6888_v18  ;;  %vm168_vm8 = vcmp.lt.s32.totalorder %v7133_v46, 0 }
 0x10e   :  { %vm1036_vm9 = vcmp.gt.s32.totalorder %v1035_v19, 0  ;;  %v367_v58 = vsel %vm365_vm11, %v353_v31, %v366_v15  ;;  %v1802_v24 = vadd.f32 0.008332121, %v1801_v11  ;;  %v1253_v55 = vshrl.u32 %v1222_v4, 16 }
 0x10f   :  { %v1037_v21 = vsel %vm1036_vm9, %v1035_v19, 0  ;;  %v370_v53 = vsel %vm368_vm7, %v369_v59, %v361_v7  ;;  %v7169_v57 = vsel %vm7144_vm6, %v6647_v62, %v828_v51  ;;  %v1229_v6 = vshrl.u32 %v7109_v61, 16 }
 0x110   :  { %v1039_v9 = vand.u32 31, %v1037_v21  ;;  %v7173_v1 = vsel %vm168_vm8, %v169_v41, %v7133_v46  ;;  %v1232_v25 = vmul.u32 %v1230_v54, %v1228_v22  ;;  %v1236_v45 = vshll.u32 %v7158_v23, 16 }
 0x111   :  { %v1252_v31 = vand.u32 65535, %v1222_v4  ;;  %v7177_v43 = vsel %vm364_vm10, %v367_v58, %v370_v53  ;;  %v7179_v15 = vand.u32 3, %v1792_v63  ;;  %v7184_v7 = vsel %vm707_vm5, %v829_v2, %v6888_v18 }
 0x112   :  { %v7186_v16 = vsub.s32 32, %v1039_v9  ;;  %v7189_v11 = vmul.f32 %v1802_v24, %v7129_v8  ;;  %v7193_v59 = vmul.f32 %v7169_v57, %v7169_v57  ;;  %v7195_v4 = vmul.u32 %v1253_v55, %v1228_v22 }
 0x113   :  { %12190 = vst [vmem:[#allocation12_spill] sm:$0xff] %v7179_v15  ;;  %v12037_v44 = vand.u32 2147483647, %v7094_v39  ;;  %v171_v19 = vclz %v7173_v1  ;;  %v7199_v51 = vmul.u32 %v1230_v54, %v1229_v6  ;;  %v1235_v63 = vmul.u32 %v1231_v13, %v1229_v6 }
 0x114   :  { %v1043_v18 = vshrl.u32 %v12026_v40, %v7186_v16  ;;  %v1046_v41 = vshrl.u32 %v12051_v42, %v7186_v16  ;;  %vm7205_vm12 = vc.u32 %v1232_v25, %v1236_v45  ;;  %v1254_v58 = vmul.u32 %v1252_v31, %v1228_v22 }
 0x115   :  { %v7209_v24 = vmul.u32 %v1252_v31, %v1229_v6  ;;  %v1042_v53 = vshll.u32 %v12024_v38, %v1039_v9  ;;  %v1045_v1 = vshll.u32 %v12026_v40, %v1039_v9  ;;  %v1049_v54 = vshrl.u32 %v12038_v30, %v7186_v16 }
 0x116   :  { %v1052_v36 = vshrl.u32 %v12030_v32, %v7186_v16  ;;  %v1258_v13 = vshll.u32 %v7195_v4, 16  ;;  %v1032_v47 = vand.u32 8388607, %v12037_v44  ;;  %v7220_v3 = vshrl.u32 %v1037_v21, 5 }
 0x117   :  { %v1051_v22 = vshll.u32 %v12038_v30, %v1039_v9  ;;  %v7223_v31 = vor.u32 %v1043_v18, %v1042_v53  ;;  %v7225_v38 = vor.u32 %v1046_v41, %v1045_v1  ;;  %v1048_v40 = vshll.u32 %v12051_v42, %v1039_v9 }
 0x118   :  { %v1055_v5 = vshrl.u32 %v12040_v35, %v7186_v16  ;;  %v1238_v32 = vshll.u32 %v7199_v51, 16  ;;  %v1242_v15 = vadd.s32 %v1236_v45, %v1232_v25  ;;  %v7232_v14 = vmul.f32 %v7091_v28, %v377_v56 }
 0x119   :  { %v1053_v0 = vor.u32 %v1052_v36, %v1051_v22  ;;  %v12194_v21 = vmov 0   ;;  %v1257_v18 = vmul.u32 %v1253_v55, %v1229_v6  ;;  %v7237_v53 = vor.u32 %v1049_v54, %v1048_v40 }
 0x11a   :  { %12193 = vst [vmem:[#allocation13_spill] sm:$0xff] %v7232_v14  ;;  %v1241_v44 = vsel %vm7205_vm12, 1, %v12194_v21  ;;  %v12195_v41 = vmov 920167782   ;;  %v1260_v30 = vshll.u32 %v7209_v24, 16  ;;  %vm1262_vm13 = vc.u32 %v1254_v58, %v1258_v13 }
 0x11b   :  { %v1054_v1 = vshll.u32 %v12195_v41, %v1039_v9  ;;  %v7241_v35 = vadd.s32 %v1258_v13, %v1254_v58  ;;  %vm1057_vm15 = vcmp.lt.s32.totalorder %v7220_v3, 1  ;;  %v1033_v36 = vor.u32 8388608, %v1032_v47 }
 0x11c   :  { %vm1060_vm14 = vcmp.lt.s32.totalorder %v7220_v3, 4  ;;  %v1065_v56 = vsel %vm1057_vm15, %v7223_v31, %v7225_v38  ;;  %vm1244_vm0 = vc.u32 %v1242_v15, %v1238_v32  ;;  %vm1059_vm5 = vcmp.lt.s32.totalorder %v7220_v3, 3 }
 0x11d   :  { %v1056_v25 = vor.u32 %v1055_v5, %v1054_v1  ;;  %v1066_v40 = vsel %vm1060_vm14, %v1053_v0, 920167782  ;;  %v388_v55 = vand.u32 2139095040, %v7232_v14  ;;  %v832_v47 = vsel %vm7144_vm6, 0, %v7184_v7 }
 0x11e   :  { %v1263_v5 = vsel %vm1262_vm13, 1, %v12194_v21  ;;  %vm1058_vm10 = vcmp.lt.s32.totalorder %v7220_v3, 2  ;;  %v1067_v6 = vsel %vm1059_vm5, %v7237_v53, %v1066_v40  ;;  %v834_v32 = vmul.f32 -0.001358992, %v7193_v59 }
 0x11f   :  { %v1243_v9 = vadd.s32 %v1241_v44, %v1235_v63  ;;  %vm1266_vm11 = vc.u32 %v7241_v35, %v1260_v30  ;;  %v7267_v45 = vsel %vm1058_vm10, %v1065_v56, %v1067_v6  ;;  %v1245_v26 = vsel %vm1244_vm0, 1, %v12194_v21 }
 0x120   :  { %v1069_v15 = vsel %vm1057_vm15, %v7225_v38, %v7237_v53  ;;  %v1070_v7 = vsel %vm1060_vm14, %v1056_v25, 1326507024  ;;  %v7276_v2 = vshll.u32 %v1033_v36, 8  ;;  %v5882_v44 = vadd.s32 4294967294, %v171_v19 }
 0x121   :  { %v1265_v63 = vadd.s32 %v1263_v5, %v1257_v18  ;;  %v1071_v58 = vsel %vm1059_vm5, %v1053_v0, %v1070_v7  ;;  %v389_v54 = vshrl.u32 %v388_v55, 23  ;;  %v841_v13 = vmul.f32 -0.00019511016, %v7193_v59 }
 0x122   :  { %v7281_v22 = vand.u32 3, %v832_v47  ;;  %v1267_v1 = vsel %vm1266_vm11, 1, %v12194_v21  ;;  %v1099_v56 = vshrl.u32 %v7267_v45, 16  ;;  %v12196_v40 = vmov 683565275  }
 0x123   :  { %v1195_v6 = vshrl.u32 %v12196_v40, %v7018_v29  ;;  %v1237_v36 = vshrl.u32 %v7158_v23, 16  ;;  %v1247_v25 = vadd.s32 %v1245_v26, %v1243_v9  ;;  %v7290_v19 = vsel %vm1058_vm10, %v1069_v15, %v1071_v58 }
 0x124   :  { %v835_v0 = vadd.f32 0.041655596, %v834_v32  ;;  %v1216_v18 = vsel %vm1214_vm1, %v7074_v37, 2102212464  ;;  %v1074_v55 = vand.u32 65535, %v7276_v2  ;;  %v1077_v47 = vshrl.u32 %v7290_v19, 16 }
 0x125   :  { %vm5883_vm6 = vcmp.lt.s32.totalorder %v5882_v44, 0  ;;  %v1259_v5 = vshrl.u32 %v7195_v4, 16  ;;  %v1269_v29 = vadd.s32 %v1267_v1, %v1265_v63  ;;  %v5887_v7 = vadd.s32 4294967169, %v389_v54 }
 0x126   :  { %v7299_v23 = vadd.f32 -0.16666654, %v7189_v11  ;;  %v842_v9 = vadd.f32 0.008332121, %v841_v13  ;;  %v7301_v26 = vmul.u32 %v1077_v47, %v1074_v55  ;;  %v7303_v32 = vmul.u32 %v1099_v56, %v1074_v55 }
 0x127   :  { %v159_v37 = vadd.s32 %v7006_v48, %v6992_v27  ;;  %v1215_v15 = vsel %vm1211_vm2, %v1195_v6, %v7115_v10  ;;  %v1239_v58 = vshrl.u32 %v7199_v51, 16  ;;  %v1248_v4 = vadd.s32 %v1247_v25, %v1237_v36 }
 0x128   :  { %v7311_v63 = vsel %vm5883_vm6, 0, %v5882_v44  ;;  %v1217_v11 = vsel %vm1213_vm3, %v7072_v17, %v1216_v18  ;;  %v1076_v54 = vand.u32 65535, %v7290_v19  ;;  %v1098_v13 = vand.u32 65535, %v7267_v45 }
 0x129   :  { %v7319_v1 = vmul.f32 %v835_v0, %v7193_v59  ;;  %v1261_v27 = vshrl.u32 %v7209_v24, 16  ;;  %v1270_v48 = vadd.s32 %v1269_v29, %v1259_v5  ;;  %v395_v10 = vadd.s32 1, %v5887_v7 }
 0x12a   :  { %v7323_v51 = vmul.f32 %v842_v9, %v7193_v59  ;;  %v1075_v44 = vshrl.u32 %v7276_v2, 16  ;;  %v1082_v6 = vshll.u32 %v7301_v26, 16  ;;  %v1104_v17 = vshll.u32 %v7303_v32, 16 }
 0x12b   :  { %v175_v36 = vsub.s32 32, %v7311_v63  ;;  %v1218_v45 = vsel %vm1212_vm4, %v1215_v15, %v1217_v11  ;;  %v7331_v25 = vadd.s32 %v1248_v4, %v1239_v58  ;;  %v7336_v19 = vadd.s32 %v7241_v35, %v1260_v30 }
 0x12c   :  { %v1078_v0 = vmul.u32 %v1076_v54, %v1074_v55  ;;  %v7338_v18 = vmul.u32 %v1076_v54, %v1075_v44  ;;  %v1100_v5 = vmul.u32 %v1098_v13, %v1074_v55  ;;  %v7340_v29 = vmul.u32 %v1098_v13, %v1075_v44 }
 0x12d   :  { %12197 = vst [vmem:[#allocation14_spill] sm:$0xff] %v7331_v25  ;;  %v1271_v9 = vadd.s32 %v1270_v48, %v1261_v27  ;;  %v12042_v12 = vand.u32 2147483647, %v7232_v14  ;;  %vm396_vm1 = vcmp.gt.s32.totalorder %v395_v10, 0  ;;  %v179_v15 = vsub.s32 4294967266, %v7311_v63 }
 0x12e   :  { %12198 = vst [vmem:[#allocation15_spill] sm:$0xff] %v7336_v19  ;;  %v1088_v58 = vadd.s32 %v1082_v6, %v1078_v0  ;;  %v7346_v24 = vadd.s32 %v1104_v17, %v1100_v5  ;;  %v397_v30 = vsel %vm396_vm1, %v395_v10, 0  ;;  %v7348_v35 = vshrl.u32 %v159_v37, %v175_v36 }
 0x12f   :  { %vm1086_vm2 = vc.u32 %v1078_v0, %v1082_v6  ;;  %vm1108_vm3 = vc.u32 %v1100_v5, %v1104_v17  ;;  %v399_v55 = vand.u32 31, %v397_v30  ;;  %v1272_v4 = vmul.u32 %v7109_v61, %v1218_v45 }
 0x130   :  { %vm1274_vm4 = vc.u32 %v7331_v25, %v7336_v19  ;;  %v1084_v11 = vshll.u32 %v7338_v18, 16  ;;  %v12043_v54 = vshll.u32 %v7340_v29, 16  ;;  %v1275_v13 = vadd.s32 1, %v1271_v9 }
 0x131   :  { %v1103_v27 = vmul.u32 %v1099_v56, %v1075_v44  ;;  %v392_v48 = vand.u32 8388607, %v12042_v12  ;;  %v7357_v10 = vsub.s32 32, %v399_v55  ;;  %v1087_v37 = vsel %vm1086_vm2, 1, %v12194_v21 }
 0x132   :  { %vm7360_vm7 = vc.u32 %v1088_v58, %v1084_v11  ;;  %v1109_v61 = vsel %vm1108_vm3, 1, %v12194_v21  ;;  %vm1112_vm8 = vc.u32 %v7346_v24, %v12043_v54  ;;  %v402_v17 = vshll.u32 %v12196_v40, %v399_v55 }
 0x133   :  { %v12201_v56 = vmov 2475754826   ;;  %v406_v0 = vshrl.u32 %v12051_v42, %v7357_v10  ;;  %v1081_v5 = vmul.u32 %v1077_v47, %v1075_v44  ;;  %v7374_v58 = vshrl.u32 %v397_v30, 5 }
 0x134   :  { %v403_v36 = vshrl.u32 %v12201_v56, %v7357_v10  ;;  %v405_v45 = vshll.u32 %v12201_v56, %v399_v55  ;;  %v408_v11 = vshll.u32 %v12051_v42, %v399_v55  ;;  %v12202_v12 = vmov 2102212464  }
 0x135   :  { %v409_v7 = vshrl.u32 %v12202_v12, %v7357_v10  ;;  %v1276_v54 = vsel %vm1274_vm4, %v1275_v13, %v1271_v9  ;;  %v1111_v33 = vadd.s32 %v1109_v61, %v1103_v27  ;;  %v393_v50 = vor.u32 8388608, %v392_v48  ;;  %v1341_v48 = vpop.permute.xlu2 %1340 }
 0x136   :  { %v411_v62 = vshll.u32 %v12202_v12, %v399_v55  ;;  %v1089_v14 = vadd.s32 %v1087_v37, %v1081_v5  ;;  %v1091_v47 = vsel %vm7360_vm7, 1, %v12194_v21  ;;  %v1113_v44 = vsel %vm1112_vm8, 1, %v12194_v21 }
 0x137   :  { %v412_v30 = vshrl.u32 %v12195_v41, %v7357_v10  ;;  %v7389_v42 = vor.u32 %v403_v36, %v402_v17  ;;  %v7391_v39 = vor.u32 %v406_v0, %v405_v45  ;;  %v414_v9 = vshll.u32 %v12195_v41, %v399_v55 }
 0x138   :  { %v12203_v13 = vmov 1326507024   ;;  %v7396_v37 = vadd.s32 %v1276_v54, %v1272_v4  ;;  %v7398_v61 = vor.u32 %v409_v7, %v408_v11  ;;  %vm417_vm9 = vcmp.lt.s32.totalorder %v7374_v58, 1 }
 0x139   :  { %v415_v27 = vshrl.u32 %v12203_v13, %v7357_v10  ;;  %v413_v6 = vor.u32 %v412_v30, %v411_v62  ;;  %v1115_v5 = vadd.s32 %v1113_v44, %v1111_v33  ;;  %vm420_vm12 = vcmp.lt.s32.totalorder %v7374_v58, 4 }
 0x13a   :  { %v7402_v17 = vshll.u32 %v393_v50, 8  ;;  %v1093_v36 = vadd.s32 %v1091_v47, %v1089_v14  ;;  %v1105_v55 = vshrl.u32 %v7303_v32, 16  ;;  %vm419_vm13 = vcmp.lt.s32.totalorder %v7374_v58, 3 }
 0x13b   :  { %v416_v60 = vor.u32 %v415_v27, %v414_v9  ;;  %v7407_v45 = vmul.f32 %v7091_v28, %v1341_v48  ;;  %vm418_vm0 = vcmp.lt.s32.totalorder %v7374_v58, 2  ;;  %v425_v62 = vsel %vm417_vm9, %v7389_v42, %v7391_v39 }
 0x13c   :  { %v426_v33 = vsel %vm420_vm12, %v413_v6, 920167782  ;;  %v7418_v50 = vadd.s32 127, %v179_v15  ;;  %v1278_v32 = vadd.s32 536870912, %v7396_v37  ;;  %v1083_v7 = vshrl.u32 %v7301_v26, 16 }
 0x13d   :  { %12204 = vst [vmem:[#allocation16_spill] sm:$0xff] %v7407_v45  ;;  %v430_v14 = vsel %vm420_vm12, %v416_v60, 1326507024  ;;  %v429_v4 = vsel %vm417_vm9, %v7391_v39, %v7398_v61  ;;  %v1116_v54 = vadd.s32 %v1115_v5, %v1105_v55  ;;  %v427_v0 = vsel %vm419_vm13, %v7398_v61, %v426_v33 }
 0x13e   :  { %v431_v11 = vsel %vm419_vm13, %v413_v6, %v430_v14  ;;  %v434_v60 = vand.u32 65535, %v7402_v17  ;;  %v1094_v15 = vadd.s32 %v1093_v36, %v1083_v7  ;;  %v428_v47 = vsel %vm418_vm0, %v425_v62, %v427_v0 }
 0x13f   :  { %v435_v26 = vshrl.u32 %v7402_v17, 16  ;;  %v1502_v44 = vand.u32 2139095040, %v7407_v45  ;;  %v1107_v30 = vshrl.u32 %v7340_v29, 16  ;;  %v432_v9 = vsel %vm418_vm0, %v429_v4, %v431_v11 }
 0x140   :  { %v458_v27 = vand.u32 65535, %v428_v47  ;;  %v459_v48 = vshrl.u32 %v428_v47, 16  ;;  %v7439_v5 = vshrl.u32 %v1278_v32, 30  ;;  %v1041_v6 = vshrl.u32 %v12196_v40, %v7186_v16 }
 0x141   :  { %v1062_v36 = vsel %vm1060_vm14, %v7237_v53, 2102212464  ;;  %v1085_v55 = vshrl.u32 %v7338_v18, 16  ;;  %v1117_v62 = vadd.s32 %v1116_v54, %v1107_v30  ;;  %v436_v33 = vand.u32 65535, %v432_v9 }
 0x142   :  { %v437_v14 = vshrl.u32 %v432_v9, 16  ;;  %v461_v7 = vmul.u32 %v459_v48, %v434_v60  ;;  %v1061_v4 = vsel %vm1057_vm15, %v1041_v6, %v7223_v31  ;;  %v460_v32 = vmul.u32 %v458_v27, %v434_v60 }
 0x143   :  { %v7450_v0 = vadd.s32 %v1094_v15, %v1085_v55  ;;  %v462_v11 = vmul.u32 %v458_v27, %v435_v26  ;;  %v1063_v16 = vsel %vm1059_vm5, %v7225_v38, %v1062_v36  ;;  %v438_v47 = vmul.u32 %v436_v33, %v434_v60 }
 0x144   :  { %v439_v53 = vmul.u32 %v437_v14, %v434_v60  ;;  %v440_v19 = vmul.u32 %v436_v33, %v435_v26  ;;  %v12205_v18 = vshll.u32 %v7340_v29, 16  ;;  %v463_v30 = vmul.u32 %v459_v48, %v435_v26 }
 0x145   :  { %v464_v9 = vshll.u32 %v461_v7, 16  ;;  %v466_v25 = vshll.u32 %v462_v11, 16  ;;  %v1280_v31 = vshll.u32 %v7439_v5, 30  ;;  %v1121_v15 = vadd.s32 1, %v1117_v62 }
 0x146   :  { %v7458_v54 = vadd.s32 %v7346_v24, %v12205_v18  ;;  %v441_v6 = vmul.u32 %v437_v14, %v435_v26  ;;  %v442_v27 = vshll.u32 %v439_v53, 16  ;;  %v444_v38 = vshll.u32 %v440_v19, 16 }
 0x147   :  { %vm468_vm14 = vc.u32 %v460_v32, %v464_v9  ;;  %v470_v60 = vadd.s32 %v464_v9, %v460_v32  ;;  %v1064_v29 = vsel %vm1058_vm10, %v1061_v4, %v1063_v16  ;;  %v844_v36 = vadd.f32 -0.16666654, %v7323_v51 }
 0x148   :  { %vm1120_vm15 = vc.u32 %v7450_v0, %v7458_v54  ;;  %vm446_vm5 = vc.u32 %v438_v47, %v442_v27  ;;  %v448_v24 = vadd.s32 %v442_v27, %v438_v47  ;;  %v469_v48 = vsel %vm468_vm14, 1, %v12194_v21 }
 0x149   :  { %v447_v55 = vsel %vm446_vm5, 1, %v12194_v21  ;;  %v471_v33 = vadd.s32 %v469_v48, %v463_v30  ;;  %vm472_vm11 = vc.u32 %v470_v60, %v466_v25  ;;  %v12206_v26 = vshll.u32 %v7133_v46, %v7311_v63 }
 0x14a   :  { %v181_v32 = vshll.u32 %v7418_v50, 23  ;;  %v1122_v3 = vsel %vm1120_vm15, %v1121_v15, %v1117_v62  ;;  %v449_v4 = vadd.s32 %v447_v55, %v441_v6  ;;  %v1118_v16 = vmul.u32 %v7276_v2, %v1064_v29 }
 0x14b   :  { %v7472_v14 = vor.u32 %v7348_v35, %v12206_v26  ;;  %vm450_vm10 = vc.u32 %v448_v24, %v444_v38  ;;  %v473_v47 = vsel %vm472_vm11, 1, %v12194_v21  ;;  %v1503_v51 = vshrl.u32 %v1502_v44, 23 }
 0x14c   :  { %v7478_v18 = vsub.s32 %v7396_v37, %v1280_v31  ;;  %v451_v30 = vsel %vm450_vm10, 1, %v12194_v21  ;;  %v465_v9 = vshrl.u32 %v461_v7, 16  ;;  %v475_v46 = vadd.s32 %v473_v47, %v471_v33 }
 0x14d   :  { %v7481_v63 = vadd.s32 %v1122_v3, %v1118_v16  ;;  %v443_v35 = vshrl.u32 %v439_v53, 16  ;;  %v453_v27 = vadd.s32 %v451_v30, %v449_v4  ;;  %v5908_v50 = vadd.s32 4294967169, %v1503_v51 }
 0x14e   :  { %v182_v62 = vor.u32 4788187, %v181_v32  ;;  %v401_v2 = vshrl.u32 %v12196_v40, %v7357_v10  ;;  %v467_v15 = vshrl.u32 %v462_v11, 16  ;;  %v476_v6 = vadd.s32 %v475_v46, %v465_v9 }
 0x14f   :  { %v422_v37 = vsel %vm420_vm12, %v7398_v61, 2102212464  ;;  %v445_v44 = vshrl.u32 %v440_v19, 16  ;;  %v454_v31 = vadd.s32 %v453_v27, %v443_v35  ;;  %v1509_v38 = vadd.s32 1, %v5908_v50 }
 0x150   :  { %vm1282_vm6 = vcmp.lt.s32.totalorder %v7478_v18, 0  ;;  %v1283_v7 = vsub.s32 0, %v7478_v18  ;;  %v477_v53 = vadd.s32 %v476_v6, %v467_v15  ;;  %v12059_v29 = vand.u32 2147483647, %v7407_v45 }
 0x151   :  { %v1124_v24 = vadd.s32 536870912, %v7481_v63  ;;  %v7492_v48 = vadd.s32 %v454_v31, %v445_v44  ;;  %v7494_v10 = vadd.s32 %v470_v60, %v466_v25  ;;  %vm1510_vm1 = vcmp.gt.s32.totalorder %v1509_v38, 0 }
 0x152   :  { %v421_v19 = vsel %vm417_vm9, %v401_v2, %v7389_v42  ;;  %v423_v61 = vsel %vm419_vm13, %v7391_v39, %v422_v37  ;;  %v481_v11 = vadd.s32 1, %v477_v53  ;;  %v1511_v55 = vsel %vm1510_vm1, %v1509_v38, 0 }
 0x153   :  { %v1805_v33 = vmul.f32 %v7299_v23, %v7129_v8  ;;  %v837_v26 = vadd.f32 -0.4999988, %v7319_v1  ;;  %vm480_vm2 = vc.u32 %v7492_v48, %v7494_v10  ;;  %v1513_v25 = vand.u32 31, %v1511_v55 }
 0x154   :  { %v845_v60 = vmul.f32 %v844_v36, %v7193_v59  ;;  %v183_v32 = vand.u32 2147483647, %v182_v62  ;;  %v185_v42 = vcvt.s32.f32 %v7472_v14  ;;  %v1284_v39 = vsel %vm1282_vm6, %v1283_v7, %v7478_v18 }
 0x155   :  { %vm362_vm3 = vweird.f32 %v6416_v20  ;;  %v7513_v3 = vshrl.u32 %v1124_v24, 30  ;;  %v424_v23 = vsel %vm418_vm0, %v421_v19, %v423_v61  ;;  %v1506_v1 = vand.u32 8388607, %v12059_v29 }
 0x156   :  { %v7519_v4 = vsub.s32 32, %v1513_v25  ;;  %v482_v36 = vsel %vm480_vm2, %v481_v11, %v477_v53  ;;  %v7521_v16 = vshrl.u32 %v1511_v55, 5  ;;  %v1516_v14 = vshll.u32 %v12196_v40, %v1513_v25 }
 0x157   :  { %v1525_v47 = vshll.u32 %v12202_v12, %v1513_v25  ;;  %v1519_v30 = vshll.u32 %v12201_v56, %v1513_v25  ;;  %v12207_v58 = vmov 2131351028   ;;  %vm67_vm4 = vcmp.lt.s32.totalorder %v6817_v34, 0 }
 0x158   :  { %v1517_v51 = vshrl.u32 %v12201_v56, %v7519_v4  ;;  %v1520_v9 = vshrl.u32 %v12207_v58, %v7519_v4  ;;  %v1522_v46 = vshll.u32 %v12207_v58, %v1513_v25  ;;  %v1523_v35 = vshrl.u32 %v12202_v12, %v7519_v4 }
 0x159   :  { %v1526_v27 = vshrl.u32 %v12195_v41, %v7519_v4  ;;  %v1528_v50 = vshll.u32 %v12195_v41, %v1513_v25  ;;  %v1529_v62 = vshrl.u32 %v12203_v13, %v7519_v4  ;;  %v186_v2 = vmul.f32 %v185_v42, %v183_v32 }
 0x15a   :  { %v1285_v15 = vclz %v1284_v39  ;;  %v478_v6 = vmul.u32 %v7402_v17, %v424_v23  ;;  %v1507_v37 = vor.u32 8388608, %v1506_v1  ;;  %v838_v44 = vmul.f32 %v837_v26, %v7193_v59 }
 0x15b   :  { %v189_v31 = vsub.s32 4, %v7080_v49  ;;  %v1126_v38 = vshll.u32 %v7513_v3, 30  ;;  %v1527_v7 = vor.u32 %v1526_v27, %v1525_v47  ;;  %v846_v53 = vadd.f32 1.0, %v845_v60 }
 0x15c   :  { %v7543_v24 = vadd.s32 %v482_v36, %v478_v6  ;;  %v7545_v19 = vor.u32 %v1517_v51, %v1516_v14  ;;  %v7547_v61 = vor.u32 %v1520_v9, %v1519_v30  ;;  %v12208_v11 = vand.u32 2147483647, %v6817_v34 }
 0x15d   :  { %v7555_v17 = vor.u32 %v1523_v35, %v1522_v46  ;;  %v1530_v59 = vor.u32 %v1529_v62, %v1528_v50  ;;  %vm1531_vm8 = vcmp.lt.s32.totalorder %v7521_v16, 1  ;;  %vm1534_vm9 = vcmp.lt.s32.totalorder %v7521_v16, 4 }
 0x15e   :  { %vm7551_vm7 = vcmp.le.f32.partialorder %v12208_v11, 0.7853982  ;;  %v187_v26 = vxor.u32 2147483648, %v186_v2  ;;  %v5903_v25 = vadd.s32 4294967294, %v1285_v15  ;;  %vm1533_vm12 = vcmp.lt.s32.totalorder %v7521_v16, 3 }
 0x15f   :  { %v7560_v60 = vshll.u32 %v1507_v37, 8  ;;  %v7565_v32 = vsel %vm362_vm3, nan, %v7177_v43  ;;  %v1806_v42 = vadd.f32 1.0, %v1805_v33  ;;  %v7568_v39 = vsub.s32 %v7481_v63, %v1126_v38  ;;  %v381_v37 = vpop.permute.xlu1 %380 }
 0x160   :  { %12211 = vst [vmem:[#allocation17_spill] sm:$0xff] %v7565_v32  ;;  %v1540_v23 = vsel %vm1534_vm9, %v1527_v7, 920167782  ;;  %v7572_v1 = vadd.f32 1.0, %v838_v44  ;;  %v7575_v36 = vmul.f32 %v846_v53, %v7169_v57  ;;  %vm851_vm13 = vcmp.eq.s32.totalorder %v7281_v22, 0 }
 0x161   :  { %vm1532_vm0 = vcmp.lt.s32.totalorder %v7521_v16, 2  ;;  %v1539_v20 = vsel %vm1531_vm8, %v7545_v19, %v7547_v61  ;;  %v484_v43 = vadd.s32 536870912, %v7543_v24  ;;  %v1541_v63 = vsel %vm1533_vm12, %v7555_v17, %v1540_v23 }
 0x162   :  { %v1543_v57 = vsel %vm1531_vm8, %v7547_v61, %v7555_v17  ;;  %v1544_v33 = vsel %vm1534_vm9, %v1530_v59, 1326507024  ;;  %v188_v14 = vsel %vm67_vm4, %v187_v26, %v186_v2  ;;  %v7598_v47 = vsel %vm67_vm4, %v189_v31, %v7080_v49 }
 0x163   :  { %vm5904_vm15 = vcmp.lt.s32.totalorder %v5903_v25, 0  ;;  %v1548_v51 = vand.u32 65535, %v7560_v60  ;;  %vm1128_vm14 = vcmp.lt.s32.totalorder %v7568_v39, 0  ;;  %v1129_v30 = vsub.s32 0, %v7568_v39 }
 0x164   :  { %v1542_v9 = vsel %vm1532_vm0, %v1539_v20, %v1541_v63  ;;  %v1545_v46 = vsel %vm1533_vm12, %v1527_v7, %v1544_v33  ;;  %v1549_v27 = vshrl.u32 %v7560_v60, 16  ;;  %v852_v62 = vxor.u32 2147483648, %v7575_v36  ;;  %v12214_v33 = vld [vmem:[#allocation14_spill] sm:$0xff] }
 0x165   :  { %v1546_v35 = vsel %vm1532_vm0, %v1543_v57, %v1545_v46  ;;  %v1572_v49 = vand.u32 65535, %v1542_v9  ;;  %v1573_v50 = vshrl.u32 %v1542_v9, 16  ;;  %v7611_v2 = vshrl.u32 %v484_v43, 30 }
 0x166   :  { %v1550_v15 = vand.u32 65535, %v1546_v35  ;;  %v1551_v6 = vshrl.u32 %v1546_v35, 16  ;;  %v7614_v44 = vmul.f32 %v1806_v42, %v7107_v52  ;;  %v7623_v53 = vsel %vm7551_vm7, %v6817_v34, %v188_v14  ;;  %v12215_v14 = vld [vmem:[#allocation15_spill] sm:$0xff] }
 0x167   :  { %v1575_v7 = vmul.u32 %v1573_v50, %v1548_v51  ;;  %v7626_v11 = vsel %vm5904_vm15, 0, %v5903_v25  ;;  %v1130_v52 = vsel %vm1128_vm14, %v1129_v30, %v7568_v39  ;;  %v1576_v23 = vmul.u32 %v1572_v49, %v1549_v27 }
 0x168   :  { %12212 = vst [vmem:[#allocation18_spill] sm:$0xff] %v7614_v44  ;;  %v1553_v59 = vmul.u32 %v1551_v6, %v1548_v51  ;;  %v1552_v26 = vmul.u32 %v1550_v15, %v1548_v51  ;;  %v1554_v42 = vmul.u32 %v1550_v15, %v1549_v27  ;;  %v7632_v20 = vmul.f32 %v7091_v28, %v381_v37 }
 0x169   :  { %v7637_v43 = vsel %vm851_vm13, %v7572_v1, %v852_v62  ;;  %v486_v63 = vshll.u32 %v7611_v2, 30  ;;  %v1574_v25 = vmul.u32 %v1572_v49, %v1548_v51  ;;  %v1578_v57 = vshll.u32 %v1575_v7, 16 }
 0x16a   :  { %12213 = vst [vmem:[#allocation19_spill] sm:$0xff] %v7632_v20  ;;  %v1273_v9 = vadd.s32 %v12215_v14, %v12214_v33  ;;  %v1555_v30 = vmul.u32 %v1551_v6, %v1549_v27  ;;  %v1556_v46 = vshll.u32 %v1553_v59, 16  ;;  %v1558_v35 = vshll.u32 %v1554_v42, 16 }
 0x16b   :  { %v7644_v15 = vmul.f32 %v7623_v53, %v7623_v53  ;;  %v1293_v28 = vsub.s32 4294967266, %v7626_v11  ;;  %v1131_v37 = vclz %v1130_v52  ;;  %v1577_v29 = vmul.u32 %v1573_v50, %v1549_v27 }
 0x16c   :  { %vm1560_vm5 = vc.u32 %v1552_v26, %v1556_v46  ;;  %v1562_v62 = vadd.s32 %v1556_v46, %v1552_v26  ;;  %v1580_v38 = vshll.u32 %v1576_v23, 16  ;;  %v542_v51 = vand.u32 2139095040, %v7632_v20 }
 0x16d   :  { %v7649_v49 = vsub.s32 %v7543_v24, %v486_v63  ;;  %v1557_v33 = vshrl.u32 %v1553_v59, 16  ;;  %v1561_v6 = vsel %vm1560_vm5, 1, %v12194_v21  ;;  %vm1582_vm11 = vc.u32 %v1574_v25, %v1578_v57 }
 0x16e   :  { %v1563_v14 = vadd.s32 %v1561_v6, %v1555_v30  ;;  %vm1564_vm10 = vc.u32 %v1562_v62, %v1558_v35  ;;  %v1583_v31 = vsel %vm1582_vm11, 1, %v12194_v21  ;;  %v1584_v8 = vadd.s32 %v1578_v57, %v1574_v25 }
 0x16f   :  { %v1289_v52 = vsub.s32 32, %v7626_v11  ;;  %v1294_v27 = vadd.s32 127, %v1293_v28  ;;  %v1565_v50 = vsel %vm1564_vm10, 1, %v12194_v21  ;;  %v1585_v26 = vadd.s32 %v1583_v31, %v1577_v29 }
 0x170   :  { %v1567_v46 = vadd.s32 %v1565_v50, %v1563_v14  ;;  %v1579_v32 = vshrl.u32 %v1575_v7, 16  ;;  %vm1586_vm6 = vc.u32 %v1584_v8, %v1580_v38  ;;  %v543_v24 = vshrl.u32 %v542_v51, 23 }
 0x171   :  { %vm854_vm1 = vcmp.eq.s32.totalorder %v7281_v22, 2  ;;  %v5900_v59 = vadd.s32 4294967294, %v1131_v37  ;;  %v489_v63 = vsub.s32 0, %v7649_v49  ;;  %v1559_v30 = vshrl.u32 %v1554_v42, 16 }
 0x172   :  { %v1587_v35 = vsel %vm1586_vm6, 1, %v12194_v21  ;;  %vm850_vm2 = vcmp.lt.s32.totalorder %v7281_v22, 2  ;;  %v1568_v25 = vadd.s32 %v1567_v46, %v1557_v33  ;;  %v1581_v57 = vshrl.u32 %v1576_v23, 16 }
 0x173   :  { %v1589_v28 = vadd.s32 %v1587_v35, %v1585_v26  ;;  %v5890_v62 = vadd.s32 4294967169, %v543_v24  ;;  %v194_v29 = vmul.f32 -0.001358992, %v7644_v15  ;;  %v1291_v31 = vshrl.u32 %v1273_v9, %v1289_v52 }
 0x174   :  { %vm488_vm3 = vcmp.lt.s32.totalorder %v7649_v49, 0  ;;  %v1515_v7 = vshrl.u32 %v12196_v40, %v7519_v4  ;;  %v1295_v37 = vshll.u32 %v1294_v27, 23  ;;  %v1536_v42 = vsel %vm1534_vm9, %v7555_v17, 2102212464 }
 0x175   :  { %v1590_v51 = vadd.s32 %v1589_v28, %v1579_v32  ;;  %v549_v6 = vadd.s32 1, %v5890_v62  ;;  %v201_v33 = vmul.f32 -0.00019511016, %v7644_v15  ;;  %v1290_v23 = vshll.u32 %v7478_v18, %v7626_v11 }
 0x176   :  { %v7669_v14 = vadd.s32 %v1568_v25, %v1559_v30  ;;  %v7671_v9 = vadd.s32 %v1584_v8, %v1580_v38  ;;  %vm5901_vm4 = vcmp.lt.s32.totalorder %v5900_v59, 0  ;;  %v490_v52 = vsel %vm488_vm3, %v489_v63, %v7649_v49 }
 0x177   :  { %v1591_v4 = vadd.s32 %v1590_v51, %v1581_v57  ;;  %vm550_vm13 = vcmp.gt.s32.totalorder %v549_v6, 0  ;;  %v195_v27 = vadd.f32 0.041655596, %v194_v29  ;;  %v1535_v17 = vsel %vm1531_vm8, %v1515_v7, %v7545_v19  ;;  %v12219_v51 = vld [vmem:[#allocation6_spill] sm:$0xff] }
 0x178   :  { %v1537_v32 = vsel %vm1533_vm12, %v7547_v61, %v1536_v42  ;;  %v551_v50 = vsel %vm550_vm13, %v549_v6, 0  ;;  %v1292_v18 = vor.u32 %v1291_v31, %v1290_v23  ;;  %v1296_v11 = vor.u32 4788187, %v1295_v37 }
 0x179   :  { %v1595_v26 = vadd.s32 1, %v1591_v4  ;;  %v553_v8 = vand.u32 31, %v551_v50  ;;  %v7681_v46 = vsel %vm5901_vm4, 0, %v5900_v59  ;;  %v491_v24 = vclz %v490_v52 }
 0x17a   :  { %vm1594_vm9 = vc.u32 %v7669_v14, %v7671_v9  ;;  %v12216_v19 = vxor.u32 2147483648, %v7572_v1  ;;  %v1538_v61 = vsel %vm1532_vm0, %v1535_v17, %v1537_v32  ;;  %v12062_v30 = vand.u32 2147483647, %v7632_v20 }
 0x17b   :  { %v7693_v35 = vsub.s32 32, %v553_v8  ;;  %v7701_v25 = vmul.f32 %v195_v27, %v7644_v15  ;;  %v202_v57 = vadd.f32 0.008332121, %v201_v33  ;;  %v12218_v1 = vsel %vm7551_vm7, 0, %v7598_v47 }
 0x17c   :  { %v856_v63 = vsel %vm854_vm1, %v12216_v19, %v7575_v36  ;;  %v7707_v36 = vand.u32 3, %v12218_v1  ;;  %v1297_v16 = vand.u32 2147483647, %v1296_v11  ;;  %v1299_v28 = vcvt.s32.f32 %v1292_v18 }
 0x17d   :  { %v7698_v59 = vsel %vm850_vm2, %v7637_v43, %v856_v63  ;;  %v1139_v62 = vsub.s32 4294967266, %v7681_v46  ;;  %v1596_v29 = vsel %vm1594_vm9, %v1595_v26, %v1591_v4  ;;  %v5888_v31 = vadd.s32 4294967294, %v491_v24 }
 0x17e   :  { %12217 = vst [vmem:[#allocation14_spill] sm:$0xff] %v7698_v59  ;;  %v1592_v22 = vmul.u32 %v7560_v60, %v1538_v61  ;;  %v557_v43 = vshrl.u32 %v12201_v56, %v7693_v35  ;;  %v560_v7 = vshrl.u32 %v12207_v58, %v7693_v35  ;;  %v546_v55 = vand.u32 8388607, %v12062_v30 }
 0x17f   :  { %v563_v47 = vshrl.u32 %v12202_v12, %v7693_v35  ;;  %v565_v37 = vshll.u32 %v12202_v12, %v553_v8  ;;  %v566_v42 = vshrl.u32 %v12195_v41, %v7693_v35  ;;  %vm1181_vm7 = vcmp.lt.s32.totalorder %v12219_v51, 0 }
 0x180   :  { %v7723_v60 = vadd.s32 %v1596_v29, %v1592_v22  ;;  %v7725_v6 = vshrl.u32 %v551_v50, 5  ;;  %v556_v33 = vshll.u32 %v12196_v40, %v553_v8  ;;  %v559_v23 = vshll.u32 %v12201_v56, %v553_v8 }
 0x181   :  { %v1300_v52 = vmul.f32 %v1299_v28, %v1297_v16  ;;  %v562_v4 = vshll.u32 %v12207_v58, %v553_v8  ;;  %v567_v27 = vor.u32 %v566_v42, %v565_v37  ;;  %v569_v17 = vshrl.u32 %v12203_v13, %v7693_v35  ;;  %v701_v16 = vpop.permute.xlu0 %700 }
 0x182   :  { %v1135_v32 = vsub.s32 32, %v7681_v46  ;;  %v1140_v18 = vadd.s32 127, %v1139_v62  ;;  %v7733_v11 = vor.u32 %v557_v43, %v556_v33  ;;  %v7735_v26 = vor.u32 %v560_v7, %v559_v23 }
 0x183   :  { %v203_v50 = vmul.f32 %v202_v57, %v7644_v15  ;;  %v547_v24 = vor.u32 8388608, %v546_v55  ;;  %v7738_v19 = vor.u32 %v563_v47, %v562_v4  ;;  %v568_v63 = vshll.u32 %v12195_v41, %v553_v8  ;;  %v7769_v47 = vld [vmem:[%s12005_s6] ss:$0 sm:$0xff] }
 0x184   :  { %v1119_v61 = vadd.s32 %v7458_v54, %v7450_v0  ;;  %vm5889_vm8 = vcmp.lt.s32.totalorder %v5888_v31, 0  ;;  %v1598_v1 = vadd.s32 536870912, %v7723_v60  ;;  %vm574_vm12 = vcmp.lt.s32.totalorder %v7725_v6, 4 }
 0x185   :  { %v12220_v28 = vand.u32 2147483647, %v12219_v51  ;;  %v1301_v57 = vxor.u32 2147483648, %v1300_v52  ;;  %v570_v29 = vor.u32 %v569_v17, %v568_v63  ;;  %vm571_vm15 = vcmp.lt.s32.totalorder %v7725_v6, 1 }
 0x186   :  { %v580_v8 = vsel %vm574_vm12, %v567_v27, 920167782  ;;  %v1137_v0 = vshrl.u32 %v1119_v61, %v1135_v32  ;;  %v1141_v54 = vshll.u32 %v1140_v18, 23  ;;  %vm573_vm14 = vcmp.lt.s32.totalorder %v7725_v6, 3 }
 0x187   :  { %vm7747_vm0 = vcmp.le.f32.partialorder %v12220_v28, 0.7853982  ;;  %v579_v22 = vsel %vm571_vm15, %v7733_v11, %v7735_v26  ;;  %v7759_v43 = vsel %vm5889_vm8, 0, %v5888_v31  ;;  %v581_v7 = vsel %vm573_vm14, %v7738_v19, %v580_v8 }
 0x188   :  { %v7764_v55 = vshll.u32 %v547_v24, 8  ;;  %v7772_v37 = vmul.f32 %v7769_v47, %v701_v16  ;;  %v1136_v42 = vshll.u32 %v7568_v39, %v7681_v46  ;;  %v7776_v33 = vshrl.u32 %v1598_v1, 30 }
 0x189   :  { %vm572_vm5 = vcmp.lt.s32.totalorder %v7725_v6, 2  ;;  %v583_v31 = vsel %vm571_vm15, %v7735_v26, %v7738_v19  ;;  %v1302_v23 = vsel %vm1181_vm7, %v1301_v57, %v1300_v52  ;;  %v584_v39 = vsel %vm574_vm12, %v570_v29, 1326507024 }
 0x18a   :  { %12223 = vst [vmem:[#allocation15_spill] sm:$0xff] %v7772_v37  ;;  %v582_v17 = vsel %vm572_vm5, %v579_v22, %v581_v7  ;;  %v7790_v46 = vor.u32 %v1137_v0, %v1136_v42  ;;  %v7792_v32 = vor.u32 4788187, %v1141_v54  ;;  %v495_v18 = vsub.s32 32, %v7759_v43 }
 0x18b   :  { %12224 = vst [vmem:[#allocation20_spill] sm:$0xff] %v7776_v33  ;;  %v585_v24 = vsel %vm573_vm14, %v567_v27, %v584_v39  ;;  %v588_v63 = vand.u32 65535, %v7764_v55  ;;  %v613_v61 = vshrl.u32 %v582_v17, 16  ;;  %v862_v1 = vand.u32 2139095040, %v7772_v37 }
 0x18c   :  { %v586_v52 = vsel %vm572_vm5, %v583_v31, %v585_v24  ;;  %v7801_v16 = vadd.f32 -0.16666654, %v203_v50  ;;  %v1600_v28 = vshll.u32 %v7776_v33, 30  ;;  %v479_v8 = vadd.s32 %v7494_v10, %v7492_v48 }
 0x18d   :  { %v590_v57 = vand.u32 65535, %v586_v52  ;;  %v591_v29 = vshrl.u32 %v586_v52, 16  ;;  %v499_v0 = vsub.s32 4294967266, %v7759_v43  ;;  %v612_v27 = vand.u32 65535, %v582_v17 }
 0x18e   :  { %v615_v54 = vmul.u32 %v613_v61, %v588_v63  ;;  %v7810_v22 = vsel %vm7747_vm0, %v12219_v51, %v1302_v23  ;;  %v589_v50 = vshrl.u32 %v7764_v55, 16  ;;  %v496_v39 = vshll.u32 %v7649_v49, %v7759_v43 }
 0x18f   :  { %v593_v42 = vmul.u32 %v591_v29, %v588_v63  ;;  %v497_v48 = vshrl.u32 %v479_v8, %v495_v18  ;;  %v863_v10 = vshrl.u32 %v862_v1, 23  ;;  %v7818_v17 = vsub.s32 %v7723_v60, %v1600_v28 }
 0x190   :  { %v592_v24 = vmul.u32 %v590_v57, %v588_v63  ;;  %v594_v52 = vmul.u32 %v590_v57, %v589_v50  ;;  %v500_v23 = vadd.s32 127, %v499_v0  ;;  %v555_v30 = vshrl.u32 %v12196_v40, %v7693_v35 }
 0x191   :  { %v596_v38 = vshll.u32 %v593_v42, 16  ;;  %v616_v4 = vmul.u32 %v612_v27, %v589_v50  ;;  %v618_v7 = vshll.u32 %v615_v54, 16  ;;  %v595_v44 = vmul.u32 %v591_v29, %v589_v50 }
 0x192   :  { %v598_v20 = vshll.u32 %v594_v52, 16  ;;  %v576_v49 = vsel %vm574_vm12, %v7738_v19, 2102212464  ;;  %v614_v43 = vmul.u32 %v612_v27, %v588_v63  ;;  %v5896_v18 = vadd.s32 4294967169, %v863_v10 }
 0x193   :  { %vm600_vm11 = vc.u32 %v592_v24, %v596_v38  ;;  %v602_v31 = vadd.s32 %v596_v38, %v592_v24  ;;  %vm1602_vm10 = vcmp.lt.s32.totalorder %v7818_v17, 0  ;;  %v1603_v1 = vsub.s32 0, %v7818_v17 }
 0x194   :  { %v601_v60 = vsel %vm600_vm11, 1, %v12194_v21  ;;  %v597_v35 = vshrl.u32 %v593_v42, 16  ;;  %v617_v29 = vmul.u32 %v613_v61, %v589_v50  ;;  %vm622_vm1 = vc.u32 %v614_v43, %v618_v7 }
 0x195   :  { %v603_v28 = vadd.s32 %v601_v60, %v595_v44  ;;  %vm604_vm6 = vc.u32 %v602_v31, %v598_v20  ;;  %v620_v8 = vshll.u32 %v616_v4, 16  ;;  %v623_v0 = vsel %vm622_vm1, 1, %v12194_v21 }
 0x196   :  { %v605_v57 = vsel %vm604_vm6, 1, %v12194_v21  ;;  %v624_v19 = vadd.s32 %v618_v7, %v614_v43  ;;  %v501_v24 = vshll.u32 %v500_v23, 23  ;;  %v625_v33 = vadd.s32 %v623_v0, %v617_v29 }
 0x197   :  { %v607_v38 = vadd.s32 %v605_v57, %v603_v28  ;;  %v12069_v63 = vand.u32 2147483647, %v7772_v37  ;;  %v869_v27 = vadd.s32 1, %v5896_v18  ;;  %v575_v44 = vsel %vm571_vm15, %v555_v30, %v7733_v11 }
 0x198   :  { %v577_v20 = vsel %vm573_vm14, %v7735_v26, %v576_v49  ;;  %vm626_vm2 = vc.u32 %v624_v19, %v620_v8  ;;  %v1604_v50 = vsel %vm1602_vm10, %v1603_v1, %v7818_v17  ;;  %v599_v7 = vshrl.u32 %v594_v52, 16 }
 0x199   :  { %v608_v61 = vadd.s32 %v607_v38, %v597_v35  ;;  %v627_v42 = vsel %vm626_vm2, 1, %v12194_v21  ;;  %vm870_vm3 = vcmp.gt.s32.totalorder %v869_v27, 0  ;;  %v7841_v31 = vor.u32 %v497_v48, %v496_v39 }
 0x19a   :  { %v619_v10 = vshrl.u32 %v615_v54, 16  ;;  %v629_v23 = vadd.s32 %v627_v42, %v625_v33  ;;  %v871_v60 = vsel %vm870_vm3, %v869_v27, 0  ;;  %v7843_v30 = vor.u32 4788187, %v501_v24 }
 0x19b   :  { %v7845_v11 = vadd.s32 %v608_v61, %v599_v7  ;;  %v866_v26 = vand.u32 8388607, %v12069_v63  ;;  %v873_v49 = vand.u32 31, %v871_v60  ;;  %v1605_v43 = vclz %v1604_v50 }
 0x19c   :  { %v578_v52 = vsel %vm572_vm5, %v575_v44, %v577_v20  ;;  %v621_v18 = vshrl.u32 %v616_v4, 16  ;;  %v630_v1 = vadd.s32 %v629_v23, %v619_v10  ;;  %v7851_v28 = vadd.s32 %v624_v19, %v620_v8 }
 0x19d   :  { %v7853_v39 = vsub.s32 32, %v873_v49  ;;  %v876_v33 = vshll.u32 %v12196_v40, %v873_v49  ;;  %v879_v54 = vshll.u32 %v12201_v56, %v873_v49  ;;  %v7857_v35 = vshrl.u32 %v871_v60, 5 }
 0x19e   :  { %v631_v48 = vadd.s32 %v630_v1, %v621_v18  ;;  %v882_v57 = vshll.u32 %v12207_v58, %v873_v49  ;;  %v885_v29 = vshll.u32 %v12202_v12, %v873_v49  ;;  %vm634_vm4 = vc.u32 %v7845_v11, %v7851_v28 }
 0x19f   :  { %v867_v6 = vor.u32 8388608, %v866_v26  ;;  %v877_v4 = vshrl.u32 %v12201_v56, %v7853_v39  ;;  %v880_v38 = vshrl.u32 %v12207_v58, %v7853_v39  ;;  %v883_v0 = vshrl.u32 %v12202_v12, %v7853_v39 }
 0x1a0   :  { %v635_v8 = vadd.s32 1, %v631_v48  ;;  %v886_v19 = vshrl.u32 %v12195_v41, %v7853_v39  ;;  %v888_v24 = vshll.u32 %v12195_v41, %v873_v49  ;;  %v632_v27 = vmul.u32 %v7764_v55, %v578_v52  ;;  %v12225_v49 = vld [vmem:[#allocation8_spill] sm:$0xff] }
 0x1a1   :  { %v7873_v44 = vor.u32 %v877_v4, %v876_v33  ;;  %v7875_v20 = vor.u32 %v880_v38, %v879_v54  ;;  %v889_v61 = vshrl.u32 %v12203_v13, %v7853_v39  ;;  %v7879_v7 = vor.u32 %v883_v0, %v882_v57 }
 0x1a2   :  { %v636_v50 = vsel %vm634_vm4, %v635_v8, %v631_v48  ;;  %v887_v42 = vor.u32 %v886_v19, %v885_v29  ;;  %vm891_vm13 = vcmp.lt.s32.totalorder %v7857_v35, 1  ;;  %v5909_v10 = vadd.s32 4294967294, %v1605_v43 }
 0x1a3   :  { %v637_v23 = vadd.s32 %v636_v50, %v632_v27  ;;  %v890_v60 = vor.u32 %v889_v61, %v888_v24  ;;  %v7882_v26 = vshll.u32 %v867_v6, 8  ;;  %vm1027_vm9 = vcmp.lt.s32.totalorder %v12225_v49, 0 }
 0x1a4   :  { %vm892_vm8 = vcmp.lt.s32.totalorder %v7857_v35, 2  ;;  %vm893_vm12 = vcmp.lt.s32.totalorder %v7857_v35, 3  ;;  %vm894_vm15 = vcmp.lt.s32.totalorder %v7857_v35, 4  ;;  %v899_v55 = vsel %vm891_vm13, %v7873_v44, %v7875_v20 }
 0x1a5   :  { %v205_v43 = vmul.f32 %v7801_v16, %v7644_v15  ;;  %v12226_v52 = vand.u32 2147483647, %v7792_v32  ;;  %v12227_v18 = vcvt.s32.f32 %v7790_v46  ;;  %v638_v33 = vadd.s32 536870912, %v637_v23 }
 0x1a6   :  { %v900_v54 = vsel %vm894_vm15, %v887_v42, 920167782  ;;  %v503_v48 = vand.u32 2147483647, %v7843_v30  ;;  %v903_v16 = vsel %vm891_vm13, %v7875_v20, %v7879_v7  ;;  %v904_v32 = vsel %vm894_vm15, %v890_v60, 1326507024 }
 0x1a7   :  { %v1146_v1 = vmul.f32 %v12227_v18, %v12226_v52  ;;  %v901_v57 = vsel %vm893_vm12, %v7879_v7, %v900_v54  ;;  %v7912_v46 = vmul.f32 %v7810_v22, %v7810_v22  ;;  %v12229_v29 = vand.u32 2147483647, %v12225_v49  ;;  %v12233_v54 = vld [vmem:[#allocation13_spill] sm:$0xff]  ;;  %v12256_v30 = vld [vmem:[#allocation19_spill] sm:$0xff] }
 0x1a8   :  { %v505_v6 = vcvt.s32.f32 %v7841_v31  ;;  %vm5910_vm5 = vcmp.lt.s32.totalorder %v5909_v10, 0  ;;  %v902_v4 = vsel %vm892_vm8, %v899_v55, %v901_v57  ;;  %v7923_v38 = vshrl.u32 %v638_v33, 30 }
 0x1a9   :  { %12228 = vst [vmem:[#allocation21_spill] sm:$0xff] %v7912_v46  ;;  %vm7916_vm14 = vcmp.le.f32.partialorder %v12229_v29, 0.7853982  ;;  %v905_v8 = vsel %vm893_vm12, %v887_v42, %v904_v32  ;;  %v908_v0 = vand.u32 65535, %v7882_v26  ;;  %v909_v19 = vshrl.u32 %v7882_v26, 16 }
 0x1aa   :  { %12232 = vst [vmem:[#allocation22_spill] sm:$0xff] %v7923_v38  ;;  %v197_v24 = vadd.f32 -0.4999988, %v7701_v25  ;;  %v1147_v27 = vxor.u32 2147483648, %v1146_v1  ;;  %v906_v61 = vsel %vm892_vm8, %v903_v16, %v905_v8  ;;  %v933_v31 = vshrl.u32 %v902_v4, 16 }
 0x1ab   :  { %v506_v50 = vmul.f32 %v505_v6, %v503_v48  ;;  %v910_v60 = vand.u32 65535, %v906_v61  ;;  %v911_v52 = vshrl.u32 %v906_v61, 16  ;;  %v932_v55 = vand.u32 65535, %v902_v4 }
 0x1ac   :  { %v206_v18 = vadd.f32 1.0, %v205_v43  ;;  %v1315_v33 = vmul.f32 -0.00019511016, %v7912_v46  ;;  %vm387_vm11 = vcmp.lt.s32.totalorder %v12233_v54, 0  ;;  %v7935_v42 = vsel %vm5910_vm5, 0, %v5909_v10 }
 0x1ad   :  { %v640_v57 = vshll.u32 %v7923_v38, 30  ;;  %v912_v25 = vmul.u32 %v910_v60, %v908_v0  ;;  %v913_v32 = vmul.u32 %v911_v52, %v908_v0  ;;  %v7938_v29 = vmul.u32 %v910_v60, %v909_v19 }
 0x1ae   :  { %v7941_v16 = vmul.f32 %v197_v24, %v7644_v15  ;;  %v12234_v48 = vsub.s32 4, %v7439_v5  ;;  %v1148_v10 = vsel %vm1027_vm9, %v1147_v27, %v1146_v1  ;;  %v12235_v6 = vand.u32 2147483647, %v12233_v54 }
 0x1af   :  { %v935_v8 = vmul.u32 %v933_v31, %v908_v0  ;;  %v507_v61 = vxor.u32 2147483648, %v506_v50  ;;  %v915_v15 = vmul.u32 %v911_v52, %v909_v19  ;;  %v916_v24 = vshll.u32 %v913_v32, 16 }
 0x1b0   :  { %v7948_v43 = vsel %vm1181_vm7, %v12234_v48, %v7439_v5  ;;  %vm7954_vm10 = vcmp.le.f32.partialorder %v12235_v6, 0.7853982  ;;  %v7958_v60 = vmul.u32 %v932_v55, %v909_v19  ;;  %v7961_v63 = vmul.f32 %v206_v18, %v7623_v53  ;;  %v2301_v18 = vpop.permute.xlu2 %2300 }
 0x1b1   :  { %v1613_v5 = vsub.s32 4294967266, %v7935_v42  ;;  %v918_v48 = vshll.u32 %v7938_v29, 16  ;;  %v934_v1 = vmul.u32 %v932_v55, %v908_v0  ;;  %v1316_v27 = vadd.f32 0.008332121, %v1315_v33 }
 0x1b2   :  { %v7968_v6 = vsel %vm7916_vm14, %v12225_v49, %v1148_v10  ;;  %v7970_v51 = vsub.s32 %v637_v23, %v640_v57  ;;  %vm920_vm7 = vc.u32 %v912_v25, %v916_v24  ;;  %v922_v37 = vadd.s32 %v916_v24, %v912_v25 }
 0x1b3   :  { %v921_v52 = vsel %vm920_vm7, 1, %v12194_v21  ;;  %v937_v38 = vmul.u32 %v933_v31, %v909_v19  ;;  %v938_v53 = vshll.u32 %v935_v8, 16  ;;  %v508_v59 = vsel %vm387_vm11, %v507_v61, %v506_v50 }
 0x1b4   :  { %v1609_v0 = vsub.s32 32, %v7935_v42  ;;  %v923_v55 = vadd.s32 %v921_v52, %v915_v15  ;;  %v940_v33 = vshll.u32 %v7958_v60, 16  ;;  %v1614_v34 = vadd.s32 127, %v1613_v5 }
 0x1b5   :  { %vm924_vm6 = vc.u32 %v922_v37, %v918_v48  ;;  %vm942_vm1 = vc.u32 %v934_v1, %v938_v53  ;;  %v944_v23 = vadd.s32 %v938_v53, %v934_v1  ;;  %v643_v57 = vsub.s32 0, %v7970_v51 }
 0x1b6   :  { %v925_v10 = vsel %vm924_vm6, 1, %v12194_v21  ;;  %v943_v19 = vsel %vm942_vm1, 1, %v12194_v21  ;;  %v7981_v31 = vmul.f32 %v7769_v47, %v2301_v18  ;;  %vm642_vm2 = vcmp.lt.s32.totalorder %v7970_v51, 0 }
 0x1b7   :  { %v927_v50 = vadd.s32 %v925_v10, %v923_v55  ;;  %v945_v25 = vadd.s32 %v943_v19, %v937_v38  ;;  %vm946_vm3 = vc.u32 %v944_v23, %v940_v33  ;;  %v1317_v61 = vmul.f32 %v1316_v27, %v7912_v46 }
 0x1b8   :  { %12238 = vst [vmem:[#allocation13_spill] sm:$0xff] %v7981_v31  ;;  %v7988_v37 = vsel %vm7954_vm10, %v12233_v54, %v508_v59  ;;  %v917_v15 = vshrl.u32 %v913_v32, 16  ;;  %v947_v24 = vsel %vm946_vm3, 1, %v12194_v21  ;;  %v7993_v5 = vmul.f32 %v7968_v6, %v7968_v6 }
 0x1b9   :  { %v1593_v48 = vadd.s32 %v7671_v9, %v7669_v14  ;;  %v939_v1 = vshrl.u32 %v935_v8, 16  ;;  %v949_v38 = vadd.s32 %v947_v24, %v945_v25  ;;  %v1615_v52 = vshll.u32 %v1614_v34, 23 }
 0x1ba   :  { %12239 = vst [vmem:[#allocation23_spill] sm:$0xff] %v7993_v5  ;;  %v644_v27 = vsel %vm642_vm2, %v643_v57, %v7970_v51  ;;  %v928_v53 = vadd.s32 %v927_v50, %v917_v15  ;;  %v2462_v18 = vand.u32 2139095040, %v7981_v31  ;;  %v8001_v59 = vmul.f32 %v7988_v37, %v7988_v37 }
 0x1bb   :  { %v1611_v32 = vshrl.u32 %v1593_v48, %v1609_v0  ;;  %v941_v55 = vshrl.u32 %v7958_v60, 16  ;;  %v950_v10 = vadd.s32 %v949_v38, %v939_v1  ;;  %vm211_vm4 = vcmp.eq.s32.totalorder %v7707_v36, 0 }
 0x1bc   :  { %v1318_v19 = vadd.f32 -0.16666654, %v1317_v61  ;;  %v875_v14 = vshrl.u32 %v12196_v40, %v7853_v39  ;;  %v919_v34 = vshrl.u32 %v7938_v29, 16  ;;  %v2463_v9 = vshrl.u32 %v2462_v18, 23 }
 0x1bd   :  { %v1610_v8 = vshll.u32 %v7818_v17, %v7935_v42  ;;  %v645_v57 = vclz %v644_v27  ;;  %v896_v0 = vsel %vm894_vm15, %v7879_v7, 2102212464  ;;  %v951_v50 = vadd.s32 %v950_v10, %v941_v55 }
 0x1be   :  { %vm214_vm5 = vcmp.eq.s32.totalorder %v7707_v36, 2  ;;  %v1161_v60 = vmul.f32 -0.00019511016, %v7993_v5  ;;  %v1616_v25 = vor.u32 4788187, %v1615_v52  ;;  %v8015_v61 = vadd.s32 %v928_v53, %v919_v34 }
 0x1bf   :  { %v5926_v39 = vadd.s32 4294967169, %v2463_v9  ;;  %v199_v29 = vadd.f32 1.0, %v7941_v16  ;;  %v212_v15 = vxor.u32 2147483648, %v7961_v63  ;;  %v521_v17 = vmul.f32 -0.00019511016, %v8001_v59 }
 0x1c0   :  { %v1612_v42 = vor.u32 %v1611_v32, %v1610_v8  ;;  %vm210_vm7 = vcmp.lt.s32.totalorder %v7707_v36, 2  ;;  %v895_v7 = vsel %vm891_vm13, %v875_v14, %v7873_v44  ;;  %v897_v24 = vsel %vm893_vm12, %v7875_v20, %v896_v0 }
 0x1c1   :  { %v8027_v48 = vadd.s32 %v944_v23, %v940_v33  ;;  %v2469_v1 = vadd.s32 1, %v5926_v39  ;;  %v1319_v16 = vmul.f32 %v1318_v19, %v7912_v46  ;;  %v1149_v38 = vsub.s32 4, %v7513_v3 }
 0x1c2   :  { %v5891_v52 = vadd.s32 4294967294, %v645_v57  ;;  %v955_v27 = vadd.s32 1, %v951_v50  ;;  %v1162_v53 = vadd.f32 0.008332121, %v1161_v60  ;;  %v1617_v18 = vand.u32 2147483647, %v1616_v25 }
 0x1c3   :  { %vm954_vm15 = vc.u32 %v8015_v61, %v8027_v48  ;;  %vm2470_vm6 = vcmp.gt.s32.totalorder %v2469_v1, 0  ;;  %v215_v44 = vxor.u32 2147483648, %v199_v29  ;;  %v509_v32 = vsub.s32 4, %v7611_v2 }
 0x1c4   :  { %v898_v20 = vsel %vm892_vm8, %v895_v7, %v897_v24  ;;  %v2471_v33 = vsel %vm2470_vm6, %v2469_v1, 0  ;;  %v514_v23 = vmul.f32 -0.001358992, %v8001_v59  ;;  %v522_v55 = vadd.f32 0.008332121, %v521_v17 }
 0x1c5   :  { %v1619_v10 = vcvt.s32.f32 %v1612_v42  ;;  %v2473_v19 = vand.u32 31, %v2471_v33  ;;  %v213_v14 = vsel %vm211_vm4, %v199_v29, %v212_v15  ;;  %v1320_v34 = vadd.f32 1.0, %v1319_v16 }
 0x1c6   :  { %vm5892_vm13 = vcmp.lt.s32.totalorder %v5891_v52, 0  ;;  %v956_v9 = vsel %vm954_vm15, %v955_v27, %v951_v50  ;;  %v8042_v8 = vsel %vm1027_vm9, %v1149_v38, %v7513_v3  ;;  %v1163_v35 = vmul.f32 %v1162_v53, %v7993_v5 }
 0x1c7   :  { %v1620_v57 = vmul.f32 %v1619_v10, %v1617_v18  ;;  %v952_v0 = vmul.u32 %v7882_v26, %v898_v20  ;;  %v216_v60 = vsel %vm214_vm5, %v215_v44, %v7961_v63  ;;  %v8055_v50 = vsel %vm387_vm11, %v509_v32, %v7611_v2 }
 0x1c8   :  { %v8057_v3 = vsub.s32 32, %v2473_v19  ;;  %v515_v39 = vadd.f32 0.041655596, %v514_v23  ;;  %v523_v29 = vmul.f32 %v522_v55, %v8001_v59  ;;  %v8060_v15 = vsel %vm5892_vm13, 0, %v5891_v52  ;;  %v1977_v55 = vpop.permute.xlu1 %1976 }
 0x1c9   :  { %v8062_v26 = vadd.s32 %v956_v9, %v952_v0  ;;  %v8066_v63 = vsel %vm210_vm7, %v213_v14, %v216_v60  ;;  %v12240_v2 = vand.u32 2147483647, %v7407_v45  ;;  %vm1501_vm8 = vcmp.lt.s32.totalorder %v7407_v45, 0 }
 0x1ca   :  { %v8079_v7 = vmul.f32 %v1320_v34, %v7810_v22  ;;  %v1164_v24 = vadd.f32 -0.16666654, %v1163_v35  ;;  %v512_v36 = vsel %vm7954_vm10, 0, %v8055_v50  ;;  %v1621_v1 = vxor.u32 2147483648, %v1620_v57 }
 0x1cb   :  { %vm8073_vm9 = vcmp.le.f32.partialorder %v12240_v2, 0.7853982  ;;  %v653_v16 = vsub.s32 4294967266, %v8060_v15  ;;  %v12077_v38 = vand.u32 2147483647, %v7981_v31  ;;  %v2485_v52 = vshll.u32 %v12202_v12, %v2473_v19  ;;  %v12245_v2 = vld [vmem:[#allocation4_spill] sm:$0xff] }
 0x1cc   :  { %12243 = vst [vmem:[#allocation24_spill] sm:$0xff] %v8079_v7  ;;  %v2486_v27 = vshrl.u32 %v12195_v41, %v8057_v3  ;;  %v516_v53 = vmul.f32 %v515_v39, %v8001_v59  ;;  %v524_v18 = vadd.f32 -0.16666654, %v523_v29  ;;  %v958_v22 = vadd.s32 536870912, %v8062_v26 }
 0x1cd   :  { %v8091_v44 = vshrl.u32 %v2471_v33, 5  ;;  %v2479_v4 = vshll.u32 %v12201_v56, %v2473_v19  ;;  %v2480_v32 = vshrl.u32 %v12207_v58, %v8057_v3  ;;  %v2482_v20 = vshll.u32 %v12207_v58, %v2473_v19 }
 0x1ce   :  { %v2483_v23 = vshrl.u32 %v12202_v12, %v8057_v3  ;;  %v2476_v10 = vshll.u32 %v12196_v40, %v2473_v19  ;;  %v2477_v14 = vshrl.u32 %v12201_v56, %v8057_v3  ;;  %v2488_v34 = vshll.u32 %v12195_v41, %v2473_v19 }
 0x1cf   :  { %v2489_v33 = vshrl.u32 %v12203_v13, %v8057_v3  ;;  %v1622_v9 = vsel %vm1501_vm8, %v1621_v1, %v1620_v57  ;;  %v654_v35 = vadd.s32 127, %v653_v16  ;;  %v2466_v0 = vand.u32 8388607, %v12077_v38  ;;  %v12246_v16 = vld [vmem:[#allocation5_spill] sm:$0xff] }
 0x1d0   :  { %v2487_v60 = vor.u32 %v2486_v27, %v2485_v52  ;;  %v525_v50 = vmul.f32 %v524_v18, %v8001_v59  ;;  %v633_v39 = vadd.s32 %v7851_v28, %v7845_v11  ;;  %v649_v29 = vsub.s32 32, %v8060_v15 }
 0x1d1   :  { %v8114_v19 = vmul.f32 %v7769_v47, %v1977_v55  ;;  %vm848_vm12 = vweird.f32 %v12245_v2  ;;  %v8117_v17 = vshrl.u32 %v958_v22, 30  ;;  %v8119_v57 = vor.u32 %v2480_v32, %v2479_v4 }
 0x1d2   :  { %v8121_v1 = vor.u32 %v2483_v23, %v2482_v20  ;;  %vm2494_vm11 = vcmp.lt.s32.totalorder %v8091_v44, 4  ;;  %vm208_vm10 = vweird.f32 %v12246_v16  ;;  %v8128_v11 = vsel %vm8073_vm9, %v7407_v45, %v1622_v9 }
 0x1d3   :  { %12244 = vst [vmem:[#allocation25_spill] sm:$0xff] %v8114_v19  ;;  %v8130_v28 = vor.u32 %v2477_v14, %v2476_v10  ;;  %v2490_v52 = vor.u32 %v2489_v33, %v2488_v34  ;;  %vm2491_vm1 = vcmp.lt.s32.totalorder %v8091_v44, 1  ;;  %v655_v27 = vshll.u32 %v654_v35, 23 }
 0x1d4   :  { %v2467_v18 = vor.u32 8388608, %v2466_v0  ;;  %vm2493_vm2 = vcmp.lt.s32.totalorder %v8091_v44, 3  ;;  %v2500_v22 = vsel %vm2494_vm11, %v2487_v60, 920167782  ;;  %v1165_v4 = vmul.f32 %v1164_v24, %v7993_v5 }
 0x1d5   :  { %v517_v32 = vadd.f32 -0.4999988, %v516_v53  ;;  %v526_v20 = vadd.f32 1.0, %v525_v50  ;;  %v1988_v23 = vand.u32 2139095040, %v8114_v19  ;;  %v651_v55 = vshrl.u32 %v633_v39, %v649_v29 }
 0x1d6   :  { %v960_v10 = vshll.u32 %v8117_v17, 30  ;;  %vm2492_vm3 = vcmp.lt.s32.totalorder %v8091_v44, 2  ;;  %v2503_v14 = vsel %vm2491_vm1, %v8119_v57, %v8121_v1  ;;  %v8146_v34 = vmul.f32 %v8128_v11, %v8128_v11 }
 0x1d7   :  { %v2499_v24 = vsel %vm2491_vm1, %v8130_v28, %v8119_v57  ;;  %v2501_v53 = vsel %vm2493_vm2, %v8121_v1, %v2500_v22  ;;  %v2504_v33 = vsel %vm2494_vm11, %v2490_v52, 1326507024  ;;  %v650_v9 = vshll.u32 %v7970_v51, %v8060_v15  ;;  %v12248_v15 = vld [vmem:[#allocation14_spill] sm:$0xff] }
 0x1d8   :  { %12247 = vst [vmem:[#allocation4_spill] sm:$0xff] %v8146_v34  ;;  %v656_v35 = vor.u32 4788187, %v655_v27  ;;  %v2505_v0 = vsel %vm2493_vm2, %v2487_v60, %v2504_v33  ;;  %v8161_v50 = vshll.u32 %v2467_v18, 8  ;;  %v1166_v39 = vadd.f32 1.0, %v1165_v4 }
 0x1d9   :  { %v529_v29 = vand.u32 3, %v512_v36  ;;  %v8165_v38 = vsel %vm2492_vm3, %v2503_v14, %v2505_v0  ;;  %v1989_v25 = vshrl.u32 %v1988_v23, 23  ;;  %v518_v22 = vmul.f32 %v517_v32, %v8001_v59 }
 0x1da   :  { %v652_v46 = vor.u32 %v651_v55, %v650_v9  ;;  %v8169_v52 = vsub.s32 %v8062_v26, %v960_v10  ;;  %v8173_v51 = vsel %vm2492_vm3, %v2499_v24, %v2501_v53  ;;  %v8178_v60 = vsel %vm848_vm12, nan, %v12248_v15  ;;  %v12255_v24 = vld [vmem:[#allocation20_spill] sm:$0xff] }
 0x1db   :  { %12249 = vst [vmem:[#allocation5_spill] sm:$0xff] %v8178_v60  ;;  %v12250_v36 = vsel %vm7747_vm0, 0, %v7948_v43  ;;  %v527_v59 = vmul.f32 %v526_v20, %v7988_v37  ;;  %v1635_v26 = vmul.f32 -0.00019511016, %v8146_v34  ;;  %v8191_v18 = vsel %vm208_vm10, nan, %v8066_v63 }
 0x1dc   :  { %v8184_v27 = vand.u32 3, %v12250_v36  ;;  %v657_v4 = vand.u32 2147483647, %v656_v35  ;;  %v2508_v2 = vand.u32 65535, %v8161_v50  ;;  %v2511_v32 = vshrl.u32 %v8165_v38, 16 }
 0x1dd   :  { %v12252_v43 = vsel %vm7916_vm14, 0, %v8042_v8  ;;  %v2533_v37 = vshrl.u32 %v8173_v51, 16  ;;  %v5917_v20 = vadd.s32 4294967169, %v1989_v25  ;;  %v8204_v16 = vmul.f32 %v1166_v39, %v7968_v6 }
 0x1de   :  { %12251 = vst [vmem:[#allocation14_spill] sm:$0xff] %v8184_v27  ;;  %v8200_v23 = vand.u32 3, %v12252_v43  ;;  %v519_v63 = vadd.f32 1.0, %v518_v22  ;;  %vm530_vm0 = vcmp.lt.s32.totalorder %v529_v29, 2  ;;  %v659_v55 = vcvt.s32.f32 %v652_v46 }
 0x1df   :  { %12254 = vst [vmem:[#allocation27_spill] sm:$0xff] %v8204_v16  ;;  %v963_v10 = vsub.s32 0, %v8169_v52  ;;  %v532_v14 = vxor.u32 2147483648, %v527_v59  ;;  %v1623_v53 = vsub.s32 4, %v12255_v24  ;;  %v1636_v33 = vadd.f32 0.008332121, %v1635_v26 }
 0x1e0   :  { %12253 = vst [vmem:[#allocation26_spill] sm:$0xff] %v8200_v23  ;;  %vm962_vm4 = vcmp.lt.s32.totalorder %v8169_v52, 0  ;;  %vm541_vm14 = vcmp.lt.s32.totalorder %v12256_v30, 0  ;;  %v660_v8 = vmul.f32 %v659_v55, %v657_v4  ;;  %v2510_v9 = vand.u32 65535, %v8165_v38 }
 0x1e1   :  { %v8211_v25 = vmul.u32 %v2511_v32, %v2508_v2  ;;  %v12080_v6 = vand.u32 2147483647, %v8114_v19  ;;  %vm531_vm5 = vcmp.eq.s32.totalorder %v529_v29, 0  ;;  %v2532_v46 = vand.u32 65535, %v8173_v51 }
 0x1e2   :  { %v8215_v35 = vmul.u32 %v2533_v37, %v2508_v2  ;;  %v1995_v0 = vadd.s32 1, %v5917_v20  ;;  %vm534_vm7 = vcmp.eq.s32.totalorder %v529_v29, 2  ;;  %v535_v39 = vxor.u32 2147483648, %v519_v63 }
 0x1e3   :  { %v964_v22 = vsel %vm962_vm4, %v963_v10, %v8169_v52  ;;  %v2509_v15 = vshrl.u32 %v8161_v50, 16  ;;  %v533_v26 = vsel %vm531_vm5, %v519_v63, %v532_v14  ;;  %v8223_v38 = vsel %vm1501_vm8, %v1623_v53, %v12255_v24 }
 0x1e4   :  { %v1637_v4 = vmul.f32 %v1636_v33, %v8146_v34  ;;  %v661_v51 = vxor.u32 2147483648, %v660_v8  ;;  %v2512_v43 = vmul.u32 %v2510_v9, %v2508_v2  ;;  %v2516_v20 = vshll.u32 %v8211_v25, 16 }
 0x1e5   :  { %v8229_v55 = vand.u32 8388607, %v12080_v6  ;;  %v965_v10 = vclz %v964_v22  ;;  %v2534_v62 = vmul.u32 %v2532_v46, %v2508_v2  ;;  %v2538_v36 = vshll.u32 %v8215_v35, 16  ;;  %v12257_v22 = vld [vmem:[#allocation22_spill] sm:$0xff] }
 0x1e6   :  { %vm1996_vm15 = vcmp.gt.s32.totalorder %v1995_v0, 0  ;;  %v536_v63 = vsel %vm534_vm7, %v535_v39, %v527_v59  ;;  %v8233_v14 = vmul.u32 %v2510_v9, %v2509_v15  ;;  %v8235_v24 = vmul.u32 %v2532_v46, %v2509_v15 }
 0x1e7   :  { %v1997_v53 = vsel %vm1996_vm15, %v1995_v0, 0  ;;  %v8238_v33 = vsel %vm530_vm0, %v533_v26, %v536_v63  ;;  %v8243_v45 = vadd.f32 -0.16666654, %v1637_v4  ;;  %v8248_v59 = vadd.s32 %v8027_v48, %v8015_v61 }
 0x1e8   :  { %v1999_v2 = vand.u32 31, %v1997_v53  ;;  %vm2520_vm6 = vc.u32 %v2512_v43, %v2516_v20  ;;  %v1993_v9 = vor.u32 8388608, %v8229_v55  ;;  %v8253_v29 = vsel %vm541_vm14, %v661_v51, %v660_v8 }
 0x1e9   :  { %v5897_v46 = vadd.s32 4294967294, %v965_v10  ;;  %vm2542_vm13 = vc.u32 %v2534_v62, %v2538_v36  ;;  %v2518_v39 = vshll.u32 %v8233_v14, 16  ;;  %v2522_v26 = vadd.s32 %v2516_v20, %v2512_v43 }
 0x1ea   :  { %v8255_v0 = vsub.s32 32, %v1999_v2  ;;  %v12089_v4 = vshll.u32 %v8235_v24, 16  ;;  %v8259_v63 = vadd.s32 %v2538_v36, %v2534_v62  ;;  %v2475_v61 = vshrl.u32 %v12196_v40, %v8057_v3 }
 0x1eb   :  { %v2515_v48 = vmul.u32 %v2511_v32, %v2509_v15  ;;  %v2521_v55 = vsel %vm2520_vm6, 1, %v12194_v21  ;;  %v2537_v6 = vmul.u32 %v2533_v37, %v2509_v15  ;;  %v2543_v8 = vsel %vm2542_vm13, 1, %v12194_v21 }
 0x1ec   :  { %v2002_v51 = vshll.u32 %v12196_v40, %v1999_v2  ;;  %v2003_v10 = vshrl.u32 %v12201_v56, %v8255_v0  ;;  %v2006_v43 = vshrl.u32 %v12207_v58, %v8255_v0  ;;  %v2005_v62 = vshll.u32 %v12201_v56, %v1999_v2 }
 0x1ed   :  { %v2009_v36 = vshrl.u32 %v12202_v12, %v8255_v0  ;;  %v2011_v3 = vshll.u32 %v12202_v12, %v1999_v2  ;;  %v2012_v32 = vshrl.u32 %v12195_v41, %v8255_v0  ;;  %vm5898_vm8 = vcmp.lt.s32.totalorder %v5897_v46, 0 }
 0x1ee   :  { %vm2524_vm12 = vc.u32 %v2522_v26, %v2518_v39  ;;  %vm2546_vm10 = vc.u32 %v8259_v63, %v12089_v4  ;;  %v8279_v37 = vshrl.u32 %v1997_v53, 5  ;;  %v8281_v15 = vor.u32 %v2003_v10, %v2002_v51 }
 0x1ef   :  { %v8283_v20 = vor.u32 %v2006_v43, %v2005_v62  ;;  %v2008_v7 = vshll.u32 %v12207_v58, %v1999_v2  ;;  %v2013_v27 = vor.u32 %v2012_v32, %v2011_v3  ;;  %v2523_v16 = vadd.s32 %v2521_v55, %v2515_v48 }
 0x1f0   :  { %v2545_v23 = vadd.s32 %v2543_v8, %v2537_v6  ;;  %v2014_v60 = vshll.u32 %v12195_v41, %v1999_v2  ;;  %v2015_v39 = vshrl.u32 %v12203_v13, %v8255_v0  ;;  %v12258_v26 = vand.u32 2147483647, %v12256_v30 }
 0x1f1   :  { %v2496_v53 = vsel %vm2494_vm11, %v8121_v1, 2102212464  ;;  %v2525_v51 = vsel %vm2524_vm12, 1, %v12194_v21  ;;  %v2547_v48 = vsel %vm2546_vm10, 1, %v12194_v21  ;;  %v2010_v6 = vor.u32 %v2009_v36, %v2008_v7 }
 0x1f2   :  { %vm8291_vm0 = vcmp.le.f32.partialorder %v12258_v26, 0.7853982  ;;  %v8301_v2 = vsel %vm5898_vm8, 0, %v5897_v46  ;;  %v2016_v55 = vor.u32 %v2015_v39, %v2014_v60  ;;  %vm2017_vm4 = vcmp.lt.s32.totalorder %v8279_v37, 1 }
 0x1f3   :  { %vm2020_vm5 = vcmp.lt.s32.totalorder %v8279_v37, 4  ;;  %v2517_v8 = vshrl.u32 %v8211_v25, 16  ;;  %v2539_v10 = vshrl.u32 %v8215_v35, 16  ;;  %v2025_v1 = vsel %vm2017_vm4, %v8281_v15, %v8283_v20 }
 0x1f4   :  { %v2026_v7 = vsel %vm2020_vm5, %v2013_v27, 920167782  ;;  %v2527_v43 = vadd.s32 %v2525_v51, %v2523_v16  ;;  %v2549_v46 = vadd.s32 %v2547_v48, %v2545_v23  ;;  %vm2019_vm11 = vcmp.lt.s32.totalorder %v8279_v37, 3  ;;  %v1661_v51 = vpop.permute.xlu0 %1660 }
 0x1f5   :  { %v8314_v60 = vshll.u32 %v1993_v9, 8  ;;  %vm2018_vm7 = vcmp.lt.s32.totalorder %v8279_v37, 2  ;;  %v2027_v25 = vsel %vm2019_vm11, %v2010_v6, %v2026_v7  ;;  %v2029_v35 = vsel %vm2017_vm4, %v8283_v20, %v2010_v6 }
 0x1f6   :  { %v2030_v62 = vsel %vm2020_vm5, %v2016_v55, 1326507024  ;;  %v973_v36 = vsub.s32 4294967266, %v8301_v2  ;;  %v2495_v23 = vsel %vm2491_vm1, %v2475_v61, %v8130_v28  ;;  %v2497_v16 = vsel %vm2493_vm2, %v8119_v57, %v2496_v53 }
 0x1f7   :  { %v2028_v9 = vsel %vm2018_vm7, %v2025_v1, %v2027_v25  ;;  %v2519_v3 = vshrl.u32 %v8233_v14, 16  ;;  %v2541_v32 = vshrl.u32 %v8235_v24, 16  ;;  %v2031_v39 = vsel %vm2019_vm11, %v2013_v27, %v2030_v62 }
 0x1f8   :  { %v2059_v26 = vshrl.u32 %v2028_v9, 16  ;;  %v2528_v48 = vadd.s32 %v2527_v43, %v2517_v8  ;;  %v2032_v28 = vsel %vm2018_vm7, %v2029_v35, %v2031_v39  ;;  %v2034_v61 = vand.u32 65535, %v8314_v60 }
 0x1f9   :  { %v2058_v55 = vand.u32 65535, %v2028_v9  ;;  %v2550_v57 = vadd.s32 %v2549_v46, %v2539_v10  ;;  %v2035_v53 = vshrl.u32 %v8314_v60, 16  ;;  %v2036_v1 = vand.u32 65535, %v2032_v28 }
 0x1fa   :  { %v2037_v7 = vshrl.u32 %v2032_v28, 16  ;;  %v8345_v14 = vsel %vm8291_vm0, %v12256_v30, %v8253_v29  ;;  %v8349_v27 = vsel %vm2492_vm3, %v2495_v23, %v2497_v16  ;;  %v2061_v8 = vmul.u32 %v2059_v26, %v2034_v61 }
 0x1fb   :  { %v8352_v43 = vmul.f32 %v7769_v47, %v1661_v51  ;;  %v974_v25 = vadd.s32 127, %v973_v36  ;;  %v12262_v10 = vshll.u32 %v8235_v24, 16  ;;  %v2040_v62 = vmul.u32 %v2036_v1, %v2035_v53 }
 0x1fc   :  { %v2039_v35 = vmul.u32 %v2037_v7, %v2034_v61  ;;  %v8359_v9 = vadd.s32 %v2528_v48, %v2519_v3  ;;  %v2060_v29 = vmul.u32 %v2058_v55, %v2034_v61  ;;  %v2062_v39 = vmul.u32 %v2058_v55, %v2035_v53 }
 0x1fd   :  { %12261 = vst [vmem:[#allocation20_spill] sm:$0xff] %v8352_v43  ;;  %v8357_v46 = vadd.s32 %v8259_v63, %v12262_v10  ;;  %v2064_v28 = vshll.u32 %v2061_v8, 16  ;;  %v2551_v44 = vadd.s32 %v2550_v57, %v2541_v32  ;;  %v2001_v23 = vshrl.u32 %v12196_v40, %v8255_v0 }
 0x1fe   :  { %v2038_v16 = vmul.u32 %v2036_v1, %v2034_v61  ;;  %v2042_v47 = vshll.u32 %v2039_v35, 16  ;;  %v2022_v36 = vsel %vm2020_vm5, %v2010_v6, 2102212464  ;;  %v2041_v24 = vmul.u32 %v2037_v7, %v2035_v53 }
 0x1ff   :  { %v2063_v51 = vmul.u32 %v2059_v26, %v2035_v53  ;;  %vm2068_vm1 = vc.u32 %v2060_v29, %v2064_v28  ;;  %v2044_v63 = vshll.u32 %v2040_v62, 16  ;;  %vm528_vm3 = vweird.f32 %v12233_v54 }
 0x200   :  { %vm2046_vm2 = vc.u32 %v2038_v16, %v2042_v47  ;;  %v2048_v10 = vadd.s32 %v2042_v47, %v2038_v16  ;;  %v2069_v3 = vsel %vm2068_vm1, 1, %v12194_v21  ;;  %v2066_v48 = vshll.u32 %v2062_v39, 16 }
 0x201   :  { %v2047_v32 = vsel %vm2046_vm2, 1, %v12194_v21  ;;  %v2070_v55 = vadd.s32 %v2064_v28, %v2060_v29  ;;  %v2071_v0 = vadd.s32 %v2069_v3, %v2063_v51  ;;  %v969_v61 = vsub.s32 32, %v8301_v2 }
 0x202   :  { %v975_v57 = vshll.u32 %v974_v25, 23  ;;  %vm2554_vm15 = vc.u32 %v8359_v9, %v8357_v46  ;;  %v2049_v6 = vadd.s32 %v2047_v32, %v2041_v24  ;;  %v2555_v26 = vadd.s32 1, %v2551_v44 }
 0x203   :  { %v2021_v53 = vsel %vm2017_vm4, %v2001_v23, %v8281_v15  ;;  %vm2050_vm6 = vc.u32 %v2048_v10, %v2044_v63  ;;  %vm2072_vm13 = vc.u32 %v2070_v55, %v2066_v48  ;;  %v2023_v1 = vsel %vm2019_vm11, %v8283_v20, %v2022_v36 }
 0x204   :  { %v2051_v7 = vsel %vm2050_vm6, 1, %v12194_v21  ;;  %v2065_v29 = vshrl.u32 %v2061_v8, 16  ;;  %v2073_v25 = vsel %vm2072_vm13, 1, %v12194_v21  ;;  %v2043_v28 = vshrl.u32 %v2039_v35, 16 }
 0x205   :  { %v2053_v16 = vadd.s32 %v2051_v7, %v2049_v6  ;;  %v2075_v47 = vadd.s32 %v2073_v25, %v2071_v0  ;;  %v1822_v24 = vand.u32 2139095040, %v8352_v43  ;;  %v970_v51 = vshll.u32 %v8169_v52, %v8301_v2 }
 0x206   :  { %v971_v15 = vshrl.u32 %v8248_v59, %v969_v61  ;;  %v976_v23 = vor.u32 4788187, %v975_v57  ;;  %v2045_v63 = vshrl.u32 %v2040_v62, 16  ;;  %v2067_v3 = vshrl.u32 %v2062_v39, 16  ;;  %v2297_v61 = vpop.permute.xlu1 %2296 }
 0x207   :  { %v2054_v10 = vadd.s32 %v2053_v16, %v2043_v28  ;;  %v2076_v20 = vadd.s32 %v2075_v47, %v2065_v29  ;;  %v1823_v36 = vshrl.u32 %v1822_v24, 23  ;;  %v2552_v8 = vmul.u32 %v8161_v50, %v8349_v27 }
 0x208   :  { %v2556_v35 = vsel %vm2554_vm15, %v2555_v26, %v2551_v44  ;;  %v2024_v32 = vsel %vm2018_vm7, %v2021_v53, %v2023_v1  ;;  %v12090_v52 = vand.u32 2147483647, %v8352_v43  ;;  %v8393_v59 = vadd.s32 %v2070_v55, %v2066_v48  ;;  %v8427_v1 = vld [vmem:[%s12005_s6] ss:$0 sm:$0xff] }
 0x209   :  { %v8391_v2 = vadd.s32 %v2054_v10, %v2045_v63  ;;  %v2077_v62 = vadd.s32 %v2076_v20, %v2067_v3  ;;  %v5914_v39 = vadd.s32 4294967169, %v1823_v36  ;;  %v538_v0 = vsel %vm528_vm3, nan, %v8238_v33 }
 0x20a   :  { %v1639_v50 = vmul.f32 %v8243_v45, %v8146_v34  ;;  %v12263_v27 = vsub.s32 4, %v12257_v22  ;;  %v972_v44 = vor.u32 %v971_v15, %v970_v51  ;;  %v8407_v48 = vadd.s32 %v2556_v35, %v2552_v8 }
 0x20b   :  { %vm2080_vm8 = vc.u32 %v8391_v2, %v8393_v59  ;;  %v2081_v55 = vadd.s32 1, %v2077_v62  ;;  %v1829_v54 = vadd.s32 1, %v5914_v39  ;;  %v8413_v33 = vmul.f32 %v8345_v14, %v8345_v14 }
 0x20c   :  { %v8405_v37 = vsel %vm541_vm14, %v12263_v27, %v12257_v22  ;;  %v977_v45 = vand.u32 2147483647, %v976_v23  ;;  %v2078_v57 = vmul.u32 %v8314_v60, %v2024_v32  ;;  %v1826_v22 = vand.u32 8388607, %v12090_v52 }
 0x20d   :  { %v12264_v6 = vsel %vm8073_vm9, 0, %v8223_v38  ;;  %v2082_v53 = vsel %vm2080_vm8, %v2081_v55, %v2077_v62  ;;  %vm1830_vm14 = vcmp.gt.s32.totalorder %v1829_v54, 0  ;;  %v8430_v7 = vmul.f32 %v8427_v1, %v2297_v61  ;;  %v12270_v55 = vld [vmem:[#allocation15_spill] sm:$0xff] }
 0x20e   :  { %v8422_v26 = vand.u32 3, %v12264_v6  ;;  %v8433_v60 = vadd.f32 %v538_v0, %v8191_v18  ;;  %v979_v29 = vcvt.s32.f32 %v972_v44  ;;  %v2083_v25 = vadd.s32 %v2082_v53, %v2078_v57 }
 0x20f   :  { %12266 = vst [vmem:[#allocation22_spill] sm:$0xff] %v8430_v7  ;;  %v1831_v42 = vsel %vm1830_vm14, %v1829_v54, 0  ;;  %v1640_v28 = vadd.f32 1.0, %v1639_v50  ;;  %v2558_v16 = vadd.s32 536870912, %v8407_v48  ;;  %v675_v24 = vmul.f32 -0.00019511016, %v8413_v33 }
 0x210   :  { %12265 = vst [vmem:[#allocation19_spill] sm:$0xff] %v8422_v26  ;;  %v1833_v47 = vand.u32 31, %v1831_v42  ;;  %v980_v51 = vmul.f32 %v979_v29, %v977_v45  ;;  %v2084_v15 = vadd.s32 536870912, %v2083_v25  ;;  %v1827_v23 = vor.u32 8388608, %v1826_v22 }
 0x211   :  { %12267 = vst [vmem:[#allocation28_spill] sm:$0xff] %v8433_v60  ;;  %v2308_v3 = vand.u32 2139095040, %v8430_v7  ;;  %v8447_v36 = vshrl.u32 %v1831_v42, 5  ;;  %v8451_v32 = vshrl.u32 %v2558_v16, 30  ;;  %vm861_vm9 = vcmp.lt.s32.totalorder %v12270_v55, 0 }
 0x212   :  { %v8440_v63 = vsub.s32 32, %v1833_v47  ;;  %v1836_v18 = vshll.u32 %v12196_v40, %v1833_v47  ;;  %v1839_v10 = vshll.u32 %v12201_v56, %v1833_v47  ;;  %v8445_v20 = vshrl.u32 %v2084_v15, 30 }
 0x213   :  { %v1842_v8 = vshll.u32 %v12207_v58, %v1833_v47  ;;  %v1845_v35 = vshll.u32 %v12202_v12, %v1833_v47  ;;  %12269 = vst [vmem:[#allocation30_spill] sm:$0xff] %v8451_v32  ;;  %v1848_v44 = vshll.u32 %v12195_v41, %v1833_v47  ;;  %v8463_v61 = vshll.u32 %v1827_v23, 8 }
 0x214   :  { %12268 = vst [vmem:[#allocation29_spill] sm:$0xff] %v8445_v20  ;;  %v1837_v62 = vshrl.u32 %v12201_v56, %v8440_v63  ;;  %v1840_v39 = vshrl.u32 %v12207_v58, %v8440_v63  ;;  %v1843_v0 = vshrl.u32 %v12202_v12, %v8440_v63  ;;  %v2086_v50 = vshll.u32 %v8445_v20, 30 }
 0x215   :  { %v1846_v27 = vshrl.u32 %v12195_v41, %v8440_v63  ;;  %v1849_v22 = vshrl.u32 %v12203_v13, %v8440_v63  ;;  %vm1851_vm12 = vcmp.lt.s32.totalorder %v8447_v36, 1  ;;  %v2309_v29 = vshrl.u32 %v2308_v3, 23 }
 0x216   :  { %v8466_v54 = vor.u32 %v1837_v62, %v1836_v18  ;;  %v8468_v45 = vor.u32 %v1840_v39, %v1839_v10  ;;  %v8470_v57 = vor.u32 %v1843_v0, %v1842_v8  ;;  %v8474_v6 = vsub.s32 %v2083_v25, %v2086_v50 }
 0x217   :  { %v1847_v53 = vor.u32 %v1846_v27, %v1845_v35  ;;  %v2560_v42 = vshll.u32 %v8451_v32, 30  ;;  %v1850_v16 = vor.u32 %v1849_v22, %v1848_v44  ;;  %vm1853_vm10 = vcmp.lt.s32.totalorder %v8447_v36, 3 }
 0x218   :  { %vm1854_vm4 = vcmp.lt.s32.totalorder %v8447_v36, 4  ;;  %v981_v47 = vxor.u32 2147483648, %v980_v51  ;;  %v2089_v15 = vsub.s32 0, %v8474_v6  ;;  %vm1852_vm5 = vcmp.lt.s32.totalorder %v8447_v36, 2 }
 0x219   :  { %v1868_v23 = vand.u32 65535, %v8463_v61  ;;  %v12271_v25 = vand.u32 2147483647, %v12270_v55  ;;  %vm2088_vm7 = vcmp.lt.s32.totalorder %v8474_v6, 0  ;;  %v1859_v10 = vsel %vm1851_vm12, %v8466_v54, %v8468_v45 }
 0x21a   :  { %v1860_v3 = vsel %vm1854_vm4, %v1847_v53, 920167782  ;;  %v1863_v8 = vsel %vm1851_vm12, %v8468_v45, %v8470_v57  ;;  %v1864_v62 = vsel %vm1854_vm4, %v1850_v16, 1326507024  ;;  %v1869_v39 = vshrl.u32 %v8463_v61, 16 }
 0x21b   :  { %vm8485_vm11 = vcmp.le.f32.partialorder %v12271_v25, 0.7853982  ;;  %v1861_v35 = vsel %vm1853_vm10, %v8470_v57, %v1860_v3  ;;  %v5923_v0 = vadd.s32 4294967169, %v2309_v29  ;;  %v668_v50 = vmul.f32 -0.001358992, %v8413_v33 }
 0x21c   :  { %v8508_v27 = vsub.s32 %v8407_v48, %v2560_v42  ;;  %v1862_v44 = vsel %vm1852_vm5, %v1859_v10, %v1861_v35  ;;  %v1865_v22 = vsel %vm1853_vm10, %v1847_v53, %v1864_v62  ;;  %v2090_v25 = vsel %vm2088_vm7, %v2089_v15, %v8474_v6 }
 0x21d   :  { %v1866_v3 = vsel %vm1852_vm5, %v1863_v8, %v1865_v22  ;;  %v1892_v16 = vand.u32 65535, %v1862_v44  ;;  %v1893_v52 = vshrl.u32 %v1862_v44, 16  ;;  %v8518_v29 = vmul.f32 %v1640_v28, %v8128_v11 }
 0x21e   :  { %v676_v38 = vadd.f32 0.008332121, %v675_v24  ;;  %v1870_v32 = vand.u32 65535, %v1866_v3  ;;  %v1871_v48 = vshrl.u32 %v1866_v3, 16  ;;  %v982_v42 = vsel %vm861_vm9, %v981_v47, %v980_v51 }
 0x21f   :  { %12274 = vst [vmem:[#allocation15_spill] sm:$0xff] %v8518_v29  ;;  %v1895_v10 = vmul.u32 %v1893_v52, %v1868_v23  ;;  %v1896_v35 = vmul.u32 %v1892_v16, %v1869_v39  ;;  %v2315_v26 = vadd.s32 1, %v5923_v0  ;;  %v2091_v53 = vclz %v2090_v25 }
 0x220   :  { %v1872_v62 = vmul.u32 %v1870_v32, %v1868_v23  ;;  %v1873_v15 = vmul.u32 %v1871_v48, %v1868_v23  ;;  %v1874_v34 = vmul.u32 %v1870_v32, %v1869_v39  ;;  %v669_v60 = vadd.f32 0.041655596, %v668_v50 }
 0x221   :  { %v2563_v8 = vsub.s32 0, %v8508_v27  ;;  %v1894_v44 = vmul.u32 %v1892_v16, %v1868_v23  ;;  %v1898_v22 = vshll.u32 %v1895_v10, 16  ;;  %v677_v11 = vmul.f32 %v676_v38, %v8413_v33 }
 0x222   :  { %vm2562_vm1 = vcmp.lt.s32.totalorder %v8508_v27, 0  ;;  %v1875_v28 = vmul.u32 %v1871_v48, %v1869_v39  ;;  %v1876_v24 = vshll.u32 %v1873_v15, 16  ;;  %v8528_v51 = vsel %vm8485_vm11, %v12270_v55, %v982_v42 }
 0x223   :  { %v1878_v47 = vshll.u32 %v1874_v34, 16  ;;  %v1900_v0 = vshll.u32 %v1896_v35, 16  ;;  %vm2316_vm2 = vcmp.gt.s32.totalorder %v2315_v26, 0  ;;  %v5918_v32 = vadd.s32 4294967294, %v2091_v53 }
 0x224   :  { %vm1880_vm3 = vc.u32 %v1872_v62, %v1876_v24  ;;  %v1882_v50 = vadd.s32 %v1876_v24, %v1872_v62  ;;  %v1897_v25 = vmul.u32 %v1893_v52, %v1869_v39  ;;  %v2564_v23 = vsel %vm2562_vm1, %v2563_v8, %v8508_v27 }
 0x225   :  { %v1881_v38 = vsel %vm1880_vm3, 1, %v12194_v21  ;;  %vm1902_vm15 = vc.u32 %v1894_v44, %v1898_v22  ;;  %v1904_v3 = vadd.s32 %v1898_v22, %v1894_v44  ;;  %v1835_v16 = vshrl.u32 %v12196_v40, %v8440_v63 }
 0x226   :  { %v1883_v48 = vadd.s32 %v1881_v38, %v1875_v28  ;;  %vm1884_vm6 = vc.u32 %v1882_v50, %v1878_v47  ;;  %v2317_v42 = vsel %vm2316_vm2, %v2315_v26, 0  ;;  %v1856_v49 = vsel %vm1854_vm4, %v8470_v57, 2102212464 }
 0x227   :  { %v1885_v53 = vsel %vm1884_vm6, 1, %v12194_v21  ;;  %v1903_v52 = vsel %vm1902_vm15, 1, %v12194_v21  ;;  %vm1906_vm13 = vc.u32 %v1904_v3, %v1900_v0  ;;  %vm5919_vm8 = vcmp.lt.s32.totalorder %v5918_v32, 0 }
 0x228   :  { %v1877_v39 = vshrl.u32 %v1873_v15, 16  ;;  %v1887_v62 = vadd.s32 %v1885_v53, %v1883_v48  ;;  %v1905_v8 = vadd.s32 %v1903_v52, %v1897_v25  ;;  %v8541_v44 = vmul.f32 %v8528_v51, %v8528_v51 }
 0x229   :  { %v2565_v63 = vclz %v2564_v23  ;;  %v1907_v26 = vsel %vm1906_vm13, 1, %v12194_v21  ;;  %v8544_v22 = vand.u32 31, %v2317_v42  ;;  %v1879_v28 = vshrl.u32 %v1874_v34, 16 }
 0x22a   :  { %v1888_v57 = vadd.s32 %v1887_v62, %v1877_v39  ;;  %v1899_v24 = vshrl.u32 %v1895_v10, 16  ;;  %v1909_v47 = vadd.s32 %v1907_v26, %v1905_v8  ;;  %v12275_v50 = vsel %vm8291_vm0, 0, %v8405_v37 }
 0x22b   :  { %v8550_v15 = vand.u32 3, %v12275_v50  ;;  %v8552_v25 = vsel %vm5919_vm8, 0, %v5918_v32  ;;  %v1855_v23 = vsel %vm1851_vm12, %v1835_v16, %v8466_v54  ;;  %v1857_v38 = vsel %vm1853_vm10, %v8468_v45, %v1856_v49 }
 0x22c   :  { %v8560_v34 = vadd.s32 %v1888_v57, %v1879_v28  ;;  %v1901_v10 = vshrl.u32 %v1896_v35, 16  ;;  %v1910_v48 = vadd.s32 %v1909_v47, %v1899_v24  ;;  %v8563_v4 = vsub.s32 32, %v8544_v22 }
 0x22d   :  { %v670_v32 = vmul.f32 %v669_v60, %v8413_v33  ;;  %v983_v53 = vsub.s32 4, %v8117_v17  ;;  %v8568_v52 = vadd.s32 %v1904_v3, %v1900_v0  ;;  %v678_v54 = vadd.f32 -0.16666654, %v677_v11 }
 0x22e   :  { %v995_v16 = vmul.f32 -0.00019511016, %v8541_v44  ;;  %v5927_v39 = vadd.s32 4294967294, %v2565_v63  ;;  %v1911_v49 = vadd.s32 %v1910_v48, %v1901_v10  ;;  %v2099_v45 = vsub.s32 4294967266, %v8552_v25 }
 0x22f   :  { %v1858_v35 = vsel %vm1852_vm5, %v1855_v23, %v1857_v38  ;;  %vm1914_vm0 = vc.u32 %v8560_v34, %v8568_v52  ;;  %v12099_v62 = vand.u32 2147483647, %v8430_v7  ;;  %v2326_v0 = vshrl.u32 %v12207_v58, %v8563_v4 }
 0x230   :  { %v1915_v60 = vadd.s32 1, %v1911_v49  ;;  %v2334_v11 = vshll.u32 %v12195_v41, %v8544_v22  ;;  %v2335_v3 = vshrl.u32 %v12203_v13, %v8563_v4  ;;  %v988_v8 = vmul.f32 -0.001358992, %v8541_v44 }
 0x231   :  { %v8584_v63 = vshrl.u32 %v2317_v42, 5  ;;  %v2329_v36 = vshrl.u32 %v12202_v12, %v8563_v4  ;;  %v2332_v26 = vshrl.u32 %v12195_v41, %v8563_v4  ;;  %v996_v28 = vadd.f32 0.008332121, %v995_v16 }
 0x232   :  { %v1916_v57 = vsel %vm1914_vm0, %v1915_v60, %v1911_v49  ;;  %v2325_v24 = vshll.u32 %v12201_v56, %v8544_v22  ;;  %v2336_v47 = vor.u32 %v2335_v3, %v2334_v11  ;;  %v2100_v50 = vadd.s32 127, %v2099_v45 }
 0x233   :  { %v1912_v23 = vmul.u32 %v8463_v61, %v1858_v35  ;;  %v2328_v38 = vshll.u32 %v12207_v58, %v8544_v22  ;;  %v2331_v42 = vshll.u32 %v12202_v12, %v8544_v22  ;;  %vm5928_vm14 = vcmp.lt.s32.totalorder %v5927_v39, 0 }
 0x234   :  { %v2095_v10 = vsub.s32 32, %v8552_v25  ;;  %v2312_v48 = vand.u32 8388607, %v12099_v62  ;;  %v8600_v16 = vor.u32 %v2326_v0, %v2325_v24  ;;  %vm2340_vm12 = vcmp.lt.s32.totalorder %v8584_v63, 4 }
 0x235   :  { %v8602_v49 = vadd.s32 %v1916_v57, %v1912_v23  ;;  %v8604_v60 = vor.u32 %v2329_v36, %v2328_v38  ;;  %v2333_v45 = vor.u32 %v2332_v26, %v2331_v42  ;;  %v671_v61 = vadd.f32 -0.4999988, %v670_v32 }
 0x236   :  { %v679_v35 = vmul.f32 %v678_v54, %v8413_v33  ;;  %v989_v11 = vadd.f32 0.041655596, %v988_v8  ;;  %v2350_v3 = vsel %vm2340_vm12, %v2336_v47, 1326507024  ;;  %v997_v37 = vmul.f32 %v996_v28, %v8541_v44 }
 0x237   :  { %v8611_v29 = vsel %vm5928_vm14, 0, %v5927_v39  ;;  %v2079_v0 = vadd.s32 %v8393_v59, %v8391_v2  ;;  %v2101_v57 = vshll.u32 %v2100_v50, 23  ;;  %v2313_v36 = vor.u32 8388608, %v2312_v48 }
 0x238   :  { %v2323_v26 = vshrl.u32 %v12201_v56, %v8563_v4  ;;  %vm2337_vm10 = vcmp.lt.s32.totalorder %v8584_v63, 1  ;;  %vm2339_vm4 = vcmp.lt.s32.totalorder %v8584_v63, 3  ;;  %v1918_v54 = vadd.s32 536870912, %v8602_v49 }
 0x239   :  { %v2097_v32 = vshrl.u32 %v2079_v0, %v2095_v10  ;;  %v2349_v39 = vsel %vm2337_vm10, %v8600_v16, %v8604_v60  ;;  %v2351_v2 = vsel %vm2339_vm4, %v2333_v45, %v2350_v3  ;;  %v672_v59 = vmul.f32 %v671_v61, %v8413_v33  ;;  %v8639_v33 = vld [vmem:[%s12005_s6] ss:$0 sm:$0xff] }
 0x23a   :  { %v680_v8 = vadd.f32 1.0, %v679_v35  ;;  %v984_v28 = vsel %vm861_vm9, %v983_v53, %v8117_v17  ;;  %v2322_v24 = vshll.u32 %v12196_v40, %v8544_v22  ;;  %v990_v47 = vmul.f32 %v989_v11, %v8541_v44  ;;  %v3293_v11 = vpop.permute.xlu2 %3292 }
 0x23b   :  { %v2096_v50 = vshll.u32 %v8474_v6, %v8552_v25  ;;  %v2102_v23 = vor.u32 4788187, %v2101_v57  ;;  %vm2338_vm5 = vcmp.lt.s32.totalorder %v8584_v63, 2  ;;  %v998_v38 = vadd.f32 -0.16666654, %v997_v37 }
 0x23c   :  { %v2573_v42 = vsub.s32 4294967266, %v8611_v29  ;;  %v8642_v17 = vor.u32 %v2323_v26, %v2322_v24  ;;  %v8646_v22 = vsel %vm2338_vm5, %v2349_v39, %v2351_v2  ;;  %v8648_v10 = vshrl.u32 %v1918_v54, 30 }
 0x23d   :  { %v2098_v53 = vor.u32 %v2097_v32, %v2096_v50  ;;  %v2346_v6 = vsel %vm2340_vm12, %v2333_v45, 920167782  ;;  %v8652_v25 = vshll.u32 %v2313_v36, 8  ;;  %v673_v48 = vadd.f32 1.0, %v672_v59 }
 0x23e   :  { %12276 = vst [vmem:[#allocation31_spill] sm:$0xff] %v8648_v10  ;;  %v681_v61 = vmul.f32 %v680_v8, %v8345_v14  ;;  %v2553_v37 = vadd.s32 %v8357_v46, %v8359_v9  ;;  %v2569_v35 = vsub.s32 32, %v8611_v29  ;;  %v991_v3 = vadd.f32 -0.4999988, %v990_v47 }
 0x23f   :  { %v2103_v0 = vand.u32 2147483647, %v2102_v23  ;;  %v2357_v57 = vshrl.u32 %v8646_v22, 16  ;;  %v8660_v26 = vmul.f32 %v8639_v33, %v3293_v11  ;;  %v999_v45 = vmul.f32 %v998_v38, %v8541_v44 }
 0x240   :  { %v2574_v36 = vadd.s32 127, %v2573_v42  ;;  %v2345_v14 = vsel %vm2337_vm10, %v8642_v17, %v8600_v16  ;;  %v2347_v46 = vsel %vm2339_vm4, %v8604_v60, %v2346_v6  ;;  %vm685_vm9 = vcmp.eq.s32.totalorder %v8550_v15, 0 }
 0x241   :  { %12277 = vst [vmem:[#allocation32_spill] sm:$0xff] %v8660_v26  ;;  %v2105_v9 = vcvt.s32.f32 %v2098_v53  ;;  %v1920_v32 = vshll.u32 %v8648_v10, 30  ;;  %v2354_v54 = vand.u32 65535, %v8652_v25  ;;  %v686_v39 = vxor.u32 2147483648, %v681_v61 }
 0x242   :  { %v689_v2 = vxor.u32 2147483648, %v673_v48  ;;  %v986_v59 = vsel %vm8485_vm11, 0, %v984_v28  ;;  %v2571_v8 = vshrl.u32 %v2553_v37, %v2569_v35  ;;  %v8677_v47 = vsel %vm2338_vm5, %v2345_v14, %v2347_v46 }
 0x243   :  { %v2106_v24 = vmul.f32 %v2105_v9, %v2103_v0  ;;  %v8681_v50 = vmul.u32 %v2357_v57, %v2354_v54  ;;  %v3304_v23 = vand.u32 2139095040, %v8660_v26  ;;  %vm688_vm7 = vcmp.eq.s32.totalorder %v8550_v15, 2 }
 0x244   :  { %v992_v38 = vmul.f32 %v991_v3, %v8541_v44  ;;  %v1000_v42 = vadd.f32 1.0, %v999_v45  ;;  %v2575_v53 = vshll.u32 %v2574_v36, 23  ;;  %v2570_v18 = vshll.u32 %v8508_v27, %v8611_v29 }
 0x245   :  { %vm1987_vm11 = vcmp.lt.s32.totalorder %v8114_v19, 0  ;;  %v8690_v28 = vsub.s32 %v8602_v49, %v1920_v32  ;;  %v2356_v6 = vand.u32 65535, %v8646_v22  ;;  %v8695_v37 = vsel %vm685_vm9, %v673_v48, %v686_v39 }
 0x246   :  { %v8697_v35 = vsel %vm688_vm7, %v689_v2, %v681_v61  ;;  %v8699_v11 = vand.u32 3, %v986_v59  ;;  %v12278_v44 = vand.u32 2147483647, %v8114_v19  ;;  %v12279_v3 = vmov 0 }
 0x247   :  { %v2379_v27 = vshrl.u32 %v8677_v47, 16  ;;  %v8708_v29 = vor.u32 %v2571_v8, %v2570_v18  ;;  %v2107_v49 = vxor.u32 2147483648, %v2106_v24  ;;  %v2362_v0 = vshll.u32 %v8681_v50, 16 }
 0x248   :  { %vm8703_vm1 = vcmp.le.f32.partialorder %v12278_v44, 0.7853982  ;;  %v3305_v45 = vshrl.u32 %v3304_v23, 23  ;;  %v8711_v48 = vadd.f32 1.0, %v992_v38  ;;  %v8714_v61 = vmul.f32 %v1000_v42, %v8528_v51 }
 0x249   :  { %v12280_v3 = vsel %vm8703_vm1, 4294967295, %v12279_v3  ;;  %v8716_v36 = vor.u32 4788187, %v2575_v53  ;;  %v2321_v14 = vshrl.u32 %v12196_v40, %v8563_v4  ;;  %v1923_v46 = vsub.s32 0, %v8690_v28 }
 0x24a   :  { %12281 = vst [vmem:[#allocation33_spill] sm:$0xff] %v12280_v3  ;;  %v2342_v9 = vsel %vm2340_vm12, %v8604_v60, 2102212464  ;;  %v2358_v32 = vmul.u32 %v2356_v6, %v2354_v54  ;;  %v6024_v39 = vadd.s32 4294967169, %v3305_v45  ;;  %vm1922_vm2 = vcmp.lt.s32.totalorder %v8690_v28, 0 }
 0x24b   :  { %v2355_v2 = vshrl.u32 %v8652_v25, 16  ;;  %v8726_v59 = vmul.u32 %v2379_v27, %v2354_v54  ;;  %v12100_v51 = vand.u32 2147483647, %v8660_v26  ;;  %v2108_v4 = vsel %vm1987_vm11, %v2107_v49, %v2106_v24 }
 0x24c   :  { %vm2366_vm3 = vc.u32 %v2358_v32, %v2362_v0  ;;  %v3311_v23 = vadd.s32 1, %v6024_v39  ;;  %v2341_v60 = vsel %vm2337_vm10, %v2321_v14, %v8642_v17  ;;  %v2343_v38 = vsel %vm2339_vm4, %v8600_v16, %v2342_v9 }
 0x24d   :  { %v8738_v42 = vmul.u32 %v2356_v6, %v2355_v2  ;;  %v2378_v53 = vand.u32 65535, %v8677_v47  ;;  %v8743_v18 = vadd.s32 %v8568_v52, %v8560_v34  ;;  %v1924_v24 = vsel %vm1922_vm2, %v1923_v46, %v8690_v28 }
 0x24e   :  { %v2368_v44 = vadd.s32 %v2362_v0, %v2358_v32  ;;  %vm3312_vm15 = vcmp.gt.s32.totalorder %v3311_v23, 0  ;;  %v2367_v49 = vsel %vm2366_vm3, 1, %v12194_v21  ;;  %v2384_v17 = vshll.u32 %v8726_v59, 16 }
 0x24f   :  { %v3308_v45 = vand.u32 8388607, %v12100_v51  ;;  %v3313_v16 = vsel %vm3312_vm15, %v3311_v23, 0  ;;  %v8753_v47 = vsel %vm8703_vm1, %v8114_v19, %v2108_v4  ;;  %v8757_v34 = vsel %vm2338_vm5, %v2341_v60, %v2343_v38  ;;  %v1981_v60 = vpop.permute.xlu1 %1980 }
 0x250   :  { %12282 = vst [vmem:[#allocation34_spill] sm:$0xff] %v8753_v47  ;;  %v2361_v52 = vmul.u32 %v2357_v57, %v2355_v2  ;;  %v3315_v6 = vand.u32 31, %v3313_v16  ;;  %v1925_v0 = vclz %v1924_v24  ;;  %v2364_v14 = vshll.u32 %v8738_v42, 16 }
 0x251   :  { %v2380_v46 = vmul.u32 %v2378_v53, %v2354_v54  ;;  %v8762_v9 = vmul.u32 %v2378_v53, %v2355_v2  ;;  %v3309_v54 = vor.u32 8388608, %v3308_v45  ;;  %v8778_v38 = vshrl.u32 %v3313_v16, 5 }
 0x252   :  { %v2369_v32 = vadd.s32 %v2367_v49, %v2361_v52  ;;  %v8764_v39 = vsub.s32 32, %v3315_v6  ;;  %v3318_v4 = vshll.u32 %v12196_v40, %v3315_v6  ;;  %v3321_v23 = vshll.u32 %v12201_v56, %v3315_v6 }
 0x253   :  { %vm8768_vm6 = vc.u32 %v2368_v44, %v2364_v14  ;;  %vm8772_vm13 = vc.u32 %v2380_v46, %v2384_v17  ;;  %v8776_v57 = vadd.s32 %v2384_v17, %v2380_v46  ;;  %v3324_v44 = vshll.u32 %v12207_v58, %v3315_v6 }
 0x254   :  { %v3319_v53 = vshrl.u32 %v12201_v56, %v8764_v39  ;;  %v3322_v24 = vshrl.u32 %v12207_v58, %v8764_v39  ;;  %v2383_v49 = vmul.u32 %v2379_v27, %v2355_v2  ;;  %v3325_v52 = vshrl.u32 %v12202_v12, %v8764_v39 }
 0x255   :  { %v3327_v14 = vshll.u32 %v12202_v12, %v3315_v6  ;;  %v3330_v17 = vshll.u32 %v12195_v41, %v3315_v6  ;;  %v12101_v45 = vshll.u32 %v8762_v9, 16  ;;  %v8795_v62 = vmul.f32 %v8427_v1, %v1981_v60 }
 0x256   :  { %v8790_v16 = vor.u32 %v3319_v53, %v3318_v4  ;;  %v8792_v46 = vor.u32 %v3322_v24, %v3321_v23  ;;  %v5915_v51 = vadd.s32 4294967294, %v1925_v0  ;;  %v2389_v27 = vsel %vm8772_vm13, 1, %v12194_v21 }
 0x257   :  { %12287 = vst [vmem:[#allocation35_spill] sm:$0xff] %v8795_v62  ;;  %v3328_v2 = vshrl.u32 %v12195_v41, %v8764_v39  ;;  %v3331_v6 = vshrl.u32 %v12203_v13, %v8764_v39  ;;  %vm8807_vm8 = vc.u32 %v8776_v57, %v12101_v45  ;;  %v8811_v1 = vor.u32 %v3325_v52, %v3324_v44 }
 0x258   :  { %vm3333_vm0 = vcmp.lt.s32.totalorder %v8778_v38, 1  ;;  %v8814_v0 = vshll.u32 %v3309_v54, 8  ;;  %vm3335_vm14 = vcmp.lt.s32.totalorder %v8778_v38, 3  ;;  %vm3336_vm12 = vcmp.lt.s32.totalorder %v8778_v38, 4 }
 0x259   :  { %v3329_v23 = vor.u32 %v3328_v2, %v3327_v14  ;;  %v3332_v22 = vor.u32 %v3331_v6, %v3330_v17  ;;  %v2371_v60 = vsel %vm8768_vm6, 1, %v12194_v21  ;;  %vm3334_vm10 = vcmp.lt.s32.totalorder %v8778_v38, 2 }
 0x25a   :  { %v3341_v53 = vsel %vm3333_vm0, %v8790_v16, %v8792_v46  ;;  %v2142_v54 = vand.u32 2139095040, %v8795_v62  ;;  %v8829_v24 = vmul.f32 %v8753_v47, %v8753_v47  ;;  %v2391_v44 = vadd.s32 %v2389_v27, %v2383_v49 }
 0x25b   :  { %v3342_v63 = vsel %vm3336_vm12, %v3329_v23, 920167782  ;;  %v2393_v14 = vsel %vm8807_vm8, 1, %v12194_v21  ;;  %v3345_v2 = vsel %vm3333_vm0, %v8792_v46, %v8811_v1  ;;  %v3350_v49 = vand.u32 65535, %v8814_v0 }
 0x25c   :  { %12290 = vst [vmem:[#allocation36_spill] sm:$0xff] %v8829_v24  ;;  %v3343_v17 = vsel %vm3335_vm14, %v8811_v1, %v3342_v63  ;;  %vm5916_vm4 = vcmp.lt.s32.totalorder %v5915_v51, 0  ;;  %v2373_v27 = vadd.s32 %v2371_v60, %v2369_v32  ;;  %v3346_v4 = vsel %vm3336_vm12, %v3332_v22, 1326507024 }
 0x25d   :  { %v3344_v6 = vsel %vm3334_vm10, %v3341_v53, %v3343_v17  ;;  %v3347_v8 = vsel %vm3335_vm14, %v3329_v23, %v3346_v4  ;;  %v3351_v63 = vshrl.u32 %v8814_v0, 16  ;;  %v2143_v45 = vshrl.u32 %v2142_v54, 23 }
 0x25e   :  { %v3375_v52 = vshrl.u32 %v3344_v6, 16  ;;  %v2363_v3 = vshrl.u32 %v8681_v50, 16  ;;  %v2395_v5 = vadd.s32 %v2393_v14, %v2391_v44  ;;  %v3348_v7 = vsel %vm3334_vm10, %v3345_v2, %v3347_v8 }
 0x25f   :  { %v3374_v32 = vand.u32 65535, %v3344_v6  ;;  %v2365_v60 = vshrl.u32 %v8738_v42, 16  ;;  %v3352_v53 = vand.u32 65535, %v3348_v7  ;;  %v3353_v17 = vshrl.u32 %v3348_v7, 16 }
 0x260   :  { %v8857_v26 = vmul.u32 %v3375_v52, %v3350_v49  ;;  %v8860_v22 = vsel %vm5916_vm4, 0, %v5915_v51  ;;  %v2374_v23 = vadd.s32 %v2373_v27, %v2363_v3  ;;  %v2385_v4 = vshrl.u32 %v8726_v59, 16 }
 0x261   :  { %v2387_v54 = vshrl.u32 %v8762_v9, 16  ;;  %v3354_v50 = vmul.u32 %v3352_v53, %v3350_v49  ;;  %v3355_v44 = vmul.u32 %v3353_v17, %v3350_v49  ;;  %v3356_v14 = vmul.u32 %v3352_v53, %v3351_v63 }
 0x262   :  { %v5920_v47 = vadd.s32 4294967169, %v2143_v45  ;;  %v2396_v8 = vadd.s32 %v2395_v5, %v2385_v4  ;;  %v3376_v2 = vmul.u32 %v3374_v32, %v3350_v49  ;;  %v3378_v6 = vmul.u32 %v3374_v32, %v3351_v63 }
 0x263   :  { %v12121_v42 = vand.u32 2147483647, %v8795_v62  ;;  %v3357_v7 = vmul.u32 %v3353_v17, %v3351_v63  ;;  %v3358_v19 = vshll.u32 %v3355_v44, 16  ;;  %v3360_v20 = vshll.u32 %v3356_v14, 16 }
 0x264   :  { %v3380_v51 = vshll.u32 %v8857_v26, 16  ;;  %v1929_v3 = vsub.s32 32, %v8860_v22  ;;  %v1933_v59 = vsub.s32 4294967266, %v8860_v22  ;;  %v8868_v27 = vadd.s32 %v2374_v23, %v2365_v60 }
 0x265   :  { %v12291_v10 = vshll.u32 %v8762_v9, 16  ;;  %vm3362_vm5 = vc.u32 %v3354_v50, %v3358_v19  ;;  %v3364_v5 = vadd.s32 %v3358_v19, %v3354_v50  ;;  %v3379_v49 = vmul.u32 %v3375_v52, %v3351_v63 }
 0x266   :  { %v2149_v32 = vadd.s32 1, %v5920_v47  ;;  %v2397_v53 = vadd.s32 %v2396_v8, %v2387_v54  ;;  %v3359_v17 = vshrl.u32 %v3355_v44, 16  ;;  %v3363_v4 = vsel %vm3362_vm5, 1, %v12194_v21 }
 0x267   :  { %v8873_v45 = vadd.s32 %v8776_v57, %v12291_v10  ;;  %v2146_v43 = vand.u32 8388607, %v12121_v42  ;;  %v3365_v31 = vadd.s32 %v3363_v4, %v3357_v7  ;;  %vm3366_vm9 = vc.u32 %v3364_v5, %v3360_v20 }
 0x268   :  { %v3382_v60 = vshll.u32 %v3378_v6, 16  ;;  %vm3384_vm7 = vc.u32 %v3376_v2, %v3380_v51  ;;  %v3317_v9 = vshrl.u32 %v12196_v40, %v8764_v39  ;;  %v3338_v19 = vsel %vm3336_vm12, %v8811_v1, 2102212464 }
 0x269   :  { %v3367_v10 = vsel %vm3366_vm9, 1, %v12194_v21  ;;  %v3385_v47 = vsel %vm3384_vm7, 1, %v12194_v21  ;;  %v3386_v52 = vadd.s32 %v3380_v51, %v3376_v2  ;;  %vm2150_vm2 = vcmp.gt.s32.totalorder %v2149_v32, 0 }
 0x26a   :  { %v3369_v57 = vadd.s32 %v3367_v10, %v3365_v31  ;;  %v3387_v63 = vadd.s32 %v3385_v47, %v3379_v49  ;;  %v8886_v23 = vshrl.u32 %v8743_v18, %v1929_v3  ;;  %v2401_v20 = vadd.s32 1, %v2397_v53 }
 0x26b   :  { %v3361_v54 = vshrl.u32 %v3356_v14, 16  ;;  %v2151_v50 = vsel %vm2150_vm2, %v2149_v32, 0  ;;  %vm2400_vm3 = vc.u32 %v8868_v27, %v8873_v45  ;;  %v3381_v1 = vshrl.u32 %v8857_v26, 16 }
 0x26c   :  { %v3370_v39 = vadd.s32 %v3369_v57, %v3359_v17  ;;  %vm3388_vm15 = vc.u32 %v3386_v52, %v3382_v60  ;;  %v3337_v31 = vsel %vm3333_vm0, %v3317_v9, %v8790_v16  ;;  %v3339_v44 = vsel %vm3335_vm14, %v8792_v46, %v3338_v19 }
 0x26d   :  { %v3389_v18 = vsel %vm3388_vm15, 1, %v12194_v21  ;;  %v2153_v8 = vand.u32 31, %v2151_v50  ;;  %v1934_v14 = vadd.s32 127, %v1933_v59  ;;  %v3383_v2 = vshrl.u32 %v3378_v6, 16 }
 0x26e   :  { %v3391_v7 = vadd.s32 %v3389_v18, %v3387_v63  ;;  %v2147_v51 = vor.u32 8388608, %v2146_v43  ;;  %v2402_v3 = vsel %vm2400_vm3, %v2401_v20, %v2397_v53  ;;  %v8898_v5 = vadd.s32 %v3370_v39, %v3361_v54 }
 0x26f   :  { %v8900_v26 = vadd.s32 %v3386_v52, %v3382_v60  ;;  %v8902_v49 = vsub.s32 32, %v2153_v8  ;;  %v3340_v16 = vsel %vm3334_vm10, %v3337_v31, %v3339_v44  ;;  %v8906_v17 = vshrl.u32 %v2151_v50, 5 }
 0x270   :  { %v3392_v32 = vadd.s32 %v3391_v7, %v3381_v1  ;;  %v2156_v46 = vshll.u32 %v12196_v40, %v2153_v8  ;;  %v2159_v43 = vshll.u32 %v12201_v56, %v2153_v8  ;;  %v2162_v53 = vshll.u32 %v12207_v58, %v2153_v8 }
 0x271   :  { %v2157_v6 = vshrl.u32 %v12201_v56, %v8902_v49  ;;  %v2160_v59 = vshrl.u32 %v12207_v58, %v8902_v49  ;;  %v2163_v38 = vshrl.u32 %v12202_v12, %v8902_v49  ;;  %v2165_v60 = vshll.u32 %v12202_v12, %v2153_v8 }
 0x272   :  { %v3393_v4 = vadd.s32 %v3392_v32, %v3383_v2  ;;  %v2166_v9 = vshrl.u32 %v12195_v41, %v8902_v49  ;;  %v12292_v19 = vmul.u32 %v8652_v25, %v8757_v34  ;;  %vm3396_vm6 = vc.u32 %v8898_v5, %v8900_v26 }
 0x273   :  { %v8927_v47 = vor.u32 %v2157_v6, %v2156_v46  ;;  %v8929_v57 = vor.u32 %v2160_v59, %v2159_v43  ;;  %vm684_vm13 = vcmp.lt.s32.totalorder %v8550_v15, 2  ;;  %v3394_v52 = vmul.u32 %v8814_v0, %v3340_v16 }
 0x274   :  { %v8923_v10 = vadd.s32 %v2402_v3, %v12292_v19  ;;  %v3397_v63 = vadd.s32 1, %v3393_v4  ;;  %v8933_v20 = vor.u32 %v2163_v38, %v2162_v53  ;;  %v2167_v54 = vor.u32 %v2166_v9, %v2165_v60 }
 0x275   :  { %v1935_v50 = vshll.u32 %v1934_v14, 23  ;;  %v2168_v25 = vshll.u32 %v12195_v41, %v2153_v8  ;;  %v2169_v34 = vshrl.u32 %v12203_v13, %v8902_v49  ;;  %vm2171_vm8 = vcmp.lt.s32.totalorder %v8906_v17, 1 }
 0x276   :  { %v3398_v39 = vsel %vm3396_vm6, %v3397_v63, %v3393_v4  ;;  %vm2174_vm0 = vcmp.lt.s32.totalorder %v8906_v17, 4  ;;  %v2179_v0 = vsel %vm2171_vm8, %v8927_v47, %v8929_v57  ;;  %v8944_v1 = vshll.u32 %v2147_v51, 8 }
 0x277   :  { %v2404_v31 = vadd.s32 536870912, %v8923_v10  ;;  %v2170_v44 = vor.u32 %v2169_v34, %v2168_v25  ;;  %vm2173_vm14 = vcmp.lt.s32.totalorder %v8906_v17, 3  ;;  %v2180_v18 = vsel %vm2174_vm0, %v2167_v54, 920167782 }
 0x278   :  { %v8950_v8 = vadd.s32 %v3398_v39, %v3394_v52  ;;  %vm2172_vm12 = vcmp.lt.s32.totalorder %v8906_v17, 2  ;;  %v2181_v14 = vsel %vm2173_vm14, %v8933_v20, %v2180_v18  ;;  %v2183_v2 = vsel %vm2171_vm8, %v8929_v57, %v8933_v20 }
 0x279   :  { %vm682_vm10 = vweird.f32 %v12256_v30  ;;  %vm1008_vm4 = vcmp.eq.s32.totalorder %v8699_v11, 2  ;;  %v2577_v7 = vand.u32 2147483647, %v8716_v36  ;;  %v1930_v51 = vshll.u32 %v8690_v28, %v8860_v22  ;;  %v4253_v22 = vpop.permute.xlu2 %4252 }
 0x27a   :  { %v2182_v3 = vsel %vm2172_vm12, %v2179_v0, %v2181_v14  ;;  %v2184_v16 = vsel %vm2174_vm0, %v2170_v44, 1326507024  ;;  %v1936_v32 = vor.u32 4788187, %v1935_v50  ;;  %v2188_v6 = vand.u32 65535, %v8944_v1 }
 0x27b   :  { %v2185_v46 = vsel %vm2173_vm14, %v2167_v54, %v2184_v16  ;;  %v2213_v43 = vshrl.u32 %v2182_v3, 16  ;;  %v2121_v59 = vmul.f32 -0.00019511016, %v8829_v24  ;;  %v1932_v36 = vor.u32 %v8886_v23, %v1930_v51 }
 0x27c   :  { %v8974_v53 = vshrl.u32 %v2404_v31, 30  ;;  %v2186_v28 = vsel %vm2172_vm12, %v2183_v2, %v2185_v46  ;;  %v3400_v4 = vadd.s32 536870912, %v8950_v8  ;;  %v8982_v9 = vmul.f32 %v8639_v33, %v4253_v22 }
 0x27d   :  { %v2191_v38 = vshrl.u32 %v2186_v28, 16  ;;  %v8979_v60 = vmul.u32 %v2213_v43, %v2188_v6  ;;  %v691_v19 = vsel %vm684_vm13, %v8695_v37, %v8697_v35  ;;  %v1009_v23 = vxor.u32 2147483648, %v8711_v48 }
 0x27e   :  { %12293 = vst [vmem:[#allocation37_spill] sm:$0xff] %v8974_v53  ;;  %v2190_v52 = vand.u32 65535, %v2186_v28  ;;  %v2212_v63 = vand.u32 65535, %v2182_v3  ;;  %v1006_v54 = vxor.u32 2147483648, %v8714_v61  ;;  %v12294_v50 = vcvt.s32.f32 %v8708_v29 }
 0x27f   :  { %v1937_v34 = vand.u32 2147483647, %v1936_v32  ;;  %v8992_v39 = vmul.u32 %v2191_v38, %v2188_v6  ;;  %vm1004_vm5 = vcmp.lt.s32.totalorder %v8699_v11, 2  ;;  %v2122_v0 = vadd.f32 0.008332121, %v2121_v59  ;;  %v12295_v32 = vld [vmem:[#allocation13_spill] sm:$0xff] }
 0x280   :  { %v2580_v25 = vmul.f32 %v12294_v50, %v2577_v7  ;;  %v1939_v31 = vcvt.s32.f32 %v1932_v36  ;;  %v2189_v44 = vshrl.u32 %v8944_v1, 16  ;;  %v2218_v15 = vshll.u32 %v8979_v60, 16 }
 0x281   :  { %v2406_v37 = vshll.u32 %v8974_v53, 30  ;;  %v8998_v35 = vshrl.u32 %v3400_v4, 30  ;;  %v2196_v18 = vshll.u32 %v8992_v39, 16  ;;  %v4264_v29 = vand.u32 2139095040, %v8982_v9 }
 0x282   :  { %v2192_v14 = vmul.u32 %v2190_v52, %v2188_v6  ;;  %v9002_v2 = vmul.u32 %v2190_v52, %v2189_v44  ;;  %v2214_v7 = vmul.u32 %v2212_v63, %v2188_v6  ;;  %v9004_v51 = vmul.u32 %v2212_v63, %v2189_v44 }
 0x283   :  { %v692_v3 = vsel %vm682_vm10, nan, %v691_v19  ;;  %vm1002_vm9 = vweird.f32 %v12270_v55  ;;  %vm1005_vm7 = vcmp.eq.s32.totalorder %v8699_v11, 0  ;;  %v1010_v16 = vsel %vm1008_vm4, %v1009_v23, %v8714_v61 }
 0x284   :  { %vm12149_vm2 = vcmp.lt.s32.totalorder %v12295_v32, 0  ;;  %v1940_v46 = vmul.f32 %v1939_v31, %v1937_v34  ;;  %vm2200_vm3 = vc.u32 %v2192_v14, %v2196_v18  ;;  %v2202_v59 = vadd.s32 %v2196_v18, %v2192_v14  ;;  %v12302_v14 = vld [vmem:[#allocation20_spill] sm:$0xff] }
 0x285   :  { %vm2222_vm15 = vc.u32 %v2214_v7, %v2218_v15  ;;  %v9014_v6 = vadd.s32 %v2218_v15, %v2214_v7  ;;  %v1007_v36 = vsel %vm1005_vm7, %v8711_v48, %v1006_v54  ;;  %v2581_v30 = vxor.u32 2147483648, %v2580_v25  ;;  %v12300_v15 = vld [vmem:[#allocation17_spill] sm:$0xff]  ;;  %v12303_v7 = vld [vmem:[#allocation31_spill] sm:$0xff] }
 0x286   :  { %v9018_v28 = vsub.s32 %v8923_v10, %v2406_v37  ;;  %v3402_v22 = vshll.u32 %v8998_v35, 30  ;;  %v12296_v4 = vand.u32 2147483647, %v12295_v32  ;;  %v12297_v61 = vmov 0 }
 0x287   :  { %v2123_v19 = vmul.f32 %v2122_v0, %v8829_v24  ;;  %v2198_v23 = vshll.u32 %v9002_v2, 16  ;;  %v12122_v52 = vshll.u32 %v9004_v51, 16  ;;  %v4265_v63 = vshrl.u32 %v4264_v29, 23 }
 0x288   :  { %vm9023_vm6 = vcmp.le.f32.partialorder %v12296_v4, 0.7853982  ;;  %v1941_v48 = vxor.u32 2147483648, %v1940_v46  ;;  %v2201_v54 = vsel %vm2200_vm3, 1, %v12194_v21  ;;  %v2217_v10 = vmul.u32 %v2213_v43, %v2189_v44 }
 0x289   :  { %v12298_v61 = vsel %vm9023_vm6, 4294967295, %v12297_v61  ;;  %v2223_v50 = vsel %vm2222_vm15, 1, %v12194_v21  ;;  %v2195_v34 = vmul.u32 %v2191_v38, %v2189_v44  ;;  %vm2204_vm13 = vc.u32 %v2202_v59, %v2198_v23 }
 0x28a   :  { %12299 = vst [vmem:[#allocation38_spill] sm:$0xff] %v12298_v61  ;;  %vm2226_vm10 = vc.u32 %v9014_v6, %v12122_v52  ;;  %v6042_v31 = vadd.s32 4294967169, %v4265_v63  ;;  %v9036_v0 = vadd.f32 %v692_v3, %v12300_v15  ;;  %v1011_v37 = vsel %vm1004_vm5, %v1007_v36, %v1010_v16 }
 0x28b   :  { %v2409_v18 = vsub.s32 0, %v9018_v28  ;;  %v9042_v29 = vsub.s32 %v8950_v8, %v3402_v22  ;;  %vm2408_vm4 = vcmp.lt.s32.totalorder %v9018_v28, 0  ;;  %v2203_v43 = vadd.s32 %v2201_v54, %v2195_v34 }
 0x28c   :  { %12301 = vst [vmem:[#allocation17_spill] sm:$0xff] %v9036_v0  ;;  %v2225_v38 = vadd.s32 %v2223_v50, %v2217_v10  ;;  %v4271_v44 = vadd.s32 1, %v6042_v31  ;;  %vm1821_vm7 = vcmp.lt.s32.totalorder %v12302_v14, 0  ;;  %v1943_v59 = vsub.s32 4, %v12303_v7 }
 0x28d   :  { %v2205_v3 = vsel %vm2204_vm13, 1, %v12194_v21  ;;  %v2227_v4 = vsel %vm2226_vm10, 1, %v12194_v21  ;;  %v9051_v11 = vsel %vm1002_vm9, nan, %v1011_v37  ;;  %v2582_v8 = vsel %vm12149_vm2, %v2581_v30, %v2580_v25 }
 0x28e   :  { %12304 = vst [vmem:[#allocation31_spill] sm:$0xff] %v9051_v11  ;;  %v2124_v16 = vadd.f32 -0.16666654, %v2123_v19  ;;  %v1942_v36 = vsel %vm1821_vm7, %v1941_v48, %v1940_v46  ;;  %v2410_v22 = vsel %vm2408_vm4, %v2409_v18, %v9018_v28  ;;  %v3405_v23 = vsub.s32 0, %v9042_v29 }
 0x28f   :  { %v12120_v63 = vand.u32 2147483647, %v8982_v9  ;;  %vm4272_vm5 = vcmp.gt.s32.totalorder %v4271_v44, 0  ;;  %vm3404_vm3 = vcmp.lt.s32.totalorder %v9042_v29, 0  ;;  %v2207_v54 = vadd.s32 %v2205_v3, %v2203_v43 }
 0x290   :  { %v2229_v55 = vadd.s32 %v2227_v4, %v2225_v38  ;;  %v4273_v10 = vsel %vm4272_vm5, %v4271_v44, 0  ;;  %v9064_v25 = vsel %vm9023_vm6, %v12295_v32, %v2582_v8  ;;  %v12306_v30 = vand.u32 2147483647, %v12302_v14 }
 0x291   :  { %12305 = vst [vmem:[#allocation39_spill] sm:$0xff] %v9064_v25  ;;  %v9075_v19 = vsel %vm1821_vm7, %v1943_v59, %v12303_v7  ;;  %v4275_v48 = vand.u32 31, %v4273_v10  ;;  %v2125_v50 = vmul.f32 %v2124_v16, %v8829_v24  ;;  %v2197_v31 = vshrl.u32 %v8992_v39, 16 }
 0x292   :  { %vm9068_vm9 = vcmp.le.f32.partialorder %v12306_v30, 0.7853982  ;;  %v2219_v15 = vshrl.u32 %v8979_v60, 16  ;;  %v2411_v37 = vclz %v2410_v22  ;;  %v3406_v18 = vsel %vm3404_vm3, %v3405_v23, %v9042_v29 }
 0x293   :  { %v9081_v34 = vsel %vm9068_vm9, %v12302_v14, %v1942_v36  ;;  %v4268_v43 = vand.u32 8388607, %v12120_v63  ;;  %v9088_v38 = vsub.s32 32, %v4275_v48  ;;  %v2208_v44 = vadd.s32 %v2207_v54, %v2197_v31 }
 0x294   :  { %v2230_v7 = vadd.s32 %v2229_v55, %v2219_v15  ;;  %v9090_v59 = vshrl.u32 %v4273_v10, 5  ;;  %v4287_v3 = vshll.u32 %v12202_v12, %v4275_v48  ;;  %v4278_v4 = vshll.u32 %v12196_v40, %v4275_v48 }
 0x295   :  { %v4279_v39 = vshrl.u32 %v12201_v56, %v9088_v38  ;;  %v4281_v60 = vshll.u32 %v12201_v56, %v4275_v48  ;;  %v4284_v8 = vshll.u32 %v12207_v58, %v4275_v48  ;;  %v4282_v16 = vshrl.u32 %v12207_v58, %v9088_v38 }
 0x296   :  { %v4285_v36 = vshrl.u32 %v12202_v12, %v9088_v38  ;;  %v4288_v22 = vshrl.u32 %v12195_v41, %v9088_v38  ;;  %v4290_v23 = vshll.u32 %v12195_v41, %v4275_v48  ;;  %v5924_v54 = vadd.s32 4294967294, %v2411_v37 }
 0x297   :  { %v2199_v55 = vshrl.u32 %v9002_v2, 16  ;;  %v2221_v10 = vshrl.u32 %v9004_v51, 16  ;;  %v4291_v30 = vshrl.u32 %v12203_v13, %v9088_v38  ;;  %v3407_v31 = vclz %v3406_v18 }
 0x298   :  { %v2155_v15 = vshrl.u32 %v12196_v40, %v8902_v49  ;;  %v2176_v63 = vsel %vm2174_vm0, %v8933_v20, 2102212464  ;;  %v4289_v42 = vor.u32 %v4288_v22, %v4287_v3  ;;  %v4269_v37 = vor.u32 8388608, %v4268_v43 }
 0x299   :  { %v9114_v52 = vadd.s32 %v2208_v44, %v2199_v55  ;;  %v2231_v48 = vadd.s32 %v2230_v7, %v2221_v10  ;;  %v9116_v61 = vor.u32 %v4279_v39, %v4278_v4  ;;  %v9118_v2 = vor.u32 %v4282_v16, %v4281_v60  ;;  %v12310_v4 = vld [vmem:[#allocation29_spill] sm:$0xff] }
 0x29a   :  { %v9120_v32 = vor.u32 %v4285_v36, %v4284_v8  ;;  %v4292_v14 = vor.u32 %v4291_v30, %v4290_v23  ;;  %vm4296_vm15 = vcmp.lt.s32.totalorder %v9090_v59, 4  ;;  %vm5925_vm13 = vcmp.lt.s32.totalorder %v5924_v54, 0  ;;  %v2969_v30 = vpop.permute.xlu1 %2968 }
 0x29b   :  { %v12309_v49 = vshll.u32 %v9004_v51, 16  ;;  %vm4293_vm0 = vcmp.lt.s32.totalorder %v9090_v59, 1  ;;  %vm4295_vm10 = vcmp.lt.s32.totalorder %v9090_v59, 3  ;;  %v6025_v20 = vadd.s32 4294967294, %v3407_v31 }
 0x29c   :  { %v2175_v43 = vsel %vm2171_vm8, %v2155_v15, %v8927_v47  ;;  %v2177_v44 = vsel %vm2173_vm14, %v8929_v57, %v2176_v63  ;;  %v4302_v7 = vsel %vm4296_vm15, %v4289_v42, 920167782  ;;  %v2235_v51 = vadd.s32 1, %v2231_v48 }
 0x29d   :  { %v9126_v18 = vadd.s32 %v9014_v6, %v12309_v49  ;;  %vm4294_vm7 = vcmp.lt.s32.totalorder %v9090_v59, 2  ;;  %v9141_v6 = vshll.u32 %v4269_v37, 8  ;;  %v4301_v47 = vsel %vm4293_vm0, %v9116_v61, %v9118_v2 }
 0x29e   :  { %v4303_v57 = vsel %vm4295_vm10, %v9120_v32, %v4302_v7  ;;  %v4305_v63 = vsel %vm4293_vm0, %v9118_v2, %v9120_v32  ;;  %v4306_v3 = vsel %vm4296_vm15, %v4292_v14, 1326507024  ;;  %v2109_v39 = vsub.s32 4, %v12310_v4  ;;  %v12316_v7 = vld [vmem:[#allocation34_spill] sm:$0xff] }
 0x29f   :  { %vm2234_vm4 = vc.u32 %v9114_v52, %v9126_v18  ;;  %v2126_v60 = vadd.f32 1.0, %v2125_v50  ;;  %v1946_v8 = vsel %vm9068_vm9, 0, %v9075_v19  ;;  %v2178_v16 = vsel %vm2172_vm12, %v2175_v43, %v2177_v44 }
 0x2a0   :  { %v9164_v36 = vmul.f32 %v9081_v34, %v9081_v34  ;;  %v9167_v22 = vsel %vm5925_vm13, 0, %v5924_v54  ;;  %vm6026_vm8 = vcmp.lt.s32.totalorder %v6025_v20, 0  ;;  %v4307_v14 = vsel %vm4295_vm10, %v4289_v42, %v4306_v3 }
 0x2a1   :  { %v2236_v50 = vsel %vm2234_vm4, %v2235_v51, %v2231_v48  ;;  %v4304_v46 = vsel %vm4294_vm7, %v4301_v47, %v4303_v57  ;;  %v4308_v17 = vsel %vm4294_vm7, %v4305_v63, %v4307_v14  ;;  %v4310_v19 = vand.u32 65535, %v9141_v6 }
 0x2a2   :  { %12311 = vst [vmem:[#allocation29_spill] sm:$0xff] %v9164_v36  ;;  %v2232_v23 = vmul.u32 %v8944_v1, %v2178_v16  ;;  %v4311_v54 = vshrl.u32 %v9141_v6, 16  ;;  %v4312_v55 = vand.u32 65535, %v4308_v17  ;;  %v4313_v10 = vshrl.u32 %v4308_v17, 16 }
 0x2a3   :  { %v9183_v42 = vmul.f32 %v9064_v25, %v9064_v25  ;;  %v9188_v15 = vsel %vm1987_vm11, %v2109_v39, %v12310_v4  ;;  %v3410_v48 = vsel %vm6026_vm8, 0, %v6025_v20  ;;  %v9191_v37 = vmul.f32 %v8639_v33, %v2969_v30 }
 0x2a4   :  { %12314 = vst [vmem:[#allocation41_spill] sm:$0xff] %v9188_v15  ;;  %v1955_v1 = vmul.f32 -0.00019511016, %v9164_v36  ;;  %v9194_v49 = vand.u32 3, %v1946_v8  ;;  %v9196_v43 = vadd.s32 %v2236_v50, %v2232_v23  ;;  %v4335_v44 = vshrl.u32 %v4304_v46, 16 }
 0x2a5   :  { %12312 = vst [vmem:[#allocation40_spill] sm:$0xff] %v9183_v42  ;;  %v9199_v51 = vmul.f32 %v2126_v60, %v12316_v7  ;;  %v2415_v47 = vsub.s32 32, %v9167_v22  ;;  %v4314_v57 = vmul.u32 %v4312_v55, %v4310_v19  ;;  %v4315_v63 = vmul.u32 %v4313_v10, %v4310_v19 }
 0x2a6   :  { %12315 = vst [vmem:[#allocation42_spill] sm:$0xff] %v9194_v49  ;;  %v2399_v20 = vadd.s32 %v8873_v45, %v8868_v27  ;;  %v3415_v3 = vsub.s32 4294967266, %v3410_v48  ;;  %v4316_v33 = vmul.u32 %v4312_v55, %v4311_v54  ;;  %v4334_v4 = vand.u32 65535, %v4304_v46 }
 0x2a7   :  { %12317 = vst [vmem:[#allocation34_spill] sm:$0xff] %v9199_v51  ;;  %v2419_v39 = vsub.s32 4294967266, %v9167_v22  ;;  %v4317_v8 = vmul.u32 %v4313_v10, %v4311_v54  ;;  %v4318_v16 = vshll.u32 %v4315_v63, 16  ;;  %v2984_v14 = vand.u32 2139095040, %v9191_v37 }
 0x2a8   :  { %v1956_v50 = vadd.f32 0.008332121, %v1955_v1  ;;  %v2238_v60 = vadd.s32 536870912, %v9196_v43  ;;  %v4320_v17 = vshll.u32 %v4316_v33, 16  ;;  %v4337_v23 = vmul.u32 %v4335_v44, %v4310_v19 }
 0x2a9   :  { %v2417_v30 = vshrl.u32 %v2399_v20, %v2415_v47  ;;  %v3395_v7 = vadd.s32 %v8900_v26, %v8898_v5  ;;  %v3411_v25 = vsub.s32 32, %v3410_v48  ;;  %vm4322_vm11 = vc.u32 %v4314_v57, %v4318_v16 }
 0x2aa   :  { %v3416_v27 = vadd.s32 127, %v3415_v3  ;;  %v4323_v45 = vsel %vm4322_vm11, 1, %v12194_v21  ;;  %v4324_v46 = vadd.s32 %v4318_v16, %v4314_v57  ;;  %v4338_v55 = vmul.u32 %v4334_v4, %v4311_v54 }
 0x2ab   :  { %v9210_v10 = vadd.s32 127, %v2419_v39  ;;  %v4325_v42 = vadd.s32 %v4323_v45, %v4317_v8  ;;  %v4336_v49 = vmul.u32 %v4334_v4, %v4310_v19  ;;  %v2985_v1 = vshrl.u32 %v2984_v14, 23 }
 0x2ac   :  { %v9212_v11 = vshrl.u32 %v2238_v60, 30  ;;  %v4319_v0 = vshrl.u32 %v4315_v63, 16  ;;  %vm4326_vm14 = vc.u32 %v4324_v46, %v4320_v17  ;;  %v4340_v47 = vshll.u32 %v4337_v23, 16 }
 0x2ad   :  { %v3412_v20 = vshll.u32 %v9042_v29, %v3410_v48  ;;  %v3413_v5 = vshrl.u32 %v3395_v7, %v3411_v25  ;;  %v4327_v26 = vsel %vm4326_vm14, 1, %v12194_v21  ;;  %v4339_v3 = vmul.u32 %v4335_v44, %v4311_v54 }
 0x2ae   :  { %v3417_v31 = vshll.u32 %v3416_v27, 23  ;;  %v4277_v57 = vshrl.u32 %v12196_v40, %v9088_v38  ;;  %v4329_v39 = vadd.s32 %v4327_v26, %v4325_v42  ;;  %v4342_v16 = vshll.u32 %v4338_v55, 16 }
 0x2af   :  { %v4298_v19 = vsel %vm4296_vm15, %v9120_v32, 2102212464  ;;  %vm4344_vm12 = vc.u32 %v4336_v49, %v4340_v47  ;;  %v4346_v63 = vadd.s32 %v4340_v47, %v4336_v49  ;;  %v6018_v4 = vadd.s32 4294967169, %v2985_v1 }
 0x2b0   :  { %v2240_v8 = vshll.u32 %v9212_v11, 30  ;;  %v4321_v29 = vshrl.u32 %v4316_v33, 16  ;;  %v4330_v25 = vadd.s32 %v4329_v39, %v4319_v0  ;;  %v4345_v48 = vsel %vm4344_vm12, 1, %v12194_v21 }
 0x2b1   :  { %v4341_v54 = vshrl.u32 %v4337_v23, 16  ;;  %v4347_v44 = vadd.s32 %v4345_v48, %v4339_v3  ;;  %vm4348_vm5 = vc.u32 %v4346_v63, %v4342_v16  ;;  %v12129_v38 = vand.u32 2147483647, %v9191_v37 }
 0x2b2   :  { %v3414_v42 = vor.u32 %v3413_v5, %v3412_v20  ;;  %v4297_v14 = vsel %vm4293_vm0, %v4277_v57, %v9116_v61  ;;  %v4299_v32 = vsel %vm4295_vm10, %v9118_v2, %v4298_v19  ;;  %v4349_v49 = vsel %vm4348_vm5, 1, %v12194_v21 }
 0x2b3   :  { %v3418_v33 = vor.u32 4788187, %v3417_v31  ;;  %v4343_v0 = vshrl.u32 %v4338_v55, 16  ;;  %v4351_v60 = vadd.s32 %v4349_v49, %v4347_v44  ;;  %v2991_v17 = vadd.s32 1, %v6018_v4 }
 0x2b4   :  { %v2416_v23 = vshll.u32 %v9018_v28, %v9167_v22  ;;  %v9234_v7 = vsub.s32 %v9196_v43, %v2240_v8  ;;  %v9236_v27 = vadd.s32 %v4330_v25, %v4321_v29  ;;  %v9238_v45 = vadd.s32 %v4346_v63, %v4342_v16  ;;  %v12318_v29 = vld [vmem:[#allocation32_spill] sm:$0xff] }
 0x2b5   :  { %v1957_v61 = vmul.f32 %v1956_v50, %v9164_v36  ;;  %v4300_v2 = vsel %vm4294_vm7, %v4297_v14, %v4299_v32  ;;  %v4352_v46 = vadd.s32 %v4351_v60, %v4341_v54  ;;  %vm2992_vm3 = vcmp.gt.s32.totalorder %v2991_v17, 0 }
 0x2b6   :  { %v9243_v31 = vor.u32 %v2417_v30, %v2416_v23  ;;  %v2421_v55 = vshll.u32 %v9210_v10, 23  ;;  %v2988_v28 = vand.u32 8388607, %v12129_v38  ;;  %v2993_v22 = vsel %vm2992_vm3, %v2991_v17, 0 }
 0x2b7   :  { %v3419_v43 = vand.u32 2147483647, %v3418_v33  ;;  %v3421_v1 = vcvt.s32.f32 %v3414_v42  ;;  %v4353_v47 = vadd.s32 %v4352_v46, %v4343_v0  ;;  %v2995_v20 = vand.u32 31, %v2993_v22 }
 0x2b8   :  { %vm2242_vm9 = vcmp.lt.s32.totalorder %v9234_v7, 0  ;;  %v2243_v50 = vsub.s32 0, %v9234_v7  ;;  %v4354_v59 = vmul.u32 %v9141_v6, %v4300_v2  ;;  %vm4356_vm15 = vc.u32 %v9236_v27, %v9238_v45  ;;  %v3297_v2 = vpop.permute.xlu2 %3296 }
 0x2b9   :  { %v4357_v30 = vadd.s32 1, %v4353_v47  ;;  %v9253_v5 = vsub.s32 32, %v2995_v20  ;;  %v2998_v10 = vshll.u32 %v12196_v40, %v2995_v20  ;;  %v3001_v26 = vshll.u32 %v12201_v56, %v2995_v20 }
 0x2ba   :  { %v2989_v3 = vor.u32 8388608, %v2988_v28  ;;  %v9257_v57 = vshrl.u32 %v2993_v22, 5  ;;  %v3004_v39 = vshll.u32 %v12207_v58, %v2995_v20  ;;  %v3007_v16 = vshll.u32 %v12202_v12, %v2995_v20  ;;  %v9292_v28 = vld [vmem:[%s12005_s6] ss:$0 sm:$0xff] }
 0x2bb   :  { %v4358_v19 = vsel %vm4356_vm15, %v4357_v30, %v4353_v47  ;;  %v2999_v6 = vshrl.u32 %v12201_v56, %v9253_v5  ;;  %v3002_v63 = vshrl.u32 %v12207_v58, %v9253_v5  ;;  %v3010_v4 = vshll.u32 %v12195_v41, %v2995_v20 }
 0x2bc   :  { %v2422_v8 = vor.u32 4788187, %v2421_v55  ;;  %vm3303_vm13 = vcmp.lt.s32.totalorder %v12318_v29, 0  ;;  %v4359_v25 = vadd.s32 %v4358_v19, %v4354_v59  ;;  %v3005_v48 = vshrl.u32 %v12202_v12, %v9253_v5 }
 0x2bd   :  { %v3008_v54 = vshrl.u32 %v12195_v41, %v9253_v5  ;;  %v2244_v44 = vsel %vm2242_vm9, %v2243_v50, %v9234_v7  ;;  %v9274_v42 = vor.u32 %v2999_v6, %v2998_v10  ;;  %v9276_v14 = vor.u32 %v3002_v63, %v3001_v26 }
 0x2be   :  { %v3011_v32 = vshrl.u32 %v12203_v13, %v9253_v5  ;;  %v3422_v49 = vmul.f32 %v3421_v1, %v3419_v43  ;;  %v4360_v33 = vadd.s32 536870912, %v4359_v25  ;;  %vm3013_vm0 = vcmp.lt.s32.totalorder %v9257_v57, 1 }
 0x2bf   :  { %v3009_v0 = vor.u32 %v3008_v54, %v3007_v16  ;;  %v9281_v60 = vor.u32 %v3005_v48, %v3004_v39  ;;  %vm3016_vm10 = vcmp.lt.s32.totalorder %v9257_v57, 4  ;;  %v9284_v23 = vshll.u32 %v2989_v3, 8 }
 0x2c0   :  { %v3012_v17 = vor.u32 %v3011_v32, %v3010_v4  ;;  %v2245_v46 = vclz %v2244_v44  ;;  %v9286_v55 = vshrl.u32 %v4360_v33, 30  ;;  %vm3015_vm4 = vcmp.lt.s32.totalorder %v9257_v57, 3 }
 0x2c1   :  { %v9295_v22 = vmul.f32 %v9292_v28, %v3297_v2  ;;  %v1958_v43 = vadd.f32 -0.16666654, %v1957_v61  ;;  %vm3014_vm7 = vcmp.lt.s32.totalorder %v9257_v57, 2  ;;  %v3021_v1 = vsel %vm3013_vm0, %v9274_v42, %v9276_v14 }
 0x2c2   :  { %v3022_v47 = vsel %vm3016_vm10, %v3009_v0, 920167782  ;;  %v2423_v20 = vand.u32 2147483647, %v2422_v8  ;;  %v2425_v50 = vcvt.s32.f32 %v9243_v31  ;;  %v3423_v59 = vxor.u32 2147483648, %v3422_v49 }
 0x2c3   :  { %v4362_v30 = vshll.u32 %v9286_v55, 30  ;;  %v3023_v61 = vsel %vm3015_vm4, %v9281_v60, %v3022_v47  ;;  %v3025_v10 = vsel %vm3013_vm0, %v9276_v14, %v9281_v60  ;;  %v3026_v26 = vsel %vm3016_vm10, %v3012_v17, 1326507024 }
 0x2c4   :  { %v3030_v3 = vand.u32 65535, %v9284_v23  ;;  %v5921_v39 = vadd.s32 4294967294, %v2245_v46  ;;  %v3024_v31 = vsel %vm3014_vm7, %v3021_v1, %v3023_v61  ;;  %v3458_v19 = vand.u32 2139095040, %v9295_v22 }
 0x2c5   :  { %v9316_v16 = vsub.s32 %v4359_v25, %v4362_v30  ;;  %v3027_v6 = vsel %vm3015_vm4, %v3009_v0, %v3026_v26  ;;  %v3031_v63 = vshrl.u32 %v9284_v23, 16  ;;  %v3054_v4 = vand.u32 65535, %v3024_v31 }
 0x2c6   :  { %v3055_v8 = vshrl.u32 %v3024_v31, 16  ;;  %v1959_v48 = vmul.f32 %v1958_v43, %v9164_v36  ;;  %v9325_v54 = vmul.f32 %v2425_v50, %v2423_v20  ;;  %v12319_v44 = vand.u32 2147483647, %v12318_v29 }
 0x2c7   :  { %v3028_v32 = vsel %vm3014_vm7, %v3025_v10, %v3027_v6  ;;  %v3424_v33 = vsel %vm3303_vm13, %v3423_v59, %v3422_v49  ;;  %vm5922_vm11 = vcmp.lt.s32.totalorder %v5921_v39, 0  ;;  %v4365_v46 = vsub.s32 0, %v9316_v16 }
 0x2c8   :  { %vm9329_vm8 = vcmp.le.f32.partialorder %v12319_v44, 0.7853982  ;;  %v3032_v0 = vand.u32 65535, %v3028_v32  ;;  %v3033_v17 = vshrl.u32 %v3028_v32, 16  ;;  %v3057_v2 = vmul.u32 %v3055_v8, %v3030_v3 }
 0x2c9   :  { %v3056_v43 = vmul.u32 %v3054_v4, %v3030_v3  ;;  %v3459_v1 = vshrl.u32 %v3458_v19, 23  ;;  %v3058_v30 = vmul.u32 %v3054_v4, %v3031_v63  ;;  %v9338_v61 = vadd.f32 1.0, %v1959_v48 }
 0x2ca   :  { %v3034_v47 = vmul.u32 %v3032_v0, %v3030_v3  ;;  %v3035_v20 = vmul.u32 %v3033_v17, %v3030_v3  ;;  %v3036_v50 = vmul.u32 %v3032_v0, %v3031_v63  ;;  %vm4364_vm14 = vcmp.lt.s32.totalorder %v9316_v16, 0 }
 0x2cb   :  { %v3060_v10 = vshll.u32 %v3057_v2, 16  ;;  %v9345_v49 = vsel %vm9329_vm8, %v12318_v29, %v3424_v33  ;;  %v2233_v59 = vadd.s32 %v9126_v18, %v9114_v52  ;;  %v9349_v31 = vsel %vm5922_vm11, 0, %v5921_v39 }
 0x2cc   :  { %v3038_v3 = vshll.u32 %v3035_v20, 16  ;;  %v3037_v19 = vmul.u32 %v3033_v17, %v3031_v63  ;;  %v3040_v6 = vshll.u32 %v3036_v50, 16  ;;  %v6027_v4 = vadd.s32 4294967169, %v3459_v1 }
 0x2cd   :  { %vm3064_vm12 = vc.u32 %v3056_v43, %v3060_v10  ;;  %v4366_v48 = vsel %vm4364_vm14, %v4365_v46, %v9316_v16  ;;  %v3059_v44 = vmul.u32 %v3055_v8, %v3031_v63  ;;  %v3062_v32 = vshll.u32 %v3058_v30, 16 }
 0x2ce   :  { %vm3042_vm5 = vc.u32 %v3034_v47, %v3038_v3  ;;  %v3044_v38 = vadd.s32 %v3038_v3, %v3034_v47  ;;  %v3065_v33 = vsel %vm3064_vm12, 1, %v12194_v21  ;;  %v3066_v26 = vadd.s32 %v3060_v10, %v3056_v43 }
 0x2cf   :  { %v3043_v0 = vsel %vm3042_vm5, 1, %v12194_v21  ;;  %v9356_v52 = vmul.f32 %v9345_v49, %v9345_v49  ;;  %v2249_v18 = vsub.s32 32, %v9349_v31  ;;  %v2253_v39 = vsub.s32 4294967266, %v9349_v31 }
 0x2d0   :  { %v2997_v17 = vshrl.u32 %v12196_v40, %v9253_v5  ;;  %v3018_v63 = vsel %vm3016_vm10, %v9281_v60, 2102212464  ;;  %v3039_v8 = vshrl.u32 %v3035_v20, 16  ;;  %v3045_v46 = vadd.s32 %v3043_v0, %v3037_v19 }
 0x2d1   :  { %vm3046_vm3 = vc.u32 %v3044_v38, %v3040_v6  ;;  %v4367_v1 = vclz %v4366_v48  ;;  %v3061_v47 = vshrl.u32 %v3057_v2, 16  ;;  %v3067_v10 = vadd.s32 %v3065_v33, %v3059_v44 }
 0x2d2   :  { %v3047_v43 = vsel %vm3046_vm3, 1, %v12194_v21  ;;  %v3041_v3 = vshrl.u32 %v3036_v50, 16  ;;  %vm3068_vm9 = vc.u32 %v3066_v26, %v3062_v32  ;;  %v3465_v53 = vadd.s32 1, %v6027_v4 }
 0x2d3   :  { %v3049_v36 = vadd.s32 %v3047_v43, %v3045_v46  ;;  %v2254_v51 = vadd.s32 127, %v2253_v39  ;;  %v3017_v5 = vsel %vm3013_vm0, %v2997_v17, %v9274_v42  ;;  %v3019_v60 = vsel %vm3015_vm4, %v9276_v14, %v3018_v63 }
 0x2d4   :  { %v3069_v38 = vsel %vm3068_vm9, 1, %v12194_v21  ;;  %v3063_v19 = vshrl.u32 %v3058_v30, 16  ;;  %vm3466_vm15 = vcmp.gt.s32.totalorder %v3465_v53, 0  ;;  %v6043_v2 = vadd.s32 4294967294, %v4367_v1 }
 0x2d5   :  { %v3050_v20 = vadd.s32 %v3049_v36, %v3039_v8  ;;  %v3071_v6 = vadd.s32 %v3069_v38, %v3067_v10  ;;  %v9373_v50 = vadd.s32 %v3066_v26, %v3062_v32  ;;  %v12135_v4 = vand.u32 2147483647, %v9295_v22 }
 0x2d6   :  { %v3467_v48 = vsel %vm3466_vm15, %v3465_v53, 0  ;;  %v3020_v44 = vsel %vm3014_vm7, %v3017_v5, %v3019_v60  ;;  %v3425_v14 = vsub.s32 4, %v8998_v35  ;;  %v3430_v36 = vmul.f32 -0.001358992, %v9356_v52 }
 0x2d7   :  { %v9378_v42 = vadd.s32 %v3050_v20, %v3041_v3  ;;  %v3072_v0 = vadd.s32 %v3071_v6, %v3061_v47  ;;  %v3469_v33 = vand.u32 31, %v3467_v48  ;;  %v3437_v30 = vmul.f32 -0.00019511016, %v9356_v52 }
 0x2d8   :  { %v2250_v26 = vshll.u32 %v9234_v7, %v9349_v31  ;;  %v2251_v32 = vshrl.u32 %v2233_v59, %v2249_v18  ;;  %v2255_v39 = vshll.u32 %v2254_v51, 23  ;;  %vm6044_vm0 = vcmp.lt.s32.totalorder %v6043_v2, 0  ;;  %v12322_v7 = vld [vmem:[#allocation22_spill] sm:$0xff] }
 0x2d9   :  { %v3073_v17 = vadd.s32 %v3072_v0, %v3063_v19  ;;  %v9385_v53 = vsub.s32 32, %v3469_v33  ;;  %v3074_v57 = vmul.u32 %v9284_v23, %v3020_v44  ;;  %vm3076_vm10 = vc.u32 %v9378_v42, %v9373_v50 }
 0x2da   :  { %v3462_v63 = vand.u32 8388607, %v12135_v4  ;;  %v9392_v46 = vshrl.u32 %v3467_v48, 5  ;;  %v3475_v1 = vshll.u32 %v12201_v56, %v3469_v33  ;;  %vm12150_vm4 = vcmp.lt.s32.totalorder %v12322_v7, 0 }
 0x2db   :  { %v3077_v8 = vadd.s32 1, %v3073_v17  ;;  %v3476_v51 = vshrl.u32 %v12207_v58, %v9385_v53  ;;  %v3478_v59 = vshll.u32 %v12207_v58, %v3469_v33  ;;  %v3479_v23 = vshrl.u32 %v12202_v12, %v9385_v53 }
 0x2dc   :  { %v3481_v31 = vshll.u32 %v12202_v12, %v3469_v33  ;;  %v3482_v18 = vshrl.u32 %v12195_v41, %v9385_v53  ;;  %v3431_v43 = vadd.f32 0.041655596, %v3430_v36  ;;  %v2252_v47 = vor.u32 %v2251_v32, %v2250_v26 }
 0x2dd   :  { %v3078_v10 = vsel %vm3076_vm10, %v3077_v8, %v3073_v17  ;;  %v3484_v3 = vshll.u32 %v12195_v41, %v3469_v33  ;;  %v2256_v5 = vor.u32 4788187, %v2255_v39  ;;  %v9406_v60 = vsel %vm6044_vm0, 0, %v6043_v2 }
 0x2de   :  { %v3079_v38 = vadd.s32 %v3078_v10, %v3074_v57  ;;  %v3463_v20 = vor.u32 8388608, %v3462_v63  ;;  %v12323_v19 = vand.u32 2147483647, %v12322_v7  ;;  %v12324_v6 = vmov 0 }
 0x2df   :  { %v3472_v48 = vshll.u32 %v12196_v40, %v3469_v33  ;;  %v3473_v44 = vshrl.u32 %v12201_v56, %v9385_v53  ;;  %v9417_v0 = vor.u32 %v3476_v51, %v3475_v1  ;;  %v3485_v36 = vshrl.u32 %v12203_v13, %v9385_v53 }
 0x2e0   :  { %vm9410_vm7 = vcmp.le.f32.partialorder %v12323_v19, 0.7853982  ;;  %v3080_v2 = vadd.s32 536870912, %v3079_v38  ;;  %v9421_v26 = vor.u32 %v3479_v23, %v3478_v59  ;;  %v3483_v32 = vor.u32 %v3482_v18, %v3481_v31 }
 0x2e1   :  { %v12325_v6 = vsel %vm9410_vm7, 4294967295, %v12324_v6  ;;  %vm3490_vm11 = vcmp.lt.s32.totalorder %v9392_v46, 4  ;;  %v3432_v39 = vmul.f32 %v3431_v43, %v9356_v52  ;;  %v3438_v17 = vadd.f32 0.008332121, %v3437_v30 }
 0x2e2   :  { %12326 = vst [vmem:[#allocation32_spill] sm:$0xff] %v12325_v6  ;;  %v3486_v57 = vor.u32 %v3485_v36, %v3484_v3  ;;  %vm3487_vm14 = vcmp.lt.s32.totalorder %v9392_v46, 1  ;;  %v2257_v33 = vand.u32 2147483647, %v2256_v5  ;;  %v2259_v63 = vcvt.s32.f32 %v2252_v47 }
 0x2e3   :  { %v9426_v8 = vshrl.u32 %v3080_v2, 30  ;;  %vm3489_vm12 = vcmp.lt.s32.totalorder %v9392_v46, 3  ;;  %v4375_v1 = vsub.s32 4294967266, %v9406_v60  ;;  %v9430_v51 = vor.u32 %v3473_v44, %v3472_v48 }
 0x2e4   :  { %v3500_v59 = vsel %vm3490_vm11, %v3486_v57, 1326507024  ;;  %v9434_v23 = vshll.u32 %v3463_v20, 8  ;;  %vm3488_vm5 = vcmp.lt.s32.totalorder %v9392_v46, 2  ;;  %v3496_v31 = vsel %vm3490_vm11, %v3483_v32, 920167782 }
 0x2e5   :  { %v3082_v30 = vshll.u32 %v9426_v8, 30  ;;  %v3499_v18 = vsel %vm3487_vm14, %v9417_v0, %v9421_v26  ;;  %v9446_v43 = vmul.f32 %v9338_v61, %v9081_v34  ;;  %v12328_v47 = vxor.u32 2147483648, %v9325_v54 }
 0x2e6   :  { %v3439_v3 = vmul.f32 %v3438_v17, %v9356_v52  ;;  %v3501_v5 = vsel %vm3489_vm12, %v3483_v32, %v3500_v59  ;;  %v2260_v20 = vmul.f32 %v2259_v63, %v2257_v33  ;;  %v4355_v19 = vadd.s32 %v9238_v45, %v9236_v27  ;;  %v3613_v32 = vpop.permute.xlu0 %3612 }
 0x2e7   :  { %12327 = vst [vmem:[#allocation43_spill] sm:$0xff] %v9446_v43  ;;  %v2428_v10 = vsel %vm12150_vm4, %v12328_v47, %v9325_v54  ;;  %v4371_v48 = vsub.s32 32, %v9406_v60  ;;  %v9459_v44 = vsub.s32 %v3079_v38, %v3082_v30  ;;  %v3495_v34 = vsel %vm3487_vm14, %v9430_v51, %v9417_v0 }
 0x2e8   :  { %v3497_v54 = vsel %vm3489_vm12, %v9421_v26, %v3496_v31  ;;  %v3502_v61 = vsel %vm3488_vm5, %v3499_v18, %v3501_v5  ;;  %v3504_v36 = vand.u32 65535, %v9434_v23  ;;  %v9474_v27 = vsel %vm9410_vm7, %v12322_v7, %v2428_v10 }
 0x2e9   :  { %12329 = vst [vmem:[#allocation44_spill] sm:$0xff] %v9474_v27  ;;  %v3426_v45 = vsel %vm3303_vm13, %v3425_v14, %v8998_v35  ;;  %v3433_v38 = vadd.f32 -0.4999988, %v3432_v39  ;;  %v4376_v2 = vadd.s32 127, %v4375_v1  ;;  %v12330_v17 = vand.u32 2147483647, %v8795_v62 }
 0x2ea   :  { %v12331_v57 = vmov 0  ;;  %v3085_v33 = vsub.s32 0, %v9459_v44  ;;  %v3506_v63 = vand.u32 65535, %v3502_v61  ;;  %v3507_v59 = vshrl.u32 %v3502_v61, 16 }
 0x2eb   :  { %vm9483_vm3 = vcmp.le.f32.partialorder %v12330_v17, 0.7853982  ;;  %v9489_v30 = vmul.f32 %v9292_v28, %v3613_v32  ;;  %v3440_v31 = vadd.f32 -0.16666654, %v3439_v3  ;;  %vm3084_vm9 = vcmp.lt.s32.totalorder %v9459_v44, 0 }
 0x2ec   :  { %v12332_v57 = vsel %vm9483_vm3, 4294967295, %v12331_v57  ;;  %v3498_v35 = vsel %vm3488_vm5, %v3495_v34, %v3497_v54  ;;  %v3505_v14 = vshrl.u32 %v9434_v23, 16  ;;  %v2261_v39 = vxor.u32 2147483648, %v2260_v20 }
 0x2ed   :  { %12333 = vst [vmem:[#allocation45_spill] sm:$0xff] %v12332_v57  ;;  %v4372_v1 = vshll.u32 %v9316_v16, %v9406_v60  ;;  %v4373_v18 = vshrl.u32 %v4355_v19, %v4371_v48  ;;  %v3509_v47 = vmul.u32 %v3507_v59, %v3504_v36  ;;  %v3428_v10 = vsel %vm9329_vm8, 0, %v3426_v45 }
 0x2ee   :  { %v3434_v5 = vmul.f32 %v3433_v38, %v9356_v52  ;;  %v4377_v61 = vshll.u32 %v4376_v2, 23  ;;  %v3508_v3 = vmul.u32 %v3506_v63, %v3504_v36  ;;  %v3086_v32 = vsel %vm3084_vm9, %v3085_v33, %v9459_v44 }
 0x2ef   :  { %v3512_v17 = vshll.u32 %v3509_v47, 16  ;;  %v3529_v4 = vshrl.u32 %v3498_v35, 16  ;;  %v3624_v34 = vand.u32 2139095040, %v9489_v30  ;;  %v3441_v6 = vmul.f32 %v3440_v31, %v9356_v52 }
 0x2f0   :  { %vm2141_vm13 = vcmp.lt.s32.totalorder %v8795_v62, 0  ;;  %v3510_v16 = vmul.u32 %v3506_v63, %v3505_v14  ;;  %v9507_v25 = vmul.f32 %v9474_v27, %v9474_v27  ;;  %v4374_v19 = vor.u32 %v4373_v18, %v4372_v1 }
 0x2f1   :  { %v2262_v60 = vsel %vm2141_vm13, %v2261_v39, %v2260_v20  ;;  %v3528_v48 = vand.u32 65535, %v3498_v35  ;;  %v9511_v45 = vand.u32 3, %v3428_v10  ;;  %v3087_v38 = vclz %v3086_v32 }
 0x2f2   :  { %12334 = vst [vmem:[#allocation46_spill] sm:$0xff] %v9507_v25  ;;  %v3511_v2 = vmul.u32 %v3507_v59, %v3505_v14  ;;  %vm3516_vm8 = vc.u32 %v3508_v3, %v3512_v17  ;;  %v9513_v33 = vadd.f32 1.0, %v3434_v5  ;;  %v4378_v52 = vor.u32 4788187, %v4377_v61 }
 0x2f3   :  { %v3531_v31 = vmul.u32 %v3529_v4, %v3504_v36  ;;  %v3625_v54 = vshrl.u32 %v3624_v34, 23  ;;  %v3442_v63 = vadd.f32 1.0, %v3441_v6  ;;  %v9518_v43 = vsel %vm9483_vm3, %v8795_v62, %v2262_v60 }
 0x2f4   :  { %v3471_v20 = vshrl.u32 %v12196_v40, %v9385_v53  ;;  %v3514_v35 = vshll.u32 %v3510_v16, 16  ;;  %v4381_v39 = vcvt.s32.f32 %v4374_v19  ;;  %v3492_v59 = vsel %vm3490_vm11, %v9421_v26, 2102212464 }
 0x2f5   :  { %v3517_v1 = vsel %vm3516_vm8, 1, %v12194_v21  ;;  %v3530_v18 = vmul.u32 %v3528_v48, %v3504_v36  ;;  %v6019_v10 = vadd.s32 4294967294, %v3087_v38  ;;  %v3518_v5 = vadd.s32 %v3512_v17, %v3508_v3 }
 0x2f6   :  { %v3519_v6 = vadd.s32 %v3517_v1, %v3511_v2  ;;  %v3532_v61 = vmul.u32 %v3528_v48, %v3505_v14  ;;  %v4379_v32 = vand.u32 2147483647, %v4378_v52  ;;  %v3533_v34 = vmul.u32 %v3529_v4, %v3505_v14 }
 0x2f7   :  { %v3534_v60 = vshll.u32 %v3531_v31, 16  ;;  %v6030_v57 = vadd.s32 4294967169, %v3625_v54  ;;  %v3491_v53 = vsel %vm3487_vm14, %v3471_v20, %v9430_v51  ;;  %v3513_v19 = vshrl.u32 %v3509_v47, 16 }
 0x2f8   :  { %vm3520_vm15 = vc.u32 %v3518_v5, %v3514_v35  ;;  %v3536_v27 = vshll.u32 %v3532_v61, 16  ;;  %v3493_v26 = vsel %vm3489_vm12, %v9417_v0, %v3492_v59  ;;  %v3515_v36 = vshrl.u32 %v3510_v16, 16 }
 0x2f9   :  { %v3521_v3 = vsel %vm3520_vm15, 1, %v12194_v21  ;;  %vm3538_vm0 = vc.u32 %v3530_v18, %v3534_v60  ;;  %vm6020_vm10 = vcmp.lt.s32.totalorder %v6019_v10, 0  ;;  %v3540_v14 = vadd.s32 %v3534_v60, %v3530_v18 }
 0x2fa   :  { %v3523_v17 = vadd.s32 %v3521_v3, %v3519_v6  ;;  %v3539_v4 = vsel %vm3538_vm0, 1, %v12194_v21  ;;  %v4382_v54 = vmul.f32 %v4381_v39, %v4379_v32  ;;  %v12141_v51 = vand.u32 2147483647, %v9489_v30 }
 0x2fb   :  { %v3541_v48 = vadd.s32 %v3539_v4, %v3533_v34  ;;  %v3631_v47 = vadd.s32 1, %v6030_v57  ;;  %v3494_v38 = vsel %vm3488_vm5, %v3491_v53, %v3493_v26  ;;  %v3535_v52 = vshrl.u32 %v3531_v31, 16 }
 0x2fc   :  { %v3524_v2 = vadd.s32 %v3523_v17, %v3513_v19  ;;  %vm3542_vm11 = vc.u32 %v3540_v14, %v3536_v27  ;;  %v9537_v0 = vsel %vm6020_vm10, 0, %v6019_v10  ;;  %v3537_v16 = vshrl.u32 %v3532_v61, 16 }
 0x2fd   :  { %v3543_v20 = vsel %vm3542_vm11, 1, %v12194_v21  ;;  %vm3632_vm14 = vcmp.gt.s32.totalorder %v3631_v47, 0  ;;  %v12335_v35 = vand.u32 2147483647, %v8982_v9  ;;  %v9548_v57 = vadd.s32 %v3540_v14, %v3536_v27 }
 0x2fe   :  { %v9546_v59 = vadd.s32 %v3524_v2, %v3515_v36  ;;  %v3545_v46 = vadd.s32 %v3543_v20, %v3541_v48  ;;  %v3633_v1 = vsel %vm3632_vm14, %v3631_v47, 0  ;;  %v9551_v31 = vmul.f32 %v3442_v63, %v9345_v49 }
 0x2ff   :  { %vm9542_vm12 = vcmp.le.f32.partialorder %v12335_v35, 0.7853982  ;;  %v3451_v18 = vxor.u32 2147483648, %v9513_v33  ;;  %vm4263_vm5 = vcmp.lt.s32.totalorder %v8982_v9, 0  ;;  %v3635_v10 = vand.u32 31, %v3633_v1 }
 0x300   :  { %v9557_v5 = vmul.f32 %v9518_v43, %v9518_v43  ;;  %v4383_v6 = vxor.u32 2147483648, %v4382_v54  ;;  %v3546_v61 = vadd.s32 %v3545_v46, %v3535_v52  ;;  %v3628_v27 = vand.u32 8388607, %v12141_v51 }
 0x301   :  { %v3095_v32 = vsub.s32 4294967266, %v9537_v0  ;;  %v3548_v34 = vmul.u32 %v9434_v23, %v3494_v38  ;;  %v9563_v49 = vshrl.u32 %v3633_v1, 5  ;;  %v9565_v63 = vsub.s32 32, %v3635_v10 }
 0x302   :  { %12338 = vst [vmem:[#allocation47_spill] sm:$0xff] %v9557_v5  ;;  %vm3450_vm9 = vcmp.eq.s32.totalorder %v9511_v45, 2  ;;  %v3547_v60 = vadd.s32 %v3546_v61, %v3537_v16  ;;  %vm3550_vm8 = vc.u32 %v9546_v59, %v9548_v57  ;;  %v3638_v53 = vshll.u32 %v12196_v40, %v3635_v10 }
 0x303   :  { %v3647_v19 = vshll.u32 %v12202_v12, %v3635_v10  ;;  %v3639_v26 = vshrl.u32 %v12201_v56, %v9565_v63  ;;  %v3641_v36 = vshll.u32 %v12201_v56, %v3635_v10  ;;  %v3642_v23 = vshrl.u32 %v12207_v58, %v9565_v63 }
 0x304   :  { %v3644_v3 = vshll.u32 %v12207_v58, %v3635_v10  ;;  %vm3447_vm15 = vcmp.eq.s32.totalorder %v9511_v45, 0  ;;  %v3551_v17 = vadd.s32 1, %v3547_v60  ;;  %v3645_v4 = vshrl.u32 %v12202_v12, %v9565_v63 }
 0x305   :  { %v3648_v14 = vshrl.u32 %v12195_v41, %v9565_v63  ;;  %v3650_v48 = vshll.u32 %v12195_v41, %v3635_v10  ;;  %v2275_v47 = vmul.f32 -0.00019511016, %v9557_v5  ;;  %v4384_v38 = vsel %vm4263_vm5, %v4383_v6, %v4382_v54 }
 0x306   :  { %v3075_v2 = vadd.s32 %v9373_v50, %v9378_v42  ;;  %v3091_v52 = vsub.s32 32, %v9537_v0  ;;  %v3096_v16 = vadd.s32 127, %v3095_v32  ;;  %v3552_v20 = vsel %vm3550_vm8, %v3551_v17, %v3547_v60 }
 0x307   :  { %v3649_v35 = vor.u32 %v3648_v14, %v3647_v19  ;;  %v3651_v46 = vshrl.u32 %v12203_v13, %v9565_v63  ;;  %v3553_v1 = vadd.s32 %v3552_v20, %v3548_v34  ;;  %v3629_v10 = vor.u32 8388608, %v3628_v27 }
 0x308   :  { %v9595_v61 = vor.u32 %v3639_v26, %v3638_v53  ;;  %v9597_v51 = vor.u32 %v3642_v23, %v3641_v36  ;;  %v9599_v54 = vor.u32 %v3645_v4, %v3644_v3  ;;  %vm3653_vm0 = vcmp.lt.s32.totalorder %v9563_v49, 1 }
 0x309   :  { %v3652_v50 = vor.u32 %v3651_v46, %v3650_v48  ;;  %vm3656_vm10 = vcmp.lt.s32.totalorder %v9563_v49, 4  ;;  %v3448_v42 = vxor.u32 2147483648, %v9551_v31  ;;  %v9607_v6 = vsel %vm9542_vm12, %v8982_v9, %v4384_v38 }
 0x30a   :  { %v3554_v32 = vadd.s32 536870912, %v3553_v1  ;;  %vm3655_vm11 = vcmp.lt.s32.totalorder %v9563_v49, 3  ;;  %vm3446_vm14 = vcmp.lt.s32.totalorder %v9511_v45, 2  ;;  %v3092_v27 = vshll.u32 %v9459_v44, %v9537_v0 }
 0x30b   :  { %v3093_v34 = vshrl.u32 %v3075_v2, %v3091_v52  ;;  %v3097_v60 = vshll.u32 %v3096_v16, 23  ;;  %v3662_v53 = vsel %vm3656_vm10, %v3649_v35, 920167782  ;;  %v2276_v19 = vadd.f32 0.008332121, %v2275_v47  ;;  %v3933_v47 = vpop.permute.xlu1 %3932 }
 0x30c   :  { %v9615_v26 = vshrl.u32 %v3554_v32, 30  ;;  %vm3654_vm8 = vcmp.lt.s32.totalorder %v9563_v49, 2  ;;  %v3661_v36 = vsel %vm3653_vm0, %v9595_v61, %v9597_v51  ;;  %v2263_v23 = vsub.s32 4, %v9212_v11 }
 0x30d   :  { %v3663_v44 = vsel %vm3655_vm11, %v9599_v54, %v3662_v53  ;;  %v3666_v0 = vsel %vm3656_vm10, %v3652_v50, 1326507024  ;;  %v9628_v3 = vshll.u32 %v3629_v10, 8  ;;  %v3452_v17 = vsel %vm3450_vm9, %v3451_v18, %v9551_v31 }
 0x30e   :  { %v9635_v4 = vmul.f32 %v9607_v6, %v9607_v6  ;;  %v3556_v14 = vshll.u32 %v9615_v26, 30  ;;  %v3665_v48 = vsel %vm3653_vm0, %v9597_v51, %v9599_v54  ;;  %v3094_v38 = vor.u32 %v3093_v34, %v3092_v27 }
 0x30f   :  { %v3098_v2 = vor.u32 4788187, %v3097_v60  ;;  %v3664_v52 = vsel %vm3654_vm8, %v3661_v36, %v3663_v44  ;;  %v3667_v31 = vsel %vm3655_vm11, %v3649_v35, %v3666_v0  ;;  %v3449_v18 = vsel %vm3447_vm15, %v9513_v33, %v3448_v42 }
 0x310   :  { %v2277_v16 = vmul.f32 %v2276_v19, %v9557_v5  ;;  %v4390_v20 = vmul.f32 -0.001358992, %v9635_v4  ;;  %v9651_v46 = vsub.s32 %v3553_v1, %v3556_v14  ;;  %v3668_v10 = vsel %vm3654_vm8, %v3665_v48, %v3667_v31 }
 0x311   :  { %v3670_v50 = vand.u32 65535, %v9628_v3  ;;  %v3671_v32 = vshrl.u32 %v9628_v3, 16  ;;  %v9658_v27 = vmul.f32 %v9292_v28, %v3933_v47  ;;  %v4397_v35 = vmul.f32 -0.00019511016, %v9635_v4 }
 0x312   :  { %vm3558_vm9 = vcmp.lt.s32.totalorder %v9651_v46, 0  ;;  %v3559_v33 = vsub.s32 0, %v9651_v46  ;;  %v3695_v42 = vshrl.u32 %v3664_v52, 16  ;;  %v3099_v34 = vand.u32 2147483647, %v3098_v2 }
 0x313   :  { %v3101_v1 = vcvt.s32.f32 %v3094_v38  ;;  %v3672_v60 = vand.u32 65535, %v3668_v10  ;;  %v3673_v53 = vshrl.u32 %v3668_v10, 16  ;;  %v9666_v19 = vsel %vm2141_vm13, %v2263_v23, %v9212_v11 }
 0x314   :  { %12339 = vst [vmem:[#allocation48_spill] sm:$0xff] %v9666_v19  ;;  %v2278_v36 = vadd.f32 -0.16666654, %v2277_v16  ;;  %v4385_v44 = vsub.s32 4, %v9286_v55  ;;  %v3694_v0 = vand.u32 65535, %v3664_v52  ;;  %v3560_v14 = vsel %vm3558_vm9, %v3559_v33, %v9651_v46 }
 0x315   :  { %v3675_v48 = vmul.u32 %v3673_v53, %v3670_v50  ;;  %v3676_v47 = vmul.u32 %v3672_v60, %v3671_v32  ;;  %v3944_v31 = vand.u32 2139095040, %v9658_v27  ;;  %v3453_v38 = vsel %vm3446_vm14, %v3449_v18, %v3452_v17 }
 0x316   :  { %vm2983_vm15 = vcmp.lt.s32.totalorder %v9191_v37, 0  ;;  %v3674_v2 = vmul.u32 %v3672_v60, %v3670_v50  ;;  %v3697_v10 = vmul.u32 %v3695_v42, %v3670_v50  ;;  %v4391_v62 = vadd.f32 0.041655596, %v4390_v20 }
 0x317   :  { %v4398_v11 = vadd.f32 0.008332121, %v4397_v35  ;;  %v12340_v23 = vand.u32 2147483647, %v9191_v37  ;;  %v3102_v52 = vmul.f32 %v3101_v1, %v3099_v34  ;;  %v3678_v33 = vshll.u32 %v3675_v48, 16 }
 0x318   :  { %v2279_v19 = vmul.f32 %v2278_v36, %v9557_v5  ;;  %v3561_v7 = vclz %v3560_v14  ;;  %v3680_v25 = vshll.u32 %v3676_v47, 16  ;;  %v3698_v45 = vmul.u32 %v3694_v0, %v3671_v32 }
 0x319   :  { %vm9676_vm13 = vcmp.le.f32.partialorder %v12340_v23, 0.7853982  ;;  %v9684_v17 = vsel %vm4263_vm5, %v4385_v44, %v9286_v55  ;;  %v3105_v18 = vsub.s32 4, %v9426_v8  ;;  %v3677_v20 = vmul.u32 %v3673_v53, %v3671_v32 }
 0x31a   :  { %v3945_v35 = vshrl.u32 %v3944_v31, 23  ;;  %vm3444_vm14 = vweird.f32 %v12318_v29  ;;  %vm3682_vm9 = vc.u32 %v3674_v2, %v3678_v33  ;;  %v3684_v60 = vadd.s32 %v3678_v33, %v3674_v2 }
 0x31b   :  { %v3696_v34 = vmul.u32 %v3694_v0, %v3670_v50  ;;  %v3700_v1 = vshll.u32 %v3697_v10, 16  ;;  %v4392_v36 = vmul.f32 %v4391_v62, %v9635_v4  ;;  %v4399_v14 = vmul.f32 %v4398_v11, %v9635_v4 }
 0x31c   :  { %v3103_v23 = vxor.u32 2147483648, %v3102_v52  ;;  %v3699_v5 = vmul.u32 %v3695_v42, %v3671_v32  ;;  %v6028_v15 = vadd.s32 4294967294, %v3561_v7  ;;  %v3683_v55 = vsel %vm3682_vm9, 1, %v12194_v21 }
 0x31d   :  { %vm3686_vm5 = vc.u32 %v3684_v60, %v3680_v25  ;;  %v3702_v44 = vshll.u32 %v3698_v45, 16  ;;  %v3637_v53 = vshrl.u32 %v12196_v40, %v9565_v63  ;;  %v3679_v31 = vshrl.u32 %v3675_v48, 16 }
 0x31e   :  { %v3685_v24 = vadd.s32 %v3683_v55, %v3677_v20  ;;  %v3687_v2 = vsel %vm3686_vm5, 1, %v12194_v21  ;;  %v3658_v62 = vsel %vm3656_vm10, %v9599_v54, 2102212464  ;;  %vm3704_vm2 = vc.u32 %v3696_v34, %v3700_v1 }
 0x31f   :  { %v3706_v50 = vadd.s32 %v3700_v1, %v3696_v34  ;;  %v6036_v0 = vadd.s32 4294967169, %v3945_v35  ;;  %v3104_v7 = vsel %vm2983_vm15, %v3103_v23, %v3102_v52  ;;  %v3681_v32 = vshrl.u32 %v3676_v47, 16 }
 0x320   :  { %v3689_v25 = vadd.s32 %v3687_v2, %v3685_v24  ;;  %v3705_v42 = vsel %vm3704_vm2, 1, %v12194_v21  ;;  %vm6029_vm9 = vcmp.lt.s32.totalorder %v6028_v15, 0  ;;  %v3701_v63 = vshrl.u32 %v3697_v10, 16 }
 0x321   :  { %v3707_v48 = vadd.s32 %v3705_v42, %v3699_v5  ;;  %vm3708_vm4 = vc.u32 %v3706_v50, %v3702_v44  ;;  %v3657_v11 = vsel %vm3653_vm0, %v3637_v53, %v9595_v61  ;;  %v3659_v54 = vsel %vm3655_vm11, %v9597_v51, %v3658_v62 }
 0x322   :  { %v3690_v33 = vadd.s32 %v3689_v25, %v3679_v31  ;;  %v3709_v20 = vsel %vm3708_vm4, 1, %v12194_v21  ;;  %v9710_v24 = vsel %vm9676_vm13, %v9191_v37, %v3104_v7  ;;  %v3703_v47 = vshrl.u32 %v3698_v45, 16 }
 0x323   :  { %v3711_v10 = vadd.s32 %v3709_v20, %v3707_v48  ;;  %v3951_v5 = vadd.s32 1, %v6036_v0  ;;  %v4393_v52 = vadd.f32 -0.4999988, %v4392_v36  ;;  %v3564_v35 = vsel %vm6029_vm9, 0, %v6028_v15 }
 0x324   :  { %v9712_v60 = vadd.s32 %v3690_v33, %v3681_v32  ;;  %v9714_v61 = vadd.s32 %v3706_v50, %v3702_v44  ;;  %v4400_v34 = vadd.f32 -0.16666654, %v4399_v14  ;;  %v3660_v51 = vsel %vm3654_vm8, %v3657_v11, %v3659_v54 }
 0x325   :  { %v3712_v1 = vadd.s32 %v3711_v10, %v3701_v63  ;;  %vm3952_vm2 = vcmp.gt.s32.totalorder %v3951_v5, 0  ;;  %v9720_v23 = vsel %vm3444_vm14, nan, %v3453_v38  ;;  %v9722_v55 = vadd.f32 1.0, %v2279_v19 }
 0x326   :  { %v9726_v45 = vmul.f32 %v9710_v24, %v9710_v24  ;;  %v3953_v15 = vsel %vm3952_vm2, %v3951_v5, 0  ;;  %v3569_v36 = vsub.s32 4294967266, %v3564_v35  ;;  %v12151_v14 = vand.u32 2147483647, %v9658_v27 }
 0x327   :  { %v3713_v44 = vadd.s32 %v3712_v1, %v3703_v47  ;;  %v3955_v53 = vand.u32 31, %v3953_v15  ;;  %v4388_v49 = vsel %vm9542_vm12, 0, %v9684_v17  ;;  %v9735_v29 = vsel %vm2983_vm15, %v3105_v18, %v9426_v8 }
 0x328   :  { %v3714_v19 = vmul.u32 %v9628_v3, %v3660_v51  ;;  %vm3716_vm4 = vc.u32 %v9712_v60, %v9714_v61  ;;  %v4394_v38 = vmul.f32 %v4393_v52, %v9635_v4  ;;  %v4401_v31 = vmul.f32 %v4400_v34, %v9635_v4 }
 0x329   :  { %v3717_v2 = vadd.s32 1, %v3713_v44  ;;  %v9742_v62 = vsub.s32 32, %v3955_v53  ;;  %v3110_v50 = vmul.f32 -0.001358992, %v9726_v45  ;;  %v3117_v0 = vmul.f32 -0.00019511016, %v9726_v45 }
 0x32a   :  { %v3549_v8 = vadd.s32 %v9548_v57, %v9546_v59  ;;  %v3565_v18 = vsub.s32 32, %v3564_v35  ;;  %v3570_v7 = vadd.s32 127, %v3569_v36  ;;  %v3948_v32 = vand.u32 8388607, %v12151_v14 }
 0x32b   :  { %v3718_v3 = vsel %vm3716_vm4, %v3717_v2, %v3713_v44  ;;  %v3961_v25 = vshll.u32 %v12201_v56, %v3955_v53  ;;  %v3964_v4 = vshll.u32 %v12207_v58, %v3955_v53  ;;  %v3967_v63 = vshll.u32 %v12202_v12, %v3955_v53 }
 0x32c   :  { %v3719_v42 = vadd.s32 %v3718_v3, %v3714_v19  ;;  %v3970_v48 = vshll.u32 %v12195_v41, %v3955_v53  ;;  %v3962_v11 = vshrl.u32 %v12207_v58, %v9742_v62  ;;  %v3965_v59 = vshrl.u32 %v12202_v12, %v9742_v62 }
 0x32d   :  { %v3968_v57 = vshrl.u32 %v12195_v41, %v9742_v62  ;;  %v3971_v54 = vshrl.u32 %v12203_v13, %v9742_v62  ;;  %v3566_v33 = vshll.u32 %v9651_v46, %v3564_v35  ;;  %v3567_v20 = vshrl.u32 %v3549_v8, %v3565_v18 }
 0x32e   :  { %v3720_v47 = vadd.s32 536870912, %v3719_v42  ;;  %v9763_v10 = vshrl.u32 %v3953_v15, 5  ;;  %v9765_v5 = vadd.f32 1.0, %v4394_v38  ;;  %v3111_v52 = vadd.f32 0.041655596, %v3110_v50 }
 0x32f   :  { %v3571_v34 = vshll.u32 %v3570_v7, 23  ;;  %v3949_v51 = vor.u32 8388608, %v3948_v32  ;;  %v3118_v1 = vadd.f32 0.008332121, %v3117_v0  ;;  %v3958_v44 = vshll.u32 %v12196_v40, %v3955_v53 }
 0x330   :  { %v9767_v36 = vshrl.u32 %v3720_v47, 30  ;;  %v3959_v19 = vshrl.u32 %v12201_v56, %v9742_v62  ;;  %v9772_v2 = vor.u32 %v3962_v11, %v3961_v25  ;;  %v9774_v46 = vor.u32 %v3965_v59, %v3964_v4 }
 0x331   :  { %v3969_v35 = vor.u32 %v3968_v57, %v3967_v63  ;;  %v3972_v15 = vor.u32 %v3971_v54, %v3970_v48  ;;  %v3568_v8 = vor.u32 %v3567_v20, %v3566_v33  ;;  %vm3973_vm0 = vcmp.lt.s32.totalorder %v9763_v10, 1  ;;  %v4893_v63 = vpop.permute.xlu2 %4892 }
 0x332   :  { %v3722_v38 = vshll.u32 %v9767_v36, 30  ;;  %vm3976_vm10 = vcmp.lt.s32.totalorder %v9763_v10, 4  ;;  %v4402_v50 = vadd.f32 1.0, %v4401_v31  ;;  %v3112_v0 = vmul.f32 %v3111_v52, %v9726_v45 }
 0x333   :  { %v3572_v53 = vor.u32 4788187, %v3571_v34  ;;  %v9780_v18 = vshll.u32 %v3949_v51, 8  ;;  %v3119_v7 = vmul.f32 %v3118_v1, %v9726_v45  ;;  %v9785_v32 = vor.u32 %v3959_v19, %v3958_v44 }
 0x334   :  { %v9783_v3 = vsub.s32 %v3719_v42, %v3722_v38  ;;  %vm3975_vm11 = vcmp.lt.s32.totalorder %v9763_v10, 3  ;;  %vm3974_vm8 = vcmp.lt.s32.totalorder %v9763_v10, 2  ;;  %v3982_v25 = vsel %vm3976_vm10, %v3969_v35, 920167782 }
 0x335   :  { %v3985_v31 = vsel %vm3973_vm0, %v9772_v2, %v9774_v46  ;;  %v3986_v4 = vsel %vm3976_vm10, %v3972_v15, 1326507024  ;;  %v3575_v42 = vcvt.s32.f32 %v3568_v8  ;;  %v9800_v11 = vmul.f32 %v9292_v28, %v4893_v63 }
 0x336   :  { %vm3724_vm15 = vcmp.lt.s32.totalorder %v9783_v3, 0  ;;  %v3725_v48 = vsub.s32 0, %v9783_v3  ;;  %v3573_v59 = vand.u32 2147483647, %v3572_v53  ;;  %v3987_v57 = vsel %vm3975_vm11, %v3969_v35, %v3986_v4 }
 0x337   :  { %12343 = vst [vmem:[#allocation49_spill] sm:$0xff] %v9800_v11  ;;  %v3990_v54 = vand.u32 65535, %v9780_v18  ;;  %v3991_v33 = vshrl.u32 %v9780_v18, 16  ;;  %v3981_v47 = vsel %vm3973_vm0, %v9785_v32, %v9772_v2  ;;  %v3983_v28 = vsel %vm3975_vm11, %v9774_v46, %v3982_v25 }
 0x338   :  { %v3726_v20 = vsel %vm3724_vm15, %v3725_v48, %v9783_v3  ;;  %v3988_v52 = vsel %vm3974_vm8, %v3985_v31, %v3987_v57  ;;  %v9818_v34 = vmul.f32 %v9722_v55, %v9518_v43  ;;  %v9821_v19 = vmul.f32 %v4402_v50, %v9607_v6 }
 0x339   :  { %v3727_v51 = vclz %v3726_v20  ;;  %v3992_v1 = vand.u32 65535, %v3988_v52  ;;  %v3993_v44 = vshrl.u32 %v3988_v52, 16  ;;  %v9827_v35 = vand.u32 3, %v4388_v49 }
 0x33a   :  { %v3108_v15 = vsel %vm9676_vm13, 0, %v9735_v29  ;;  %v3113_v8 = vadd.f32 -0.4999988, %v3112_v0  ;;  %v3120_v38 = vadd.f32 -0.16666654, %v3119_v7  ;;  %v3984_v55 = vsel %vm3974_vm8, %v3981_v47, %v3983_v28 }
 0x33b   :  { %v6031_v43 = vadd.s32 4294967294, %v3727_v51  ;;  %v3995_v53 = vmul.u32 %v3993_v44, %v3990_v54  ;;  %v4411_v6 = vxor.u32 2147483648, %v9765_v5  ;;  %v3576_v50 = vmul.f32 %v3575_v42, %v3573_v59 }
 0x33c   :  { %v3996_v25 = vmul.u32 %v3992_v1, %v3991_v33  ;;  %v4904_v39 = vand.u32 2139095040, %v9800_v11  ;;  %v3994_v17 = vmul.u32 %v3992_v1, %v3990_v54  ;;  %v4014_v31 = vand.u32 65535, %v3984_v55 }
 0x33d   :  { %vm6032_vm12 = vcmp.lt.s32.totalorder %v6031_v43, 0  ;;  %v3998_v49 = vshll.u32 %v3995_v53, 16  ;;  %v9836_v4 = vand.u32 3, %v3108_v15  ;;  %vm3457_vm13 = vcmp.lt.s32.totalorder %v9295_v22, 0 }
 0x33e   :  { %v3730_v16 = vsel %vm6032_vm12, 0, %v6031_v43  ;;  %v4015_v29 = vshrl.u32 %v3984_v55, 16  ;;  %v3114_v0 = vmul.f32 %v3113_v8, %v9726_v45  ;;  %v3121_v7 = vmul.f32 %v3120_v38, %v9726_v45 }
 0x33f   :  { %v3735_v63 = vsub.s32 4294967266, %v3730_v16  ;;  %v3997_v48 = vmul.u32 %v3993_v44, %v3991_v33  ;;  %v3577_v42 = vxor.u32 2147483648, %v3576_v50  ;;  %v3715_v59 = vadd.s32 %v9714_v61, %v9712_v60 }
 0x340   :  { %v3957_v57 = vshrl.u32 %v12196_v40, %v9742_v62  ;;  %v4000_v20 = vshll.u32 %v3996_v25, 16  ;;  %v3731_v47 = vsub.s32 32, %v3730_v16  ;;  %vm4002_vm14 = vc.u32 %v3994_v17, %v3998_v49 }
 0x341   :  { %v4016_v28 = vmul.u32 %v4014_v31, %v3990_v54  ;;  %v4905_v52 = vshrl.u32 %v4904_v39, 23  ;;  %vm4410_vm5 = vcmp.eq.s32.totalorder %v9827_v35, 2  ;;  %v4003_v51 = vsel %vm4002_vm14, 1, %v12194_v21 }
 0x342   :  { %v4004_v1 = vadd.s32 %v3998_v49, %v3994_v17  ;;  %v4017_v45 = vmul.u32 %v4015_v29, %v3990_v54  ;;  %v4018_v15 = vmul.u32 %v4014_v31, %v3991_v33  ;;  %v12344_v44 = vand.u32 2147483647, %v9295_v22 }
 0x343   :  { %v3736_v60 = vadd.s32 127, %v3735_v63  ;;  %v3978_v61 = vsel %vm3976_vm10, %v9774_v46, 2102212464  ;;  %v3999_v62 = vshrl.u32 %v3995_v53, 16  ;;  %v4005_v38 = vadd.s32 %v4003_v51, %v3997_v48 }
 0x344   :  { %vm9849_vm9 = vcmp.le.f32.partialorder %v12344_v44, 0.7853982  ;;  %vm4006_vm2 = vc.u32 %v4004_v1, %v4000_v20  ;;  %v4019_v43 = vmul.u32 %v4015_v29, %v3991_v33  ;;  %v4020_v55 = vshll.u32 %v4017_v45, 16 }
 0x345   :  { %v4022_v39 = vshll.u32 %v4018_v15, 16  ;;  %v3732_v54 = vshll.u32 %v9783_v3, %v3730_v16  ;;  %v3733_v17 = vshrl.u32 %v3715_v59, %v3731_v47  ;;  %v3977_v49 = vsel %vm3973_vm0, %v3957_v57, %v9785_v32 }
 0x346   :  { %v4007_v31 = vsel %vm4006_vm2, 1, %v12194_v21  ;;  %vm4024_vm4 = vc.u32 %v4016_v28, %v4020_v55  ;;  %v4026_v44 = vadd.s32 %v4020_v55, %v4016_v28  ;;  %v6054_v14 = vadd.s32 4294967169, %v4905_v52 }
 0x347   :  { %v4009_v63 = vadd.s32 %v4007_v31, %v4005_v38  ;;  %v3737_v46 = vshll.u32 %v3736_v60, 23  ;;  %v3979_v33 = vsel %vm3975_vm11, %v9772_v2, %v3978_v61  ;;  %v4001_v53 = vshrl.u32 %v3996_v25, 16 }
 0x348   :  { %v4025_v29 = vsel %vm4024_vm4, 1, %v12194_v21  ;;  %v4021_v16 = vshrl.u32 %v4017_v45, 16  ;;  %vm4028_vm10 = vc.u32 %v4026_v44, %v4022_v39  ;;  %v3122_v59 = vadd.f32 1.0, %v3121_v7 }
 0x349   :  { %v4010_v3 = vadd.s32 %v4009_v63, %v3999_v62  ;;  %v4027_v48 = vadd.s32 %v4025_v29, %v4019_v43  ;;  %v3578_v32 = vsel %vm3457_vm13, %v3577_v42, %v3576_v50  ;;  %v4029_v57 = vsel %vm4028_vm10, 1, %v12194_v21 }
 0x34a   :  { %v4911_v20 = vadd.s32 1, %v6054_v14  ;;  %v3734_v47 = vor.u32 %v3733_v17, %v3732_v54  ;;  %v3980_v28 = vsel %vm3974_vm8, %v3977_v49, %v3979_v33  ;;  %v4023_v52 = vshrl.u32 %v4018_v15, 16 }
 0x34b   :  { %v4031_v2 = vadd.s32 %v4029_v57, %v4027_v48  ;;  %v3738_v25 = vor.u32 4788187, %v3737_v46  ;;  %v9870_v51 = vadd.s32 %v4010_v3, %v4001_v53  ;;  %v9872_v1 = vadd.s32 %v4026_v44, %v4022_v39 }
 0x34c   :  { %vm4912_vm0 = vcmp.gt.s32.totalorder %v4911_v20, 0  ;;  %vm4407_vm11 = vcmp.eq.s32.totalorder %v9827_v35, 0  ;;  %v4408_v7 = vxor.u32 2147483648, %v9821_v19  ;;  %v12152_v42 = vand.u32 2147483647, %v9800_v11 }
 0x34d   :  { %v4032_v50 = vadd.s32 %v4031_v2, %v4021_v16  ;;  %v4913_v14 = vsel %vm4912_vm0, %v4911_v20, 0  ;;  %v4412_v10 = vsel %vm4410_vm5, %v4411_v6, %v9821_v19  ;;  %v3115_v45 = vadd.f32 1.0, %v3114_v0 }
 0x34e   :  { %vm3127_vm8 = vcmp.eq.s32.totalorder %v9836_v4, 0  ;;  %v4915_v15 = vand.u32 31, %v4913_v14  ;;  %v3123_v60 = vmul.f32 %v3122_v59, %v9710_v24  ;;  %v9887_v61 = vsel %vm9849_vm9, %v9295_v22, %v3578_v32 }
 0x34f   :  { %v4033_v62 = vadd.s32 %v4032_v50, %v4023_v52  ;;  %v4034_v38 = vmul.u32 %v9780_v18, %v3980_v28  ;;  %vm4406_vm15 = vcmp.lt.s32.totalorder %v9827_v35, 2  ;;  %v3739_v43 = vand.u32 2147483647, %v3738_v25 }
 0x350   :  { %v3741_v55 = vcvt.s32.f32 %v3734_v47  ;;  %vm4036_vm12 = vc.u32 %v9870_v51, %v9872_v1  ;;  %v9893_v19 = vsub.s32 32, %v4915_v15  ;;  %v4908_v24 = vand.u32 8388607, %v12152_v42 }
 0x351   :  { %v4037_v6 = vadd.s32 1, %v4033_v62  ;;  %v9897_v0 = vshrl.u32 %v4913_v14, 5  ;;  %v4927_v39 = vshll.u32 %v12202_v12, %v4915_v15  ;;  %vm3126_vm14 = vcmp.lt.s32.totalorder %v9836_v4, 2 }
 0x352   :  { %v4918_v18 = vshll.u32 %v12196_v40, %v4915_v15  ;;  %v4919_v54 = vshrl.u32 %v12201_v56, %v9893_v19  ;;  %v4921_v17 = vshll.u32 %v12201_v56, %v4915_v15  ;;  %v4924_v49 = vshll.u32 %v12207_v58, %v4915_v15 }
 0x353   :  { %v4038_v31 = vsel %vm4036_vm12, %v4037_v6, %v4033_v62  ;;  %v4922_v63 = vshrl.u32 %v12207_v58, %v9893_v19  ;;  %v4925_v44 = vshrl.u32 %v12202_v12, %v9893_v19  ;;  %v4928_v46 = vshrl.u32 %v12195_v41, %v9893_v19 }
 0x354   :  { %v3128_v33 = vxor.u32 2147483648, %v3123_v60  ;;  %vm3130_vm5 = vcmp.eq.s32.totalorder %v9836_v4, 2  ;;  %v3131_v53 = vxor.u32 2147483648, %v3115_v45  ;;  %v4039_v29 = vadd.s32 %v4038_v31, %v4034_v38  ;;  %v4573_v31 = vpop.permute.xlu0 %4572 }
 0x355   :  { %v9915_v3 = vmul.f32 %v9887_v61, %v9887_v61  ;;  %v4929_v16 = vor.u32 %v4928_v46, %v4927_v39  ;;  %v4930_v48 = vshll.u32 %v12195_v41, %v4915_v15  ;;  %v4931_v59 = vshrl.u32 %v12203_v13, %v9893_v19 }
 0x356   :  { %vm4404_vm2 = vweird.f32 %v8982_v9  ;;  %v3742_v32 = vmul.f32 %v3741_v55, %v3739_v43  ;;  %v4040_v57 = vadd.s32 536870912, %v4039_v29  ;;  %v9921_v20 = vor.u32 %v4919_v54, %v4918_v18 }
 0x357   :  { %v9923_v47 = vor.u32 %v4922_v63, %v4921_v17  ;;  %vm3124_vm4 = vweird.f32 %v9191_v37  ;;  %v4909_v28 = vor.u32 8388608, %v4908_v24  ;;  %v9926_v52 = vor.u32 %v4925_v44, %v4924_v49 }
 0x358   :  { %vm4933_vm10 = vcmp.lt.s32.totalorder %v9897_v0, 1  ;;  %vm4936_vm0 = vcmp.lt.s32.totalorder %v9897_v0, 4  ;;  %v4409_v2 = vsel %vm4407_vm11, %v9765_v5, %v4408_v7  ;;  %v3132_v25 = vsel %vm3130_vm5, %v3131_v53, %v3123_v60 }
 0x359   :  { %v9935_v50 = vshrl.u32 %v4040_v57, 30  ;;  %vm4935_vm12 = vcmp.lt.s32.totalorder %v9897_v0, 3  ;;  %v3129_v14 = vsel %vm3127_vm8, %v3115_v45, %v3128_v33  ;;  %v3584_v15 = vmul.f32 -0.001358992, %v9915_v3 }
 0x35a   :  { %v4932_v62 = vor.u32 %v4931_v59, %v4930_v48  ;;  %v4942_v38 = vsel %vm4936_vm0, %v4929_v16, 920167782  ;;  %v3591_v43 = vmul.f32 -0.00019511016, %v9915_v3  ;;  %vm4934_vm11 = vcmp.lt.s32.totalorder %v9897_v0, 2 }
 0x35b   :  { %v4042_v5 = vshll.u32 %v9935_v50, 30  ;;  %v4941_v7 = vsel %vm4933_vm10, %v9921_v20, %v9923_v47  ;;  %v4413_v45 = vsel %vm4406_vm15, %v4409_v2, %v4412_v10  ;;  %v3743_v60 = vxor.u32 2147483648, %v3742_v32 }
 0x35c   :  { %v4943_v55 = vsel %vm4935_vm12, %v9926_v52, %v4942_v38  ;;  %v9955_v6 = vshll.u32 %v4909_v28, 8  ;;  %v3579_v24 = vsub.s32 4, %v9615_v26  ;;  %v12347_v39 = vand.u32 2147483647, %v9489_v30  ;;  %v9991_v28 = vld [vmem:[%s12005_s6] ss:$0 sm:$0xff] }
 0x35d   :  { %vm3623_vm5 = vcmp.lt.s32.totalorder %v9489_v30, 0  ;;  %v9965_v54 = vsub.s32 %v4039_v29, %v4042_v5  ;;  %v3133_v35 = vsel %vm3126_vm14, %v3129_v14, %v3132_v25  ;;  %v4944_v10 = vsel %vm4934_vm11, %v4941_v7, %v4943_v55 }
 0x35e   :  { %vm9960_vm8 = vcmp.le.f32.partialorder %v12347_v39, 0.7853982  ;;  %v4945_v17 = vsel %vm4933_vm10, %v9923_v47, %v9926_v52  ;;  %v4946_v49 = vsel %vm4936_vm0, %v4932_v62, 1326507024  ;;  %v3585_v63 = vadd.f32 0.041655596, %v3584_v15 }
 0x35f   :  { %v3592_v44 = vadd.f32 0.008332121, %v3591_v43  ;;  %vm4044_vm15 = vcmp.lt.s32.totalorder %v9965_v54, 0  ;;  %v4045_v46 = vsub.s32 0, %v9965_v54  ;;  %v3744_v4 = vsel %vm3623_vm5, %v3743_v60, %v3742_v32 }
 0x360   :  { %v4947_v33 = vsel %vm4935_vm12, %v4929_v16, %v4946_v49  ;;  %v4950_v53 = vand.u32 65535, %v9955_v6  ;;  %v4975_v29 = vshrl.u32 %v4944_v10, 16  ;;  %v4951_v57 = vshrl.u32 %v9955_v6, 16 }
 0x361   :  { %v4046_v48 = vsel %vm4044_vm15, %v4045_v46, %v9965_v54  ;;  %v4948_v59 = vsel %vm4934_vm11, %v4945_v17, %v4947_v33  ;;  %v9994_v32 = vmul.f32 %v9991_v28, %v4573_v31  ;;  %v9998_v16 = vsel %vm4404_vm2, nan, %v4413_v45 }
 0x362   :  { %12351 = vst [vmem:[#allocation51_spill] sm:$0xff] %v9998_v16  ;;  %v4047_v2 = vclz %v4046_v48  ;;  %v4952_v25 = vand.u32 65535, %v4948_v59  ;;  %v4953_v14 = vshrl.u32 %v4948_v59, 16  ;;  %v10002_v15 = vsel %vm3124_vm4, nan, %v3133_v35 }
 0x363   :  { %12350 = vst [vmem:[#allocation50_spill] sm:$0xff] %v9994_v32  ;;  %v10007_v62 = vsel %vm3457_vm13, %v3579_v24, %v9615_v26  ;;  %v10012_v38 = vsel %vm9960_vm8, %v9489_v30, %v3744_v4  ;;  %v4974_v9 = vand.u32 65535, %v4944_v10  ;;  %v10015_v43 = vmul.f32 %v3585_v63, %v9915_v3 }
 0x364   :  { %v6037_v5 = vadd.s32 4294967294, %v4047_v2  ;;  %v4955_v7 = vmul.u32 %v4953_v14, %v4950_v53  ;;  %v4977_v45 = vmul.u32 %v4975_v29, %v4950_v53  ;;  %v3593_v37 = vmul.f32 %v3592_v44, %v9915_v3 }
 0x365   :  { %v4954_v60 = vmul.u32 %v4952_v25, %v4950_v53  ;;  %v4956_v55 = vmul.u32 %v4952_v25, %v4951_v57  ;;  %v4584_v39 = vand.u32 2139095040, %v9994_v32  ;;  %v10021_v26 = vmul.f32 %v10012_v38, %v10012_v38 }
 0x366   :  { %vm6038_vm13 = vcmp.lt.s32.totalorder %v6037_v5, 0  ;;  %v4917_v24 = vshrl.u32 %v12196_v40, %v9893_v19  ;;  %v4957_v17 = vmul.u32 %v4953_v14, %v4951_v57  ;;  %v4958_v49 = vshll.u32 %v4955_v7, 16 }
 0x367   :  { %v4050_v10 = vsel %vm6038_vm13, 0, %v6037_v5  ;;  %v4978_v31 = vmul.u32 %v4974_v9, %v4951_v57  ;;  %v4938_v63 = vsel %vm4936_vm0, %v9926_v52, 2102212464  ;;  %v4960_v44 = vshll.u32 %v4956_v55, 16 }
 0x368   :  { %v4976_v46 = vmul.u32 %v4974_v9, %v4950_v53  ;;  %v4980_v4 = vshll.u32 %v4977_v45, 16  ;;  %v3750_v33 = vmul.f32 -0.001358992, %v10021_v26  ;;  %v4035_v48 = vadd.s32 %v9872_v1, %v9870_v51 }
 0x369   :  { %vm4962_vm14 = vc.u32 %v4954_v60, %v4958_v49  ;;  %v4585_v19 = vshrl.u32 %v4584_v39, 23  ;;  %v4055_v59 = vsub.s32 4294967266, %v4050_v10  ;;  %v4964_v25 = vadd.s32 %v4958_v49, %v4954_v60 }
 0x36a   :  { %v4963_v2 = vsel %vm4962_vm14, 1, %v12194_v21  ;;  %v4979_v14 = vmul.u32 %v4975_v29, %v4951_v57  ;;  %v4937_v5 = vsel %vm4933_vm10, %v4917_v24, %v9921_v20  ;;  %v4939_v52 = vsel %vm4935_vm12, %v9923_v47, %v4938_v63 }
 0x36b   :  { %v4965_v53 = vadd.s32 %v4963_v2, %v4957_v17  ;;  %v4982_v9 = vshll.u32 %v4978_v31, 16  ;;  %v4051_v42 = vsub.s32 32, %v4050_v10  ;;  %v4959_v35 = vshrl.u32 %v4955_v7, 16 }
 0x36c   :  { %vm4966_vm2 = vc.u32 %v4964_v25, %v4960_v44  ;;  %vm4984_vm4 = vc.u32 %v4976_v46, %v4980_v4  ;;  %v4986_v60 = vadd.s32 %v4980_v4, %v4976_v46  ;;  %v6048_v29 = vadd.s32 4294967169, %v4585_v19 }
 0x36d   :  { %v4967_v51 = vsel %vm4966_vm2, 1, %v12194_v21  ;;  %v4985_v1 = vsel %vm4984_vm4, 1, %v12194_v21  ;;  %v4056_v57 = vadd.s32 127, %v4055_v59  ;;  %v4961_v39 = vshrl.u32 %v4956_v55, 16 }
 0x36e   :  { %v4969_v49 = vadd.s32 %v4967_v51, %v4965_v53  ;;  %v4987_v20 = vadd.s32 %v4985_v1, %v4979_v14  ;;  %v3757_v24 = vmul.f32 -0.00019511016, %v10021_v26  ;;  %v4981_v16 = vshrl.u32 %v4977_v45, 16 }
 0x36f   :  { %vm4988_vm10 = vc.u32 %v4986_v60, %v4982_v9  ;;  %v4591_v47 = vadd.s32 1, %v6048_v29  ;;  %v4052_v17 = vshll.u32 %v9965_v54, %v4050_v10  ;;  %v4940_v7 = vsel %vm4934_vm11, %v4937_v5, %v4939_v52 }
 0x370   :  { %v4970_v63 = vadd.s32 %v4969_v49, %v4959_v35  ;;  %v4989_v44 = vsel %vm4988_vm10, 1, %v12194_v21  ;;  %v4053_v2 = vshrl.u32 %v4035_v48, %v4051_v42  ;;  %v4983_v46 = vshrl.u32 %v4978_v31, 16 }
 0x371   :  { %v4991_v4 = vadd.s32 %v4989_v44, %v4987_v20  ;;  %vm4592_vm0 = vcmp.gt.s32.totalorder %v4591_v47, 0  ;;  %v4057_v55 = vshll.u32 %v4056_v57, 23  ;;  %v10048_v59 = vadd.s32 %v4986_v60, %v4982_v9 }
 0x372   :  { %v10046_v19 = vadd.s32 %v4970_v63, %v4961_v39  ;;  %v4593_v45 = vsel %vm4592_vm0, %v4591_v47, 0  ;;  %v3582_v54 = vsel %vm9849_vm9, 0, %v10007_v62  ;;  %v3745_v0 = vsub.s32 4, %v9767_v36 }
 0x373   :  { %v4992_v10 = vadd.s32 %v4991_v4, %v4981_v16  ;;  %v4595_v35 = vand.u32 31, %v4593_v45  ;;  %v10056_v42 = vadd.f32 %v9720_v23, %v10002_v15  ;;  %v3587_v31 = vadd.f32 -0.4999988, %v10015_v43 }
 0x374   :  { %v3594_v48 = vadd.f32 -0.16666654, %v3593_v37  ;;  %v3751_v25 = vadd.f32 0.041655596, %v3750_v33  ;;  %v3758_v14 = vadd.f32 0.008332121, %v3757_v24  ;;  %v4994_v52 = vmul.u32 %v9955_v6, %v4940_v7 }
 0x375   :  { %v4993_v5 = vadd.s32 %v4992_v10, %v4983_v46  ;;  %v10060_v53 = vsub.s32 32, %v4595_v35  ;;  %v4054_v9 = vor.u32 %v4053_v2, %v4052_v17  ;;  %v4058_v51 = vor.u32 4788187, %v4057_v55 }
 0x376   :  { %vm4996_vm12 = vc.u32 %v10046_v19, %v10048_v59  ;;  %v12352_v16 = vand.u32 2147483647, %v9994_v32  ;;  %v10066_v15 = vshrl.u32 %v4593_v45, 5  ;;  %v4598_v43 = vshll.u32 %v12196_v40, %v4595_v35 }
 0x377   :  { %v4997_v23 = vadd.s32 1, %v4993_v5  ;;  %v4607_v37 = vshll.u32 %v12202_v12, %v4595_v35  ;;  %v4599_v6 = vshrl.u32 %v12201_v56, %v10060_v53  ;;  %v4601_v33 = vshll.u32 %v12201_v56, %v4595_v35 }
 0x378   :  { %v4588_v1 = vand.u32 8388607, %v12352_v16  ;;  %v4602_v60 = vshrl.u32 %v12207_v58, %v10060_v53  ;;  %v4604_v29 = vshll.u32 %v12207_v58, %v4595_v35  ;;  %v4605_v39 = vshrl.u32 %v12202_v12, %v10060_v53 }
 0x379   :  { %v4998_v57 = vsel %vm4996_vm12, %v4997_v23, %v4993_v5  ;;  %v4608_v49 = vshrl.u32 %v12195_v41, %v10060_v53  ;;  %v4610_v20 = vshll.u32 %v12195_v41, %v4595_v35  ;;  %v3595_v24 = vmul.f32 %v3594_v48, %v9915_v3 }
 0x37a   :  { %v3752_v47 = vmul.f32 %v3751_v25, %v10021_v26  ;;  %v3759_v17 = vmul.f32 %v3758_v14, %v10021_v26  ;;  %v4999_v7 = vadd.s32 %v4998_v57, %v4994_v52  ;;  %v4059_v63 = vand.u32 2147483647, %v4058_v51 }
 0x37b   :  { %v4061_v44 = vcvt.s32.f32 %v4054_v9  ;;  %v4609_v2 = vor.u32 %v4608_v49, %v4607_v37  ;;  %v4611_v46 = vshrl.u32 %v12203_v13, %v10060_v53  ;;  %v4589_v55 = vor.u32 8388608, %v4588_v1 }
 0x37c   :  { %v5000_v4 = vadd.s32 536870912, %v4999_v7  ;;  %v10086_v45 = vor.u32 %v4599_v6, %v4598_v43  ;;  %v10088_v10 = vor.u32 %v4602_v60, %v4601_v33  ;;  %v10090_v35 = vor.u32 %v4605_v39, %v4604_v29 }
 0x37d   :  { %v4612_v48 = vor.u32 %v4611_v46, %v4610_v20  ;;  %vm4613_vm11 = vcmp.lt.s32.totalorder %v10066_v15, 1  ;;  %vm4616_vm15 = vcmp.lt.s32.totalorder %v10066_v15, 4  ;;  %v3588_v25 = vmul.f32 %v3587_v31, %v9915_v3 }
 0x37e   :  { %v3746_v14 = vsel %vm3623_vm5, %v3745_v0, %v9767_v36  ;;  %v10098_v5 = vshrl.u32 %v5000_v4, 30  ;;  %vm4615_vm13 = vcmp.lt.s32.totalorder %v10066_v15, 3  ;;  %v3596_v52 = vadd.f32 1.0, %v3595_v24 }
 0x37f   :  { %v3760_v9 = vadd.f32 -0.16666654, %v3759_v17  ;;  %v4062_v51 = vmul.f32 %v4061_v44, %v4059_v63  ;;  %v4622_v16 = vsel %vm4616_vm15, %v4609_v2, 920167782  ;;  %vm4614_vm14 = vcmp.lt.s32.totalorder %v10066_v15, 2 }
 0x380   :  { %v5002_v1 = vshll.u32 %v10098_v5, 30  ;;  %v4621_v3 = vsel %vm4613_vm11, %v10086_v45, %v10088_v10  ;;  %v10109_v36 = vshll.u32 %v4589_v55, 8  ;;  %v3753_v0 = vadd.f32 -0.4999988, %v3752_v47 }
 0x381   :  { %vm3943_vm5 = vcmp.lt.s32.totalorder %v9658_v27, 0  ;;  %v4623_v31 = vsel %vm4615_vm13, %v10090_v35, %v4622_v16  ;;  %v4626_v23 = vsel %vm4616_vm15, %v4612_v48, 1326507024  ;;  %v10117_v43 = vadd.f32 1.0, %v3588_v25 }
 0x382   :  { %v3748_v37 = vsel %vm9960_vm8, 0, %v3746_v14  ;;  %v10121_v6 = vsub.s32 %v4999_v7, %v5002_v1  ;;  %v4625_v33 = vsel %vm4613_vm11, %v10088_v10, %v10090_v35  ;;  %v3761_v60 = vmul.f32 %v3760_v9, %v10021_v26  ;;  %v2974_v14 = vpop.permute.xlu1 %2973 }
 0x383   :  { %v4063_v29 = vxor.u32 2147483648, %v4062_v51  ;;  %v4624_v57 = vsel %vm4614_vm14, %v4621_v3, %v4623_v31  ;;  %v4627_v39 = vsel %vm4615_vm13, %v4609_v2, %v4626_v23  ;;  %v10133_v49 = vmul.f32 %v3596_v52, %v9887_v61 }
 0x384   :  { %v5005_v18 = vsub.s32 0, %v10121_v6  ;;  %v4630_v20 = vand.u32 65535, %v10109_v36  ;;  %v4631_v24 = vshrl.u32 %v10109_v36, 16  ;;  %v3754_v47 = vmul.f32 %v3753_v0, %v10021_v26 }
 0x385   :  { %vm5004_vm8 = vcmp.lt.s32.totalorder %v10121_v6, 0  ;;  %v4628_v17 = vsel %vm4614_vm14, %v4625_v33, %v4627_v39  ;;  %v4655_v7 = vshrl.u32 %v4624_v57, 16  ;;  %v10146_v61 = vand.u32 3, %v3582_v54 }
 0x386   :  { %v12353_v63 = vand.u32 2147483647, %v9658_v27  ;;  %v4632_v2 = vand.u32 65535, %v4628_v17  ;;  %v4654_v26 = vand.u32 65535, %v4624_v57  ;;  %v3762_v4 = vadd.f32 1.0, %v3761_v60 }
 0x387   :  { %v4064_v55 = vsel %vm3943_vm5, %v4063_v29, %v4062_v51  ;;  %v4633_v48 = vshrl.u32 %v4628_v17, 16  ;;  %v10157_v8 = vand.u32 3, %v3748_v37  ;;  %v5006_v62 = vsel %vm5004_vm8, %v5005_v18, %v10121_v6 }
 0x388   :  { %vm10150_vm2 = vcmp.le.f32.partialorder %v12353_v63, 0.7853982  ;;  %v4636_v54 = vmul.u32 %v4632_v2, %v4631_v24  ;;  %v4657_v25 = vmul.u32 %v4655_v7, %v4630_v20  ;;  %v3602_v52 = vxor.u32 2147483648, %v10133_v49 }
 0x389   :  { %v3755_v9 = vadd.f32 1.0, %v3754_v47  ;;  %v4635_v16 = vmul.u32 %v4633_v48, %v4630_v20  ;;  %v10162_v1 = vmul.f32 %v9991_v28, %v2974_v14  ;;  %v4065_v3 = vsub.s32 4, %v9935_v50 }
 0x38a   :  { %v10168_v51 = vsel %vm10150_vm2, %v9658_v27, %v4064_v55  ;;  %v4634_v0 = vmul.u32 %v4632_v2, %v4630_v20  ;;  %v4658_v31 = vmul.u32 %v4654_v26, %v4631_v24  ;;  %v3763_v23 = vmul.f32 %v3762_v4, %v10012_v38 }
 0x38b   :  { %v5007_v37 = vclz %v5006_v62  ;;  %v4597_v33 = vshrl.u32 %v12196_v40, %v10060_v53  ;;  %v4638_v60 = vshll.u32 %v4635_v16, 16  ;;  %vm3767_vm9 = vcmp.eq.s32.totalorder %v10157_v8, 0 }
 0x38c   :  { %vm3770_vm4 = vcmp.eq.s32.totalorder %v10157_v8, 2  ;;  %v4637_v29 = vmul.u32 %v4633_v48, %v4631_v24  ;;  %v4640_v57 = vshll.u32 %v4636_v54, 16  ;;  %v4656_v39 = vmul.u32 %v4654_v26, %v4630_v20 }
 0x38d   :  { %v4660_v18 = vshll.u32 %v4657_v25, 16  ;;  %v3771_v47 = vxor.u32 2147483648, %v3755_v9  ;;  %v10177_v17 = vmul.f32 %v10168_v51, %v10168_v51  ;;  %v4618_v38 = vsel %vm4616_vm15, %v10090_v35, 2102212464 }
 0x38e   :  { %v3138_v53 = vand.u32 2139095040, %v10162_v1  ;;  %vm4642_vm10 = vc.u32 %v4634_v0, %v4638_v60  ;;  %v4644_v63 = vadd.s32 %v4638_v60, %v4634_v0  ;;  %v4659_v2 = vmul.u32 %v4655_v7, %v4631_v24 }
 0x38f   :  { %v4662_v4 = vshll.u32 %v4658_v31, 16  ;;  %vm3601_vm0 = vcmp.eq.s32.totalorder %v10146_v61, 0  ;;  %v6055_v20 = vadd.s32 4294967294, %v5007_v37  ;;  %v4617_v26 = vsel %vm4613_vm11, %v4597_v33, %v10086_v45 }
 0x390   :  { %v4639_v55 = vshrl.u32 %v4635_v16, 16  ;;  %v4643_v48 = vsel %vm4642_vm10, 1, %v12194_v21  ;;  %vm4646_vm15 = vc.u32 %v4644_v63, %v4640_v57  ;;  %vm4664_vm8 = vc.u32 %v4656_v39, %v4660_v18 }
 0x391   :  { %v4645_v62 = vadd.s32 %v4643_v48, %v4637_v29  ;;  %v4666_v35 = vadd.s32 %v4660_v18, %v4656_v39  ;;  %v4619_v24 = vsel %vm4615_vm13, %v10088_v10, %v4618_v38  ;;  %v4641_v7 = vshrl.u32 %v4636_v54, 16 }
 0x392   :  { %v4647_v14 = vsel %vm4646_vm15, 1, %v12194_v21  ;;  %v4665_v0 = vsel %vm4664_vm8, 1, %v12194_v21  ;;  %v4661_v60 = vshrl.u32 %v4657_v25, 16  ;;  %v3768_v45 = vxor.u32 2147483648, %v3763_v23 }
 0x393   :  { %v4649_v37 = vadd.s32 %v4647_v14, %v4645_v62  ;;  %v4667_v46 = vadd.s32 %v4665_v0, %v4659_v2  ;;  %vm4668_vm11 = vc.u32 %v4666_v35, %v4662_v4  ;;  %vm6056_vm12 = vcmp.lt.s32.totalorder %v6055_v20, 0 }
 0x394   :  { %v4669_v16 = vsel %vm4668_vm11, 1, %v12194_v21  ;;  %v3139_v33 = vshrl.u32 %v3138_v53, 23  ;;  %v4070_v29 = vmul.f32 -0.001358992, %v10177_v17  ;;  %v4663_v39 = vshrl.u32 %v4658_v31, 16 }
 0x395   :  { %v4650_v57 = vadd.s32 %v4649_v37, %v4639_v55  ;;  %v4671_v18 = vadd.s32 %v4669_v16, %v4667_v46  ;;  %v4620_v10 = vsel %vm4614_vm14, %v4617_v26, %v4619_v24  ;;  %v10198_v54 = vadd.s32 %v4666_v35, %v4662_v4 }
 0x396   :  { %v12155_v38 = vand.u32 2147483647, %v10162_v1  ;;  %v6021_v25 = vadd.s32 4294967169, %v3139_v33  ;;  %vm3766_vm13 = vcmp.lt.s32.totalorder %v10157_v8, 2  ;;  %v10202_v63 = vsel %vm6056_vm12, 0, %v6055_v20 }
 0x397   :  { %v10204_v2 = vadd.s32 %v4650_v57, %v4641_v7  ;;  %v4672_v53 = vadd.s32 %v4671_v18, %v4661_v60  ;;  %v3769_v55 = vsel %vm3767_vm9, %v3755_v9, %v3768_v45  ;;  %v3772_v46 = vsel %vm3770_vm4, %v3771_v47, %v3763_v23 }
 0x398   :  { %v10213_v15 = vsel %vm3943_vm5, %v4065_v3, %v9935_v50  ;;  %v3145_v31 = vadd.s32 1, %v6021_v25  ;;  %v4071_v4 = vadd.f32 0.041655596, %v4070_v29  ;;  %v4077_v26 = vmul.f32 -0.00019511016, %v10177_v17 }
 0x399   :  { %v4673_v20 = vadd.s32 %v4672_v53, %v4663_v39  ;;  %v4674_v48 = vmul.u32 %v10109_v36, %v4620_v10  ;;  %v5015_v62 = vsub.s32 4294967266, %v10202_v63  ;;  %vm4676_vm14 = vc.u32 %v10204_v2, %v10198_v54 }
 0x39a   :  { %v3142_v9 = vand.u32 8388607, %v12155_v38  ;;  %vm3146_vm9 = vcmp.gt.s32.totalorder %v3145_v31, 0  ;;  %v10227_v50 = vsel %vm3601_vm0, %v10117_v43, %v3602_v52  ;;  %v12356_v3 = vxor.u32 2147483648, %v10117_v43 }
 0x39b   :  { %vm12357_vm5 = vcmp.eq.s32.totalorder %v10146_v61, 2  ;;  %v4677_v23 = vadd.s32 1, %v4673_v20  ;;  %v3147_v47 = vsel %vm3146_vm9, %v3145_v31, 0  ;;  %v10238_v35 = vsel %vm3766_vm13, %v3769_v55, %v3772_v46 }
 0x39c   :  { %v10234_v36 = vsel %vm12357_vm5, %v12356_v3, %v10133_v49  ;;  %v4068_v24 = vsel %vm10150_vm2, 0, %v10213_v15  ;;  %v4995_v52 = vadd.s32 %v10048_v59, %v10046_v19  ;;  %v3149_v7 = vand.u32 31, %v3147_v47 }
 0x39d   :  { %v4072_v43 = vmul.f32 %v4071_v4, %v10177_v17  ;;  %v4078_v14 = vadd.f32 0.008332121, %v4077_v26  ;;  %v5011_v49 = vsub.s32 32, %v10202_v63  ;;  %v4678_v0 = vsel %vm4676_vm14, %v4677_v23, %v4673_v20  ;;  %v5213_v20 = vpop.permute.xlu2 %5212 }
 0x39e   :  { %v5016_v37 = vadd.s32 127, %v5015_v62  ;;  %v4679_v60 = vadd.s32 %v4678_v0, %v4674_v48  ;;  %v3143_v45 = vor.u32 8388608, %v3142_v9  ;;  %v10247_v8 = vsub.s32 32, %v3149_v7 }
 0x39f   :  { %v10249_v16 = vshrl.u32 %v3147_v47, 5  ;;  %v3152_v33 = vshll.u32 %v12196_v40, %v3149_v7  ;;  %v3155_v29 = vshll.u32 %v12201_v56, %v3149_v7  ;;  %v3161_v19 = vshll.u32 %v12202_v12, %v3149_v7 }
 0x3a0   :  { %v4680_v59 = vadd.s32 536870912, %v4679_v60  ;;  %v3153_v57 = vshrl.u32 %v12201_v56, %v10247_v8  ;;  %v3158_v39 = vshll.u32 %v12207_v58, %v3149_v7  ;;  %v3164_v18 = vshll.u32 %v12195_v41, %v3149_v7 }
 0x3a1   :  { %vm3600_vm4 = vcmp.lt.s32.totalorder %v10146_v61, 2  ;;  %vm3764_vm10 = vweird.f32 %v9489_v30  ;;  %v3156_v10 = vshrl.u32 %v12207_v58, %v10247_v8  ;;  %v3159_v25 = vshrl.u32 %v12202_v12, %v10247_v8 }
 0x3a2   :  { %v3162_v53 = vshrl.u32 %v12195_v41, %v10247_v8  ;;  %v3165_v55 = vshrl.u32 %v12203_v13, %v10247_v8  ;;  %v4073_v46 = vadd.f32 -0.4999988, %v4072_v43  ;;  %v4079_v31 = vmul.f32 %v4078_v14, %v10177_v17 }
 0x3a3   :  { %v5012_v4 = vshll.u32 %v10121_v6, %v10202_v63  ;;  %v10271_v26 = vshrl.u32 %v4680_v59, 30  ;;  %v5013_v48 = vshrl.u32 %v4995_v52, %v5011_v49  ;;  %v10273_v62 = vor.u32 %v3153_v57, %v3152_v33 }
 0x3a4   :  { %v10275_v9 = vor.u32 %v3156_v10, %v3155_v29  ;;  %v3163_v3 = vor.u32 %v3162_v53, %v3161_v19  ;;  %v5017_v23 = vshll.u32 %v5016_v37, 23  ;;  %v3160_v7 = vor.u32 %v3159_v25, %v3158_v39 }
 0x3a5   :  { %v4682_v47 = vshll.u32 %v10271_v26, 30  ;;  %vm3167_vm0 = vcmp.lt.s32.totalorder %v10249_v16, 1  ;;  %v3166_v43 = vor.u32 %v3165_v55, %v3164_v18  ;;  %vm3170_vm12 = vcmp.lt.s32.totalorder %v10249_v16, 4 }
 0x3a6   :  { %v10280_v14 = vshll.u32 %v3143_v45, 8  ;;  %v10283_v6 = vmul.f32 %v9991_v28, %v5213_v20  ;;  %v4074_v63 = vmul.f32 %v4073_v46, %v10177_v17  ;;  %v4080_v52 = vadd.f32 -0.16666654, %v4079_v31 }
 0x3a7   :  { %v10286_v49 = vsub.s32 %v4679_v60, %v4682_v47  ;;  %vm3169_vm15 = vcmp.lt.s32.totalorder %v10249_v16, 3  ;;  %v5014_v0 = vor.u32 %v5013_v48, %v5012_v4  ;;  %vm3168_vm8 = vcmp.lt.s32.totalorder %v10249_v16, 2 }
 0x3a8   :  { %v3175_v37 = vsel %vm3167_vm0, %v10273_v62, %v10275_v9  ;;  %v3176_v45 = vsel %vm3170_vm12, %v3163_v3, 920167782  ;;  %v5018_v33 = vor.u32 4788187, %v5017_v23  ;;  %v3179_v60 = vsel %vm3167_vm0, %v10275_v9, %v3160_v7 }
 0x3a9   :  { %vm4684_vm11 = vcmp.lt.s32.totalorder %v10286_v49, 0  ;;  %v4685_v29 = vsub.s32 0, %v10286_v49  ;;  %v3177_v19 = vsel %vm3169_vm15, %v3160_v7, %v3176_v45  ;;  %v3180_v59 = vsel %vm3170_vm12, %v3166_v43, 1326507024 }
 0x3aa   :  { %v3184_v57 = vand.u32 65535, %v10280_v14  ;;  %v5224_v39 = vand.u32 2139095040, %v10283_v6  ;;  %v3178_v10 = vsel %vm3168_vm8, %v3175_v37, %v3177_v19  ;;  %v3181_v25 = vsel %vm3169_vm15, %v3163_v3, %v3180_v59 }
 0x3ab   :  { %v4686_v18 = vsel %vm4684_vm11, %v4685_v29, %v10286_v49  ;;  %v3185_v53 = vshrl.u32 %v10280_v14, 16  ;;  %v3182_v46 = vsel %vm3168_vm8, %v3179_v60, %v3181_v25  ;;  %v3208_v31 = vand.u32 65535, %v3178_v10 }
 0x3ac   :  { %v4687_v55 = vclz %v4686_v18  ;;  %v3209_v4 = vshrl.u32 %v3178_v10, 16  ;;  %v10319_v20 = vsel %vm3600_vm4, %v10227_v50, %v10234_v36  ;;  %v10324_v48 = vsel %vm3764_vm10, nan, %v10238_v35 }
 0x3ad   :  { %v3186_v3 = vand.u32 65535, %v3182_v46  ;;  %v3187_v23 = vshrl.u32 %v3182_v46, 16  ;;  %v4081_v47 = vmul.f32 %v4080_v52, %v10177_v17  ;;  %v10331_v43 = vand.u32 3, %v4068_v24 }
 0x3ae   :  { %v6049_v37 = vadd.s32 4294967294, %v4687_v55  ;;  %v5225_v45 = vshrl.u32 %v5224_v39, 23  ;;  %v3211_v29 = vmul.u32 %v3209_v4, %v3184_v57  ;;  %v10333_v60 = vadd.f32 1.0, %v4074_v63 }
 0x3af   :  { %v3188_v61 = vmul.u32 %v3186_v3, %v3184_v57  ;;  %v3189_v50 = vmul.u32 %v3187_v23, %v3184_v57  ;;  %v3190_v36 = vmul.u32 %v3186_v3, %v3185_v53  ;;  %v5019_v30 = vand.u32 2147483647, %v5018_v33 }
 0x3b0   :  { %v5021_v35 = vcvt.s32.f32 %v5014_v0  ;;  %v3212_v19 = vmul.u32 %v3208_v31, %v3185_v53  ;;  %vm6050_vm13 = vcmp.lt.s32.totalorder %v6049_v37, 0  ;;  %v3191_v59 = vmul.u32 %v3187_v23, %v3185_v53 }
 0x3b1   :  { %v3192_v17 = vshll.u32 %v3189_v50, 16  ;;  %v3194_v52 = vshll.u32 %v3190_v36, 16  ;;  %v4082_v44 = vadd.f32 1.0, %v4081_v47  ;;  %v3151_v15 = vshrl.u32 %v12196_v40, %v10247_v8 }
 0x3b2   :  { %v3210_v24 = vmul.u32 %v3208_v31, %v3184_v57  ;;  %v6060_v18 = vadd.s32 4294967169, %v5225_v45  ;;  %v3172_v39 = vsel %vm3170_vm12, %v3160_v7, 2102212464  ;;  %v3214_v63 = vshll.u32 %v3211_v29, 16 }
 0x3b3   :  { %vm3196_vm2 = vc.u32 %v3188_v61, %v3192_v17  ;;  %v3198_v10 = vadd.s32 %v3192_v17, %v3188_v61  ;;  %v10339_v25 = vmul.f32 %v5021_v35, %v5019_v30  ;;  %v10341_v0 = vsel %vm6050_vm13, 0, %v6049_v37 }
 0x3b4   :  { %v3197_v33 = vsel %vm3196_vm2, 1, %v12194_v21  ;;  %v3213_v55 = vmul.u32 %v3209_v4, %v3185_v53  ;;  %v3193_v46 = vshrl.u32 %v3189_v50, 16  ;;  %v3216_v23 = vshll.u32 %v3212_v19, 16 }
 0x3b5   :  { %v3199_v3 = vadd.s32 %v3197_v33, %v3191_v59  ;;  %vm3200_vm14 = vc.u32 %v3198_v10, %v3194_v52  ;;  %v3171_v8 = vsel %vm3167_vm0, %v3151_v15, %v10273_v62  ;;  %v3173_v7 = vsel %vm3169_vm15, %v10275_v9, %v3172_v39 }
 0x3b6   :  { %v3201_v57 = vsel %vm3200_vm14, 1, %v12194_v21  ;;  %vm3218_vm9 = vc.u32 %v3210_v24, %v3214_v63  ;;  %v3220_v37 = vadd.s32 %v3214_v63, %v3210_v24  ;;  %v5231_v53 = vadd.s32 1, %v6060_v18 }
 0x3b7   :  { %v3203_v31 = vadd.s32 %v3201_v57, %v3199_v3  ;;  %v3219_v47 = vsel %vm3218_vm9, 1, %v12194_v21  ;;  %v4695_v4 = vsub.s32 4294967266, %v10341_v0  ;;  %v3195_v45 = vshrl.u32 %v3190_v36, 16 }
 0x3b8   :  { %v3221_v61 = vadd.s32 %v3219_v47, %v3213_v55  ;;  %v12154_v50 = vand.u32 2147483647, %v10283_v6  ;;  %vm4903_vm5 = vcmp.lt.s32.totalorder %v9800_v11, 0  ;;  %v3215_v30 = vshrl.u32 %v3211_v29, 16 }
 0x3b9   :  { %v3204_v62 = vadd.s32 %v3203_v31, %v3193_v46  ;;  %vm3222_vm4 = vc.u32 %v3220_v37, %v3216_v23  ;;  %vm5232_vm10 = vcmp.gt.s32.totalorder %v5231_v53, 0  ;;  %v4675_v9 = vadd.s32 %v10198_v54, %v10204_v2 }
 0x3ba   :  { %v3174_v35 = vsel %vm3168_vm8, %v3171_v8, %v3173_v7  ;;  %v3223_v59 = vsel %vm3222_vm4, 1, %v12194_v21  ;;  %v5233_v17 = vsel %vm5232_vm10, %v5231_v53, 0  ;;  %v5023_v36 = vxor.u32 2147483648, %v10339_v25 }
 0x3bb   :  { %v3217_v52 = vshrl.u32 %v3212_v19, 16  ;;  %v3225_v15 = vadd.s32 %v3223_v59, %v3221_v61  ;;  %v5235_v24 = vand.u32 31, %v5233_v17  ;;  %v4691_v18 = vsub.s32 32, %v10341_v0 }
 0x3bc   :  { %v10362_v39 = vadd.s32 %v3204_v62, %v3195_v45  ;;  %v10364_v29 = vadd.s32 %v3220_v37, %v3216_v23  ;;  %v5228_v54 = vand.u32 8388607, %v12154_v50  ;;  %v12358_v2 = vand.u32 2147483647, %v9800_v11 }
 0x3bd   :  { %v4696_v10 = vadd.s32 127, %v4695_v4  ;;  %v3226_v63 = vadd.s32 %v3225_v15, %v3215_v30  ;;  %v3228_v19 = vmul.u32 %v10280_v14, %v3174_v35  ;;  %v10375_v33 = vsub.s32 32, %v5235_v24 }
 0x3be   :  { %vm10370_vm0 = vcmp.le.f32.partialorder %v12358_v2, 0.7853982  ;;  %v4692_v55 = vshll.u32 %v10286_v49, %v10341_v0  ;;  %v5238_v46 = vshll.u32 %v12196_v40, %v5235_v24  ;;  %v5241_v3 = vshll.u32 %v12201_v56, %v5235_v24 }
 0x3bf   :  { %v5244_v23 = vshll.u32 %v12207_v58, %v5235_v24  ;;  %v3227_v8 = vadd.s32 %v3226_v63, %v3217_v52  ;;  %v10382_v7 = vshrl.u32 %v5233_v17, 5  ;;  %v5239_v57 = vshrl.u32 %v12201_v56, %v10375_v33 }
 0x3c0   :  { %v5242_v14 = vshrl.u32 %v12207_v58, %v10375_v33  ;;  %v4693_v31 = vshrl.u32 %v4675_v9, %v4691_v18  ;;  %vm3230_vm12 = vc.u32 %v10362_v39, %v10364_v29  ;;  %v5245_v49 = vshrl.u32 %v12202_v12, %v10375_v33 }
 0x3c1   :  { %v5247_v0 = vshll.u32 %v12202_v12, %v5235_v24  ;;  %v4083_v47 = vmul.f32 %v4082_v44, %v10168_v51  ;;  %vm4090_vm15 = vcmp.eq.s32.totalorder %v10331_v43, 2  ;;  %v4697_v37 = vshll.u32 %v4696_v10, 23 }
 0x3c2   :  { %v3231_v53 = vadd.s32 1, %v3227_v8  ;;  %v5229_v4 = vor.u32 8388608, %v5228_v54  ;;  %vm4087_vm8 = vcmp.eq.s32.totalorder %v10331_v43, 0  ;;  %v10396_v45 = vor.u32 %v5239_v57, %v5238_v46 }
 0x3c3   :  { %v10398_v61 = vor.u32 %v5242_v14, %v5241_v3  ;;  %v10400_v62 = vor.u32 %v5245_v49, %v5244_v23  ;;  %v5248_v30 = vshrl.u32 %v12195_v41, %v10375_v33  ;;  %v5250_v35 = vshll.u32 %v12195_v41, %v5235_v24 }
 0x3c4   :  { %v3232_v9 = vsel %vm3230_vm12, %v3231_v53, %v3227_v8  ;;  %v5251_v51 = vshrl.u32 %v12203_v13, %v10375_v33  ;;  %vm5253_vm11 = vcmp.lt.s32.totalorder %v10382_v7, 1  ;;  %v5024_v44 = vsel %vm4903_vm5, %v5023_v36, %v10339_v25 }
 0x3c5   :  { %v4694_v59 = vor.u32 %v4693_v31, %v4692_v55  ;;  %v3233_v17 = vadd.s32 %v3232_v9, %v3228_v19  ;;  %v5249_v52 = vor.u32 %v5248_v30, %v5247_v0  ;;  %vm5255_vm13 = vcmp.lt.s32.totalorder %v10382_v7, 3 }
 0x3c6   :  { %v5252_v15 = vor.u32 %v5251_v51, %v5250_v35  ;;  %vm5256_vm2 = vcmp.lt.s32.totalorder %v10382_v7, 4  ;;  %v10413_v18 = vshll.u32 %v5229_v4, 8  ;;  %v4698_v24 = vor.u32 4788187, %v4697_v37  ;;  %v3617_v35 = vpop.permute.xlu1 %3616 }
 0x3c7   :  { %v3234_v54 = vadd.s32 536870912, %v3233_v17  ;;  %vm12153_vm14 = vcmp.lt.s32.totalorder %v10382_v7, 2  ;;  %v5261_v2 = vsel %vm5253_vm11, %v10396_v45, %v10398_v61  ;;  %v4091_v25 = vxor.u32 2147483648, %v10333_v60 }
 0x3c8   :  { %v5262_v36 = vsel %vm5256_vm2, %v5249_v52, 920167782  ;;  %v5265_v10 = vsel %vm5253_vm11, %v10398_v61, %v10400_v62  ;;  %v5266_v63 = vsel %vm5256_vm2, %v5252_v15, 1326507024  ;;  %v4088_v19 = vxor.u32 2147483648, %v4083_v47 }
 0x3c9   :  { %v10432_v55 = vsel %vm10370_vm0, %v9800_v11, %v5024_v44  ;;  %v10434_v46 = vshrl.u32 %v3234_v54, 30  ;;  %v5263_v3 = vsel %vm5255_vm13, %v10400_v62, %v5262_v36  ;;  %v5267_v8 = vsel %vm5255_vm13, %v5249_v52, %v5266_v63 }
 0x3ca   :  { %v5264_v23 = vsel %vm12153_vm14, %v5261_v2, %v5263_v3  ;;  %v5270_v57 = vand.u32 65535, %v10413_v18  ;;  %v5271_v14 = vshrl.u32 %v10413_v18, 16  ;;  %v4699_v31 = vand.u32 2147483647, %v4698_v24 }
 0x3cb   :  { %v4701_v49 = vcvt.s32.f32 %v4694_v59  ;;  %v3236_v0 = vshll.u32 %v10434_v46, 30  ;;  %v5268_v37 = vsel %vm12153_vm14, %v5265_v10, %v5267_v8  ;;  %v5025_v53 = vsub.s32 4, %v10098_v5 }
 0x3cc   :  { %v10451_v4 = vmul.f32 %v10432_v55, %v10432_v55  ;;  %v5272_v30 = vand.u32 65535, %v5268_v37  ;;  %v5273_v9 = vshrl.u32 %v5268_v37, 16  ;;  %v10455_v51 = vsel %vm4090_vm15, %v4091_v25, %v4083_v47 }
 0x3cd   :  { %vm4583_vm9 = vcmp.lt.s32.totalorder %v9994_v32, 0  ;;  %v10458_v44 = vsub.s32 %v3233_v17, %v3236_v0  ;;  %v5294_v59 = vand.u32 65535, %v5264_v23  ;;  %v5295_v52 = vshrl.u32 %v5264_v23, 16 }
 0x3ce   :  { %12361 = vst [vmem:[#allocation52_spill] sm:$0xff] %v10451_v4  ;;  %v10463_v15 = vsel %vm4087_vm8, %v10333_v60, %v4088_v19  ;;  %v5274_v24 = vmul.u32 %v5272_v30, %v5270_v57  ;;  %v5275_v54 = vmul.u32 %v5273_v9, %v5270_v57  ;;  %v10465_v2 = vmul.u32 %v5272_v30, %v5271_v14 }
 0x3cf   :  { %v4702_v36 = vmul.f32 %v4701_v49, %v4699_v31  ;;  %vm3238_vm4 = vcmp.lt.s32.totalorder %v10458_v44, 0  ;;  %v3239_v47 = vsub.s32 0, %v10458_v44  ;;  %v10470_v25 = vmul.f32 %v9991_v28, %v3617_v35 }
 0x3d0   :  { %v5037_v17 = vmul.f32 -0.00019511016, %v10451_v4  ;;  %v5277_v10 = vmul.u32 %v5273_v9, %v5271_v14  ;;  %v5278_v63 = vshll.u32 %v5275_v54, 16  ;;  %v5280_v3 = vshll.u32 %v10465_v2, 16 }
 0x3d1   :  { %v3229_v60 = vadd.s32 %v10364_v29, %v10362_v39  ;;  %v3240_v19 = vsel %vm3238_vm4, %v3239_v47, %v10458_v44  ;;  %v5296_v23 = vmul.u32 %v5294_v59, %v5270_v57  ;;  %v5297_v8 = vmul.u32 %v5295_v52, %v5270_v57 }
 0x3d2   :  { %v3241_v31 = vclz %v3240_v19  ;;  %vm5282_vm12 = vc.u32 %v5274_v24, %v5278_v63  ;;  %v5284_v49 = vadd.s32 %v5278_v63, %v5274_v24  ;;  %v5298_v28 = vmul.u32 %v5294_v59, %v5271_v14 }
 0x3d3   :  { %v12362_v0 = vand.u32 2147483647, %v9994_v32  ;;  %v4703_v30 = vxor.u32 2147483648, %v4702_v36  ;;  %v5283_v9 = vsel %vm5282_vm12, 1, %v12194_v21  ;;  %v5300_v39 = vshll.u32 %v5297_v8, 16 }
 0x3d4   :  { %v3778_v29 = vand.u32 2139095040, %v10470_v25  ;;  %v6022_v35 = vadd.s32 4294967294, %v3241_v31  ;;  %v5237_v57 = vshrl.u32 %v12196_v40, %v10375_v33  ;;  %v5285_v47 = vadd.s32 %v5283_v9, %v5277_v10 }
 0x3d5   :  { %vm10480_vm15 = vcmp.le.f32.partialorder %v12362_v0, 0.7853982  ;;  %vm5286_vm8 = vc.u32 %v5284_v49, %v5280_v3  ;;  %vm3598_vm4 = vweird.f32 %v9295_v22  ;;  %v5279_v59 = vshrl.u32 %v5275_v54, 16 }
 0x3d6   :  { %v5287_v24 = vsel %vm5286_vm8, 1, %v12194_v21  ;;  %v5299_v63 = vmul.u32 %v5295_v52, %v5271_v14  ;;  %vm5304_vm14 = vc.u32 %v5296_v23, %v5300_v39  ;;  %vm6023_vm10 = vcmp.lt.s32.totalorder %v6022_v35, 0 }
 0x3d7   :  { %v5258_v19 = vsel %vm5256_vm2, %v10400_v62, 2102212464  ;;  %v5289_v0 = vadd.s32 %v5287_v24, %v5285_v47  ;;  %v5302_v50 = vshll.u32 %v5298_v28, 16  ;;  %vm4084_vm12 = vweird.f32 %v9658_v27 }
 0x3d8   :  { %v3244_v31 = vsel %vm6023_vm10, 0, %v6022_v35  ;;  %v5305_v33 = vsel %vm5304_vm14, 1, %v12194_v21  ;;  %v5306_v10 = vadd.s32 %v5300_v39, %v5296_v23  ;;  %v3779_v3 = vshrl.u32 %v3778_v29, 23 }
 0x3d9   :  { %v5038_v49 = vadd.f32 0.008332121, %v5037_v17  ;;  %v4704_v54 = vsel %vm4583_vm9, %v4703_v30, %v4702_v36  ;;  %v3245_v14 = vsub.s32 32, %v3244_v31  ;;  %v3249_v52 = vsub.s32 4294967266, %v3244_v31 }
 0x3da   :  { %v5257_v9 = vsel %vm5253_vm11, %v5237_v57, %v10396_v45  ;;  %v5281_v62 = vshrl.u32 %v10465_v2, 16  ;;  %v5290_v47 = vadd.s32 %v5289_v0, %v5279_v59  ;;  %v5307_v24 = vadd.s32 %v5305_v33, %v5299_v63 }
 0x3db   :  { %v3250_v38 = vadd.s32 127, %v3249_v52  ;;  %v5259_v23 = vsel %vm5255_vm13, %v10398_v61, %v5258_v19  ;;  %v5301_v39 = vshrl.u32 %v5297_v8, 16  ;;  %vm5308_vm2 = vc.u32 %v5306_v10, %v5302_v50 }
 0x3dc   :  { %v3246_v17 = vshll.u32 %v10458_v44, %v3244_v31  ;;  %v3247_v36 = vshrl.u32 %v3229_v60, %v3245_v14  ;;  %v5309_v30 = vsel %vm5308_vm2, 1, %v12194_v21  ;;  %v6033_v29 = vadd.s32 4294967169, %v3779_v3 }
 0x3dd   :  { %v5026_v45 = vsel %vm4903_vm5, %v5025_v53, %v10098_v5  ;;  %v3251_v2 = vshll.u32 %v3250_v38, 23  ;;  %v5303_v35 = vshrl.u32 %v5298_v28, 16  ;;  %v5311_v57 = vadd.s32 %v5309_v30, %v5307_v24 }
 0x3de   :  { %vm12365_vm11 = vcmp.lt.s32.totalorder %v10331_v43, 2  ;;  %v10515_v8 = vadd.s32 %v5290_v47, %v5281_v62  ;;  %v10517_v44 = vadd.s32 %v5306_v10, %v5302_v50  ;;  %v3785_v60 = vadd.s32 1, %v6033_v29 }
 0x3df   :  { %v4093_v61 = vsel %vm12365_vm11, %v10463_v15, %v10455_v51  ;;  %v5039_v59 = vmul.f32 %v5038_v49, %v10451_v4  ;;  %v10523_v63 = vsel %vm10480_vm15, %v9994_v32, %v4704_v54  ;;  %vm12366_vm5 = vcmp.lt.s32.totalorder %v10382_v7, 2 }
 0x3e0   :  { %v5260_v5 = vsel %vm12366_vm5, %v5257_v9, %v5259_v23  ;;  %v5312_v38 = vadd.s32 %v5311_v57, %v5301_v39  ;;  %v3248_v53 = vor.u32 %v3247_v36, %v3246_v17  ;;  %v3252_v28 = vor.u32 4788187, %v3251_v2 }
 0x3e1   :  { %v12156_v43 = vand.u32 2147483647, %v10470_v25  ;;  %vm3786_vm13 = vcmp.gt.s32.totalorder %v3785_v60, 0  ;;  %v10531_v50 = vsel %vm3598_vm4, nan, %v10319_v20  ;;  %v3929_v51 = vadd.f32 %v10324_v48, %v10056_v42 }
 0x3e2   :  { %v5313_v15 = vadd.s32 %v5312_v38, %v5303_v35  ;;  %v3787_v19 = vsel %vm3786_vm13, %v3785_v60, 0  ;;  %v5028_v7 = vsel %vm10370_vm0, 0, %v5026_v45  ;;  %v5314_v0 = vmul.u32 %v10413_v18, %v5260_v5 }
 0x3e3   :  { %vm5316_vm14 = vc.u32 %v10515_v8, %v10517_v44  ;;  %v3789_v31 = vand.u32 31, %v3787_v19  ;;  %v4094_v33 = vsel %vm4084_vm12, nan, %v4093_v61  ;;  %v5040_v22 = vadd.f32 -0.16666654, %v5039_v59 }
 0x3e4   :  { %v10544_v20 = vmul.f32 %v10523_v63, %v10523_v63  ;;  %v5317_v42 = vadd.s32 1, %v5313_v15  ;;  %v3253_v48 = vand.u32 2147483647, %v3252_v28  ;;  %v3255_v10 = vcvt.s32.f32 %v3248_v53 }
 0x3e5   :  { %v3782_v16 = vand.u32 8388607, %v12156_v43  ;;  %v10548_v3 = vsub.s32 32, %v3789_v31  ;;  %v3792_v49 = vshll.u32 %v12196_v40, %v3789_v31  ;;  %v3795_v54 = vshll.u32 %v12201_v56, %v3789_v31 }
 0x3e6   :  { %v5318_v18 = vsel %vm5316_vm14, %v5317_v42, %v5313_v15  ;;  %v3801_v27 = vshll.u32 %v12202_v12, %v3789_v31  ;;  %v3798_v62 = vshll.u32 %v12207_v58, %v3789_v31  ;;  %v4717_v47 = vmul.f32 -0.00019511016, %v10544_v20 }
 0x3e7   :  { %v5319_v14 = vadd.s32 %v5318_v18, %v5314_v0  ;;  %v3793_v52 = vshrl.u32 %v12201_v56, %v10548_v3  ;;  %v3796_v9 = vshrl.u32 %v12207_v58, %v10548_v3  ;;  %v10559_v24 = vshrl.u32 %v3787_v19, 5 }
 0x3e8   :  { %v3799_v23 = vshrl.u32 %v12202_v12, %v10548_v3  ;;  %v3802_v39 = vshrl.u32 %v12195_v41, %v10548_v3  ;;  %v5041_v17 = vmul.f32 %v5040_v22, %v10451_v4  ;;  %v4705_v36 = vsub.s32 4, %v10271_v26 }
 0x3e9   :  { %v5320_v30 = vadd.s32 536870912, %v5319_v14  ;;  %v3783_v29 = vor.u32 8388608, %v3782_v16  ;;  %v3256_v45 = vmul.f32 %v3255_v10, %v3253_v48  ;;  %v3804_v35 = vshll.u32 %v12195_v41, %v3789_v31  ;;  %v3937_v48 = vpop.permute.xlu1 %3936 }
 0x3ea   :  { %v3803_v2 = vor.u32 %v3802_v39, %v3801_v27  ;;  %v3805_v57 = vshrl.u32 %v12203_v13, %v10548_v3  ;;  %v10572_v60 = vor.u32 %v3793_v52, %v3792_v49  ;;  %v10574_v59 = vor.u32 %v3796_v9, %v3795_v54 }
 0x3eb   :  { %v10570_v61 = vshrl.u32 %v5320_v30, 30  ;;  %v10576_v5 = vor.u32 %v3799_v23, %v3798_v62  ;;  %v4718_v38 = vadd.f32 0.008332121, %v4717_v47  ;;  %vm3807_vm0 = vcmp.lt.s32.totalorder %v10559_v24, 1 }
 0x3ec   :  { %vm3809_vm10 = vcmp.lt.s32.totalorder %v10559_v24, 3  ;;  %vm3810_vm8 = vcmp.lt.s32.totalorder %v10559_v24, 4  ;;  %v10581_v53 = vadd.f32 %v4094_v33, %v3929_v51  ;;  %v5042_v28 = vadd.f32 1.0, %v5041_v17 }
 0x3ed   :  { %v10583_v15 = vand.u32 3, %v5028_v7  ;;  %v5322_v19 = vshll.u32 %v10570_v61, 30  ;;  %v3257_v0 = vxor.u32 2147483648, %v3256_v45  ;;  %v3806_v31 = vor.u32 %v3805_v57, %v3804_v35 }
 0x3ee   :  { %12367 = vst [vmem:[#allocation53_spill] sm:$0xff] %v10581_v53  ;;  %v3816_v22 = vsel %vm3810_vm8, %v3803_v2, 920167782  ;;  %v10588_v42 = vshll.u32 %v3783_v29, 8  ;;  %vm3808_vm4 = vcmp.lt.s32.totalorder %v10559_v24, 2  ;;  %v3815_v51 = vsel %vm3807_vm0, %v10572_v60, %v10574_v59 }
 0x3ef   :  { %12368 = vst [vmem:[#allocation54_spill] sm:$0xff] %v10583_v15  ;;  %v10590_v10 = vsub.s32 %v5319_v14, %v5322_v19  ;;  %v3817_v7 = vsel %vm3809_vm10, %v10576_v5, %v3816_v22  ;;  %v4706_v33 = vsel %vm4583_vm9, %v4705_v36, %v10271_v26  ;;  %v4719_v16 = vmul.f32 %v4718_v38, %v10544_v20  ;;  %v10619_v26 = vld [vmem:[%s12005_s6] ss:$0 sm:$0xff] }
 0x3f0   :  { %v12369_v18 = vand.u32 2147483647, %v10162_v1  ;;  %vm3137_vm2 = vcmp.lt.s32.totalorder %v10162_v1, 0  ;;  %v10612_v54 = vmul.f32 %v5042_v28, %v10432_v55  ;;  %v10622_v14 = vmul.f32 %v10619_v26, %v3937_v48 }
 0x3f1   :  { %vm5324_vm11 = vcmp.lt.s32.totalorder %v10590_v10, 0  ;;  %v5325_v27 = vsub.s32 0, %v10590_v10  ;;  %v3818_v52 = vsel %vm3808_vm4, %v3815_v51, %v3817_v7  ;;  %v3819_v55 = vsel %vm3807_vm0, %v10574_v59, %v10576_v5 }
 0x3f2   :  { %vm10606_vm12 = vcmp.le.f32.partialorder %v12369_v18, 0.7853982  ;;  %12372 = vst [vmem:[#allocation55_spill] sm:$0xff] %v10612_v54  ;;  %v3820_v9 = vsel %vm3810_vm8, %v3806_v31, 1326507024  ;;  %v3824_v62 = vand.u32 65535, %v10588_v42  ;;  %v3258_v47 = vsel %vm3137_vm2, %v3257_v0, %v3256_v45 }
 0x3f3   :  { %v5326_v23 = vsel %vm5324_vm11, %v5325_v27, %v10590_v10  ;;  %v3821_v39 = vsel %vm3809_vm10, %v3803_v2, %v3820_v9  ;;  %v3825_v17 = vshrl.u32 %v10588_v42, 16  ;;  %v4720_v36 = vadd.f32 -0.16666654, %v4719_v16 }
 0x3f4   :  { %v3259_v30 = vsub.s32 4, %v10434_v46  ;;  %v5327_v29 = vclz %v5326_v23  ;;  %v3822_v35 = vsel %vm3808_vm4, %v3819_v55, %v3821_v39  ;;  %v4708_v57 = vsel %vm10480_vm15, 0, %v4706_v33 }
 0x3f5   :  { %v3826_v38 = vand.u32 65535, %v3822_v35  ;;  %v3827_v28 = vshrl.u32 %v3822_v35, 16  ;;  %v3849_v45 = vshrl.u32 %v3818_v52, 16  ;;  %v10648_v2 = vsel %vm10606_vm12, %v10162_v1, %v3258_v47 }
 0x3f6   :  { %v6061_v0 = vadd.s32 4294967294, %v5327_v29  ;;  %v4098_v31 = vand.u32 2139095040, %v10622_v14  ;;  %v3848_v7 = vand.u32 65535, %v3818_v52  ;;  %v4721_v37 = vmul.f32 %v4720_v36, %v10544_v20 }
 0x3f7   :  { %v3828_v22 = vmul.u32 %v3826_v38, %v3824_v62  ;;  %v3829_v48 = vmul.u32 %v3827_v28, %v3824_v62  ;;  %v3830_v51 = vmul.u32 %v3826_v38, %v3825_v17  ;;  %v10652_v33 = vand.u32 3, %v4708_v57 }
 0x3f8   :  { %v10657_v16 = vsel %vm3137_vm2, %v3259_v30, %v10434_v46  ;;  %vm6062_vm9 = vcmp.lt.s32.totalorder %v6061_v0, 0  ;;  %v3831_v27 = vmul.u32 %v3827_v28, %v3825_v17  ;;  %v3851_v9 = vmul.u32 %v3849_v45, %v3824_v62 }
 0x3f9   :  { %12373 = vst [vmem:[#allocation56_spill] sm:$0xff] %v10652_v33  ;;  %v5330_v18 = vsel %vm6062_vm9, 0, %v6061_v0  ;;  %v3832_v55 = vshll.u32 %v3829_v48, 16  ;;  %v10661_v47 = vmul.f32 %v10648_v2, %v10648_v2  ;;  %v5315_v52 = vadd.s32 %v10517_v44, %v10515_v8 }
 0x3fa   :  { %v4099_v39 = vshrl.u32 %v4098_v31, 23  ;;  %v5335_v36 = vsub.s32 4294967266, %v5330_v18  ;;  %v3834_v29 = vshll.u32 %v3830_v51, 16  ;;  %v3852_v46 = vmul.u32 %v3848_v7, %v3825_v17 }
 0x3fb   :  { %vm3836_vm15 = vc.u32 %v3828_v22, %v3832_v55  ;;  %v3264_v30 = vmul.f32 -0.001358992, %v10661_v47  ;;  %v3838_v57 = vadd.s32 %v3832_v55, %v3828_v22  ;;  %v3850_v38 = vmul.u32 %v3848_v7, %v3824_v62 }
 0x3fc   :  { %v3837_v35 = vsel %vm3836_vm15, 1, %v12194_v21  ;;  %v5331_v28 = vsub.s32 32, %v5330_v18  ;;  %v5336_v0 = vadd.s32 127, %v5335_v36  ;;  %v3854_v43 = vshll.u32 %v3851_v9, 16 }
 0x3fd   :  { %v3839_v19 = vadd.s32 %v3837_v35, %v3831_v27  ;;  %v3791_v8 = vshrl.u32 %v12196_v40, %v10548_v3  ;;  %v3833_v44 = vshrl.u32 %v3829_v48, 16  ;;  %vm3840_vm5 = vc.u32 %v3838_v57, %v3834_v29 }
 0x3fe   :  { %v3853_v31 = vmul.u32 %v3849_v45, %v3825_v17  ;;  %v3271_v23 = vmul.f32 -0.00019511016, %v10661_v47  ;;  %v3812_v54 = vsel %vm3810_vm8, %v10576_v5, 2102212464  ;;  %v3841_v15 = vsel %vm3840_vm5, 1, %v12194_v21 }
 0x3ff   :  { %v3856_v22 = vshll.u32 %v3852_v46, 16  ;;  %v3265_v62 = vadd.f32 0.041655596, %v3264_v30  ;;  %v5332_v7 = vshll.u32 %v10590_v10, %v5330_v18  ;;  %v3843_v27 = vadd.s32 %v3841_v15, %v3839_v19 }
 0x400   :  { %vm3858_vm13 = vc.u32 %v3850_v38, %v3854_v43  ;;  %v5333_v55 = vshrl.u32 %v5315_v52, %v5331_v28  ;;  %v5337_v36 = vshll.u32 %v5336_v0, 23  ;;  %v3860_v48 = vadd.s32 %v3854_v43, %v3850_v38 }
 0x401   :  { %v3859_v3 = vsel %vm3858_vm13, 1, %v12194_v21  ;;  %v3835_v17 = vshrl.u32 %v3830_v51, 16  ;;  %v3844_v45 = vadd.s32 %v3843_v27, %v3833_v44  ;;  %v6039_v35 = vadd.s32 4294967169, %v4099_v39 }
 0x402   :  { %v3861_v29 = vadd.s32 %v3859_v3, %v3853_v31  ;;  %v3811_v5 = vsel %vm3807_vm0, %v3791_v8, %v10572_v60  ;;  %v3813_v30 = vsel %vm3809_vm10, %v10574_v59, %v3812_v54  ;;  %v3855_v10 = vshrl.u32 %v3851_v9, 16 }
 0x403   :  { %vm3862_vm14 = vc.u32 %v3860_v48, %v3856_v22  ;;  %v3266_v15 = vmul.f32 %v3265_v62, %v10661_v47  ;;  %v3272_v19 = vadd.f32 0.008332121, %v3271_v23  ;;  %v4105_v43 = vadd.s32 1, %v6039_v35 }
 0x404   :  { %v3863_v18 = vsel %vm3862_vm14, 1, %v12194_v21  ;;  %v5334_v51 = vor.u32 %v5333_v55, %v5332_v7  ;;  %v5338_v52 = vor.u32 4788187, %v5337_v36  ;;  %v3857_v57 = vshrl.u32 %v3852_v46, 16 }
 0x405   :  { %v3865_v39 = vadd.s32 %v3863_v18, %v3861_v29  ;;  %v3814_v38 = vsel %vm3808_vm4, %v3811_v5, %v3813_v30  ;;  %v10687_v60 = vadd.s32 %v3844_v45, %v3835_v17  ;;  %v10689_v28 = vadd.s32 %v3860_v48, %v3856_v22 }
 0x406   :  { %vm4106_vm0 = vcmp.gt.s32.totalorder %v4105_v43, 0  ;;  %v4722_v59 = vadd.f32 1.0, %v4721_v37  ;;  %v3267_v0 = vadd.f32 -0.4999988, %v3266_v15  ;;  %v3273_v8 = vmul.f32 %v3272_v19, %v10661_v47  ;;  %v4257_v19 = vpop.permute.xlu0 %4256 }
 0x407   :  { %v3866_v9 = vadd.s32 %v3865_v39, %v3855_v10  ;;  %v4107_v23 = vsel %vm4106_vm0, %v4105_v43, 0  ;;  %v12374_v46 = vand.u32 2147483647, %v10622_v14  ;;  %v5339_v31 = vand.u32 2147483647, %v5338_v52 }
 0x408   :  { %v4109_v24 = vand.u32 31, %v4107_v23  ;;  %v5341_v62 = vcvt.s32.f32 %v5334_v51  ;;  %v3868_v22 = vmul.u32 %v10588_v42, %v3814_v38  ;;  %vm3870_vm10 = vc.u32 %v10687_v60, %v10689_v28 }
 0x409   :  { %v4102_v44 = vand.u32 8388607, %v12374_v46  ;;  %v3867_v7 = vadd.s32 %v3866_v9, %v3857_v57  ;;  %vm5223_vm8 = vcmp.lt.s32.totalorder %v10283_v6, 0  ;;  %v10705_v3 = vshrl.u32 %v4107_v23, 5 }
 0x40a   :  { %v10700_v37 = vsub.s32 32, %v4109_v24  ;;  %v4112_v27 = vshll.u32 %v12196_v40, %v4109_v24  ;;  %v4115_v55 = vshll.u32 %v12201_v56, %v4109_v24  ;;  %v4118_v48 = vshll.u32 %v12207_v58, %v4109_v24 }
 0x40b   :  { %v3871_v36 = vadd.s32 1, %v3867_v7  ;;  %v4121_v17 = vshll.u32 %v12202_v12, %v4109_v24  ;;  %v4103_v45 = vor.u32 8388608, %v4102_v44  ;;  %v5342_v5 = vmul.f32 %v5341_v62, %v5339_v31 }
 0x40c   :  { %v4113_v42 = vshrl.u32 %v12201_v56, %v10700_v37  ;;  %v4116_v29 = vshrl.u32 %v12207_v58, %v10700_v37  ;;  %v4119_v35 = vshrl.u32 %v12202_v12, %v10700_v37  ;;  %v4122_v10 = vshrl.u32 %v12195_v41, %v10700_v37 }
 0x40d   :  { %v3872_v30 = vsel %vm3870_vm10, %v3871_v36, %v3867_v7  ;;  %v4124_v15 = vshll.u32 %v12195_v41, %v4109_v24  ;;  %v3274_v18 = vadd.f32 -0.16666654, %v3273_v8  ;;  %v12375_v43 = vand.u32 2147483647, %v10283_v6 }
 0x40e   :  { %v3873_v52 = vadd.s32 %v3872_v30, %v3868_v22  ;;  %v10724_v57 = vor.u32 %v4113_v42, %v4112_v27  ;;  %v10726_v39 = vor.u32 %v4116_v29, %v4115_v55  ;;  %v4120_v38 = vor.u32 %v4119_v35, %v4118_v48 }
 0x40f   :  { %vm10720_vm4 = vcmp.le.f32.partialorder %v12375_v43, 0.7853982  ;;  %v4123_v9 = vor.u32 %v4122_v10, %v4121_v17  ;;  %v4125_v23 = vshrl.u32 %v12203_v13, %v10700_v37  ;;  %vm4127_vm2 = vcmp.lt.s32.totalorder %v10705_v3, 1 }
 0x410   :  { %v3874_v46 = vadd.s32 536870912, %v3873_v52  ;;  %vm4129_vm11 = vcmp.lt.s32.totalorder %v10705_v3, 3  ;;  %vm4130_vm9 = vcmp.lt.s32.totalorder %v10705_v3, 4  ;;  %v10734_v8 = vmul.f32 %v10619_v26, %v4257_v19 }
 0x411   :  { %v10737_v44 = vmul.f32 %v4722_v59, %v10523_v63  ;;  %v5343_v24 = vxor.u32 2147483648, %v5342_v5  ;;  %v4126_v31 = vor.u32 %v4125_v23, %v4124_v15  ;;  %v10739_v62 = vshll.u32 %v4103_v45, 8 }
 0x412   :  { %v10741_v7 = vshrl.u32 %v3874_v46, 30  ;;  %vm4128_vm15 = vcmp.lt.s32.totalorder %v10705_v3, 2  ;;  %v4135_v22 = vsel %vm4127_vm2, %v10724_v57, %v10726_v39  ;;  %v4136_v27 = vsel %vm4130_vm9, %v4123_v9, 920167782 }
 0x413   :  { %v3275_v55 = vmul.f32 %v3274_v18, %v10661_v47  ;;  %v4137_v59 = vsel %vm4129_vm11, %v4120_v38, %v4136_v27  ;;  %v4139_v36 = vsel %vm4127_vm2, %v10726_v39, %v4120_v38  ;;  %v10758_v48 = vmul.f32 %v3267_v0, %v10661_v47 }
 0x414   :  { %v3876_v17 = vshll.u32 %v10741_v7, 30  ;;  %v4140_v45 = vsel %vm4130_vm9, %v4126_v31, 1326507024  ;;  %v4418_v42 = vand.u32 2139095040, %v10734_v8  ;;  %v4138_v29 = vsel %vm4128_vm15, %v4135_v22, %v4137_v59 }
 0x415   :  { %v4141_v35 = vsel %vm4129_vm11, %v4123_v9, %v4140_v45  ;;  %v4144_v30 = vand.u32 65535, %v10739_v62  ;;  %v4145_v10 = vshrl.u32 %v10739_v62, 16  ;;  %v5344_v47 = vsel %vm5223_vm8, %v5343_v24, %v5342_v5 }
 0x416   :  { %v3877_v0 = vsub.s32 %v3873_v52, %v3876_v17  ;;  %v4142_v15 = vsel %vm4128_vm15, %v4139_v36, %v4141_v35  ;;  %v4168_v19 = vand.u32 65535, %v4138_v29  ;;  %v3276_v18 = vadd.f32 1.0, %v3275_v55 }
 0x417   :  { %v3869_v43 = vadd.s32 %v10689_v28, %v10687_v60  ;;  %v4146_v23 = vand.u32 65535, %v4142_v15  ;;  %v4147_v46 = vshrl.u32 %v4142_v15, 16  ;;  %v4169_v31 = vshrl.u32 %v4138_v29, 16 }
 0x418   :  { %vm3878_vm5 = vcmp.lt.s32.totalorder %v3877_v0, 0  ;;  %v3879_v9 = vsub.s32 0, %v3877_v0  ;;  %v4419_v22 = vshrl.u32 %v4418_v42, 23  ;;  %v10779_v27 = vsel %vm10720_vm4, %v10283_v6, %v5344_v47 }
 0x419   :  { %v4148_v5 = vmul.u32 %v4146_v23, %v4144_v30  ;;  %v4149_v52 = vmul.u32 %v4147_v46, %v4144_v30  ;;  %v4150_v24 = vmul.u32 %v4146_v23, %v4145_v10  ;;  %v4111_v55 = vshrl.u32 %v12196_v40, %v10700_v37 }
 0x41a   :  { %v3880_v59 = vsel %vm3878_vm5, %v3879_v9, %v3877_v0  ;;  %v4170_v36 = vmul.u32 %v4168_v19, %v4144_v30  ;;  %v4171_v60 = vmul.u32 %v4169_v31, %v4144_v30  ;;  %v4151_v17 = vmul.u32 %v4147_v46, %v4145_v10 }
 0x41b   :  { %v3881_v28 = vclz %v3880_v59  ;;  %v4152_v45 = vshll.u32 %v4149_v52, 16  ;;  %v4172_v35 = vmul.u32 %v4168_v19, %v4145_v10  ;;  %v4132_v42 = vsel %vm4130_vm9, %v4120_v38, 2102212464 }
 0x41c   :  { %v4154_v29 = vshll.u32 %v4150_v24, 16  ;;  %v4174_v15 = vshll.u32 %v4171_v60, 16  ;;  %v6045_v47 = vadd.s32 4294967169, %v4419_v22  ;;  %v10787_v63 = vmul.f32 %v10779_v27, %v10779_v27 }
 0x41d   :  { %v6034_v23 = vadd.s32 4294967294, %v3881_v28  ;;  %vm4156_vm13 = vc.u32 %v4148_v5, %v4152_v45  ;;  %v4158_v9 = vadd.s32 %v4152_v45, %v4148_v5  ;;  %v4131_v37 = vsel %vm4127_vm2, %v4111_v55, %v10724_v57 }
 0x41e   :  { %v4157_v30 = vsel %vm4156_vm13, 1, %v12194_v21  ;;  %v4173_v19 = vmul.u32 %v4169_v31, %v4145_v10  ;;  %vm4178_vm14 = vc.u32 %v4170_v36, %v4174_v15  ;;  %v4133_v38 = vsel %vm4129_vm11, %v10726_v39, %v4132_v42 }
 0x41f   :  { %vm6035_vm0 = vcmp.lt.s32.totalorder %v6034_v23, 0  ;;  %v4159_v46 = vadd.s32 %v4157_v30, %v4151_v17  ;;  %v4176_v22 = vshll.u32 %v4172_v35, 16  ;;  %vm4160_vm10 = vc.u32 %v4158_v9, %v4154_v29 }
 0x420   :  { %v3884_v59 = vsel %vm6035_vm0, 0, %v6034_v23  ;;  %v4179_v28 = vsel %vm4178_vm14, 1, %v12194_v21  ;;  %v4180_v5 = vadd.s32 %v4174_v15, %v4170_v36  ;;  %v4153_v57 = vshrl.u32 %v4149_v52, 16 }
 0x421   :  { %v3885_v45 = vsub.s32 32, %v3884_v59  ;;  %v3886_v54 = vshll.u32 %v3877_v0, %v3884_v59  ;;  %v3889_v11 = vsub.s32 4294967266, %v3884_v59  ;;  %v4155_v55 = vshrl.u32 %v4150_v24, 16 }
 0x422   :  { %v4161_v10 = vsel %vm4160_vm10, 1, %v12194_v21  ;;  %v4175_v31 = vshrl.u32 %v4171_v60, 16  ;;  %v4181_v53 = vadd.s32 %v4179_v28, %v4173_v19  ;;  %vm4182_vm2 = vc.u32 %v4180_v5, %v4176_v22 }
 0x423   :  { %v3887_v32 = vshrl.u32 %v3869_v43, %v3885_v45  ;;  %v3890_v4 = vadd.s32 127, %v3889_v11  ;;  %v4163_v33 = vadd.s32 %v4161_v10, %v4159_v46  ;;  %v3269_v39 = vadd.f32 1.0, %v10758_v48 }
 0x424   :  { %v5357_v17 = vmul.f32 -0.00019511016, %v10787_v63  ;;  %v4177_v42 = vshrl.u32 %v4172_v35, 16  ;;  %v4183_v36 = vsel %vm4182_vm2, 1, %v12194_v21  ;;  %v3277_v24 = vmul.f32 %v3276_v18, %v10648_v2 }
 0x425   :  { %v3888_v29 = vor.u32 %v3887_v32, %v3886_v54  ;;  %v3891_v0 = vshll.u32 %v3890_v4, 23  ;;  %v4164_v15 = vadd.s32 %v4163_v33, %v4153_v57  ;;  %v4185_v52 = vadd.s32 %v4183_v36, %v4181_v53 }
 0x426   :  { %v4134_v60 = vsel %vm4128_vm15, %v4131_v37, %v4133_v38  ;;  %v10804_v43 = vadd.s32 %v4180_v5, %v4176_v22  ;;  %v4425_v11 = vadd.s32 1, %v6045_v47  ;;  %v12378_v32 = vsel %vm10606_vm12, 0, %v10657_v16  ;;  %v6175_v5 = vld [vmem:[%s12007_s8 + $0x78] sm:$0xff] }
 0x427   :  { %v3892_v23 = vor.u32 4788187, %v3891_v0  ;;  %v3895_v9 = vcvt.s32.f32 %v3888_v29  ;;  %v10806_v48 = vadd.s32 %v4164_v15, %v4155_v55  ;;  %v4186_v30 = vadd.s32 %v4185_v52, %v4175_v31  ;;  %2779 = vmatpush.bf16.msra.mxu1 %v6175_v5 }
 0x428   :  { %v3279_v4 = vand.u32 3, %v12378_v32  ;;  %v12379_v53 = vsub.s32 4, %v10570_v61  ;;  %vm4426_vm11 = vcmp.gt.s32.totalorder %v4425_v11, 0  ;;  %v3285_v33 = vxor.u32 2147483648, %v3269_v39 }
 0x429   :  { %v5358_v54 = vadd.f32 0.008332121, %v5357_v17  ;;  %v3893_v3 = vand.u32 2147483647, %v3892_v23  ;;  %v4187_v18 = vadd.s32 %v4186_v30, %v4177_v42  ;;  %v3282_v47 = vxor.u32 2147483648, %v3277_v24 }
 0x42a   :  { %v5346_v2 = vsel %vm5223_vm8, %v12379_v53, %v10570_v61  ;;  %v4188_v37 = vmul.u32 %v10739_v62, %v4134_v60  ;;  %vm4190_vm9 = vc.u32 %v10806_v48, %v10804_v43  ;;  %v4427_v49 = vsel %vm4426_vm11, %v4425_v11, 0 }
 0x42b   :  { %v3896_v16 = vmul.f32 %v3895_v9, %v3893_v3  ;;  %v4191_v19 = vadd.s32 1, %v4187_v18  ;;  %v12168_v38 = vand.u32 2147483647, %v10734_v8  ;;  %v4429_v46 = vand.u32 31, %v4427_v49 }
 0x42c   :  { %vm3278_vm12 = vweird.f32 %v10162_v1  ;;  %vm3280_vm8 = vcmp.lt.s32.totalorder %v3279_v4, 2  ;;  %vm3281_vm15 = vcmp.eq.s32.totalorder %v3279_v4, 0  ;;  %vm3284_vm5 = vcmp.eq.s32.totalorder %v3279_v4, 2 }
 0x42d   :  { %v5348_v61 = vsel %vm10720_vm4, 0, %v5346_v2  ;;  %v5359_v22 = vmul.f32 %v5358_v54, %v10787_v63  ;;  %v4192_v62 = vsel %vm4190_vm9, %v4191_v19, %v4187_v18  ;;  %v10826_v59 = vsub.s32 32, %v4429_v46  ;;  %v4577_v18 = vpop.permute.xlu1 %4576 }
 0x42e   :  { %v12380_v28 = vand.u32 2147483647, %v10470_v25  ;;  %vm3777_vm14 = vcmp.lt.s32.totalorder %v10470_v25, 0  ;;  %v3897_v45 = vxor.u32 2147483648, %v3896_v16  ;;  %v4193_v57 = vadd.s32 %v4192_v62, %v4188_v37 }
 0x42f   :  { %v3283_v55 = vsel %vm3281_vm15, %v3269_v39, %v3282_v47  ;;  %v3286_v10 = vsel %vm3284_vm5, %v3285_v33, %v3277_v24  ;;  %v4422_v51 = vand.u32 8388607, %v12168_v38  ;;  %v4432_v31 = vshll.u32 %v12196_v40, %v4429_v46 }
 0x430   :  { %vm10830_vm13 = vcmp.le.f32.partialorder %v12380_v28, 0.7853982  ;;  %v4194_v17 = vadd.s32 536870912, %v4193_v57  ;;  %v4433_v42 = vshrl.u32 %v12201_v56, %v10826_v59  ;;  %v4435_v36 = vshll.u32 %v12201_v56, %v4429_v46 }
 0x431   :  { %v4436_v29 = vshrl.u32 %v12207_v58, %v10826_v59  ;;  %v5360_v0 = vadd.f32 -0.16666654, %v5359_v22  ;;  %v10843_v15 = vshrl.u32 %v4427_v49, 5  ;;  %v4441_v39 = vshll.u32 %v12202_v12, %v4429_v46 }
 0x432   :  { %v4442_v52 = vshrl.u32 %v12195_v41, %v10826_v59  ;;  %v3898_v24 = vsel %vm3777_vm14, %v3897_v45, %v3896_v16  ;;  %v10850_v60 = vshrl.u32 %v4194_v17, 30  ;;  %v4438_v11 = vshll.u32 %v12207_v58, %v4429_v46 }
 0x433   :  { %v4439_v23 = vshrl.u32 %v12202_v12, %v10826_v59  ;;  %v10855_v9 = vand.u32 3, %v5348_v61  ;;  %v4423_v30 = vor.u32 8388608, %v4422_v51  ;;  %v4444_v32 = vshll.u32 %v12195_v41, %v4429_v46 }
 0x434   :  { %v4445_v53 = vshrl.u32 %v12203_v13, %v10826_v59  ;;  %v3287_v2 = vsel %vm3280_vm8, %v3283_v55, %v3286_v10  ;;  %v4196_v33 = vshll.u32 %v10850_v60, 30  ;;  %v10862_v54 = vor.u32 %v4433_v42, %v4432_v31 }
 0x435   :  { %v10864_v3 = vor.u32 %v4436_v29, %v4435_v36  ;;  %v5361_v47 = vmul.f32 %v5360_v0, %v10787_v63  ;;  %v10870_v37 = vsel %vm10830_vm13, %v10470_v25, %v3898_v24  ;;  %v4443_v49 = vor.u32 %v4442_v52, %v4441_v39 }
 0x436   :  { %vm4447_vm4 = vcmp.lt.s32.totalorder %v10843_v15, 1  ;;  %v10873_v16 = vsub.s32 %v4193_v57, %v4196_v33  ;;  %v4440_v4 = vor.u32 %v4439_v23, %v4438_v11  ;;  %v4446_v19 = vor.u32 %v4445_v53, %v4444_v32 }
 0x437   :  { %vm4450_vm0 = vcmp.lt.s32.totalorder %v10843_v15, 4  ;;  %v3288_v46 = vsel %vm3278_vm12, nan, %v3287_v2  ;;  %vm4449_vm10 = vcmp.lt.s32.totalorder %v10843_v15, 3  ;;  %v10879_v61 = vshll.u32 %v4423_v30, 8 }
 0x438   :  { %v10882_v22 = vmul.f32 %v10619_v26, %v4577_v18  ;;  %vm4198_vm2 = vcmp.lt.s32.totalorder %v10873_v16, 0  ;;  %v4199_v62 = vsub.s32 0, %v10873_v16  ;;  %vm4448_vm11 = vcmp.lt.s32.totalorder %v10843_v15, 2 }
 0x439   :  { %v4455_v28 = vsel %vm4447_vm4, %v10862_v54, %v10864_v3  ;;  %v5362_v1 = vadd.f32 1.0, %v5361_v47  ;;  %v3899_v45 = vsub.s32 4, %v10741_v7  ;;  %v10894_v57 = vmul.f32 %v10870_v37, %v10870_v37 }
 0x43a   :  { %v4456_v55 = vsel %vm4450_vm0, %v4443_v49, 920167782  ;;  %v4200_v10 = vsel %vm4198_vm2, %v4199_v62, %v10873_v16  ;;  %v4459_v31 = vsel %vm4447_vm4, %v10864_v3, %v4440_v4  ;;  %v4460_v17 = vsel %vm4450_vm0, %v4446_v19, 1326507024 }
 0x43b   :  { %v4457_v51 = vsel %vm4449_vm10, %v4440_v4, %v4456_v55  ;;  %v10907_v42 = vadd.f32 %v10531_v50, %v3288_v46  ;;  %v4201_v36 = vclz %v4200_v10  ;;  %v4464_v0 = vand.u32 65535, %v10879_v61 }
 0x43c   :  { %v4458_v29 = vsel %vm4448_vm11, %v4455_v28, %v4457_v51  ;;  %v3904_v39 = vmul.f32 -0.001358992, %v10894_v57  ;;  %v4461_v52 = vsel %vm4449_vm10, %v4443_v49, %v4460_v17  ;;  %v4738_v11 = vand.u32 2139095040, %v10882_v22 }
 0x43d   :  { %12383 = vst [vmem:[#allocation57_spill] sm:$0xff] %v10907_v42  ;;  %v4489_v24 = vshrl.u32 %v4458_v29, 16  ;;  %v10919_v23 = vsel %vm3777_vm14, %v3899_v45, %v10741_v7  ;;  %v3911_v50 = vmul.f32 -0.00019511016, %v10894_v57  ;;  %v6040_v30 = vadd.s32 4294967294, %v4201_v36 }
 0x43e   :  { %v4462_v32 = vsel %vm4448_vm11, %v4459_v31, %v4461_v52  ;;  %v10925_v53 = vmul.f32 %v5362_v1, %v10779_v27  ;;  %v4465_v2 = vshrl.u32 %v10879_v61, 16  ;;  %v4189_v47 = vadd.s32 %v10804_v43, %v10806_v48 }
 0x43f   :  { %v4466_v33 = vand.u32 65535, %v4462_v32  ;;  %v4467_v18 = vshrl.u32 %v4462_v32, 16  ;;  %vm6041_vm9 = vcmp.lt.s32.totalorder %v6040_v30, 0  ;;  %v4488_v49 = vand.u32 65535, %v4458_v29 }
 0x440   :  { %v12167_v7 = vand.u32 2147483647, %v10882_v22  ;;  %v3905_v19 = vadd.f32 0.041655596, %v3904_v39  ;;  %v4204_v46 = vsel %vm6041_vm9, 0, %v6040_v30  ;;  %v10931_v62 = vmul.u32 %v4489_v24, %v4464_v0 }
 0x441   :  { %v4739_v28 = vshrl.u32 %v4738_v11, 23  ;;  %v3912_v45 = vadd.f32 0.008332121, %v3911_v50  ;;  %v4205_v55 = vsub.s32 32, %v4204_v46  ;;  %v4431_v27 = vshrl.u32 %v12196_v40, %v10826_v59 }
 0x442   :  { %v4452_v1 = vsel %vm4450_vm0, %v4440_v4, 2102212464  ;;  %v4209_v10 = vsub.s32 4294967266, %v4204_v46  ;;  %v4468_v51 = vmul.u32 %v4466_v33, %v4464_v0  ;;  %v4469_v43 = vmul.u32 %v4467_v18, %v4464_v0 }
 0x443   :  { %v4470_v48 = vmul.u32 %v4466_v33, %v4465_v2  ;;  %v4206_v31 = vshll.u32 %v10873_v16, %v4204_v46  ;;  %v4207_v17 = vshrl.u32 %v4189_v47, %v4205_v55  ;;  %v4490_v36 = vmul.u32 %v4488_v49, %v4464_v0 }
 0x444   :  { %v4492_v29 = vmul.u32 %v4488_v49, %v4465_v2  ;;  %v4210_v39 = vadd.s32 127, %v4209_v10  ;;  %v4471_v52 = vmul.u32 %v4467_v18, %v4465_v2  ;;  %v4472_v11 = vshll.u32 %v4469_v43, 16 }
 0x445   :  { %v4494_v50 = vshll.u32 %v10931_v62, 16  ;;  %v3906_v30 = vmul.f32 %v3905_v19, %v10894_v57  ;;  %v4451_v59 = vsel %vm4447_vm4, %v4431_v27, %v10862_v54  ;;  %v4453_v4 = vsel %vm4449_vm10, %v10864_v3, %v4452_v1 }
 0x446   :  { %v4474_v32 = vshll.u32 %v4470_v48, 16  ;;  %v4211_v16 = vshll.u32 %v4210_v39, 23  ;;  %vm4476_vm12 = vc.u32 %v4468_v51, %v4472_v11  ;;  %v4478_v0 = vadd.s32 %v4472_v11, %v4468_v51 }
 0x447   :  { %v4493_v33 = vmul.u32 %v4489_v24, %v4465_v2  ;;  %v4208_v47 = vor.u32 %v4207_v17, %v4206_v31  ;;  %v4473_v18 = vshrl.u32 %v4469_v43, 16  ;;  %v4477_v49 = vsel %vm4476_vm12, 1, %v12194_v21 }
 0x448   :  { %v4496_v46 = vshll.u32 %v4492_v29, 16  ;;  %v4212_v55 = vor.u32 4788187, %v4211_v16  ;;  %v4479_v19 = vadd.s32 %v4477_v49, %v4471_v52  ;;  %vm4480_vm8 = vc.u32 %v4478_v0, %v4474_v32  ;;  %v6167_v0 = vld [vmem:[%s12007_s8 + $0x38] sm:$0xff] }
 0x449   :  { %vm4498_vm15 = vc.u32 %v4490_v36, %v4494_v50  ;;  %v4481_v54 = vsel %vm4480_vm8, 1, %v12194_v21  ;;  %v4500_v10 = vadd.s32 %v4494_v50, %v4490_v36  ;;  %v6051_v3 = vadd.s32 4294967169, %v4739_v28  ;;  %2765 = vmatpush.bf16.msra.mxu0 %v6167_v0 }
 0x44a   :  { %v4499_v27 = vsel %vm4498_vm15, 1, %v12194_v21  ;;  %v3913_v1 = vmul.f32 %v3912_v45, %v10894_v57  ;;  %v4475_v39 = vshrl.u32 %v4470_v48, 16  ;;  %v4483_v51 = vadd.s32 %v4481_v54, %v4479_v19 }
 0x44b   :  { %v4501_v24 = vadd.s32 %v4499_v27, %v4493_v33  ;;  %v4454_v2 = vsel %vm4448_vm11, %v4451_v59, %v4453_v4  ;;  %v4495_v43 = vshrl.u32 %v10931_v62, 16  ;;  %vm4502_vm5 = vc.u32 %v4500_v10, %v4496_v46 }
 0x44c   :  { %v4745_v31 = vadd.s32 1, %v6051_v3  ;;  %v4213_v17 = vand.u32 2147483647, %v4212_v55  ;;  %v4215_v52 = vcvt.s32.f32 %v4208_v47  ;;  %v4484_v11 = vadd.s32 %v4483_v51, %v4473_v18  ;;  %v6295_v18 = vld [vmem:[%s12005_s6] ss:$0 sm:$0xff] }
 0x44d   :  { %v4503_v32 = vsel %vm4502_vm5, 1, %v12194_v21  ;;  %vm4097_vm14 = vcmp.lt.s32.totalorder %v10622_v14, 0  ;;  %v4497_v28 = vshrl.u32 %v4492_v29, 16  ;;  %v4742_v45 = vand.u32 8388607, %v12167_v7 }
 0x44e   :  { %v4505_v36 = vadd.s32 %v4503_v32, %v4501_v24  ;;  %vm4746_vm4 = vcmp.gt.s32.totalorder %v4745_v31, 0  ;;  %v3902_v15 = vsel %vm10830_vm13, 0, %v10919_v23  ;;  %v10960_v62 = vadd.s32 %v4484_v11, %v4475_v39  ;;  %v4897_v24 = vpop.permute.xlu2 %4896 }
 0x44f   :  { %v10962_v48 = vadd.s32 %v4500_v10, %v4496_v46  ;;  %v4747_v50 = vsel %vm4746_vm4, %v4745_v31, 0  ;;  %v4219_v4 = vsub.s32 4, %v10850_v60  ;;  %v3907_v23 = vadd.f32 -0.4999988, %v3906_v30 }
 0x450   :  { %v4506_v16 = vadd.s32 %v4505_v36, %v4495_v43  ;;  %v4749_v29 = vand.u32 31, %v4747_v50  ;;  %v3914_v33 = vadd.f32 -0.16666654, %v3913_v1  ;;  %v12384_v47 = vand.u32 2147483647, %v10622_v14 }
 0x451   :  { %v4216_v49 = vmul.f32 %v4215_v52, %v4213_v17  ;;  %v4508_v46 = vmul.u32 %v10879_v61, %v4454_v2  ;;  %v4743_v19 = vor.u32 8388608, %v4742_v45  ;;  %vm4510_vm0 = vc.u32 %v10960_v62, %v10962_v48 }
 0x452   :  { %vm10974_vm13 = vcmp.le.f32.partialorder %v12384_v47, 0.7853982  ;;  %v4507_v55 = vadd.s32 %v4506_v16, %v4497_v28  ;;  %v10979_v54 = vsub.s32 32, %v4749_v29  ;;  %v4752_v27 = vshll.u32 %v12196_v40, %v4749_v29 }
 0x453   :  { %v4755_v30 = vshll.u32 %v12201_v56, %v4749_v29  ;;  %v4758_v10 = vshll.u32 %v12207_v58, %v4749_v29  ;;  %v4761_v3 = vshll.u32 %v12202_v12, %v4749_v29  ;;  %v10987_v39 = vshrl.u32 %v4747_v50, 5 }
 0x454   :  { %v4511_v1 = vadd.s32 1, %v4507_v55  ;;  %v4753_v61 = vshrl.u32 %v12201_v56, %v10979_v54  ;;  %v4756_v51 = vshrl.u32 %v12207_v58, %v10979_v54  ;;  %v4217_v2 = vxor.u32 2147483648, %v4216_v49 }
 0x455   :  { %v4759_v43 = vshrl.u32 %v12202_v12, %v10979_v54  ;;  %v4762_v31 = vshrl.u32 %v12195_v41, %v10979_v54  ;;  %v4764_v17 = vshll.u32 %v12195_v41, %v4749_v29  ;;  %v4765_v28 = vshrl.u32 %v12203_v13, %v10979_v54 }
 0x456   :  { %v4512_v52 = vsel %vm4510_vm0, %v4511_v1, %v4507_v55  ;;  %v4754_v11 = vor.u32 %v4753_v61, %v4752_v27  ;;  %v10998_v32 = vor.u32 %v4756_v51, %v4755_v30  ;;  %v11003_v16 = vmul.f32 %v10619_v26, %v4897_v24 }
 0x457   :  { %v4513_v36 = vadd.s32 %v4512_v52, %v4508_v46  ;;  %v4760_v45 = vor.u32 %v4759_v43, %v4758_v10  ;;  %v4763_v50 = vor.u32 %v4762_v31, %v4761_v3  ;;  %v4766_v0 = vor.u32 %v4765_v28, %v4764_v17 }
 0x458   :  { %vm4767_vm10 = vcmp.lt.s32.totalorder %v10987_v39, 1  ;;  %vm4769_vm2 = vcmp.lt.s32.totalorder %v10987_v39, 3  ;;  %v11007_v5 = vshll.u32 %v4743_v19, 8  ;;  %v4218_v29 = vsel %vm4097_vm14, %v4217_v2, %v4216_v49 }
 0x459   :  { %v4514_v47 = vadd.s32 536870912, %v4513_v36  ;;  %vm4768_vm11 = vcmp.lt.s32.totalorder %v10987_v39, 2  ;;  %vm4770_vm9 = vcmp.lt.s32.totalorder %v10987_v39, 4  ;;  %v3908_v46 = vmul.f32 %v3907_v23, %v10894_v57 }
 0x45a   :  { %v11014_v55 = vand.u32 3, %v3902_v15  ;;  %v4775_v26 = vsel %vm4767_vm10, %v4754_v11, %v10998_v32  ;;  %v4776_v19 = vsel %vm4770_vm9, %v4763_v50, 920167782  ;;  %v3915_v27 = vmul.f32 %v3914_v33, %v10894_v57 }
 0x45b   :  { %v11022_v30 = vshrl.u32 %v4514_v47, 30  ;;  %v4777_v49 = vsel %vm4769_vm2, %v4760_v45, %v4776_v19  ;;  %v4779_v23 = vsel %vm4767_vm10, %v10998_v32, %v4760_v45  ;;  %v11032_v15 = vsel %vm10974_vm13, %v10622_v14, %v4218_v29 }
 0x45c   :  { %v4778_v10 = vsel %vm4768_vm11, %v4775_v26, %v4777_v49  ;;  %v4780_v57 = vsel %vm4770_vm9, %v4766_v0, 1326507024  ;;  %v5058_v33 = vand.u32 2139095040, %v11003_v16  ;;  %v11042_v3 = vsel %vm4097_vm14, %v4219_v4, %v10850_v60 }
 0x45d   :  { %v4516_v1 = vshll.u32 %v11022_v30, 30  ;;  %v4781_v61 = vsel %vm4769_vm2, %v4763_v50, %v4780_v57  ;;  %v4784_v51 = vand.u32 65535, %v11007_v5  ;;  %v11048_v24 = vadd.f32 1.0, %v3908_v46 }
 0x45e   :  { %v4782_v2 = vsel %vm4768_vm11, %v4779_v23, %v4781_v61  ;;  %v4785_v43 = vshrl.u32 %v11007_v5, 16  ;;  %v4809_v31 = vshrl.u32 %v4778_v10, 16  ;;  %v3916_v17 = vadd.f32 1.0, %v3915_v27 }
 0x45f   :  { %v11055_v60 = vmul.f32 %v11032_v15, %v11032_v15  ;;  %v11057_v4 = vsub.s32 %v4513_v36, %v4516_v1  ;;  %v4808_v52 = vand.u32 65535, %v4778_v10  ;;  %v4786_v28 = vand.u32 65535, %v4782_v2 }
 0x460   :  { %v4787_v50 = vshrl.u32 %v4782_v2, 16  ;;  %v5059_v29 = vshrl.u32 %v5058_v33, 23  ;;  %v4751_v46 = vshrl.u32 %v12196_v40, %v10979_v54  ;;  %v4811_v26 = vmul.u32 %v4809_v31, %v4784_v51 }
 0x461   :  { %vm4518_vm12 = vcmp.lt.s32.totalorder %v11057_v4, 0  ;;  %v4519_v47 = vsub.s32 0, %v11057_v4  ;;  %v4509_v19 = vadd.s32 %v10962_v48, %v10960_v62  ;;  %v4788_v27 = vmul.u32 %v4786_v28, %v4784_v51 }
 0x462   :  { %v4789_v36 = vmul.u32 %v4787_v50, %v4784_v51  ;;  %v4790_v49 = vmul.u32 %v4786_v28, %v4785_v43  ;;  %v4231_v23 = vmul.f32 -0.00019511016, %v11055_v60  ;;  %v4810_v57 = vmul.u32 %v4808_v52, %v4784_v51 }
 0x463   :  { %v4520_v10 = vsel %vm4518_vm12, %v4519_v47, %v11057_v4  ;;  %v11068_v33 = vmul.u32 %v4808_v52, %v4785_v43  ;;  %v4791_v61 = vmul.u32 %v4787_v50, %v4785_v43  ;;  %v4771_v54 = vsel %vm4767_vm10, %v4751_v46, %v4754_v11 }
 0x464   :  { %v4521_v1 = vclz %v4520_v10  ;;  %v4792_v2 = vshll.u32 %v4789_v36, 16  ;;  %v4794_v59 = vshll.u32 %v4790_v49, 16  ;;  %v4772_v62 = vsel %vm4770_vm9, %v4760_v45, 2102212464 }
 0x465   :  { %v4814_v48 = vshll.u32 %v4811_v26, 16  ;;  %v4816_v28 = vshll.u32 %v11068_v33, 16  ;;  %v4813_v47 = vmul.u32 %v4809_v31, %v4785_v43  ;;  %v4793_v51 = vshrl.u32 %v4789_v36, 16 }
 0x466   :  { %v6046_v35 = vadd.s32 4294967294, %v4521_v1  ;;  %vm4796_vm8 = vc.u32 %v4788_v27, %v4792_v2  ;;  %v4798_v7 = vadd.s32 %v4792_v2, %v4788_v27  ;;  %v4795_v10 = vshrl.u32 %v4790_v49, 16 }
 0x467   :  { %v4797_v52 = vsel %vm4796_vm8, 1, %v12194_v21  ;;  %vm4818_vm15 = vc.u32 %v4810_v57, %v4814_v48  ;;  %v4820_v50 = vadd.s32 %v4814_v48, %v4810_v57  ;;  %v4815_v31 = vshrl.u32 %v4811_v26, 16 }
 0x468   :  { %vm6047_vm5 = vcmp.lt.s32.totalorder %v6046_v35, 0  ;;  %v4799_v38 = vadd.s32 %v4797_v52, %v4791_v61  ;;  %vm4800_vm14 = vc.u32 %v4798_v7, %v4794_v59  ;;  %v4819_v45 = vsel %vm4818_vm15, 1, %v12194_v21  ;;  %v6166_v7 = vld [vmem:[%s12007_s8 + $0x30] sm:$0xff] }
 0x469   :  { %v4524_v11 = vsel %vm6047_vm5, 0, %v6046_v35  ;;  %v4801_v46 = vsel %vm4800_vm14, 1, %v12194_v21  ;;  %vm4822_vm4 = vc.u32 %v4820_v50, %v4816_v28  ;;  %v4821_v36 = vadd.s32 %v4819_v45, %v4813_v47  ;;  %v6174_v35 = vld [vmem:[%s12007_s8 + $0x70] sm:$0xff]  ;;  %2766 = vmatpush.bf16.msra.mxu0 %v6166_v7 }
 0x46a   :  { %v4525_v0 = vsub.s32 32, %v4524_v11  ;;  %v4526_v1 = vshll.u32 %v11057_v4, %v4524_v11  ;;  %v4529_v27 = vsub.s32 4294967266, %v4524_v11  ;;  %v4803_v43 = vadd.s32 %v4801_v46, %v4799_v38  ;;  %2780 = vmatpush.bf16.msra.mxu1 %v6174_v35 }
 0x46b   :  { %v4823_v2 = vsel %vm4822_vm4, 1, %v12194_v21  ;;  %v6057_v57 = vadd.s32 4294967169, %v5059_v29  ;;  %v4773_v4 = vsel %vm4769_vm2, %v10998_v32, %v4772_v62  ;;  %v11090_v26 = vmul.f32 %v3916_v17, %v10870_v37  ;;  %v6165_v17 = vld [vmem:[%s12007_s8 + $0x28] sm:$0xff] }
 0x46c   :  { %v4527_v59 = vshrl.u32 %v4509_v19, %v4525_v0  ;;  %v4530_v49 = vadd.s32 127, %v4529_v27  ;;  %v4804_v38 = vadd.s32 %v4803_v43, %v4793_v51  ;;  %v4817_v29 = vshrl.u32 %v11068_v33, 16  ;;  %v6173_v33 = vld [vmem:[%s12007_s8 + $0x68] sm:$0xff] }
 0x46d   :  { %v4825_v61 = vadd.s32 %v4823_v2, %v4821_v36  ;;  %v5065_v48 = vadd.s32 1, %v6057_v57  ;;  %vm3921_vm0 = vcmp.eq.s32.totalorder %v11014_v55, 0  ;;  %v11096_v19 = vadd.s32 %v4820_v50, %v4816_v28  ;;  %v5217_v50 = vpop.permute.xlu1 %5216  ;;  %2767 = vmatpush.bf16.msra.mxu0 %v6165_v17  ;;  %v6172_v2 = vld [vmem:[%s12007_s8 + $0x60] sm:$0xff] }
 0x46e   :  { %v4528_v47 = vor.u32 %v4527_v59, %v4526_v1  ;;  %v4531_v52 = vshll.u32 %v4530_v49, 23  ;;  %v11094_v0 = vadd.s32 %v4804_v38, %v4795_v10  ;;  %v4232_v11 = vadd.f32 0.008332121, %v4231_v23  ;;  %2781 = vmatpush.bf16.msra.mxu1 %v6173_v33 }
 0x46f   :  { %v4774_v32 = vsel %vm4768_vm11, %v4771_v54, %v4773_v4  ;;  %v4826_v37 = vadd.s32 %v4825_v61, %v4815_v31  ;;  %vm5066_vm10 = vcmp.gt.s32.totalorder %v5065_v48, 0  ;;  %vm3924_vm2 = vcmp.eq.s32.totalorder %v11014_v55, 2 }
 0x470   :  { %v4532_v62 = vor.u32 4788187, %v4531_v52  ;;  %v4535_v51 = vcvt.s32.f32 %v4528_v47  ;;  %v12387_v28 = vand.u32 2147483647, %v11003_v16  ;;  %v3925_v39 = vxor.u32 2147483648, %v11048_v24 }
 0x471   :  { %v4222_v54 = vsel %vm10974_vm13, 0, %v11042_v3  ;;  %v4827_v10 = vadd.s32 %v4826_v37, %v4817_v29  ;;  %v5067_v46 = vsel %vm5066_vm10, %v5065_v48, 0  ;;  %v4828_v1 = vmul.u32 %v11007_v5, %v4774_v32  ;;  %v6164_v5 = vld [vmem:[%s12007_s8 + $0x20] sm:$0xff] }
 0x472   :  { %v5062_v23 = vand.u32 8388607, %v12387_v28  ;;  %v4533_v45 = vand.u32 2147483647, %v4532_v62  ;;  %vm4830_vm11 = vc.u32 %v11094_v0, %v11096_v19  ;;  %v5069_v27 = vand.u32 31, %v5067_v46  ;;  %2768 = vmatpush.bf16.msra.mxu0 %v6164_v5  ;;  %2782 = vmatpush.bf16.msra.mxu1 %v6172_v2  ;;  %v6171_v28 = vld [vmem:[%s12007_s8 + $0x58] sm:$0xff] }
 0x473   :  { %v3922_v43 = vxor.u32 2147483648, %v11090_v26  ;;  %v4233_v31 = vmul.f32 %v4232_v11, %v11055_v60  ;;  %vm4417_vm9 = vcmp.lt.s32.totalorder %v10734_v8, 0  ;;  %v4831_v36 = vadd.s32 1, %v4827_v10 }
 0x474   :  { %v11122_v3 = vmul.f32 %v6295_v18, %v5217_v50  ;;  %v4536_v57 = vmul.f32 %v4535_v51, %v4533_v45  ;;  %v5063_v7 = vor.u32 8388608, %v5062_v23  ;;  %v11130_v35 = vshrl.u32 %v5067_v46, 5  ;;  %v6163_v51 = vld [vmem:[%s12007_s8 + $0x18] sm:$0xff] }
 0x475   :  { %v5070_v59 = vsub.s32 32, %v5069_v27  ;;  %v4832_v49 = vsel %vm4830_vm11, %v4831_v36, %v4827_v10  ;;  %v5072_v4 = vshll.u32 %v12196_v40, %v5069_v27  ;;  %v5075_v38 = vshll.u32 %v12201_v56, %v5069_v27 }
 0x476   :  { %v5078_v29 = vshll.u32 %v12207_v58, %v5069_v27  ;;  %v12388_v61 = vand.u32 2147483647, %v10734_v8  ;;  %v4833_v47 = vadd.s32 %v4832_v49, %v4828_v1  ;;  %v5081_v11 = vshll.u32 %v12202_v12, %v5069_v27  ;;  %2769 = vmatpush.bf16.msra.mxu0 %v6163_v51  ;;  %2783 = vmatpush.bf16.msra.mxu1 %v6171_v28 }
 0x477   :  { %v5073_v52 = vshrl.u32 %v12201_v56, %v5070_v59  ;;  %v5084_v32 = vshll.u32 %v12195_v41, %v5069_v27  ;;  %v5076_v37 = vshrl.u32 %v12207_v58, %v5070_v59  ;;  %v5079_v17 = vshrl.u32 %v12202_v12, %v5070_v59 }
 0x478   :  { %vm11137_vm13 = vcmp.le.f32.partialorder %v12388_v61, 0.7853982  ;;  %v5082_v33 = vshrl.u32 %v12195_v41, %v5070_v59  ;;  %v5085_v62 = vshrl.u32 %v12203_v13, %v5070_v59  ;;  %v11157_v23 = vsel %vm3924_vm2, %v3925_v39, %v11090_v26 }
 0x479   :  { %v4234_v50 = vadd.f32 -0.16666654, %v4233_v31  ;;  %v11159_v10 = vand.u32 3, %v4222_v54  ;;  %v4834_v46 = vadd.s32 536870912, %v4833_v47  ;;  %v11164_v45 = vsel %vm3921_vm0, %v11048_v24, %v3922_v43  ;;  %v6162_v24 = vld [vmem:[%s12007_s8 + $0x10] sm:$0xff] }
 0x47a   :  { %v5074_v1 = vor.u32 %v5073_v52, %v5072_v4  ;;  %v5077_v27 = vor.u32 %v5076_v37, %v5075_v38  ;;  %v5378_v36 = vand.u32 2139095040, %v11122_v3  ;;  %v4537_v18 = vxor.u32 2147483648, %v4536_v57  ;;  %v6170_v43 = vld [vmem:[%s12007_s8 + $0x50] sm:$0xff]  ;;  %v6157_v4 = vld [vmem:[%s12008_s7 + $0x8] sm:$0xff]  ;;  %2770 = vmatpush.bf16.msra.mxu0 %v6162_v24 }
 0x47b   :  { %v11167_v5 = vshrl.u32 %v4834_v46, 30  ;;  %v5083_v2 = vor.u32 %v5082_v33, %v5081_v11  ;;  %v11169_v26 = vshll.u32 %v5063_v7, 8  ;;  %v5080_v39 = vor.u32 %v5079_v17, %v5078_v29  ;;  %2784 = vmatpush.bf16.msra.mxu1 %v6170_v43  ;;  %2820 = vmatpush.bf16.msra.mxu2 %v6157_v4 }
 0x47c   :  { %v5086_v54 = vor.u32 %v5085_v62, %v5084_v32  ;;  %vm5087_vm12 = vcmp.lt.s32.totalorder %v11130_v35, 1  ;;  %vm5090_vm8 = vcmp.lt.s32.totalorder %v11130_v35, 4  ;;  %v11180_v31 = vmul.f32 %v4234_v50, %v11055_v60 }
 0x47d   :  { %v4836_v49 = vshll.u32 %v11167_v5, 30  ;;  %vm5089_vm15 = vcmp.lt.s32.totalorder %v11130_v35, 3  ;;  %vm5088_vm5 = vcmp.lt.s32.totalorder %v11130_v35, 2  ;;  %v5095_v38 = vsel %vm5087_vm12, %v5074_v1, %v5077_v27 }
 0x47e   :  { %v5096_v29 = vsel %vm5090_vm8, %v5083_v2, 920167782  ;;  %v12169_v61 = vand.u32 2147483647, %v11122_v3  ;;  %v4538_v52 = vsel %vm4417_vm9, %v4537_v18, %v4536_v57  ;;  %v5071_v32 = vshrl.u32 %v12196_v40, %v5070_v59  ;;  %v6161_v57 = vld [vmem:[%s12007_s8 + $0x8] sm:$0xff] }
 0x47f   :  { %v11196_v11 = vsub.s32 %v4833_v47, %v4836_v49  ;;  %v5379_v37 = vshrl.u32 %v5378_v36, 23  ;;  %v5097_v17 = vsel %vm5089_vm15, %v5080_v39, %v5096_v29  ;;  %v5099_v33 = vsel %vm5087_vm12, %v5077_v27, %v5080_v39  ;;  %v6169_v59 = vld [vmem:[%s12007_s8 + $0x48] sm:$0xff]  ;;  %v6156_v47 = vld [vmem:[%s12008_s7] sm:$0xff]  ;;  %2771 = vmatpush.bf16.msra.mxu0 %v6161_v57 }
 0x480   :  { %v5100_v62 = vsel %vm5090_vm8, %v5086_v54, 1326507024  ;;  %v5104_v51 = vand.u32 65535, %v11169_v26  ;;  %v5092_v50 = vsel %vm5090_vm8, %v5080_v39, 2102212464  ;;  %v5098_v46 = vsel %vm5088_vm5, %v5095_v38, %v5097_v17  ;;  %2785 = vmatpush.bf16.msra.mxu1 %v6169_v59  ;;  %2821 = vmatpush.bf16.msra.mxu2 %v6156_v47  ;;  %v2831_v17 = vld [vmem:[%s12009_s9 + $0x18] sm:$0xff] }
 0x481   :  { %vm4838_vm14 = vcmp.lt.s32.totalorder %v11196_v11, 0  ;;  %v4839_v28 = vsub.s32 0, %v11196_v11  ;;  %v11224_v36 = vsel %vm11137_vm13, %v10734_v8, %v4538_v52  ;;  %v5101_v18 = vsel %vm5089_vm15, %v5083_v2, %v5100_v62  ;;  %2850 = vmatpush.msra.mxu3 %v2831_v17 }
 0x482   :  { %v5105_v54 = vshrl.u32 %v11169_v26, 16  ;;  %v5129_v24 = vshrl.u32 %v5098_v46, 16  ;;  %v5091_v39 = vsel %vm5087_vm12, %v5071_v32, %v5074_v1  ;;  %v5102_v49 = vsel %vm5088_vm5, %v5099_v33, %v5101_v18  ;;  %v6160_v1 = vld [vmem:[%s12007_s8] sm:$0xff] }
 0x483   :  { %v4840_v43 = vsel %vm4838_vm14, %v4839_v28, %v11196_v11  ;;  %v5128_v4 = vand.u32 65535, %v5098_v46  ;;  %v5093_v29 = vsel %vm5089_vm15, %v5077_v27, %v5092_v50  ;;  %v5106_v2 = vand.u32 65535, %v5102_v49  ;;  %v6168_v32 = vld [vmem:[%s12007_s8 + $0x40] sm:$0xff]  ;;  %2772 = vmatpush.bf16.msra.mxu0 %v6160_v1  ;;  %v2830_v46 = vld [vmem:[%s12009_s9 + $0x10] sm:$0xff] }
 0x484   :  { %v4841_v38 = vclz %v4840_v43  ;;  %v5107_v52 = vshrl.u32 %v5102_v49, 16  ;;  %v11247_v33 = vmul.f32 %v11224_v36, %v11224_v36  ;;  %v4829_v27 = vadd.s32 %v11096_v19, %v11094_v0  ;;  %2786 = vmatpush.bf16.msra.mxu1 %v6168_v32  ;;  %2851 = vmatpush.msra.mxu3 %v2830_v46 }
 0x485   :  { %v11251_v62 = vmul.u32 %v5129_v24, %v5104_v51  ;;  %v11255_v57 = vand.u32 8388607, %v12169_v61  ;;  %v5108_v47 = vmul.u32 %v5106_v2, %v5104_v51  ;;  %v11257_v50 = vmul.u32 %v5106_v2, %v5105_v54 }
 0x486   :  { %v6052_v59 = vadd.s32 4294967294, %v4841_v38  ;;  %v5109_v28 = vmul.u32 %v5107_v52, %v5104_v51  ;;  %v11264_v0 = vsel %vm5088_vm5, %v5091_v39, %v5093_v29  ;;  %v5130_v19 = vmul.u32 %v5128_v4, %v5104_v51 }
 0x487   :  { %v11266_v18 = vmul.u32 %v5128_v4, %v5105_v54  ;;  %v6063_v43 = vadd.s32 4294967169, %v5379_v37  ;;  %v5111_v49 = vmul.u32 %v5107_v52, %v5105_v54  ;;  %v5133_v2 = vmul.u32 %v5129_v24, %v5105_v54 }
 0x488   :  { %vm6053_vm4 = vcmp.lt.s32.totalorder %v6052_v59, 0  ;;  %v5112_v38 = vshll.u32 %v5109_v28, 16  ;;  %5765 = vmatpush.msrb.mxu1 %v2831_v17  ;;  %v5114_v61 = vshll.u32 %v11257_v50, 16  ;;  %v5134_v7 = vshll.u32 %v11251_v62, 16 }
 0x489   :  { %v4844_v1 = vsel %vm6053_vm4, 0, %v6052_v59  ;;  %v5135_v35 = vshrl.u32 %v11251_v62, 16  ;;  %v5113_v37 = vshrl.u32 %v5109_v28, 16  ;;  %v5136_v54 = vshll.u32 %v11266_v18, 16 }
 0x48a   :  { %v4845_v39 = vsub.s32 32, %v4844_v1  ;;  %v4846_v51 = vshll.u32 %v11196_v11, %v4844_v1  ;;  %v4849_v4 = vsub.s32 4294967266, %v4844_v1  ;;  %vm5116_vm0 = vc.u32 %v5108_v47, %v5112_v38  ;;  %5766 = vmatpush.msrb.mxu1 %v2830_v46 }
 0x48b   :  { %v5117_v29 = vsel %vm5116_vm0, 1, %v12194_v21  ;;  %v5118_v52 = vadd.s32 %v5112_v38, %v5108_v47  ;;  %v5115_v32 = vshrl.u32 %v11257_v50, 16  ;;  %vm4737_vm10 = vcmp.lt.s32.totalorder %v10882_v22, 0  ;;  %v6155_v50 = vld [vmem:[%s12010_s0] sm:$0xff] }
 0x48c   :  { %v4847_v24 = vshrl.u32 %v4829_v27, %v4845_v39  ;;  %v4850_v17 = vadd.s32 127, %v4849_v4  ;;  %v5119_v59 = vadd.s32 %v5117_v29, %v5111_v49  ;;  %vm5138_vm11 = vc.u32 %v5130_v19, %v5134_v7 }
 0x48d   :  { %vm5120_vm2 = vc.u32 %v5118_v52, %v5114_v61  ;;  %v5140_v62 = vadd.s32 %v5134_v7, %v5130_v19  ;;  %v5385_v11 = vadd.s32 1, %v6063_v43  ;;  %v5139_v46 = vsel %vm5138_vm11, 1, %v12194_v21  ;;  %v2829_v7 = vld [vmem:[%s12009_s9 + $0x8] sm:$0xff] }
 0x48e   :  { %v4848_v1 = vor.u32 %v4847_v24, %v4846_v51  ;;  %v4851_v42 = vshll.u32 %v4850_v17, 23  ;;  %v5121_v28 = vsel %vm5120_vm2, 1, %v12194_v21  ;;  %v5137_v38 = vshrl.u32 %v11266_v18, 16  ;;  %2852 = vmatpush.msra.mxu3 %v2829_v7  ;;  %5767 = vmatpush.msrb.mxu1 %v2829_v7  ;;  %v2828_v51 = vld [vmem:[%s12009_s9] sm:$0xff] }
 0x48f   :  { %v5123_v47 = vadd.s32 %v5121_v28, %v5119_v59  ;;  %v5141_v27 = vadd.s32 %v5139_v46, %v5133_v2  ;;  %vm5142_vm12 = vc.u32 %v5140_v62, %v5136_v54  ;;  %vm3920_vm8 = vcmp.lt.s32.totalorder %v11014_v55, 2  ;;  %v5931_v55 = vld [vmem:[%s12011_s1] sm:$0xf] }
 0x490   :  { %v4852_v61 = vor.u32 4788187, %v4851_v42  ;;  %v4855_v19 = vcvt.s32.f32 %v4848_v1  ;;  %v5143_v43 = vsel %vm5142_vm12, 1, %v12194_v21  ;;  %vm5386_vm15 = vcmp.gt.s32.totalorder %v5385_v11, 0  ;;  %2853 = vmatpush.msra.mxu3 %v2828_v51  ;;  %5768 = vmatpush.msrb.mxu1 %v2828_v51 }
 0x491   :  { %v5124_v18 = vadd.s32 %v5123_v47, %v5113_v37  ;;  %v11287_v49 = vadd.s32 %v5140_v62, %v5136_v54  ;;  %v5145_v2 = vadd.s32 %v5143_v43, %v5141_v27  ;;  %v5387_v39 = vsel %vm5386_vm15, %v5385_v11, 0 }
 0x492   :  { %v4236_v4 = vadd.f32 1.0, %v11180_v31  ;;  %v4853_v29 = vand.u32 2147483647, %v4852_v61  ;;  %v5389_v52 = vand.u32 31, %v5387_v39  ;;  %vm2810_vm5 = vcmask 261120  }
 0x493   :  { %v4551_v42 = vmul.f32 -0.00019511016, %v11247_v33  ;;  %v11294_v24 = vadd.s32 %v5124_v18, %v5115_v32  ;;  %v5146_v37 = vadd.s32 %v5145_v2, %v5135_v35  ;;  %v5148_v54 = vmul.u32 %v11169_v26, %v11264_v0  ;;  %6013 = vmatmul.msk.bf16.vlgmr.msra.gmra.mxu2 %vm2810_vm5, %v6155_v50 }
 0x494   :  { %v4856_v17 = vmul.f32 %v4855_v19, %v4853_v29  ;;  %v5383_v59 = vor.u32 8388608, %v11255_v57  ;;  %v11300_v62 = vshrl.u32 %v5387_v39, 5  ;;  %v5390_v31 = vsub.s32 32, %v5389_v52 }
 0x495   :  { %v5147_v11 = vadd.s32 %v5146_v37, %v5137_v38  ;;  %vm5150_vm14 = vc.u32 %v11294_v24, %v11287_v49  ;;  %v5392_v1 = vshll.u32 %v12196_v40, %v5389_v52  ;;  %v5395_v32 = vshll.u32 %v12201_v56, %v5389_v52 }
 0x496   :  { %v4857_v35 = vxor.u32 2147483648, %v4856_v17  ;;  %v5393_v28 = vshrl.u32 %v12201_v56, %v5390_v31  ;;  %v5396_v26 = vshrl.u32 %v12207_v58, %v5390_v31  ;;  %v5398_v0 = vshll.u32 %v12207_v58, %v5389_v52 }
 0x497   :  { %v5151_v46 = vadd.s32 1, %v5147_v11  ;;  %v5399_v57 = vshrl.u32 %v12202_v12, %v5390_v31  ;;  %v5401_v47 = vshll.u32 %v12202_v12, %v5389_v52  ;;  %v5402_v38 = vshrl.u32 %v12195_v41, %v5390_v31 }
 0x498   :  { %v4552_v27 = vadd.f32 0.008332121, %v4551_v42  ;;  %v12391_v50 = vand.u32 2147483647, %v10882_v22  ;;  %v4858_v56 = vsel %vm4737_vm10, %v4857_v35, %v4856_v17  ;;  %v5404_v61 = vshll.u32 %v12195_v41, %v5389_v52 }
 0x499   :  { %v5152_v58 = vsel %vm5150_vm14, %v5151_v46, %v5147_v11  ;;  %v5394_v19 = vor.u32 %v5393_v28, %v5392_v1  ;;  %v5397_v43 = vor.u32 %v5396_v26, %v5395_v32  ;;  %v5403_v18 = vor.u32 %v5402_v38, %v5401_v47 }
 0x49a   :  { %vm11314_vm4 = vcmp.le.f32.partialorder %v12391_v50, 0.7853982  ;;  %v5153_v2 = vadd.s32 %v5152_v58, %v5148_v54  ;;  %v5400_v12 = vor.u32 %v5399_v57, %v5398_v0  ;;  %v5405_v39 = vshrl.u32 %v12203_v13, %v5390_v31 }
 0x49b   :  { %vm5407_vm0 = vcmp.lt.s32.totalorder %v11300_v62, 1  ;;  %v11327_v51 = vsel %vm3920_vm8, %v11164_v45, %v11157_v23  ;;  %vm5409_vm2 = vcmp.lt.s32.totalorder %v11300_v62, 3  ;;  %vm5410_vm11 = vcmp.lt.s32.totalorder %v11300_v62, 4  ;;  %v6159_v23 = vld [vmem:[%s12011_s1 + $0x4] sm:$0xf0] }
 0x49c   :  { %v11331_v41 = vshll.u32 %v5383_v59, 8  ;;  %v12394_v29 = vsub.s32 4, %v11022_v30  ;;  %v5154_v52 = vadd.s32 536870912, %v5153_v2  ;;  %v5406_v42 = vor.u32 %v5405_v39, %v5404_v61 }
 0x49d   :  { %vm5408_vm12 = vcmp.lt.s32.totalorder %v11300_v62, 2  ;;  %v11348_v45 = vmul.f32 %v4236_v4, %v11032_v15  ;;  %v5415_v37 = vsel %vm5407_vm0, %v5394_v19, %v5397_v43  ;;  %v5416_v54 = vsel %vm5410_vm11, %v5403_v18, 920167782  ;;  %v12396_v62 = vld [vmem:[#allocation7_spill] sm:$0xff] }
 0x49e   :  { %v11338_v13 = vsel %vm4417_vm9, %v12394_v29, %v11022_v30  ;;  %v11353_v30 = vsel %vm11314_vm4, %v10882_v22, %v4858_v56  ;;  %v4553_v17 = vmul.f32 %v4552_v27, %v11247_v33  ;;  %v11360_v59 = vshrl.u32 %v5154_v52, 30 }
 0x49f   :  { %v5417_v11 = vsel %vm5409_vm2, %v5400_v12, %v5416_v54  ;;  %v5419_v15 = vsel %vm5407_vm0, %v5397_v43, %v5400_v12  ;;  %v5420_v1 = vsel %vm5410_vm11, %v5406_v42, 1326507024  ;;  %v5424_v32 = vand.u32 65535, %v11331_v41 }
 0x4a0   :  { %v5418_v4 = vsel %vm5408_vm12, %v5415_v37, %v5417_v11  ;;  %v5932_v35 = vor.u32 %v6159_v23, %v5931_v55  ;;  %v11373_v28 = vmul.f32 %v11353_v30, %v11353_v30  ;;  %v5156_v26 = vshll.u32 %v11360_v59, 30 }
 0x4a1   :  { %v5421_v0 = vsel %vm5409_vm2, %v5403_v18, %v5420_v1  ;;  %v5425_v46 = vshrl.u32 %v11331_v41, 16  ;;  %v5391_v57 = vshrl.u32 %v12196_v40, %v5390_v31  ;;  %v5448_v38 = vand.u32 65535, %v5418_v4 }
 0x4a2   :  { %v5422_v47 = vsel %vm5408_vm12, %v5419_v15, %v5421_v0  ;;  %v5449_v27 = vshrl.u32 %v5418_v4, 16  ;;  %2773 = vmatmul.bf16.vlgmr.msra.gmra.mxu0 %v5932_v35  ;;  %v4554_v50 = vadd.f32 -0.16666654, %v4553_v17  ;;  %v4859_v56 = vsub.s32 4, %v11167_v5 }
 0x4a3   :  { %v5149_v61 = vadd.s32 %v11287_v49, %v11294_v24  ;;  %v5157_v58 = vsub.s32 %v5153_v2, %v5156_v26  ;;  %v5412_v18 = vsel %vm5410_vm11, %v5400_v12, 2102212464  ;;  %v5426_v39 = vand.u32 65535, %v5422_v47 }
 0x4a4   :  { %v5427_v29 = vshrl.u32 %v5422_v47, 16  ;;  %v5451_v52 = vmul.u32 %v5449_v27, %v5424_v32  ;;  %v4871_v40 = vmul.f32 -0.00019511016, %v11373_v28  ;;  %v11388_v42 = vmul.u32 %v5448_v38, %v5425_v46 }
 0x4a5   :  { %vm5158_vm9 = vcmp.lt.s32.totalorder %v5157_v58, 0  ;;  %v5159_v31 = vsub.s32 0, %v5157_v58  ;;  %v5411_v55 = vsel %vm5407_vm0, %v5391_v57, %v5394_v19  ;;  %v5428_v23 = vmul.u32 %v5426_v39, %v5424_v32 }
 0x4a6   :  { %v5429_v37 = vmul.u32 %v5427_v29, %v5424_v32  ;;  %v5430_v54 = vmul.u32 %v5426_v39, %v5425_v46  ;;  %v5413_v24 = vsel %vm5409_vm2, %v5397_v43, %v5412_v18  ;;  %v5450_v2 = vmul.u32 %v5448_v38, %v5424_v32 }
 0x4a7   :  { %v5160_v49 = vsel %vm5158_vm9, %v5159_v31, %v5157_v58  ;;  %v5454_v12 = vshll.u32 %v5451_v52, 16  ;;  %v5431_v11 = vmul.u32 %v5427_v29, %v5425_v46  ;;  %v4872_v1 = vadd.f32 0.008332121, %v4871_v40 }
 0x4a8   :  { %v5161_v17 = vclz %v5160_v49  ;;  %v5432_v15 = vshll.u32 %v5429_v37, 16  ;;  %v5434_v4 = vshll.u32 %v5430_v54, 16  ;;  %v5433_v35 = vshrl.u32 %v5429_v37, 16 }
 0x4a9   :  { %v5453_v26 = vmul.u32 %v5449_v27, %v5425_v46  ;;  %v5456_v0 = vshll.u32 %v11388_v42, 16  ;;  %v5435_v19 = vshrl.u32 %v5430_v54, 16  ;;  %vm3918_vm15 = vweird.f32 %v10470_v25  ;;  %v6158_v46 = vld [vmem:[%s12011_s1 + $0x4] sm:$0xf]  ;;  %v5933_v27 = vld [vmem:[%s12011_s1 + $0x8] sm:$0xf0] }
 0x4aa   :  { %v6058_v47 = vadd.s32 4294967294, %v5161_v17  ;;  %vm5436_vm8 = vc.u32 %v5428_v23, %v5432_v15  ;;  %v5438_v57 = vadd.s32 %v5432_v15, %v5428_v23  ;;  %v5455_v43 = vshrl.u32 %v5451_v52, 16 }
 0x4ab   :  { %v5437_v39 = vsel %vm5436_vm8, 1, %v12194_v21  ;;  %vm5458_vm14 = vc.u32 %v5450_v2, %v5454_v12  ;;  %v5460_v32 = vadd.s32 %v5454_v12, %v5450_v2  ;;  %v4555_v49 = vmul.f32 %v4554_v50, %v11247_v33 }
 0x4ac   :  { %vm6059_vm0 = vcmp.lt.s32.totalorder %v6058_v47, 0  ;;  %v5439_v38 = vadd.s32 %v5437_v39, %v5431_v11  ;;  %vm5440_vm2 = vc.u32 %v5438_v57, %v5434_v4  ;;  %v5459_v18 = vsel %vm5458_vm14, 1, %v12194_v21 }
 0x4ad   :  { %v5164_v29 = vsel %vm6059_vm0, 0, %v6058_v47  ;;  %v5441_v40 = vsel %vm5440_vm2, 1, %v12194_v21  ;;  %v5461_v31 = vadd.s32 %v5459_v18, %v5453_v26  ;;  %vm5462_vm11 = vc.u32 %v5460_v32, %v5456_v0 }
 0x4ae   :  { %v5165_v52 = vsub.s32 32, %v5164_v29  ;;  %v5166_v23 = vshll.u32 %v5157_v58, %v5164_v29  ;;  %v5169_v37 = vsub.s32 4294967266, %v5164_v29  ;;  %v5443_v54 = vadd.s32 %v5441_v40, %v5439_v38  ;;  %v12395_v58 = vld [vmem:[#allocation23_spill] sm:$0xff] }
 0x4af   :  { %v5457_v2 = vshrl.u32 %v11388_v42, 16  ;;  %v5463_v12 = vsel %vm5462_vm11, 1, %v12194_v21  ;;  %v5936_v17 = vor.u32 %v6158_v46, %v5933_v27  ;;  %v4873_v47 = vmul.f32 %v4872_v1, %v11373_v28 }
 0x4b0   :  { %v5167_v11 = vshrl.u32 %v5149_v61, %v5165_v52  ;;  %v5170_v15 = vadd.s32 127, %v5169_v37  ;;  %v5444_v4 = vadd.s32 %v5443_v54, %v5433_v35  ;;  %v5465_v57 = vadd.s32 %v5463_v12, %v5461_v31 }
 0x4b1   :  { %v5414_v26 = vsel %vm5408_vm12, %v5411_v55, %v5413_v24  ;;  %v11411_v39 = vadd.s32 %v5460_v32, %v5456_v0  ;;  %2787 = vmatmul.bf16.vlgmr.msra.gmra.mxu1 %v5936_v17  ;;  %v1154_v38 = vmul.f32 -0.001358992, %v12395_v58  ;;  %v4556_v46 = vadd.f32 1.0, %v4555_v49 }
 0x4b2   :  { %v5168_v50 = vor.u32 %v5167_v11, %v5166_v23  ;;  %v5171_v18 = vshll.u32 %v5170_v15, 23  ;;  %v11414_v42 = vadd.s32 %v5444_v4, %v5435_v19  ;;  %v5466_v21 = vadd.s32 %v5465_v57, %v5455_v43 }
 0x4b3   :  { %v4860_v61 = vsel %vm4737_vm10, %v4859_v56, %v11167_v5  ;;  %v1155_v1 = vadd.f32 0.041655596, %v1154_v38  ;;  %v1474_v55 = vmul.f32 -0.001358992, %v12396_v62  ;;  %v5468_v32 = vmul.u32 %v11331_v41, %v5414_v26 }
 0x4b4   :  { %v5172_v24 = vor.u32 4788187, %v5171_v18  ;;  %v5175_v35 = vcvt.s32.f32 %v5168_v50  ;;  %v5467_v0 = vadd.s32 %v5466_v21, %v5457_v2  ;;  %v4874_v27 = vadd.f32 -0.16666654, %v4873_v47  ;;  %v12401_v50 = vld [vmem:[#allocation36_spill] sm:$0xff] }
 0x4b5   :  { %vm5470_vm12 = vc.u32 %v11414_v42, %v11411_v39  ;;  %v1156_v19 = vmul.f32 %v1155_v1, %v12395_v58  ;;  %v1475_v43 = vadd.f32 0.041655596, %v1474_v55  ;;  %v11429_v29 = vsel %vm3918_vm15, nan, %v11327_v51  ;;  %v12402_v21 = vld [vmem:[#allocation8_spill] sm:$0xff] }
 0x4b6   :  { %v4542_v5 = vsel %vm11137_vm13, 0, %v11338_v13  ;;  %v5173_v56 = vand.u32 2147483647, %v5172_v24  ;;  %v5471_v40 = vadd.s32 1, %v5467_v0  ;;  %v11435_v41 = vmul.f32 %v4556_v46, %v11224_v36 }
 0x4b7   :  { %v4862_v31 = vsel %vm11314_vm4, 0, %v4860_v61  ;;  %v1157_v52 = vadd.f32 -0.4999988, %v1156_v19  ;;  %v1476_v23 = vmul.f32 %v1475_v43, %v12396_v62  ;;  %v4242_v37 = vxor.u32 2147483648, %v11348_v45  ;;  %v12404_v19 = vld [vmem:[#allocation5_spill] sm:$0xff] }
 0x4b8   :  { %vm5057_vm10 = vcmp.lt.s32.totalorder %v11003_v16, 0  ;;  %v5176_v25 = vmul.f32 %v5175_v35, %v5173_v56  ;;  %v5472_v51 = vsel %vm5470_vm12, %v5471_v40, %v5467_v0  ;;  %v4875_v48 = vmul.f32 %v4874_v27, %v11373_v28  ;;  %v12403_v27 = vld [vmem:[#allocation28_spill] sm:$0xff]  ;;  %v12406_v56 = vld [vmem:[#allocation27_spill] sm:$0xff] }
 0x4b9   :  { %v5473_v13 = vadd.s32 %v5472_v51, %v5468_v32  ;;  %v1158_v54 = vmul.f32 %v1157_v52, %v12395_v58  ;;  %v1477_v49 = vadd.f32 -0.4999988, %v1476_v23  ;;  %v11444_v36 = vand.u32 3, %v4542_v5  ;;  %v12400_v58 = vld [vmem:[#allocation11_spill] sm:$0xff]  ;;  %v12405_v5 = vld [vmem:[#allocation26_spill] sm:$0xff]  ;;  %v12408_v52 = vld [vmem:[#allocation9_spill] sm:$0xff] }
 0x4ba   :  { %v11446_v2 = vand.u32 3, %v4862_v31  ;;  %v12397_v7 = vand.u32 2147483647, %v11003_v16  ;;  %v5177_v17 = vxor.u32 2147483648, %v5176_v25  ;;  %v5179_v26 = vsub.s32 4, %v11360_v59  ;;  %v12409_v51 = vld [vmem:[#allocation2_spill] sm:$0xff] }
 0x4bb   :  { %v5474_v15 = vadd.s32 536870912, %v5473_v13  ;;  %v1159_v4 = vadd.f32 1.0, %v1158_v54  ;;  %v1478_v57 = vmul.f32 %v1477_v49, %v12396_v62  ;;  %v1794_v38 = vmul.f32 -0.001358992, %v12400_v58 }
 0x4bc   :  { %vm11450_vm13 = vcmp.le.f32.partialorder %v12397_v7, 0.7853982  ;;  %v5178_v47 = vsel %vm5057_vm10, %v5177_v17, %v5176_v25  ;;  %v2114_v18 = vmul.f32 -0.001358992, %v12401_v50  ;;  %vm1168_vm4 = vweird.f32 %v12402_v21 }
 0x4bd   :  { %v11462_v46 = vadd.f32 1.0, %v4875_v48  ;;  %v11467_v61 = vsel %vm11450_vm13, %v11003_v16, %v5178_v47  ;;  %v11469_v1 = vshrl.u32 %v5474_v15, 30  ;;  %v1175_v62 = vxor.u32 2147483648, %v1159_v4  ;;  %v12410_v15 = vld [vmem:[#allocation41_spill] sm:$0xff] }
 0x4be   :  { %v11473_v55 = vmul.f32 %v11467_v61, %v11467_v61  ;;  %v1479_v24 = vadd.f32 1.0, %v1478_v57  ;;  %v1795_v35 = vadd.f32 0.041655596, %v1794_v38  ;;  %v2115_v0 = vadd.f32 0.041655596, %v2114_v18  ;;  %v12412_v18 = vld [vmem:[#allocation10_spill] sm:$0xff] }
 0x4bf   :  { %v5476_v32 = vshll.u32 %v11469_v1, 30  ;;  %v1013_v43 = vadd.f32 %v12404_v19, %v12403_v27  ;;  %vm1170_vm9 = vcmp.lt.s32.totalorder %v12405_v5, 2  ;;  %vm1171_vm8 = vcmp.eq.s32.totalorder %v12405_v5, 0 }
 0x4c0   :  { %v12407_v40 = vxor.u32 2147483648, %v12406_v56  ;;  %vm1174_vm15 = vcmp.eq.s32.totalorder %v12405_v5, 2  ;;  %vm1490_vm14 = vcmp.lt.s32.totalorder %v12408_v52, 2  ;;  %vm1491_vm0 = vcmp.eq.s32.totalorder %v12408_v52, 0 }
 0x4c1   :  { %v5191_v23 = vmul.f32 -0.00019511016, %v11473_v55  ;;  %v11486_v25 = vsub.s32 %v5473_v13, %v5476_v32  ;;  %vm1488_vm2 = vweird.f32 %v12409_v51  ;;  %v1796_v48 = vmul.f32 %v1795_v35, %v12400_v58 }
 0x4c2   :  { %v1173_v31 = vsel %vm1171_vm8, %v1159_v4, %v12407_v40  ;;  %v2116_v54 = vmul.f32 %v2115_v0, %v12401_v50  ;;  %v5469_v49 = vadd.s32 %v11411_v39, %v11414_v42  ;;  %v1176_v7 = vsel %vm1174_vm15, %v1175_v62, %v12406_v56  ;;  %v12414_v39 = vld [vmem:[#allocation12_spill] sm:$0xff] }
 0x4c3   :  { %v1495_v17 = vxor.u32 2147483648, %v1479_v24  ;;  %v2112_v57 = vsel %vm8703_vm1, 0, %v12410_v15  ;;  %vm5478_vm11 = vcmp.lt.s32.totalorder %v11486_v25, 0  ;;  %v5479_v13 = vsub.s32 0, %v11486_v25 }
 0x4c4   :  { %v1177_v47 = vsel %vm1170_vm9, %v1173_v31, %v1176_v7  ;;  %v1797_v38 = vadd.f32 -0.4999988, %v1796_v48  ;;  %v12413_v35 = vxor.u32 2147483648, %v12412_v18  ;;  %vm1494_vm12 = vcmp.eq.s32.totalorder %v12408_v52, 2  ;;  %v12415_v48 = vld [vmem:[#allocation46_spill] sm:$0xff] }
 0x4c5   :  { %vm1811_vm8 = vcmp.eq.s32.totalorder %v12414_v39, 0  ;;  %v2117_v42 = vadd.f32 -0.4999988, %v2116_v54  ;;  %v5192_v62 = vadd.f32 0.008332121, %v5191_v23  ;;  %v5480_v32 = vsel %vm5478_vm11, %v5479_v13, %v11486_v25 }
 0x4c6   :  { %v1493_v0 = vsel %vm1491_vm0, %v1479_v24, %v12413_v35  ;;  %v1798_v27 = vmul.f32 %v1797_v38, %v12400_v58  ;;  %vm1814_vm1 = vcmp.eq.s32.totalorder %v12414_v39, 2  ;;  %v2129_v19 = vand.u32 3, %v2112_v57  ;;  %v12416_v57 = vld [vmem:[#allocation34_spill] sm:$0xff] }
 0x4c7   :  { %v5481_v56 = vclz %v5480_v32  ;;  %v1178_v5 = vsel %vm1168_vm4, nan, %v1177_v47  ;;  %v1496_v40 = vsel %vm1494_vm12, %v1495_v17, %v12412_v18  ;;  %vm1810_vm9 = vcmp.lt.s32.totalorder %v12414_v39, 2  ;;  %v12417_v17 = vld [vmem:[#allocation3_spill] sm:$0xff]  ;;  %v12418_v47 = vld [vmem:[#allocation37_spill] sm:$0xff]  ;;  %v12426_v39 = vld [vmem:[#allocation4_spill] sm:$0xff] }
 0x4c8   :  { %v2118_v24 = vmul.f32 %v2117_v42, %v12401_v50  ;;  %v1497_v31 = vsel %vm1490_vm14, %v1493_v0, %v1496_v40  ;;  %v1799_v23 = vadd.f32 1.0, %v1798_v27  ;;  %v2434_v54 = vmul.f32 -0.001358992, %v12415_v48 }
 0x4c9   :  { %v2441_v58 = vmul.f32 -0.00019511016, %v12415_v48  ;;  %v6064_v7 = vadd.s32 4294967294, %v5481_v56  ;;  %v1333_v15 = vadd.f32 %v1178_v5, %v1013_v43  ;;  %v2132_v21 = vxor.u32 2147483648, %v12416_v57 }
 0x4ca   :  { %v2119_v4 = vadd.f32 1.0, %v2118_v24  ;;  %v5193_v13 = vmul.f32 %v5192_v62, %v11473_v55  ;;  %vm1808_vm4 = vweird.f32 %v12417_v17  ;;  %vm2130_vm15 = vcmp.lt.s32.totalorder %v2129_v19, 2  ;;  %v12419_v62 = vld [vmem:[#allocation18_spill] sm:$0xff] }
 0x4cb   :  { %v2429_v50 = vsub.s32 4, %v12418_v47  ;;  %v2435_v38 = vadd.f32 0.041655596, %v2434_v54  ;;  %vm6065_vm0 = vcmp.lt.s32.totalorder %v6064_v7, 0  ;;  %v1498_v52 = vsel %vm1488_vm2, nan, %v1497_v31  ;;  %v12421_v24 = vld [vmem:[#allocation22_spill] sm:$0xff] }
 0x4cc   :  { %v1815_v18 = vxor.u32 2147483648, %v1799_v23  ;;  %vm2131_vm14 = vcmp.eq.s32.totalorder %v2129_v19, 0  ;;  %v5484_v35 = vsel %vm6065_vm0, 0, %v6064_v7  ;;  %v2135_v0 = vxor.u32 2147483648, %v2119_v4 }
 0x4cd   :  { %v2436_v43 = vmul.f32 %v2435_v38, %v12415_v48  ;;  %v2442_v42 = vadd.f32 0.008332121, %v2441_v58  ;;  %v5485_v32 = vsub.s32 32, %v5484_v35  ;;  %v5489_v27 = vsub.s32 4294967266, %v5484_v35 }
 0x4ce   :  { %v12420_v56 = vxor.u32 2147483648, %v12419_v62  ;;  %vm2134_vm11 = vcmp.eq.s32.totalorder %v2129_v19, 2  ;;  %v2133_v40 = vsel %vm2131_vm14, %v2119_v4, %v2132_v21  ;;  %vm12422_vm12 = vcmp.lt.s32.totalorder %v12421_v24, 0 }
 0x4cf   :  { %v2430_v51 = vsel %vm12422_vm12, %v2429_v50, %v12418_v47  ;;  %v2437_v31 = vadd.f32 -0.4999988, %v2436_v43  ;;  %v2443_v54 = vmul.f32 %v2442_v42, %v12415_v48  ;;  %v5486_v7 = vshll.u32 %v11486_v25, %v5484_v35  ;;  %v12425_v42 = vld [vmem:[#allocation25_spill] sm:$0xff] }
 0x4d0   :  { %v1813_v5 = vsel %vm1811_vm8, %v1799_v23, %v12420_v56  ;;  %v5487_v38 = vshrl.u32 %v5469_v49, %v5485_v32  ;;  %v5490_v58 = vadd.s32 127, %v5489_v27  ;;  %v1816_v11 = vsel %vm1814_vm1, %v1815_v18, %v12419_v62  ;;  %v12424_v49 = vld [vmem:[#allocation21_spill] sm:$0xff] }
 0x4d1   :  { %v1817_v23 = vsel %vm1810_vm9, %v1813_v5, %v1816_v11  ;;  %v2136_v4 = vsel %vm2134_vm11, %v2135_v0, %v12416_v57  ;;  %v2438_v21 = vmul.f32 %v2437_v31, %v12415_v48  ;;  %v2444_v56 = vadd.f32 -0.16666654, %v2443_v54  ;;  %v12427_v31 = vld [vmem:[#allocation14_spill] sm:$0xff]  ;;  %v12428_v54 = vld [vmem:[#allocation44_spill] sm:$0xff] }
 0x4d2   :  { %v1653_v47 = vadd.f32 %v1498_v52, %v1333_v15  ;;  %v2137_v50 = vsel %vm2130_vm15, %v2133_v40, %v2136_v4  ;;  %v2432_v25 = vsel %vm9410_vm7, 0, %v2430_v51  ;;  %v1308_v35 = vmul.f32 -0.001358992, %v12424_v49 }
 0x4d3   :  { %vm2128_vm2 = vweird.f32 %v12425_v42  ;;  %v2439_v32 = vadd.f32 1.0, %v2438_v21  ;;  %v2445_v18 = vmul.f32 %v2444_v56, %v12415_v48  ;;  %v1628_v11 = vmul.f32 -0.001358992, %v12426_v39 }
 0x4d4   :  { %v5488_v27 = vor.u32 %v5487_v38, %v5486_v7  ;;  %v5491_v57 = vshll.u32 %v5490_v58, 23  ;;  %v1818_v0 = vsel %vm1808_vm4, nan, %v1817_v23  ;;  %vm2448_vm8 = vweird.f32 %v12421_v24  ;;  %v12429_v7 = vld [vmem:[#allocation17_spill] sm:$0xff]  ;;  %v12430_v38 = vld [vmem:[#allocation31_spill] sm:$0xff] }
 0x4d5   :  { %v2138_v19 = vsel %vm2128_vm2, nan, %v2137_v50  ;;  %v2446_v15 = vadd.f32 1.0, %v2445_v18  ;;  %v2449_v52 = vand.u32 3, %v2432_v25  ;;  %v1309_v62 = vadd.f32 0.041655596, %v1308_v35  ;;  %v12431_v23 = vld [vmem:[#allocation29_spill] sm:$0xff] }
 0x4d6   :  { %v11550_v5 = vadd.f32 -0.16666654, %v5193_v13  ;;  %v1973_v40 = vadd.f32 %v1818_v0, %v1653_v47  ;;  %v2455_v51 = vxor.u32 2147483648, %v2439_v32  ;;  %vm1325_vm7 = vcmp.eq.s32.totalorder %v12427_v31, 0 }
 0x4d7   :  { %v1629_v48 = vadd.f32 0.041655596, %v1628_v11  ;;  %v2447_v4 = vmul.f32 %v2446_v15, %v12428_v54  ;;  %v1014_v58 = vadd.f32 %v12430_v38, %v12429_v7  ;;  %v1310_v17 = vmul.f32 %v1309_v62, %v12424_v49  ;;  %v12432_v11 = vld [vmem:[#allocation6_spill] sm:$0xff]  ;;  %v12434_v54 = vld [vmem:[#allocation19_spill] sm:$0xff]  ;;  %v12435_v38 = vld [vmem:[#allocation24_spill] sm:$0xff] }
 0x4d8   :  { %v1948_v21 = vmul.f32 -0.001358992, %v12431_v23  ;;  %v5492_v56 = vor.u32 4788187, %v5491_v57  ;;  %v5495_v50 = vcvt.s32.f32 %v5488_v27  ;;  %v2293_v43 = vadd.f32 %v2138_v19, %v1973_v40  ;;  %v12433_v19 = vld [vmem:[#allocation47_spill] sm:$0xff] }
 0x4d9   :  { %vm1328_vm1 = vcmp.eq.s32.totalorder %v12427_v31, 2  ;;  %v1630_v13 = vmul.f32 %v1629_v48, %v12426_v39  ;;  %v2452_v47 = vxor.u32 2147483648, %v2447_v4  ;;  %vm2454_vm9 = vcmp.eq.s32.totalorder %v2449_v52, 2 }
 0x4da   :  { %v1311_v25 = vadd.f32 -0.4999988, %v1310_v17  ;;  %vm1324_vm4 = vcmp.lt.s32.totalorder %v12427_v31, 2  ;;  %v1949_v35 = vadd.f32 0.041655596, %v1948_v21  ;;  %vm2450_vm15 = vcmp.lt.s32.totalorder %v2449_v52, 2 }
 0x4db   :  { %vm2451_vm0 = vcmp.eq.s32.totalorder %v2449_v52, 0  ;;  %v2456_v42 = vsel %vm2454_vm9, %v2455_v51, %v2447_v4  ;;  %v1631_v18 = vadd.f32 -0.4999988, %v1630_v13  ;;  %vm1322_vm14 = vweird.f32 %v12432_v11  ;;  %v12438_v13 = vld [vmem:[#allocation48_spill] sm:$0xff] }
 0x4dc   :  { %v2453_v0 = vsel %vm2451_vm0, %v2439_v32, %v2452_v47  ;;  %v1312_v27 = vmul.f32 %v1311_v25, %v12424_v49  ;;  %v1950_v57 = vmul.f32 %v1949_v35, %v12431_v23  ;;  %v2268_v15 = vmul.f32 -0.001358992, %v12433_v19  ;;  %v12447_v47 = vld [vmem:[#allocation40_spill] sm:$0xff] }
 0x4dd   :  { %v5493_v62 = vand.u32 2147483647, %v5492_v56  ;;  %v2457_v40 = vsel %vm2450_vm15, %v2453_v0, %v2456_v42  ;;  %v1632_v48 = vmul.f32 %v1631_v18, %v12426_v39  ;;  %vm1644_vm11 = vcmp.lt.s32.totalorder %v12434_v54, 2  ;;  %v12437_v56 = vld [vmem:[#allocation16_spill] sm:$0xff] }
 0x4de   :  { %v2458_v52 = vsel %vm2448_vm8, nan, %v2457_v40  ;;  %v1313_v51 = vadd.f32 1.0, %v1312_v27  ;;  %vm1645_vm12 = vcmp.eq.s32.totalorder %v12434_v54, 0  ;;  %v1951_v4 = vadd.f32 -0.4999988, %v1950_v57  ;;  %v12440_v27 = vld [vmem:[#allocation15_spill] sm:$0xff] }
 0x4df   :  { %v2613_v32 = vadd.f32 %v2458_v52, %v2293_v43  ;;  %v1633_v7 = vadd.f32 1.0, %v1632_v48  ;;  %vm1648_vm2 = vcmp.eq.s32.totalorder %v12434_v54, 2  ;;  %v2269_v49 = vadd.f32 0.041655596, %v2268_v15  ;;  %v12442_v40 = vld [vmem:[#allocation20_spill] sm:$0xff]  ;;  %v12443_v48 = vld [vmem:[#allocation42_spill] sm:$0xff] }
 0x4e0   :  { %v12436_v17 = vxor.u32 2147483648, %v12435_v38  ;;  %v1329_v39 = vxor.u32 2147483648, %v1313_v51  ;;  %vm1642_vm9 = vweird.f32 %v12437_v56  ;;  %v1952_v24 = vmul.f32 %v1951_v4, %v12431_v23 }
 0x4e1   :  { %v2266_v25 = vsel %vm9483_vm3, 0, %v12438_v13  ;;  %v5496_v35 = vmul.f32 %v5495_v50, %v5493_v62  ;;  %v2615_v43 = vmul.f32 0.125, %v2613_v32  ;;  %v1649_v42 = vxor.u32 2147483648, %v1633_v7 }
 0x4e2   :  { %v1327_v21 = vsel %vm1325_vm7, %v1313_v51, %v12436_v17  ;;  %v2270_v18 = vmul.f32 %v2269_v49, %v12433_v19  ;;  %vm12170_vm8 = vcmp.lt.s32.totalorder %v11122_v3, 0  ;;  %v1330_v0 = vsel %vm1328_vm1, %v1329_v39, %v12435_v38  ;;  %v12444_v49 = vld [vmem:[#allocation43_spill] sm:$0xff] }
 0x4e3   :  { %v12441_v57 = vxor.u32 2147483648, %v12440_v27  ;;  %v1953_v15 = vadd.f32 1.0, %v1952_v24  ;;  %vm1962_vm7 = vweird.f32 %v12442_v40  ;;  %vm1964_vm3 = vcmp.lt.s32.totalorder %v12443_v48, 2  ;;  %6014 = vmatmul.msk.f32.vlgmr.msra.gmra.mxu3 %vm2810_vm5, %v2615_v43  ;;  %v12446_v24 = vld [vmem:[#allocation30_spill] sm:$0xff] }
 0x4e4   :  { %v1331_v50 = vsel %vm1324_vm4, %v1327_v21, %v1330_v0  ;;  %vm1965_vm15 = vcmp.eq.s32.totalorder %v12443_v48, 0  ;;  %v2271_v62 = vadd.f32 -0.4999988, %v2270_v18  ;;  %v2283_v52 = vand.u32 3, %v2266_v25  ;;  %v12448_v0 = vld [vmem:[#allocation13_spill] sm:$0xff] }
 0x4e5   :  { %v1647_v23 = vsel %vm1645_vm12, %v1633_v7, %v12441_v57  ;;  %v1650_v51 = vsel %vm1648_vm2, %v1649_v42, %v12440_v27  ;;  %vm1968_vm1 = vcmp.eq.s32.totalorder %v12443_v48, 2  ;;  %v1969_v4 = vxor.u32 2147483648, %v1953_v15 }
 0x4e6   :  { %v2286_v32 = vxor.u32 2147483648, %v9818_v34  ;;  %v1332_v7 = vsel %vm1322_vm14, nan, %v1331_v50  ;;  %v1651_v31 = vsel %vm1644_vm11, %v1647_v23, %v1650_v51  ;;  %v12445_v38 = vxor.u32 2147483648, %v12444_v49 }
 0x4e7   :  { %v2272_v21 = vmul.f32 %v2271_v62, %v12433_v19  ;;  %v1334_v39 = vadd.f32 %v1332_v7, %v1014_v58  ;;  %v2583_v13 = vsub.s32 4, %v12446_v24  ;;  %v2588_v25 = vmul.f32 -0.001358992, %v12447_v47 }
 0x4e8   :  { %v1967_v17 = vsel %vm1965_vm15, %v1953_v15, %v12445_v38  ;;  %v2595_v43 = vmul.f32 -0.00019511016, %v12447_v47  ;;  %v5497_v42 = vxor.u32 2147483648, %v5496_v35  ;;  %v1970_v18 = vsel %vm1968_vm1, %v1969_v4, %v12444_v49 }
 0x4e9   :  { %v2273_v11 = vadd.f32 1.0, %v2272_v21  ;;  %vm2285_vm4 = vcmp.eq.s32.totalorder %v2283_v52, 0  ;;  %v1971_v54 = vsel %vm1964_vm3, %v1967_v17, %v1970_v18  ;;  %vm12449_vm0 = vcmp.lt.s32.totalorder %v12448_v0, 0 }
 0x4ea   :  { %v2584_v27 = vsel %vm12449_vm0, %v2583_v13, %v12446_v24  ;;  %v2589_v19 = vadd.f32 0.041655596, %v2588_v25  ;;  %v2596_v58 = vadd.f32 0.008332121, %v2595_v43  ;;  %v1652_v57 = vsel %vm1642_vm9, nan, %v1651_v31  ;;  %v12451_v24 = vld [vmem:[#allocation35_spill] sm:$0xff] }
 0x4eb   :  { %v2287_v23 = vsel %vm2285_vm4, %v2273_v11, %v2286_v32  ;;  %v2289_v15 = vxor.u32 2147483648, %v2273_v11  ;;  %v2586_v62 = vsel %vm9023_vm6, 0, %v2584_v27  ;;  %v1654_v51 = vadd.f32 %v1652_v57, %v1334_v39  ;;  %v12456_v27 = vld [vmem:[#allocation51_spill] sm:$0xff] }
 0x4ec   :  { %vm2288_vm14 = vcmp.eq.s32.totalorder %v2283_v52, 2  ;;  %v2590_v4 = vmul.f32 %v2589_v19, %v12447_v47  ;;  %v2597_v48 = vmul.f32 %v2596_v58, %v12447_v47  ;;  %v1972_v7 = vsel %vm1962_vm7, nan, %v1971_v54  ;;  %v12455_v54 = vld [vmem:[#allocation53_spill] sm:$0xff] }
 0x4ed   :  { %vm2284_vm11 = vcmp.lt.s32.totalorder %v2283_v52, 2  ;;  %v2290_v49 = vsel %vm2288_vm14, %v2289_v15, %v9818_v34  ;;  %v4710_v56 = vmul.f32 -0.001358992, %v10544_v20  ;;  %v2603_v17 = vand.u32 3, %v2586_v62  ;;  %v12460_v62 = vld [vmem:[#allocation39_spill] sm:$0xff] }
 0x4ee   :  { %v2291_v31 = vsel %vm2284_vm11, %v2287_v23, %v2290_v49  ;;  %v2591_v32 = vadd.f32 -0.4999988, %v2590_v4  ;;  %v2598_v38 = vadd.f32 -0.16666654, %v2597_v48  ;;  %v11628_v21 = vmul.f32 %v11462_v46, %v11353_v30  ;;  %v12452_v46 = vld [vmem:[#allocation56_spill] sm:$0xff] }
 0x4ef   :  { %v11632_v39 = vmul.f32 %v11550_v5, %v11473_v55  ;;  %v11636_v40 = vsel %vm12170_vm8, %v5497_v42, %v5496_v35  ;;  %v4711_v52 = vadd.f32 0.041655596, %v4710_v56  ;;  %v1974_v34 = vadd.f32 %v1972_v7, %v1654_v51  ;;  %v12453_v5 = vld [vmem:[#allocation52_spill] sm:$0xff]  ;;  %v12454_v42 = vld [vmem:[#allocation50_spill] sm:$0xff] }
 0x4f0   :  { %vm2282_vm6 = vweird.f32 %v12451_v24  ;;  %v2592_v13 = vmul.f32 %v2591_v32, %v12447_v47  ;;  %v2599_v25 = vmul.f32 %v2598_v38, %v12447_v47  ;;  %vm2602_vm12 = vweird.f32 %v12448_v0  ;;  %v12462_v32 = vld [vmem:[#allocation54_spill] sm:$0xff] }
 0x4f1   :  { %v2292_v43 = vsel %vm2282_vm6, nan, %v2291_v31  ;;  %v4712_v30 = vmul.f32 %v4711_v52, %v10544_v20  ;;  %vm4726_vm2 = vcmp.lt.s32.totalorder %v12452_v46, 2  ;;  %vm4727_vm9 = vcmp.eq.s32.totalorder %v12452_v46, 0  ;;  %v12461_v31 = vld [vmem:[#allocation49_spill] sm:$0xff] }
 0x4f2   :  { %v5030_v35 = vmul.f32 -0.001358992, %v12453_v5  ;;  %vm4724_vm7 = vweird.f32 %v12454_v42  ;;  %v2593_v18 = vadd.f32 1.0, %v2592_v13  ;;  %v2600_v11 = vadd.f32 1.0, %v2599_v25 }
 0x4f3   :  { %vm2604_vm3 = vcmp.lt.s32.totalorder %v2603_v17, 2  ;;  %vm2605_vm15 = vcmp.eq.s32.totalorder %v2603_v17, 0  ;;  %v4569_v47 = vadd.f32 %v12456_v27, %v12455_v54  ;;  %v4713_v19 = vadd.f32 -0.4999988, %v4712_v30 }
 0x4f4   :  { %v5031_v58 = vadd.f32 0.041655596, %v5030_v35  ;;  %v5350_v57 = vmul.f32 -0.001358992, %v10787_v63  ;;  %v12457_v23 = vand.u32 2147483647, %v11122_v3  ;;  %v2294_v50 = vadd.f32 %v2292_v43, %v1974_v34 }
 0x4f5   :  { %v2601_v51 = vmul.f32 %v2600_v11, %v12460_v62  ;;  %vm2608_vm4 = vcmp.eq.s32.totalorder %v2603_v17, 2  ;;  %v2609_v4 = vxor.u32 2147483648, %v2593_v18  ;;  %v4714_v48 = vmul.f32 %v4713_v19, %v10544_v20 }
 0x4f6   :  { %vm11652_vm1 = vcmp.le.f32.partialorder %v12457_v23, 0.7853982  ;;  %vm4730_vm0 = vcmp.eq.s32.totalorder %v12452_v46, 2  ;;  %v5032_v7 = vmul.f32 %v5031_v58, %v12453_v5  ;;  %v5351_v49 = vadd.f32 0.041655596, %v5350_v57 }
 0x4f7   :  { %v2606_v56 = vxor.u32 2147483648, %v2601_v51  ;;  %vm5044_vm14 = vweird.f32 %v12461_v31  ;;  %vm5046_vm11 = vcmp.lt.s32.totalorder %v12462_v32, 2  ;;  %v4224_v38 = vmul.f32 -0.001358992, %v11055_v60  ;;  %v6188_v31 = vld [vmem:[%s12007_s8 + $0x38] sm:$0xff] }
 0x4f8   :  { %v4715_v52 = vadd.f32 1.0, %v4714_v48  ;;  %v5033_v34 = vadd.f32 -0.4999988, %v5032_v7  ;;  %vm5047_vm6 = vcmp.eq.s32.totalorder %v12462_v32, 0  ;;  %v5352_v24 = vmul.f32 %v5351_v49, %v10787_v63  ;;  %v12464_v7 = vld [vmem:[#allocation55_spill] sm:$0xff]  ;;  %5681 = vmatpush.bf16.msrb.mxu3 %v6188_v31 }
 0x4f9   :  { %v2607_v20 = vsel %vm2605_vm15, %v2593_v18, %v2606_v56  ;;  %v2610_v13 = vsel %vm2608_vm4, %v2609_v4, %v2601_v51  ;;  %vm5050_vm8 = vcmp.eq.s32.totalorder %v12462_v32, 2  ;;  %v4225_v25 = vadd.f32 0.041655596, %v4224_v38 }
 0x4fa   :  { %v2611_v43 = vsel %vm2604_vm3, %v2607_v20, %v2610_v13  ;;  %v12463_v30 = vxor.u32 2147483648, %v10737_v44  ;;  %v4731_v11 = vxor.u32 2147483648, %v4715_v52  ;;  %v5034_v54 = vmul.f32 %v5033_v34, %v12453_v5 }
 0x4fb   :  { %v2612_v27 = vsel %vm2602_vm12, nan, %v2611_v43  ;;  %v5353_v19 = vadd.f32 -0.4999988, %v5352_v24  ;;  %v4226_v18 = vmul.f32 %v4225_v25, %v11055_v60  ;;  %v4544_v58 = vmul.f32 -0.001358992, %v11247_v33 }
 0x4fc   :  { %v4729_v35 = vsel %vm4727_vm9, %v4715_v52, %v12463_v30  ;;  %v2614_v57 = vadd.f32 %v2612_v27, %v2294_v50  ;;  %v4732_v17 = vsel %vm4730_vm0, %v4731_v11, %v10737_v44  ;;  %v5035_v23 = vadd.f32 1.0, %v5034_v54  ;;  %v11727_v11 = vld [vmem:[%s12013_s11 + $0x18] sm:$0xff]  ;;  %v11732_v54 = vld [vmem:[%s12013_s11 + $0x10] sm:$0xff] }
 0x4fd   :  { %vm5367_vm3 = vcmp.eq.s32.totalorder %v10855_v9, 0  ;;  %v4733_v62 = vsel %vm4726_vm2, %v4729_v35, %v4732_v17  ;;  %v5354_v5 = vmul.f32 %v5353_v19, %v10787_v63  ;;  %v4227_v0 = vadd.f32 -0.4999988, %v4226_v18  ;;  %2897 = vmatpush.msrb.mxu2 %v11727_v11  ;;  %v12467_v17 = vld [vmem:[#allocation57_spill] sm:$0xff] }
 0x4fe   :  { %v4545_v51 = vadd.f32 0.041655596, %v4544_v58  ;;  %v2616_v4 = vmul.f32 0.125, %v2614_v57  ;;  %v4734_v48 = vsel %vm4724_vm7, nan, %v4733_v62  ;;  %v12465_v50 = vxor.u32 2147483648, %v12464_v7 }
 0x4ff   :  { %v5051_v44 = vxor.u32 2147483648, %v5035_v23  ;;  %v4889_v56 = vadd.f32 %v4734_v48, %v4569_v47  ;;  %v5355_v38 = vadd.f32 1.0, %v5354_v5  ;;  %v4228_v52 = vmul.f32 %v4227_v0, %v11055_v60  ;;  %2898 = vmatpush.msrb.mxu2 %v11732_v54 }
 0x500   :  { %v5049_v49 = vsel %vm5047_vm6, %v5035_v23, %v12465_v50  ;;  %v4546_v46 = vmul.f32 %v4545_v51, %v11247_v33  ;;  %v11696_v63 = vsel %vm11652_vm1, %v11122_v3, %v11636_v40  ;;  %6015 = vmatmul.msk.f32.gmra.mxu3 %vm2810_vm5, %v2616_v4  ;;  %vm5366_vm12 = vcmp.lt.s32.totalorder %v10855_v9, 2 }
 0x501   :  { %v5052_v42 = vsel %vm5050_vm8, %v5051_v44, %v12464_v7  ;;  %vm5370_vm2 = vcmp.eq.s32.totalorder %v10855_v9, 2  ;;  %v12466_v47 = vxor.u32 2147483648, %v10925_v53  ;;  %v5371_v40 = vxor.u32 2147483648, %v5355_v38 }
 0x502   :  { %v5053_v60 = vsel %vm5046_vm11, %v5049_v49, %v5052_v42  ;;  %v4229_v24 = vadd.f32 1.0, %v4228_v52  ;;  %vm5364_vm9 = vweird.f32 %v10283_v6  ;;  %v4547_v13 = vadd.f32 -0.4999988, %v4546_v46 }
 0x503   :  { %v5369_v34 = vsel %vm5367_vm3, %v5355_v38, %v12466_v47  ;;  %v5054_v20 = vsel %vm5044_vm14, nan, %v5053_v60  ;;  %v4864_v25 = vmul.f32 -0.001358992, %v11373_v28  ;;  %v5180_v32 = vsel %vm5057_vm10, %v5179_v26, %v11360_v59 }
 0x504   :  { %v5196_v43 = vadd.f32 1.0, %v11632_v39  ;;  %v5209_v30 = vadd.f32 %v5054_v20, %v4889_v56  ;;  %v5372_v35 = vsel %vm5370_vm2, %v5371_v40, %v10925_v53  ;;  %vm4238_vm10 = vweird.f32 %v10622_v14 }
 0x505   :  { %v4882_v59 = vxor.u32 2147483648, %v11628_v21  ;;  %v5373_v53 = vsel %vm5366_vm12, %v5369_v34, %v5372_v35  ;;  %v4548_v26 = vmul.f32 %v4547_v13, %v11247_v33  ;;  %v4865_v39 = vadd.f32 0.041655596, %v4864_v25 }
 0x506   :  { %v11742_v27 = vmul.f32 %v11696_v63, %v11696_v63  ;;  %v5374_v19 = vsel %vm5364_vm9, nan, %v5373_v53  ;;  %vm4241_vm8 = vcmp.eq.s32.totalorder %v11159_v10, 0  ;;  %v4245_v18 = vxor.u32 2147483648, %v4229_v24 }
 0x507   :  { %v5529_v58 = vadd.f32 %v5374_v19, %v5209_v30  ;;  %vm4244_vm7 = vcmp.eq.s32.totalorder %v11159_v10, 2  ;;  %v4549_v9 = vadd.f32 1.0, %v4548_v26  ;;  %v4866_v33 = vmul.f32 %v4865_v39, %v11373_v28  ;;  %v6187_v26 = vld [vmem:[%s12007_s8 + $0x30] sm:$0xff] }
 0x508   :  { %v5197_v57 = vmul.f32 %v5196_v43, %v11467_v61  ;;  %v3930_v23 = vadd.f32 %v11429_v29, %v12467_v17  ;;  %vm4240_vm15 = vcmp.lt.s32.totalorder %v11159_v10, 2  ;;  %v5184_v6 = vmul.f32 -0.001358992, %v11473_v55  ;;  %5682 = vmatpush.bf16.msrb.mxu3 %v6187_v26  ;;  %v6271_v26 = vld [vmem:[%s12014_s12] ss:$0 sm:$0xff] }
 0x509   :  { %v5531_v62 = vmul.f32 0.125, %v5529_v58  ;;  %v4243_v5 = vsel %vm4241_vm8, %v4229_v24, %v4242_v37  ;;  %vm4560_vm4 = vcmp.lt.s32.totalorder %v11444_v36, 2  ;;  %vm4561_vm0 = vcmp.eq.s32.totalorder %v11444_v36, 0  ;;  %v11818_v58 = vld [vmem:[%s12013_s11] sm:$0xff] }
 0x50a   :  { %v4246_v0 = vsel %vm4244_vm7, %v4245_v18, %v11348_v45  ;;  %vm4558_vm14 = vweird.f32 %v10734_v8  ;;  %v4867_v61 = vadd.f32 -0.4999988, %v4866_v33  ;;  %v5182_v29 = vsel %vm11450_vm13, 0, %v5180_v32 }
 0x50b   :  { %v5185_v51 = vadd.f32 0.041655596, %v5184_v6  ;;  %6151 = vmatmul.msk.f32.vlgmr.msrb.gmra.mxu1 %vm2810_vm5, %v5531_v62  ;;  %v4565_v4 = vxor.u32 2147483648, %v4549_v9  ;;  %v5499_v48 = vsub.s32 4, %v11469_v1  ;;  %v5504_v37 = vmul.f32 -0.001358992, %v11742_v27 }
 0x50c   :  { %v5511_v7 = vmul.f32 -0.00019511016, %v11742_v27  ;;  %vm4564_vm11 = vcmp.eq.s32.totalorder %v11444_v36, 2  ;;  %v4868_v45 = vmul.f32 %v4867_v61, %v11373_v28  ;;  %vm4878_vm6 = vweird.f32 %v10882_v22  ;;  %v6186_v22 = vld [vmem:[%s12007_s8 + $0x28] sm:$0xff]  ;;  %v6195_v61 = vld [vmem:[%s12007_s8 + $0x70] sm:$0xff] }
 0x50d   :  { %v5186_v50 = vmul.f32 %v5185_v51, %v11473_v55  ;;  %v4247_v12 = vsel %vm4240_vm15, %v4243_v5, %v4246_v0  ;;  %vm4880_vm13 = vcmp.lt.s32.totalorder %v11446_v2, 2  ;;  %vm4881_vm3 = vcmp.eq.s32.totalorder %v11446_v2, 0  ;;  %5683 = vmatpush.bf16.msrb.mxu3 %v6186_v22 }
 0x50e   :  { %vm4884_vm12 = vcmp.eq.s32.totalorder %v11446_v2, 2  ;;  %v4869_v49 = vadd.f32 1.0, %v4868_v45  ;;  %v5199_v56 = vand.u32 3, %v5182_v29  ;;  %vm12468_vm2 = vcmp.lt.s32.totalorder %v11122_v3, 0  ;;  %v11808_v2 = vld [vmem:[%s12013_s11 + $0x8] sm:$0xff] }
 0x50f   :  { %v5187_v44 = vadd.f32 -0.4999988, %v5186_v50  ;;  %v5500_v28 = vsel %vm12468_vm2, %v5499_v48, %v11469_v1  ;;  %v12469_v38 = vxor.u32 2147483648, %v11435_v41  ;;  %v4566_v10 = vsel %vm4564_vm11, %v4565_v4, %v11435_v41  ;;  %2899 = vmatpush.msrb.mxu2 %v11808_v2  ;;  %v6194_v48 = vld [vmem:[%s12007_s8 + $0x68] sm:$0xff] }
 0x510   :  { %v5505_v46 = vadd.f32 0.041655596, %v5504_v37  ;;  %v5512_v42 = vadd.f32 0.008332121, %v5511_v7  ;;  %v4248_v60 = vsel %vm4238_vm10, nan, %v4247_v12  ;;  %v4885_v47 = vxor.u32 2147483648, %v4869_v49 }
 0x511   :  { %v4563_v52 = vsel %vm4561_vm0, %v4549_v9, %v12469_v38  ;;  %v5188_v34 = vmul.f32 %v5187_v44, %v11473_v55  ;;  %v5202_v40 = vxor.u32 2147483648, %v5197_v57  ;;  %v4883_v24 = vsel %vm4881_vm3, %v4869_v49, %v4882_v59  ;;  %v6196_v9 = vld [vmem:[%s12007_s8 + $0x78] sm:$0xff]  ;;  %2900 = vmatpush.msrb.mxu2 %v11818_v58  ;;  %v6183_v37 = vld [vmem:[%s12007_s8 + $0x10] sm:$0xff]  ;;  %v6193_v7 = vld [vmem:[%s12007_s8 + $0x60] sm:$0xff] }
 0x512   :  { %v5502_v1 = vsel %vm11652_vm1, 0, %v5500_v28  ;;  %v5506_v20 = vmul.f32 %v5505_v46, %v11742_v27  ;;  %v5513_v13 = vmul.f32 %v5512_v42, %v11742_v27  ;;  %v4567_v41 = vsel %vm4560_vm4, %v4563_v52, %v4566_v10  ;;  %v6182_v28 = vld [vmem:[%s12007_s8 + $0x8] sm:$0xff]  ;;  %v6192_v38 = vld [vmem:[%s12007_s8 + $0x58] sm:$0xff]  ;;  %v6181_v10 = vld [vmem:[%s12007_s8] sm:$0xff] }
 0x513   :  { %v4886_v14 = vsel %vm4884_vm12, %v4885_v47, %v11628_v21  ;;  %v5189_v25 = vadd.f32 1.0, %v5188_v34  ;;  %vm5201_vm9 = vcmp.eq.s32.totalorder %v5199_v56, 0  ;;  %v4250_v32 = vadd.f32 %v4248_v60, %v3930_v23  ;;  %5695 = vmatpush.bf16.msra.mxu2 %v6196_v9  ;;  %v6191_v46 = vld [vmem:[%s12007_s8 + $0x50] sm:$0xff]  ;;  %v6068_v60 = vld [vmem:[%s12015_s4] sm:$0xf]  ;;  %v6178_v34 = vld [vmem:[%s12008_s7 + $0x8] sm:$0xff] }
 0x514   :  { %vm5204_vm10 = vcmp.eq.s32.totalorder %v5199_v56, 2  ;;  %v5507_v55 = vadd.f32 -0.4999988, %v5506_v20  ;;  %v5514_v43 = vadd.f32 -0.16666654, %v5513_v13  ;;  %v4887_v15 = vsel %vm4880_vm13, %v4883_v24, %v4886_v14  ;;  %5735 = vmatpush.bf16.msrb.mxu0 %v6178_v34  ;;  %v6177_v24 = vld [vmem:[%s12008_s7] sm:$0xff] }
 0x515   :  { %vm5200_vm1 = vcmp.lt.s32.totalorder %v5199_v56, 2  ;;  %v5205_v30 = vxor.u32 2147483648, %v5189_v25  ;;  %v5519_v35 = vand.u32 3, %v5502_v1  ;;  %v4568_v36 = vsel %vm4558_vm14, nan, %v4567_v41  ;;  %v6269_v56 = vld [vmem:[%s12012_s10] ss:$0 sm:$0xff] }
 0x516   :  { %v5203_v31 = vsel %vm5201_vm9, %v5189_v25, %v5202_v40  ;;  %v5508_v59 = vmul.f32 %v5507_v55, %v11742_v27  ;;  %v5515_v21 = vmul.f32 %v5514_v43, %v11742_v27  ;;  %v4888_v39 = vsel %vm4878_vm6, nan, %v4887_v15  ;;  %v2823_v49 = vpop.f32.mrf.mxu2  ;;  %v6180_v47 = vld [vmem:[%s12015_s4 + $0x4] sm:$0xf0]  ;;  %v6189_v41 = vld [vmem:[%s12007_s8 + $0x40] sm:$0xff] }
 0x517   :  { %v5206_v53 = vsel %vm5204_vm10, %v5205_v30, %v5197_v57  ;;  %v4570_v18 = vadd.f32 %v4568_v36, %v4250_v32  ;;  %vm5198_vm8 = vweird.f32 %v11003_v16  ;;  %vm5524_vm7 = vcmp.eq.s32.totalorder %v5519_v35, 2  ;;  %5696 = vmatpush.bf16.msra.mxu2 %v6195_v61  ;;  %v6190_v13 = vld [vmem:[%s12007_s8 + $0x48] sm:$0xff]  ;;  %v6176_v14 = vld [vmem:[%s12016_s3] sm:$0xff] }
 0x518   :  { %v5509_v8 = vadd.f32 1.0, %v5508_v59  ;;  %v5516_v19 = vadd.f32 1.0, %v5515_v21  ;;  %v5207_v27 = vsel %vm5200_vm1, %v5203_v31, %v5206_v53  ;;  %vm5521_vm15 = vcmp.eq.s32.totalorder %v5519_v35, 0  ;;  %5736 = vmatpush.bf16.msrb.mxu0 %v6177_v24  ;;  %v6070_v31 = vld [vmem:[%s12015_s4 + $0x8] sm:$0xf0] }
 0x519   :  { %v4890_v57 = vadd.f32 %v4888_v39, %v4570_v18  ;;  %v5208_v17 = vsel %vm5198_vm8, nan, %v5207_v27  ;;  %vm5520_vm4 = vcmp.lt.s32.totalorder %v5519_v35, 2  ;;  %vm5518_vm0 = vweird.f32 %v11122_v3  ;;  %v6184_v3 = vld [vmem:[%s12007_s8 + $0x18] sm:$0xff] }
 0x51a   :  { %v5517_v33 = vmul.f32 %v5516_v19, %v11696_v63  ;;  %v5525_v16 = vxor.u32 2147483648, %v5509_v8  ;;  %v6185_v63 = vld [vmem:[%s12007_s8 + $0x20] sm:$0xff]  ;;  %v6069_v1 = vor.u32 %v6180_v47, %v6068_v60  ;;  %v2908_v21 = vlaneseq }
 0x51b   :  { %v5210_v5 = vadd.f32 %v5208_v17, %v4890_v57  ;;  %5684 = vmatpush.bf16.msrb.mxu3 %v6185_v63  ;;  %5697 = vmatpush.bf16.msra.mxu2 %v6194_v48  ;;  %vm2913_vm11 = vcmask 64512   ;;  %v6270_v17 = vld [vmem:[%s12012_s10] ss:$0 sm:$0xff] }
 0x51c   :  { %v5522_v23 = vxor.u32 2147483648, %v5517_v33  ;;  %v5526_v6 = vsel %vm5524_vm7, %v5525_v16, %v5517_v33  ;;  %6150 = vmatmul.msk.bf16.vlgmr.msrb.gmra.mxu0 %vm2810_vm5, %v6176_v14  ;;  %v11897_v53 = vand.u32 127, %v2908_v21  ;;  %v6296_v14 = vld [vmem:[%s12004_s2] sm:$0xff] }
 0x51e   :  { %v5523_v62 = vsel %vm5521_vm15, %v5509_v8, %v5522_v23  ;;  %v2825_v55 = vpop.f32.mrf.mxu2  ;;  %vm2910_vm14 = vcmp.lt.s32.totalorder %v11897_v53, 4  ;;  %vm2958_vm9 = vcmp.eq.s32.totalorder %v11897_v53, 4 }
 0x51f   :  { %v5527_v0 = vsel %vm5520_vm4, %v5523_v62, %v5526_v6  ;;  %5685 = vmatpush.bf16.msrb.mxu3 %v6184_v3  ;;  %5698 = vmatpush.bf16.msra.mxu2 %v6193_v7  ;;  %v2774_v45 = vpop.f32.mrf.mxu0 }
 0x520   :  { %v5528_v29 = vsel %vm5518_vm0, nan, %v5527_v0 }
 0x521   :  { %v5530_v51 = vadd.f32 %v5528_v29, %v5210_v5 }
 0x523   :  { %v5532_v4 = vmul.f32 0.125, %v5530_v51  ;;  %5686 = vmatpush.bf16.msrb.mxu3 %v6183_v37  ;;  %5699 = vmatpush.bf16.msra.mxu2 %v6192_v38 }
 0x525   :  { %6152 = vmatmul.msk.f32.gmra.mxu1 %vm2810_vm5, %v5532_v4 }
 0x527   :  { %5687 = vmatpush.bf16.msrb.mxu3 %v6182_v28  ;;  %5700 = vmatpush.bf16.msra.mxu2 %v6191_v46  ;;  %v6314_v28 = vmov 8  }
 0x528   :  { %6264 = vset.pattern.permute.xlu1 %v6314_v28  ;;  %6266 = vset.pattern.permute.xlu0 %v6314_v28 }
 0x529   :  { %6265 = vset.pattern.permute.xlu2 %v6314_v28 }
 0x52b   :  { %5688 = vmatpush.bf16.msrb.mxu3 %v6181_v10  ;;  %5701 = vmatpush.bf16.msra.mxu2 %v6190_v13 }
 0x52e   :  { %v2788_v50 = vpop.f32.mrf.mxu1  ;;  %5689 = vmatmul.bf16.vlgmr.msrb.gmra.mxu3 %v6069_v1 }
 0x52f   :  { %v2789_v12 = vadd.f32 %v2788_v50, %v2774_v45  ;;  %5812 = vmatpush.msra.mxu3 %v11727_v11  ;;  %5702 = vmatpush.bf16.msra.mxu2 %v6189_v41  ;;  %v2776_v11 = vpop.f32.mrf.mxu0 }
 0x531   :  { %v2824_v44 = vadd.f32 %v2823_v49, %v2789_v12  ;;  %5813 = vmatpush.msra.mxu3 %v11732_v54  ;;  %v6179_v54 = vld [vmem:[%s12015_s4 + $0x4] sm:$0xf] }
 0x532   :  { %v6073_v59 = vor.u32 %v6179_v54, %v6070_v31 }
 0x533   :  { %5814 = vmatpush.msra.mxu3 %v11808_v2 }
 0x535   :  { %5815 = vmatpush.msra.mxu3 %v11818_v58 }
 0x536   :  { %v2790_v25 = vpop.f32.mrf.mxu1 }
 0x537   :  { %v2791_v32 = vadd.f32 %v2790_v25, %v2776_v11  ;;  %v6198_v11 = vceil.f32 %v6296_v14  ;;  %v6199_v25 = vfloor.f32 %v6296_v14 }
 0x539   :  { %v2826_v43 = vadd.f32 %v2825_v55, %v2791_v32 }
 0x566   :  { %v2855_v52 = vpop.f32.mrf.mxu3 }
 0x567   :  { %v2861_v42 = vadd.f32 %v2855_v52, %v2824_v44  ;;  %v6272_v52 = vld [vmem:[%s12014_s12] ss:$0 sm:$0xff] }
 0x569   :  { %v2867_v40 = vadd.f32 %v6269_v56, %v2861_v42 }
 0x56b   :  { %v2869_v20 = vmax.f32 %v2867_v40, 0.0 }
 0x56d   :  { %6016 = vmatmul.msk.f32.vlgmr.msrb.gmra.mxu2 %vm2810_vm5, %v2869_v20 }
 0x583   :  { %v2858_v15 = vpop.f32.mrf.mxu3 }
 0x584   :  { %v2862_v30 = vadd.f32 %v2858_v15, %v2826_v43  ;;  %v6297_v15 = vld [vmem:[%s12006_s5 + $0x8] sm:$0xff] }
 0x585   :  { %vm6212_vm6 = vcmp.lt.s32.totalorder %v6297_v15, 0 }
 0x586   :  { %v2868_v35 = vadd.f32 %v6269_v56, %v2862_v30  ;;  %v6213_v30 = vceil.f32 %v6297_v15 }
 0x588   :  { %v2870_v36 = vmax.f32 %v2868_v35, 0.0  ;;  %v5770_v6 = vpop.f32.mrf.mxu1  ;;  %v6214_v35 = vfloor.f32 %v6297_v15 }
 0x58a   :  { %6017 = vmatmul.msk.f32.gmra.mxu2 %vm2810_vm5, %v2870_v36  ;;  %v6215_v36 = vsel %vm6212_vm6, %v6213_v30, %v6214_v35 }
 0x58b   :  { %v6216_v54 = vcvt.f32.s32 %v6215_v36 }
 0x592   :  { %5703 = vmatmul.bf16.vlgmr.msra.gmra.mxu2 %v6073_v59 }
 0x599   :  { %v5738_v33 = vpop.f32.mrf.mxu0 }
 0x5a1   :  { %v5740_v51 = vpop.f32.mrf.mxu0 }
 0x5a2   :  { %v5773_v3 = vpop.f32.mrf.mxu1 }
 0x5b1   :  { %v5690_v9 = vpop.f32.mrf.mxu3 }
 0x5b9   :  { %v5692_v0 = vpop.f32.mrf.mxu3 }
 0x5f0   :  { %v2902_v2 = vpop.f32.mrf.mxu2 }
 0x5f1   :  { %v11903_v39 = vadd.f32 %v6271_v26, %v2902_v2 }
 0x5f3   :  { %v2911_v8 = vsel %vm2910_vm14, %v11903_v39, -1e+30 }
 0x5f4   :  { %v2914_v19 = vsel %vm2913_vm11, %v2911_v8, -inf }
 0x5f5   :  { %2915 = vmax.xlane.f32.xlu2 %v2914_v19 }
 0x60d   :  { %v2905_v18 = vpop.f32.mrf.mxu2 }
 0x60e   :  { %v11909_v27 = vadd.f32 %v6271_v26, %v2905_v18 }
 0x610   :  { %v2912_v58 = vsel %vm2910_vm14, %v11909_v27, -1e+30 }
 0x611   :  { %v2917_v22 = vsel %vm2913_vm11, %v2912_v58, -inf }
 0x612   :  { %2918 = vmax.xlane.f32.xlu0 %v2917_v22 }
 0x615   :  { %v5704_v16 = vpop.f32.mrf.mxu2 }
 0x616   :  { %v5705_v57 = vadd.f32 %v5704_v16, %v5690_v9 }
 0x618   :  { %v5739_v23 = vadd.f32 %v5738_v33, %v5705_v57 }
 0x61a   :  { %v5776_v62 = vadd.f32 %v5770_v6, %v5739_v23 }
 0x61c   :  { %v5782_v5 = vadd.f32 %v6270_v17, %v5776_v62  ;;  %v6298_v62 = vld [vmem:[%s12004_s2 + $0x8] sm:$0xff] }
 0x61d   :  { %v5706_v63 = vpop.f32.mrf.mxu2  ;;  %vm6202_vm3 = vcmp.lt.s32.totalorder %v6298_v62, 0 }
 0x61e   :  { %v5784_v61 = vmax.f32 %v5782_v5, 0.0  ;;  %v5707_v29 = vadd.f32 %v5706_v63, %v5692_v0  ;;  %v6203_v5 = vceil.f32 %v6298_v62  ;;  %v6204_v0 = vfloor.f32 %v6298_v62 }
 0x620   :  { %v5741_v4 = vadd.f32 %v5740_v51, %v5707_v29  ;;  %6153 = vmatmul.msk.f32.vlgmr.msra.gmra.mxu3 %vm2810_vm5, %v5784_v61  ;;  %v6299_v29 = vld [vmem:[%s12006_s5] sm:$0xff] }
 0x621   :  { %v6208_v51 = vceil.f32 %v6299_v29  ;;  %vm6207_vm12 = vcmp.lt.s32.totalorder %v6299_v29, 0 }
 0x622   :  { %v5777_v48 = vadd.f32 %v5773_v3, %v5741_v4  ;;  %v6209_v4 = vfloor.f32 %v6299_v29  ;;  %v6205_v3 = vsel %vm6202_vm3, %v6203_v5, %v6204_v0 }
 0x624   :  { %v5783_v37 = vadd.f32 %v6270_v17, %v5777_v48  ;;  %v6206_v48 = vcvt.f32.s32 %v6205_v3 }
 0x626   :  { %v5785_v7 = vmax.f32 %v5783_v37, 0.0  ;;  %v6210_v37 = vsel %vm6207_vm12, %v6208_v51, %v6209_v4 }
 0x628   :  { %6154 = vmatmul.msk.f32.gmra.mxu3 %vm2810_vm5, %v5785_v7  ;;  %vm6197_vm5 = vcmp.lt.s32.totalorder %v6296_v14, 0  ;;  %v6211_v7 = vcvt.f32.s32 %v6210_v37 }
 0x629   :  { %v6200_v55 = vsel %vm6197_vm5, %v6198_v11, %v6199_v25 }
 0x62a   :  { %v6201_v43 = vcvt.f32.s32 %v6200_v55 }
 0x668   :  { %v2916_v38 = vpop.xlane.xlu2 %2915 }
 0x669   :  { %v2920_v10 = vsub.f32 %v2911_v8, %v2916_v38 }
 0x66b   :  { %v2922_v47 = vmul.f32 1.442695, %v2920_v10 }
 0x685   :  { %v2919_v45 = vpop.xlane.xlu0 %2918 }
 0x686   :  { %v11920_v50 = vsub.f32 %v2912_v58, %v2919_v45 }
 0x688   :  { %v2924_v12 = vmul.f32 1.442695, %v11920_v50 }
 0x68a   :  { %6273 = vpow2.f32 %v2924_v12 }
 0x68b   :  { %6275 = vpow2.f32 %v2922_v47 }
 0x690   :  { %v6274_v49 = vpop.eup %6273 }
 0x691   :  { %v2927_v44 = vsel %vm2910_vm14, %v6274_v49, 0.0  ;;  %v6276_v13 = vpop.eup %6275 }
 0x692   :  { %v2931_v56 = vsel %vm2913_vm11, %v2927_v44, 0.0  ;;  %v2926_v41 = vsel %vm2910_vm14, %v6276_v13, 0.0 }
 0x693   :  { %2932 = vadd.xlane.f32.xlu0 %v2931_v56  ;;  %v2928_v32 = vsel %vm2913_vm11, %v2926_v41, 0.0 }
 0x6a3   :  { %v5817_v46 = vpop.f32.mrf.mxu3 }
 0x6a4   :  { %v11929_v42 = vadd.f32 %v6272_v52, %v5817_v46 }
 0x6a6   :  { %v5823_v60 = vsel %vm2910_vm14, %v11929_v42, -1e+30 }
 0x6a7   :  { %v5825_v34 = vsel %vm2913_vm11, %v5823_v60, -inf }
 0x6a8   :  { %5826 = vmax.xlane.f32.xlu1 %v5825_v34 }
 0x6ab   :  { %v5820_v40 = vpop.f32.mrf.mxu3 }
 0x6ac   :  { %v11935_v24 = vadd.f32 %v6272_v52, %v5820_v40 }
 0x6ae   :  { %v5824_v1 = vsel %vm2910_vm14, %v11935_v24, -1e+30 }
 0x6af   :  { %v5828_v20 = vsel %vm2913_vm11, %v5824_v1, -inf }
 0x6b0   :  { %5829 = vmax.xlane.f32.xlu2 %v5828_v20 }
 0x6b8   :  { %2929 = vadd.xlane.f32.xlu2 %v2928_v32 }
 0x6c1   :  { %2941 = vperm.xlu1 %6264, %v6201_v43  }
 0x6c9   :  { %5855 = vperm.xlu1 %6264, %v6216_v54  }
 0x706   :  { %v2933_v45 = vpop.xlane.xlu0 %2932 }
 0x71b   :  { %v5827_v31 = vpop.xlane.xlu1 %5826 }
 0x71c   :  { %v11950_v59 = vsub.f32 %v5823_v60, %v5827_v31 }
 0x71e   :  { %v5833_v21 = vmul.f32 1.442695, %v11950_v59 }
 0x720   :  { %6277 = vpow2.f32 %v5833_v21 }
 0x723   :  { %v5830_v26 = vpop.xlane.xlu2 %5829 }
 0x724   :  { %v5832_v2 = vsub.f32 %v5824_v1, %v5830_v26 }
 0x726   :  { %v6278_v8 = vpop.eup %6277  ;;  %v5835_v19 = vmul.f32 1.442695, %v5832_v2 }
 0x727   :  { %v5837_v18 = vsel %vm2910_vm14, %v6278_v8, 0.0 }
 0x728   :  { %6279 = vpow2.f32 %v5835_v19  ;;  %v5839_v58 = vsel %vm2913_vm11, %v5837_v18, 0.0 }
 0x729   :  { %5840 = vadd.xlane.f32.xlu2 %v5839_v58 }
 0x72b   :  { %v2930_v22 = vpop.xlane.xlu2 %2929 }
 0x72c   :  { %6281 = vlog2.f32 %v2930_v22 }
 0x72d   :  { %6283 = vlog2.f32 %v2933_v45 }
 0x72e   :  { %v6280_v9 = vpop.eup %6279 }
 0x72f   :  { %v5838_v33 = vsel %vm2910_vm14, %v6280_v9, 0.0 }
 0x730   :  { %v5842_v16 = vsel %vm2913_vm11, %v5838_v33, 0.0 }
 0x731   :  { %5843 = vadd.xlane.f32.xlu0 %v5842_v16 }
 0x732   :  { %v6282_v57 = vpop.eup %6281 }
 0x733   :  { %v2935_v17 = vmul.f32 0.6931472, %v6282_v57  ;;  %v2942_v23 = vpop.permute.xlu1 %2941  ;;  %v6284_v49 = vpop.eup %6283 }
 0x734   :  { %vm2946_vm13 = vcmp.eq.s32.totalorder %v11897_v53, %v2942_v23  ;;  %v2937_v44 = vmul.f32 0.6931472, %v6284_v49 }
 0x735   :  { %v2938_v6 = vsub.f32 %v2920_v10, %v2935_v17 }
 0x736   :  { %v2939_v52 = vsub.f32 %v11920_v50, %v2937_v44 }
 0x737   :  { %v2948_v63 = vsel %vm2946_vm13, %v2938_v6, 0.0 }
 0x738   :  { %v2950_v61 = vsel %vm2913_vm11, %v2948_v63, 0.0 }
 0x739   :  { %2951 = vadd.xlane.f32.xlu1 %v2950_v61 }
 0x73b   :  { %v5856_v56 = vpop.permute.xlu1 %5855 }
 0x73c   :  { %vm5858_vm10 = vcmp.eq.s32.totalorder %v11897_v53, %v5856_v56 }
 0x741   :  { %2944 = vperm.xlu2 %6265, %v6206_v48  }
 0x745   :  { %5852 = vperm.xlu0 %6266, %v6211_v7  }
 0x79c   :  { %v5841_v12 = vpop.xlane.xlu2 %5840 }
 0x7a4   :  { %v5844_v28 = vpop.xlane.xlu0 %5843  ;;  %v2945_v38 = vpop.permute.xlu2 %2944 }
 0x7a5   :  { %6285 = vlog2.f32 %v5844_v28  ;;  %vm2947_vm2 = vcmp.eq.s32.totalorder %v11897_v53, %v2945_v38 }
 0x7a6   :  { %v2949_v10 = vsel %vm2947_vm2, %v2939_v52, 0.0  ;;  %6287 = vlog2.f32 %v5841_v12 }
 0x7a7   :  { %v2953_v46 = vsel %vm2913_vm11, %v2949_v10, 0.0 }
 0x7a8   :  { %2954 = vadd.xlane.f32.xlu2 %v2953_v46 }
 0x7ab   :  { %v6286_v60 = vpop.eup %6285 }
 0x7ac   :  { %v5848_v47 = vmul.f32 0.6931472, %v6286_v60  ;;  %v2952_v34 = vpop.xlane.xlu1 %2951  ;;  %v6288_v20 = vpop.eup %6287 }
 0x7ad   :  { %v2956_v40 = vsub.f32 0.0, %v2952_v34  ;;  %v5846_v14 = vmul.f32 0.6931472, %v6288_v20 }
 0x7ae   :  { %v5850_v1 = vsub.f32 %v5832_v2, %v5848_v47 }
 0x7af   :  { %v2959_v50 = vsel %vm2958_vm9, %v2956_v40, %v11903_v39  ;;  %v5849_v25 = vsub.f32 %v11950_v59, %v5846_v14 }
 0x7b0   :  { %2961 = vst.msk [vmem:[%s12017_s13] sm:$0xff] %vm2913_vm11, %v2959_v50  ;;  %v5860_v13 = vsel %vm5858_vm10, %v5850_v1, 0.0 }
 0x7b1   :  { %v5864_v41 = vsel %vm2913_vm11, %v5860_v13, 0.0 }
 0x7b2   :  { %5865 = vadd.xlane.f32.xlu1 %v5864_v41 }
 0x7b7   :  { %v5853_v11 = vpop.permute.xlu0 %5852 }
 0x7b8   :  { %vm5857_vm1 = vcmp.eq.s32.totalorder %v11897_v53, %v5853_v11 }
 0x7b9   :  { %v5859_v32 = vsel %vm5857_vm1, %v5849_v25, 0.0 }
 0x7ba   :  { %v5861_v55 = vsel %vm2913_vm11, %v5859_v32, 0.0 }
 0x7bb   :  { %5862 = vadd.xlane.f32.xlu0 %v5861_v55 }
 0x81b   :  { %v2955_v39 = vpop.xlane.xlu2 %2954 }
 0x81c   :  { %v2957_v43 = vsub.f32 0.0, %v2955_v39 }
 0x81e   :  { %v2960_v15 = vsel %vm2958_vm9, %v2957_v43, %v11909_v27 }
 0x81f   :  { %2962 = vst.msk [vmem:[%s12017_s13 + $0x8] sm:$0xff] %vm2913_vm11, %v2960_v15 }
 0x825   :  { %v5866_v30 = vpop.xlane.xlu1 %5865 }
 0x826   :  { %v5868_v35 = vsub.f32 0.0, %v5866_v30 }
 0x828   :  { %v5870_v36 = vsel %vm2958_vm9, %v5868_v35, %v11935_v24 }
 0x829   :  { %5872 = vst.msk [vmem:[%s12018_s14 + $0x8] sm:$0xff] %vm2913_vm11, %v5870_v36 }
 0x82e   :  { %v5863_v54 = vpop.xlane.xlu0 %5862 }
 0x82f   :  { %v5867_v31 = vsub.f32 0.0, %v5863_v54 }
 0x831   :  { %v5869_v27 = vsel %vm2958_vm9, %v5867_v31, %v11929_v42 }
 0x832   :  { %5871 = vst.msk [vmem:[%s12018_s14] sm:$0xff] %vm2913_vm11, %v5869_v27 }

</bundles_post_ra>
